<compile_context>
chip_gen: v5e
topology: v5e:2x2
jax: 0.10.0
libtpu: 0.0.40
codegen_flags: <defaults>
</compile_context>

<pallas_src>
import math

import jax
import jax.numpy as jnp
from jax import lax
from jax.experimental import pallas as pl
from jax.experimental.pallas import tpu as pltpu

N_NODES = 250      # gene_kg has 250 nodes (hard-coded in the module)
N_PAD = 256        # padded node count for (8,128) / MXU alignment
KG_DIM = 256       # GCN hidden dim ('concate' mode)
FEAT_DIM = 1024    # DenseNet feature dim implied by fc2 = Linear(1024+256, 1)
_INV_N = 1.0 / N_NODES
_MM_DTYPE = jnp.bfloat16   # matmul operand dtype (accumulation stays f32)

# Row indices inside the packed (16, 256) f32 small-parameter stack.
_R_CONV1_B, _R_CONV1_G, _R_CONV1_BE = 0, 1, 2
_R_POOL1_B = 3
_R_CONV2_B, _R_CONV2_G, _R_CONV2_BE = 4, 5, 6
_R_POOL2_B = 7
_R_FC2_WKG = 8
_N_SMALL_ROWS = 16

# Slice indices inside the packed (6, 256, 256) bf16 matrix stack.
_W_ADJ, _W_CONV1, _W_POOL1, _W_CONV2, _W_POOL2, _W_GENEKG = 0, 1, 2, 3, 4, 5


def _vmem_spec():
    return pl.BlockSpec(memory_space=pltpu.MemorySpace.VMEM)


# ----------------------------------------------------------------------------
# Single fused kernel: two GCNBlock(256,256, bn=1, add_self=1, normalize=1)
# layers, two Linear(256,256) pools, and the kg row of the 'concate' fc2 head.
# Everything (6 matrices + 9 row params) arrives in exactly two VMEM operands.
# ----------------------------------------------------------------------------
def dense_kg_kernel(w_ref, sp_ref, o_ref):
    adj = w_ref[_W_ADJ]                                    # (N_PAD, N_PAD) bf16, add_self folded in

    # node mask over the 250 real rows (padded rows must not pollute BN stats)
    node_iota = lax.broadcasted_iota(jnp.int32, (N_PAD, KG_DIM), 0)
    m = (node_iota < N_NODES).astype(jnp.float32)          # (N_PAD, KG_DIM)

    def row(i):
        return sp_ref[i:i + 1, :]                          # (1, KG_DIM) f32, static slice

    def gcn_block(x_bf16, w_idx, b_i, g_i, be_i):
        # y = (adj + I) @ x  (add_self folded); then y @ W + bias   (MXU, f32 acc)
        y = jnp.dot(adj, x_bf16, preferred_element_type=jnp.float32)
        y = jnp.dot(y.astype(_MM_DTYPE), w_ref[w_idx],
                    preferred_element_type=jnp.float32)
        y = (y + row(b_i)) * m                             # bias + zero padded rows
        # F.normalize(y, p=2, dim=2): y / max(||y||,1e-12) == y * rsqrt(max(ss,1e-24))
        ss = jnp.sum(y * y, axis=-1, keepdims=True)
        y = y * lax.rsqrt(jnp.maximum(ss, 1e-24))
        # bn=1 with the all-ones kg_mask: the reference gather/scatter collapses
        # to plain BatchNorm1d over the 250 valid nodes (training-mode batch
        # statistics, biased variance, eps=1e-5).  Affine folded into
        # per-column scale/shift; var = E[y^2] - mean^2 (y already masked,
        # L2-normalized, so cancellation is bounded).
        mean = jnp.sum(y, axis=0, keepdims=True) * _INV_N
        ex2 = jnp.sum(y * y, axis=0, keepdims=True) * _INV_N
        var = jnp.maximum(ex2 - mean * mean, 0.0)
        scale = row(g_i) * lax.rsqrt(var + 1e-5)
        shift = row(be_i) - mean * scale
        # dropout=0.0, relu=0 -> no-op
        return y * scale + shift

    def linear(x, w_idx, b_i):
        return jnp.dot(x.astype(_MM_DTYPE), w_ref[w_idx],
                       preferred_element_type=jnp.float32) + row(b_i)

    kg = gcn_block(w_ref[_W_GENEKG], _W_CONV1, _R_CONV1_B, _R_CONV1_G, _R_CONV1_BE)
    kg = linear(kg, _W_POOL1, _R_POOL1_B)
    kg = gcn_block(kg.astype(_MM_DTYPE), _W_CONV2, _R_CONV2_B, _R_CONV2_G, _R_CONV2_BE)
    kg = linear(kg, _W_POOL2, _R_POOL2_B)

    # fc2 kg row of the concatenation: logits[n] = kg[n] . w_kg
    # (1,C)_bf16 x (N,C)_bf16 contracted on C -> (1,N) lane-dense, one MXU pass.
    wkg = row(_R_FC2_WKG).astype(_MM_DTYPE)
    o_ref[...] = lax.dot_general(
        wkg, kg.astype(_MM_DTYPE),
        dimension_numbers=(((1,), (1,)), ((), ())),
        preferred_element_type=jnp.float32)                # (1, N_PAD)


# ----------------------------------------------------------------------------
# Parameter init (deterministic, mirrors __init__ shapes; all padding, packing
# and fc2 splits hoisted here so the forward pass is a single 2-operand
# pallas_call plus a tiny fused XLA tail).
# ----------------------------------------------------------------------------
def init_params(key, kg_adj, x_channels):
    ks = jax.random.split(key, 8)

    def xavier_normal(k, shape):
        std = math.sqrt(2.0 / (shape[0] + shape[1]))
        return std * jax.random.normal(k, shape, jnp.float32)

    def kaiming_uniform(k, shape, fan_in):
        bound = math.sqrt(6.0 / fan_in)
        return jax.random.uniform(k, shape, jnp.float32, -bound, bound)

    def linear_init(k, d_in, d_out):
        k1, k2 = jax.random.split(k)
        bound = 1.0 / math.sqrt(d_in)
        w = jax.random.uniform(k1, (d_in, d_out), jnp.float32, -bound, bound)
        b = jax.random.uniform(k2, (d_out,), jnp.float32, -bound, bound)
        return w, b

    def pad_nodes(a):
        pads = [(0, N_PAD - s) if s == N_NODES else (0, 0) for s in a.shape]
        return jnp.pad(a, pads)

    # conv1 / conv2: GCNBlock(256,256) weights (xavier-normal, zero bias,
    # BatchNorm1d(256) gamma=1, beta=0); pool1/pool2: Linear(256,256).
    conv1_w = xavier_normal(ks[0], (KG_DIM, KG_DIM))
    conv2_w = xavier_normal(ks[1], (KG_DIM, KG_DIM))
    pool1_w, pool1_b = linear_init(ks[2], KG_DIM, KG_DIM)
    pool2_w, pool2_b = linear_init(ks[3], KG_DIM, KG_DIM)
    # gene_kg: (1, 250, 256) kaiming-uniform (batch dim squeezed, node-padded)
    gene_kg = pad_nodes(
        kaiming_uniform(ks[4], (N_NODES, KG_DIM), fan_in=N_NODES * KG_DIM))
    # kg_adj padded to 256x256 with add_self folded in (adj + I)
    adj_eye = pad_nodes(kg_adj) + jnp.eye(N_PAD, dtype=jnp.float32)
    # fc2: Linear(1024 + 256, 1), split exactly over the concatenation
    w_fc2, b_fc2 = linear_init(ks[5], FEAT_DIM + KG_DIM, 1)
    w_feat = w_fc2[:FEAT_DIM, 0]                                   # (1024,)
    w_kg = w_fc2[FEAT_DIM:, 0]                                     # (256,)
    # DenseNet stand-in projection channels -> 1024, folded with w_feat:
    #   feature[b].w_feat == pooled[b].(dense_w @ w_feat) + dense_b.w_feat
    dense_w, dense_b = linear_init(ks[6], x_channels, FEAT_DIM)

    p = {}
    # ---- packed operands for the kernel (2 DMAs total) ----
    p["big_stack"] = jnp.stack(
        [adj_eye, conv1_w, pool1_w, conv2_w, pool2_w, gene_kg],
        axis=0).astype(_MM_DTYPE)                                  # (6,256,256) bf16
    small = jnp.zeros((_N_SMALL_ROWS, KG_DIM), jnp.float32)
    small = small.at[_R_CONV1_B].set(jnp.zeros((KG_DIM,), jnp.float32))
    small = small.at[_R_CONV1_G].set(jnp.ones((KG_DIM,), jnp.float32))
    small = small.at[_R_CONV1_BE].set(jnp.zeros((KG_DIM,), jnp.float32))
    small = small.at[_R_POOL1_B].set(pool1_b)
    small = small.at[_R_CONV2_B].set(jnp.zeros((KG_DIM,), jnp.float32))
    small = small.at[_R_CONV2_G].set(jnp.ones((KG_DIM,), jnp.float32))
    small = small.at[_R_CONV2_BE].set(jnp.zeros((KG_DIM,), jnp.float32))
    small = small.at[_R_POOL2_B].set(pool2_b)
    small = small.at[_R_FC2_WKG].set(w_kg)
    p["small_stack"] = small                                        # (16,256) f32
    # ---- XLA-side tail parameters (batch-dependent feature term) ----
    p["wfeat_eff"] = (dense_w @ w_feat).reshape(1, x_channels)      # (1, C)
    p["bias_total"] = (jnp.dot(dense_b, w_feat) + b_fc2[0]).reshape(1, 1)
    return p


# ----------------------------------------------------------------------------
# Dense_KG.forward ('concate')
# ----------------------------------------------------------------------------
_COST = pl.CostEstimate(
    flops=6 * 2 * KG_DIM ** 3 + 2 * KG_DIM * KG_DIM,   # 6 big matmuls + fc2 row
    transcendentals=4 * KG_DIM,                        # rsqrt per row/col, 2 blocks
    bytes_accessed=6 * KG_DIM * KG_DIM * 2 + _N_SMALL_ROWS * KG_DIM * 4 + KG_DIM * 4,
)


def dense_kg_forward(params, X):
    # feature, _ = densenet(X)
    # TODO(synk): the real DenseNet backbone is an external module passed to
    # __init__; stand-in = global-avg-pool (NCHW) + linear projection to 1024,
    # whose fc2 feature-row is folded in at init (mathematically exact).
    pooled = jnp.mean(X, axis=(2, 3))                               # (B, C)

    # Batch-independent GCN stack + fc2 kg row: one 2-operand Pallas kernel.
    kg_logits = pl.pallas_call(
        dense_kg_kernel,
        out_shape=jax.ShapeDtypeStruct((1, N_PAD), jnp.float32),
        in_specs=[_vmem_spec(), _vmem_spec()],
        out_specs=_vmem_spec(),
        cost_estimate=_COST,
    )(params["big_stack"], params["small_stack"])                   # (1, N_PAD)

    # fc2 over the concatenation splits exactly:
    #   out[b, n] = feature[b].w_feat + kg[n].w_kg + fc2_bias
    # Feature term is plain XLA (fuses with the pooling); broadcast-add the kg
    # row and slice the 250 real nodes from the lane-dense padded output.
    s_f = jnp.sum(pooled * params["wfeat_eff"], axis=-1, keepdims=True) \
        + params["bias_total"]                                       # (B, 1)
    out = s_f + kg_logits                                            # (B, N_PAD)
    return out[:, :N_NODES]                                          # (B, 250)


if __name__ == "__main__":
    key = jax.random.PRNGKey(0)
    k_adj, k_params, k_x = jax.random.split(key, 3)

    # deterministic symmetric row-normalized adjacency over the 250 KG nodes
    a = jax.random.uniform(k_adj, (N_NODES, N_NODES), jnp.float32)
    a = 0.5 * (a + a.T)
    kg_adj = a / jnp.sum(a, axis=1, keepdims=True)

    X = jax.random.normal(k_x, (2, 4, 16, 16), jnp.float32)          # NCHW
    params = init_params(k_params, kg_adj, x_channels=X.shape[1])

    fwd = jax.jit(dense_kg_forward)
    out = jax.block_until_ready(fwd(params, X))
    assert out.shape == (2, N_NODES) and out.dtype == jnp.float32
    assert bool(jnp.all(jnp.isfinite(out)))
    print("KERNEL_OK")
</pallas_src>

<mosaic_0001>
module attributes {stable_mosaic.version = 11 : i64} {
  func.func @dense_kg_kernel(%arg0: memref<6x256x256xbf16, #tpu.memory_space<vmem>>, %arg1: memref<16x256xf32, #tpu.memory_space<vmem>>, %arg2: memref<1x256xf32, #tpu.memory_space<vmem>>) attributes {dimension_semantics = [], scalar_prefetch = 0 : i64, scratch_operands = 0 : i64, tpu.core_type = #tpu.core_type<tc>} {
    %c0 = arith.constant 0 : index
    %c0_0 = arith.constant 0 : index
    %c0_1 = arith.constant 0 : index
    %0 = vector.load %arg0[%c0, %c0_0, %c0_1] : memref<6x256x256xbf16, #tpu.memory_space<vmem>>, vector<1x256x256xbf16>
    %1 = vector.shape_cast %0 : vector<1x256x256xbf16> to vector<256x256xbf16>
    %2 = tpu.iota {dimensions = array<i32: 0>} : vector<256x256xi32>
    %c250_i32 = arith.constant 250 : i32
    %3 = vector.broadcast %c250_i32 : i32 to vector<256x256xi32>
    %4 = arith.cmpi slt, %2, %3 : vector<256x256xi32>
    %5 = arith.extui %4 : vector<256x256xi1> to vector<256x256xi32>
    %6 = arith.sitofp %5 : vector<256x256xi32> to vector<256x256xf32>
    %c5 = arith.constant 5 : index
    %c0_2 = arith.constant 0 : index
    %c0_3 = arith.constant 0 : index
    %7 = vector.load %arg0[%c5, %c0_2, %c0_3] : memref<6x256x256xbf16, #tpu.memory_space<vmem>>, vector<1x256x256xbf16>
    %8 = vector.shape_cast %7 : vector<1x256x256xbf16> to vector<256x256xbf16>
    %cst = arith.constant dense<0.000000e+00> : vector<256x256xf32>
    %9 = tpu.matmul %1, %8, %cst {dimension_numbers = #tpu.dot_dimension_numbers<[1], [0], [0], [1], [0, 0, 1, 1], [], []>} : vector<256x256xbf16>, vector<256x256xbf16>, vector<256x256xf32> -> vector<256x256xf32>
    %10 = arith.truncf %9 : vector<256x256xf32> to vector<256x256xbf16>
    %c1 = arith.constant 1 : index
    %c0_4 = arith.constant 0 : index
    %c0_5 = arith.constant 0 : index
    %11 = vector.load %arg0[%c1, %c0_4, %c0_5] : memref<6x256x256xbf16, #tpu.memory_space<vmem>>, vector<1x256x256xbf16>
    %12 = vector.shape_cast %11 : vector<1x256x256xbf16> to vector<256x256xbf16>
    %cst_6 = arith.constant dense<0.000000e+00> : vector<256x256xf32>
    %13 = tpu.matmul %10, %12, %cst_6 {dimension_numbers = #tpu.dot_dimension_numbers<[1], [0], [0], [1], [0, 0, 1, 1], [], []>} : vector<256x256xbf16>, vector<256x256xbf16>, vector<256x256xf32> -> vector<256x256xf32>
    %c0_7 = arith.constant 0 : index
    %c0_8 = arith.constant 0 : index
    %14 = vector.load %arg1[%c0_7, %c0_8] : memref<16x256xf32, #tpu.memory_space<vmem>>, vector<1x256xf32>
    %15 = vector.broadcast %14 : vector<1x256xf32> to vector<256x256xf32>
    %16 = arith.addf %13, %15 : vector<256x256xf32>
    %17 = arith.mulf %16, %6 : vector<256x256xf32>
    %18 = arith.mulf %17, %17 : vector<256x256xf32>
    %cst_9 = arith.constant dense<0.000000e+00> : vector<256xf32>
    %19 = vector.multi_reduction <add>, %18, %cst_9 [1] : vector<256x256xf32> to vector<256xf32>
    %20 = vector.shape_cast %19 : vector<256xf32> to vector<256x1xf32>
    %cst_10 = arith.constant 1.000000e-24 : f32
    %21 = vector.broadcast %cst_10 : f32 to vector<256x1xf32>
    %22 = arith.maximumf %20, %21 : vector<256x1xf32>
    %23 = math.rsqrt %22 : vector<256x1xf32>
    %24 = vector.broadcast %23 : vector<256x1xf32> to vector<256x256xf32>
    %25 = arith.mulf %17, %24 : vector<256x256xf32>
    %cst_11 = arith.constant dense<0.000000e+00> : vector<256xf32>
    %26 = vector.multi_reduction <add>, %25, %cst_11 [0] : vector<256x256xf32> to vector<256xf32>
    %27 = vector.shape_cast %26 : vector<256xf32> to vector<1x256xf32>
    %cst_12 = arith.constant 4.000000e-03 : f32
    %28 = vector.broadcast %cst_12 : f32 to vector<1x256xf32>
    %29 = arith.mulf %27, %28 : vector<1x256xf32>
    %30 = arith.mulf %25, %25 : vector<256x256xf32>
    %cst_13 = arith.constant dense<0.000000e+00> : vector<256xf32>
    %31 = vector.multi_reduction <add>, %30, %cst_13 [0] : vector<256x256xf32> to vector<256xf32>
    %32 = vector.shape_cast %31 : vector<256xf32> to vector<1x256xf32>
    %cst_14 = arith.constant 4.000000e-03 : f32
    %33 = vector.broadcast %cst_14 : f32 to vector<1x256xf32>
    %34 = arith.mulf %32, %33 : vector<1x256xf32>
    %35 = arith.mulf %29, %29 : vector<1x256xf32>
    %36 = arith.subf %34, %35 : vector<1x256xf32>
    %cst_15 = arith.constant 0.000000e+00 : f32
    %37 = vector.broadcast %cst_15 : f32 to vector<1x256xf32>
    %38 = arith.maximumf %36, %37 : vector<1x256xf32>
    %c1_16 = arith.constant 1 : index
    %c0_17 = arith.constant 0 : index
    %39 = vector.load %arg1[%c1_16, %c0_17] : memref<16x256xf32, #tpu.memory_space<vmem>>, vector<1x256xf32>
    %cst_18 = arith.constant 9.99999974E-6 : f32
    %40 = vector.broadcast %cst_18 : f32 to vector<1x256xf32>
    %41 = arith.addf %38, %40 : vector<1x256xf32>
    %42 = math.rsqrt %41 : vector<1x256xf32>
    %43 = arith.mulf %39, %42 : vector<1x256xf32>
    %c2 = arith.constant 2 : index
    %c0_19 = arith.constant 0 : index
    %44 = vector.load %arg1[%c2, %c0_19] : memref<16x256xf32, #tpu.memory_space<vmem>>, vector<1x256xf32>
    %45 = arith.mulf %29, %43 : vector<1x256xf32>
    %46 = arith.subf %44, %45 : vector<1x256xf32>
    %47 = vector.broadcast %43 : vector<1x256xf32> to vector<256x256xf32>
    %48 = arith.mulf %25, %47 : vector<256x256xf32>
    %49 = vector.broadcast %46 : vector<1x256xf32> to vector<256x256xf32>
    %50 = arith.addf %48, %49 : vector<256x256xf32>
    %51 = arith.truncf %50 : vector<256x256xf32> to vector<256x256xbf16>
    %c2_20 = arith.constant 2 : index
    %c0_21 = arith.constant 0 : index
    %c0_22 = arith.constant 0 : index
    %52 = vector.load %arg0[%c2_20, %c0_21, %c0_22] : memref<6x256x256xbf16, #tpu.memory_space<vmem>>, vector<1x256x256xbf16>
    %53 = vector.shape_cast %52 : vector<1x256x256xbf16> to vector<256x256xbf16>
    %cst_23 = arith.constant dense<0.000000e+00> : vector<256x256xf32>
    %54 = tpu.matmul %51, %53, %cst_23 {dimension_numbers = #tpu.dot_dimension_numbers<[1], [0], [0], [1], [0, 0, 1, 1], [], []>} : vector<256x256xbf16>, vector<256x256xbf16>, vector<256x256xf32> -> vector<256x256xf32>
    %c3 = arith.constant 3 : index
    %c0_24 = arith.constant 0 : index
    %55 = vector.load %arg1[%c3, %c0_24] : memref<16x256xf32, #tpu.memory_space<vmem>>, vector<1x256xf32>
    %56 = vector.broadcast %55 : vector<1x256xf32> to vector<256x256xf32>
    %57 = arith.addf %54, %56 : vector<256x256xf32>
    %58 = arith.truncf %57 : vector<256x256xf32> to vector<256x256xbf16>
    %cst_25 = arith.constant dense<0.000000e+00> : vector<256x256xf32>
    %59 = tpu.matmul %1, %58, %cst_25 {dimension_numbers = #tpu.dot_dimension_numbers<[1], [0], [0], [1], [0, 0, 1, 1], [], []>} : vector<256x256xbf16>, vector<256x256xbf16>, vector<256x256xf32> -> vector<256x256xf32>
    %60 = arith.truncf %59 : vector<256x256xf32> to vector<256x256xbf16>
    %c3_26 = arith.constant 3 : index
    %c0_27 = arith.constant 0 : index
    %c0_28 = arith.constant 0 : index
    %61 = vector.load %arg0[%c3_26, %c0_27, %c0_28] : memref<6x256x256xbf16, #tpu.memory_space<vmem>>, vector<1x256x256xbf16>
    %62 = vector.shape_cast %61 : vector<1x256x256xbf16> to vector<256x256xbf16>
    %cst_29 = arith.constant dense<0.000000e+00> : vector<256x256xf32>
    %63 = tpu.matmul %60, %62, %cst_29 {dimension_numbers = #tpu.dot_dimension_numbers<[1], [0], [0], [1], [0, 0, 1, 1], [], []>} : vector<256x256xbf16>, vector<256x256xbf16>, vector<256x256xf32> -> vector<256x256xf32>
    %c4 = arith.constant 4 : index
    %c0_30 = arith.constant 0 : index
    %64 = vector.load %arg1[%c4, %c0_30] : memref<16x256xf32, #tpu.memory_space<vmem>>, vector<1x256xf32>
    %65 = vector.broadcast %64 : vector<1x256xf32> to vector<256x256xf32>
    %66 = arith.addf %63, %65 : vector<256x256xf32>
    %67 = arith.mulf %66, %6 : vector<256x256xf32>
    %68 = arith.mulf %67, %67 : vector<256x256xf32>
    %cst_31 = arith.constant dense<0.000000e+00> : vector<256xf32>
    %69 = vector.multi_reduction <add>, %68, %cst_31 [1] : vector<256x256xf32> to vector<256xf32>
    %70 = vector.shape_cast %69 : vector<256xf32> to vector<256x1xf32>
    %cst_32 = arith.constant 1.000000e-24 : f32
    %71 = vector.broadcast %cst_32 : f32 to vector<256x1xf32>
    %72 = arith.maximumf %70, %71 : vector<256x1xf32>
    %73 = math.rsqrt %72 : vector<256x1xf32>
    %74 = vector.broadcast %73 : vector<256x1xf32> to vector<256x256xf32>
    %75 = arith.mulf %67, %74 : vector<256x256xf32>
    %cst_33 = arith.constant dense<0.000000e+00> : vector<256xf32>
    %76 = vector.multi_reduction <add>, %75, %cst_33 [0] : vector<256x256xf32> to vector<256xf32>
    %77 = vector.shape_cast %76 : vector<256xf32> to vector<1x256xf32>
    %cst_34 = arith.constant 4.000000e-03 : f32
    %78 = vector.broadcast %cst_34 : f32 to vector<1x256xf32>
    %79 = arith.mulf %77, %78 : vector<1x256xf32>
    %80 = arith.mulf %75, %75 : vector<256x256xf32>
    %cst_35 = arith.constant dense<0.000000e+00> : vector<256xf32>
    %81 = vector.multi_reduction <add>, %80, %cst_35 [0] : vector<256x256xf32> to vector<256xf32>
    %82 = vector.shape_cast %81 : vector<256xf32> to vector<1x256xf32>
    %cst_36 = arith.constant 4.000000e-03 : f32
    %83 = vector.broadcast %cst_36 : f32 to vector<1x256xf32>
    %84 = arith.mulf %82, %83 : vector<1x256xf32>
    %85 = arith.mulf %79, %79 : vector<1x256xf32>
    %86 = arith.subf %84, %85 : vector<1x256xf32>
    %cst_37 = arith.constant 0.000000e+00 : f32
    %87 = vector.broadcast %cst_37 : f32 to vector<1x256xf32>
    %88 = arith.maximumf %86, %87 : vector<1x256xf32>
    %c5_38 = arith.constant 5 : index
    %c0_39 = arith.constant 0 : index
    %89 = vector.load %arg1[%c5_38, %c0_39] : memref<16x256xf32, #tpu.memory_space<vmem>>, vector<1x256xf32>
    %cst_40 = arith.constant 9.99999974E-6 : f32
    %90 = vector.broadcast %cst_40 : f32 to vector<1x256xf32>
    %91 = arith.addf %88, %90 : vector<1x256xf32>
    %92 = math.rsqrt %91 : vector<1x256xf32>
    %93 = arith.mulf %89, %92 : vector<1x256xf32>
    %c6 = arith.constant 6 : index
    %c0_41 = arith.constant 0 : index
    %94 = vector.load %arg1[%c6, %c0_41] : memref<16x256xf32, #tpu.memory_space<vmem>>, vector<1x256xf32>
    %95 = arith.mulf %79, %93 : vector<1x256xf32>
    %96 = arith.subf %94, %95 : vector<1x256xf32>
    %97 = vector.broadcast %93 : vector<1x256xf32> to vector<256x256xf32>
    %98 = arith.mulf %75, %97 : vector<256x256xf32>
    %99 = vector.broadcast %96 : vector<1x256xf32> to vector<256x256xf32>
    %100 = arith.addf %98, %99 : vector<256x256xf32>
    %101 = arith.truncf %100 : vector<256x256xf32> to vector<256x256xbf16>
    %c4_42 = arith.constant 4 : index
    %c0_43 = arith.constant 0 : index
    %c0_44 = arith.constant 0 : index
    %102 = vector.load %arg0[%c4_42, %c0_43, %c0_44] : memref<6x256x256xbf16, #tpu.memory_space<vmem>>, vector<1x256x256xbf16>
    %103 = vector.shape_cast %102 : vector<1x256x256xbf16> to vector<256x256xbf16>
    %cst_45 = arith.constant dense<0.000000e+00> : vector<256x256xf32>
    %104 = tpu.matmul %101, %103, %cst_45 {dimension_numbers = #tpu.dot_dimension_numbers<[1], [0], [0], [1], [0, 0, 1, 1], [], []>} : vector<256x256xbf16>, vector<256x256xbf16>, vector<256x256xf32> -> vector<256x256xf32>
    %c7 = arith.constant 7 : index
    %c0_46 = arith.constant 0 : index
    %105 = vector.load %arg1[%c7, %c0_46] : memref<16x256xf32, #tpu.memory_space<vmem>>, vector<1x256xf32>
    %106 = vector.broadcast %105 : vector<1x256xf32> to vector<256x256xf32>
    %107 = arith.addf %104, %106 : vector<256x256xf32>
    %c8 = arith.constant 8 : index
    %c0_47 = arith.constant 0 : index
    %108 = vector.load %arg1[%c8, %c0_47] : memref<16x256xf32, #tpu.memory_space<vmem>>, vector<1x256xf32>
    %109 = arith.truncf %108 : vector<1x256xf32> to vector<1x256xbf16>
    %110 = arith.truncf %107 : vector<256x256xf32> to vector<256x256xbf16>
    %cst_48 = arith.constant dense<0.000000e+00> : vector<1x256xf32>
    %111 = tpu.matmul %109, %110, %cst_48 {dimension_numbers = #tpu.dot_dimension_numbers<[1], [1], [0], [0], [0, 0, 1, 0], [], []>} : vector<1x256xbf16>, vector<256x256xbf16>, vector<1x256xf32> -> vector<1x256xf32>
    %c0_49 = arith.constant 0 : index
    %c0_50 = arith.constant 0 : index
    %112 = vector.load %arg2[%c0_49, %c0_50] : memref<1x256xf32, #tpu.memory_space<vmem>>, vector<1x256xf32>
    tpu.vector_store %arg2[%c0_49, %c0_50], %111 {strides = array<i32>} : memref<1x256xf32, #tpu.memory_space<vmem>>, vector<1x256xf32>,
    return
  }
}

</mosaic_0001>

<bundles_post_ra>
// kernel: dense_kg_forward.1
= control target key start
LH: loop header
LB: loop body
LE: loop exit
PB: predicated region body
PF: predicated region fallthrough
CT: control target
= control target key end

     0   :  { %7 = vsyncpa [#allocation3], 0  ;;  %s11122_s0 = inlined_call_operand.hbm [shape: bf16[6,256,256], index: 0, kind: input, shape index: {}]   ;;  %s11123_s1 = inlined_call_operand.hbm [shape: f32[16,256], index: 1, kind: input, shape index: {}]   ;;  %s11124_s2 = inlined_call_operand.vmem [shape: f32[1,256], index: 2, kind: output, shape index: {}]  }
   0x1   :  { %s13_s11 = sshll.u32 %s11122_s0, 4  ;;  %s14_s11 = int_to_ptr.hbm [resolvable:$true] %s13_s11 }
   0x2   :  { %8 = vsyncpa [#allocation5], 0  ;;  %s6998_s12 = smov [#allocation2]   ;;  %s26_s16 = sshll.u32 %s11123_s1, 4  ;;  %s27_s16 = int_to_ptr.hbm [resolvable:$true] %s26_s16 }
   0x3   :  { %s15_s13 = sshll.u32 %s6998_s12, 4  ;;  %s6999_s17 = smov 128   ;;  %s16_s13 = int_to_ptr.vmem [resolvable:$true] %s15_s13 }
   0x4   :  { %s7000_s18 = smov 8   ;;  %s7001_s19 = smov [#allocation4]  }
   0x5   :  { %21 = dma.hbm_to_vmem [thread:$0]  %s14_s11, 24576, %s16_s13, [#allocation3], %s6999_s17, %s6999_s17, %s7000_s18  }
   0x6   :  { %s28_s20 = sshll.u32 %s7001_s19, 4  ;;  %s7002_s21 = smov 256   ;;  %s29_s20 = int_to_ptr.vmem [resolvable:$true] %s28_s20 }
   0x7   :  { %s7003_s22 = smov 16  }
   0x8   :  { %34 = dma.hbm_to_vmem [thread:$0]  %s27_s16, 512, %s29_s20, [#allocation5], %s7002_s21, %s7002_s21, %s7003_s22  }
   0x9   :  { %6994 = dma.done.wait [#allocation3], 24576  }
   0xa   :  { %6995 = vsyncadd [#allocation3], 4294942720 }
   0xb   :  { %6996 = dma.done.wait [#allocation5], 512  }
   0xc   :  { %6997 = vsyncadd [#allocation5], 4294966784  ;;  %v6029_v0 = vld [vmem:[#allocation2 + $0x570] sm:$0xf]  ;;  %v6658_v1 = vld [vmem:[#allocation2 + $0x574] sm:$0xf0] }
   0xd   :  { %v6093_v2 = vld [vmem:[#allocation2 + $0x5f0] sm:$0xf]  ;;  %v6030_v3 = vor.u32 %v6658_v1, %v6029_v0  ;;  %v6674_v4 = vld [vmem:[#allocation2 + $0x5f4] sm:$0xf0]  ;;  %v6657_v5 = vld [vmem:[#allocation2 + $0x574] sm:$0xf] }
   0xe   :  { %v6031_v6 = vld [vmem:[#allocation2 + $0x578] sm:$0xf0]  ;;  %v6094_v7 = vor.u32 %v6674_v4, %v6093_v2  ;;  %v6673_v9 = vld [vmem:[#allocation2 + $0x5f4] sm:$0xf]  ;;  %v6021_v11 = vld [vmem:[#allocation2 + $0x560] sm:$0xf] }
   0xf   :  { %v6034_v8 = vor.u32 %v6657_v5, %v6031_v6  ;;  %v6095_v10 = vld [vmem:[#allocation2 + $0x5f8] sm:$0xf0]  ;;  %557 = vmatpush.bf16.msra.mxu0 %v6030_v3  ;;  %v6656_v13 = vld [vmem:[#allocation2 + $0x564] sm:$0xf0]  ;;  %v6085_v14 = vld [vmem:[#allocation2 + $0x5e0] sm:$0xf] }
  0x10   :  { %v6098_v12 = vor.u32 %v6673_v9, %v6095_v10  ;;  %v6672_v15 = vld [vmem:[#allocation2 + $0x5e4] sm:$0xf0]  ;;  %646 = vmatpush.bf16.msra.mxu1 %v6094_v7  ;;  %v6022_v16 = vor.u32 %v6656_v13, %v6021_v11  ;;  %v6655_v18 = vld [vmem:[#allocation2 + $0x564] sm:$0xf]  ;;  %v6023_v19 = vld [vmem:[#allocation2 + $0x568] sm:$0xf0] }
  0x11   :  { %735 = vmatpush.bf16.msra.mxu2 %v6034_v8  ;;  %v6086_v17 = vor.u32 %v6672_v15, %v6085_v14  ;;  %v6671_v20 = vld [vmem:[#allocation2 + $0x5e4] sm:$0xf]  ;;  %v6026_v21 = vor.u32 %v6655_v18, %v6023_v19  ;;  %v6087_v22 = vld [vmem:[#allocation2 + $0x5e8] sm:$0xf0]  ;;  %v6013_v23 = vld [vmem:[#allocation2 + $0x550] sm:$0xf] }
  0x12   :  { %824 = vmatpush.bf16.msra.mxu3 %v6098_v12  ;;  %v6654_v24 = vld [vmem:[#allocation2 + $0x554] sm:$0xf0]  ;;  %v6090_v25 = vor.u32 %v6671_v20, %v6087_v22  ;;  %v6077_v26 = vld [vmem:[#allocation2 + $0x5d0] sm:$0xf]  ;;  %v6653_v28 = vld [vmem:[#allocation2 + $0x554] sm:$0xf] }
  0x13   :  { %v6670_v27 = vld [vmem:[#allocation2 + $0x5d4] sm:$0xf0]  ;;  %558 = vmatpush.bf16.msra.mxu0 %v6022_v16  ;;  %v6014_v29 = vor.u32 %v6654_v24, %v6013_v23  ;;  %v6015_v30 = vld [vmem:[#allocation2 + $0x558] sm:$0xf0]  ;;  %v6669_v31 = vld [vmem:[#allocation2 + $0x5d4] sm:$0xf] }
  0x14   :  { %v6079_v32 = vld [vmem:[#allocation2 + $0x5d8] sm:$0xf0]  ;;  %647 = vmatpush.bf16.msra.mxu1 %v6086_v17  ;;  %v6078_v33 = vor.u32 %v6670_v27, %v6077_v26  ;;  %v6018_v34 = vor.u32 %v6653_v28, %v6015_v30  ;;  %v6005_v35 = vld [vmem:[#allocation2 + $0x540] sm:$0xf]  ;;  %v6652_v36 = vld [vmem:[#allocation2 + $0x544] sm:$0xf0] }
  0x15   :  { %736 = vmatpush.bf16.msra.mxu2 %v6026_v21  ;;  %v6069_v37 = vld [vmem:[#allocation2 + $0x5c0] sm:$0xf]  ;;  %v6082_v38 = vor.u32 %v6669_v31, %v6079_v32  ;;  %v6668_v39 = vld [vmem:[#allocation2 + $0x5c4] sm:$0xf0]  ;;  %v6651_v40 = vld [vmem:[#allocation2 + $0x544] sm:$0xf]  ;;  %v6006_v44 = vor.u32 %v6652_v36, %v6005_v35 }
  0x16   :  { %825 = vmatpush.bf16.msra.mxu3 %v6090_v25  ;;  %v6007_v41 = vld [vmem:[#allocation2 + $0x548] sm:$0xf0]  ;;  %v6667_v42 = vld [vmem:[#allocation2 + $0x5c4] sm:$0xf]  ;;  %v6070_v45 = vor.u32 %v6668_v39, %v6069_v37  ;;  %v5997_v47 = vld [vmem:[#allocation2 + $0x530] sm:$0xf] }
  0x17   :  { %v6071_v43 = vld [vmem:[#allocation2 + $0x5c8] sm:$0xf0]  ;;  %559 = vmatpush.bf16.msra.mxu0 %v6014_v29  ;;  %v6010_v46 = vor.u32 %v6651_v40, %v6007_v41  ;;  %v6650_v48 = vld [vmem:[#allocation2 + $0x534] sm:$0xf0]  ;;  %v6061_v49 = vld [vmem:[#allocation2 + $0x5b0] sm:$0xf] }
  0x18   :  { %648 = vmatpush.bf16.msra.mxu1 %v6078_v33  ;;  %v6074_v50 = vor.u32 %v6667_v42, %v6071_v43  ;;  %v6666_v51 = vld [vmem:[#allocation2 + $0x5b4] sm:$0xf0]  ;;  %v6649_v52 = vld [vmem:[#allocation2 + $0x534] sm:$0xf]  ;;  %v5999_v53 = vld [vmem:[#allocation2 + $0x538] sm:$0xf0]  ;;  %v5998_v56 = vor.u32 %v6650_v48, %v5997_v47 }
  0x19   :  { %737 = vmatpush.bf16.msra.mxu2 %v6018_v34  ;;  %v6665_v54 = vld [vmem:[#allocation2 + $0x5b4] sm:$0xf]  ;;  %v6063_v55 = vld [vmem:[#allocation2 + $0x5b8] sm:$0xf0]  ;;  %v6062_v57 = vor.u32 %v6666_v51, %v6061_v49  ;;  %v6002_v58 = vor.u32 %v6649_v52, %v5999_v53  ;;  %v5989_v59 = vld [vmem:[#allocation2 + $0x520] sm:$0xf] }
  0x1a   :  { %826 = vmatpush.bf16.msra.mxu3 %v6082_v38  ;;  %v6648_v60 = vld [vmem:[#allocation2 + $0x524] sm:$0xf0]  ;;  %v6053_v61 = vld [vmem:[#allocation2 + $0x5a0] sm:$0xf]  ;;  %v6066_v62 = vor.u32 %v6665_v54, %v6063_v55  ;;  %v6647_v0 = vld [vmem:[#allocation2 + $0x524] sm:$0xf] }
  0x1b   :  { %560 = vmatpush.bf16.msra.mxu0 %v6006_v44  ;;  %v6664_v63 = vld [vmem:[#allocation2 + $0x5a4] sm:$0xf0]  ;;  %v5991_v1 = vld [vmem:[#allocation2 + $0x528] sm:$0xf0]  ;;  %v6663_v2 = vld [vmem:[#allocation2 + $0x5a4] sm:$0xf]  ;;  %v5990_v4 = vor.u32 %v6648_v60, %v5989_v59 }
  0x1c   :  { %649 = vmatpush.bf16.msra.mxu1 %v6070_v45  ;;  %v6055_v3 = vld [vmem:[#allocation2 + $0x5a8] sm:$0xf0]  ;;  %v6054_v5 = vor.u32 %v6664_v63, %v6053_v61  ;;  %v5994_v6 = vor.u32 %v6647_v0, %v5991_v1  ;;  %v5981_v7 = vld [vmem:[#allocation2 + $0x510] sm:$0xf]  ;;  %v6646_v8 = vld [vmem:[#allocation2 + $0x514] sm:$0xf0] }
  0x1d   :  { %738 = vmatpush.bf16.msra.mxu2 %v6010_v46  ;;  %v6045_v9 = vld [vmem:[#allocation2 + $0x590] sm:$0xf]  ;;  %v6058_v10 = vor.u32 %v6663_v2, %v6055_v3  ;;  %v6662_v11 = vld [vmem:[#allocation2 + $0x594] sm:$0xf0]  ;;  %v6645_v12 = vld [vmem:[#allocation2 + $0x514] sm:$0xf]  ;;  %v5982_v16 = vor.u32 %v6646_v8, %v5981_v7 }
  0x1e   :  { %827 = vmatpush.bf16.msra.mxu3 %v6074_v50  ;;  %v5983_v13 = vld [vmem:[#allocation2 + $0x518] sm:$0xf0]  ;;  %v6661_v14 = vld [vmem:[#allocation2 + $0x594] sm:$0xf]  ;;  %v6046_v17 = vor.u32 %v6662_v11, %v6045_v9  ;;  %v5973_v19 = vld [vmem:[#allocation2 + $0x500] sm:$0xf] }
  0x1f   :  { %561 = vmatpush.bf16.msra.mxu0 %v5998_v56  ;;  %v6047_v15 = vld [vmem:[#allocation2 + $0x598] sm:$0xf0]  ;;  %v5986_v18 = vor.u32 %v6645_v12, %v5983_v13  ;;  %v6644_v20 = vld [vmem:[#allocation2 + $0x504] sm:$0xf0]  ;;  %v6037_v21 = vld [vmem:[#allocation2 + $0x580] sm:$0xf] }
  0x20   :  { %650 = vmatpush.bf16.msra.mxu1 %v6062_v57  ;;  %v6050_v22 = vor.u32 %v6661_v14, %v6047_v15  ;;  %v6660_v23 = vld [vmem:[#allocation2 + $0x584] sm:$0xf0]  ;;  %v6643_v24 = vld [vmem:[#allocation2 + $0x504] sm:$0xf]  ;;  %v5975_v25 = vld [vmem:[#allocation2 + $0x508] sm:$0xf0]  ;;  %v5974_v28 = vor.u32 %v6644_v20, %v5973_v19 }
  0x21   :  { %739 = vmatpush.bf16.msra.mxu2 %v6002_v58  ;;  %v6659_v26 = vld [vmem:[#allocation2 + $0x584] sm:$0xf]  ;;  %v6039_v27 = vld [vmem:[#allocation2 + $0x588] sm:$0xf0]  ;;  %v5845_v29 = vld [vmem:[#allocation2] sm:$0xf]  ;;  %v6038_v31 = vor.u32 %v6660_v23, %v6037_v21  ;;  %v5978_v32 = vor.u32 %v6643_v24, %v5975_v25 }
  0x22   :  { %828 = vmatpush.bf16.msra.mxu3 %v6066_v62  ;;  %v6612_v30 = vld [vmem:[#allocation2 + $0x4] sm:$0xf0]  ;;  %v6611_v33 = vld [vmem:[#allocation2 + $0x4] sm:$0xf]  ;;  %v5847_v34 = vld [vmem:[#allocation2 + $0x8] sm:$0xf0]  ;;  %v6042_v35 = vor.u32 %v6659_v26, %v6039_v27 }
  0x23   :  { %562 = vmatpush.bf16.msra.mxu0 %v5990_v4  ;;  %v7026_v36 = vor.u32 %v6612_v30, %v5845_v29  ;;  %v7028_v37 = vor.u32 %v6611_v33, %v5847_v34  ;;  %v5853_v38 = vld [vmem:[#allocation2 + $0x10] sm:$0xf]  ;;  %v6614_v39 = vld [vmem:[#allocation2 + $0x14] sm:$0xf0]  ;;  %v6613_v40 = vld [vmem:[#allocation2 + $0x14] sm:$0xf] }
  0x24   :  { %651 = vmatpush.bf16.msra.mxu1 %v6054_v5  ;;  %v5855_v41 = vld [vmem:[#allocation2 + $0x18] sm:$0xf0]  ;;  %v7034_v42 = vor.u32 %v6614_v39, %v5853_v38  ;;  %v5861_v44 = vld [vmem:[#allocation2 + $0x20] sm:$0xf]  ;;  %v6616_v45 = vld [vmem:[#allocation2 + $0x24] sm:$0xf0] }
  0x25   :  { %740 = vmatpush.bf16.msra.mxu2 %v5994_v6  ;;  %11313 = vst [vmem:[#allocation8_spill] sm:$0xff] %v7026_v36  ;;  %v7036_v43 = vor.u32 %v6613_v40, %v5855_v41  ;;  %v6615_v46 = vld [vmem:[#allocation2 + $0x24] sm:$0xf]  ;;  %v5863_v47 = vld [vmem:[#allocation2 + $0x28] sm:$0xf0]  ;;  %v7042_v48 = vor.u32 %v6616_v45, %v5861_v44 }
  0x26   :  { %829 = vmatpush.bf16.msra.mxu3 %v6058_v10  ;;  %11314 = vst [vmem:[#allocation9_spill] sm:$0xff] %v7028_v37  ;;  %v7044_v49 = vor.u32 %v6615_v46, %v5863_v47  ;;  %v5869_v50 = vld [vmem:[#allocation2 + $0x30] sm:$0xf]  ;;  %v6618_v51 = vld [vmem:[#allocation2 + $0x34] sm:$0xf0] }
  0x27   :  { %563 = vmatpush.bf16.msra.mxu0 %v5982_v16  ;;  %11315 = vst [vmem:[#allocation10_spill] sm:$0xff] %v7034_v42  ;;  %v6617_v52 = vld [vmem:[#allocation2 + $0x34] sm:$0xf]  ;;  %v5871_v53 = vld [vmem:[#allocation2 + $0x38] sm:$0xf0]  ;;  %v7050_v54 = vor.u32 %v6618_v51, %v5869_v50 }
  0x28   :  { %652 = vmatpush.bf16.msra.mxu1 %v6046_v17  ;;  %11316 = vst [vmem:[#allocation11_spill] sm:$0xff] %v7036_v43  ;;  %v7052_v55 = vor.u32 %v6617_v52, %v5871_v53  ;;  %v5877_v56 = vld [vmem:[#allocation2 + $0x40] sm:$0xf]  ;;  %v6620_v57 = vld [vmem:[#allocation2 + $0x44] sm:$0xf0] }
  0x29   :  { %741 = vmatpush.bf16.msra.mxu2 %v5986_v18  ;;  %11317 = vst [vmem:[#allocation12_spill] sm:$0xff] %v7042_v48  ;;  %v6619_v58 = vld [vmem:[#allocation2 + $0x44] sm:$0xf]  ;;  %v5879_v59 = vld [vmem:[#allocation2 + $0x48] sm:$0xf0]  ;;  %v7058_v60 = vor.u32 %v6620_v57, %v5877_v56 }
  0x2a   :  { %830 = vmatpush.bf16.msra.mxu3 %v6050_v22  ;;  %11318 = vst [vmem:[#allocation13_spill] sm:$0xff] %v7044_v49  ;;  %v7060_v61 = vor.u32 %v6619_v58, %v5879_v59  ;;  %v5885_v62 = vld [vmem:[#allocation2 + $0x50] sm:$0xf]  ;;  %v6622_v63 = vld [vmem:[#allocation2 + $0x54] sm:$0xf0] }
  0x2b   :  { %564 = vmatpush.bf16.msra.mxu0 %v5974_v28  ;;  %11319 = vst [vmem:[#allocation14_spill] sm:$0xff] %v7050_v54  ;;  %v6621_v0 = vld [vmem:[#allocation2 + $0x54] sm:$0xf]  ;;  %v5887_v1 = vld [vmem:[#allocation2 + $0x58] sm:$0xf0]  ;;  %v7066_v2 = vor.u32 %v6622_v63, %v5885_v62 }
  0x2c   :  { %653 = vmatpush.bf16.msra.mxu1 %v6038_v31  ;;  %11320 = vst [vmem:[#allocation15_spill] sm:$0xff] %v7052_v55  ;;  %v7068_v3 = vor.u32 %v6621_v0, %v5887_v1  ;;  %v5893_v4 = vld [vmem:[#allocation2 + $0x60] sm:$0xf]  ;;  %v6624_v5 = vld [vmem:[#allocation2 + $0x64] sm:$0xf0] }
  0x2d   :  { %742 = vmatpush.bf16.msra.mxu2 %v5978_v32  ;;  %11321 = vst [vmem:[#allocation16_spill] sm:$0xff] %v7058_v60  ;;  %v6623_v6 = vld [vmem:[#allocation2 + $0x64] sm:$0xf]  ;;  %v5895_v7 = vld [vmem:[#allocation2 + $0x68] sm:$0xf0]  ;;  %v7074_v8 = vor.u32 %v6624_v5, %v5893_v4 }
  0x2e   :  { %831 = vmatpush.bf16.msra.mxu3 %v6042_v35  ;;  %565 = vmatmul.bf16.vlgmr.msra.gmra.mxu0 %v7026_v36  ;;  %11322 = vst [vmem:[#allocation17_spill] sm:$0xff] %v7060_v61  ;;  %v7076_v9 = vor.u32 %v6623_v6, %v5895_v7  ;;  %v5901_v10 = vld [vmem:[#allocation2 + $0x70] sm:$0xf]  ;;  %v6626_v11 = vld [vmem:[#allocation2 + $0x74] sm:$0xf0] }
  0x2f   :  { %654 = vmatmul.bf16.vlgmr.msra.gmra.mxu1 %v7028_v37  ;;  %11323 = vst [vmem:[#allocation18_spill] sm:$0xff] %v7066_v2  ;;  %v6625_v12 = vld [vmem:[#allocation2 + $0x74] sm:$0xf]  ;;  %v5903_v13 = vld [vmem:[#allocation2 + $0x78] sm:$0xf0]  ;;  %v7082_v14 = vor.u32 %v6626_v11, %v5901_v10 }
  0x30   :  { %743 = vmatmul.bf16.vlgmr.msra.gmra.mxu2 %v7026_v36  ;;  %11324 = vst [vmem:[#allocation19_spill] sm:$0xff] %v7068_v3  ;;  %v7084_v15 = vor.u32 %v6625_v12, %v5903_v13  ;;  %v5909_v16 = vld [vmem:[#allocation2 + $0x80] sm:$0xf]  ;;  %v6628_v17 = vld [vmem:[#allocation2 + $0x84] sm:$0xf0] }
  0x31   :  { %832 = vmatmul.bf16.vlgmr.msra.gmra.mxu3 %v7028_v37  ;;  %11325 = vst [vmem:[#allocation20_spill] sm:$0xff] %v7074_v8  ;;  %v6627_v18 = vld [vmem:[#allocation2 + $0x84] sm:$0xf]  ;;  %v5911_v19 = vld [vmem:[#allocation2 + $0x88] sm:$0xf0]  ;;  %v7090_v20 = vor.u32 %v6628_v17, %v5909_v16 }
  0x32   :  { %11326 = vst [vmem:[#allocation21_spill] sm:$0xff] %v7076_v9  ;;  %v7092_v22 = vor.u32 %v6627_v18, %v5911_v19  ;;  %v5917_v32 = vld [vmem:[#allocation2 + $0x90] sm:$0xf]  ;;  %v6630_v33 = vld [vmem:[#allocation2 + $0x94] sm:$0xf0] }
  0x33   :  { %11327 = vst [vmem:[#allocation22_spill] sm:$0xff] %v7082_v14  ;;  %v6629_v34 = vld [vmem:[#allocation2 + $0x94] sm:$0xf]  ;;  %v5919_v35 = vld [vmem:[#allocation2 + $0x98] sm:$0xf0]  ;;  %v7100_v39 = vor.u32 %v6630_v33, %v5917_v32 }
  0x34   :  { %11328 = vst [vmem:[#allocation23_spill] sm:$0xff] %v7084_v15  ;;  %v7102_v44 = vor.u32 %v6629_v34, %v5919_v35  ;;  %v5925_v62 = vld [vmem:[#allocation2 + $0xa0] sm:$0xf]  ;;  %v6632_v63 = vld [vmem:[#allocation2 + $0xa4] sm:$0xf0] }
  0x35   :  { %11329 = vst [vmem:[#allocation24_spill] sm:$0xff] %v7090_v20  ;;  %v6631_v0 = vld [vmem:[#allocation2 + $0xa4] sm:$0xf]  ;;  %v5927_v1 = vld [vmem:[#allocation2 + $0xa8] sm:$0xf0]  ;;  %v7112_v5 = vor.u32 %v6632_v63, %v5925_v62 }
  0x36   :  { %11330 = vst [vmem:[#allocation25_spill] sm:$0xff] %v7092_v22  ;;  %v7114_v10 = vor.u32 %v6631_v0, %v5927_v1  ;;  %v6636_v62 = vld [vmem:[#allocation2 + $0xc4] sm:$0xf0]  ;;  %v6635_v63 = vld [vmem:[#allocation2 + $0xc4] sm:$0xf] }
  0x37   :  { %11331 = vst [vmem:[#allocation26_spill] sm:$0xff] %v7100_v39  ;;  %v5943_v0 = vld [vmem:[#allocation2 + $0xc8] sm:$0xf0] }
  0x38   :  { %11332 = vst [vmem:[#allocation27_spill] sm:$0xff] %v7102_v44 }
  0x39   :  { %11333 = vst [vmem:[#allocation28_spill] sm:$0xff] %v7112_v5 }
  0x3a   :  { %11334 = vst [vmem:[#allocation29_spill] sm:$0xff] %v7114_v10 }
  0x3e   :  { %570 = vmatmul.bf16.gmra.mxu0 %v7034_v42 }
  0x3f   :  { %659 = vmatmul.bf16.gmra.mxu1 %v7036_v43 }
  0x40   :  { %748 = vmatmul.bf16.gmra.mxu2 %v7034_v42 }
  0x41   :  { %837 = vmatmul.bf16.gmra.mxu3 %v7036_v43 }
  0x4e   :  { %575 = vmatmul.bf16.gmra.mxu0 %v7042_v48 }
  0x4f   :  { %664 = vmatmul.bf16.gmra.mxu1 %v7044_v49 }
  0x50   :  { %753 = vmatmul.bf16.gmra.mxu2 %v7042_v48 }
  0x51   :  { %842 = vmatmul.bf16.gmra.mxu3 %v7044_v49 }
  0x5e   :  { %580 = vmatmul.bf16.gmra.mxu0 %v7050_v54 }
  0x5f   :  { %669 = vmatmul.bf16.gmra.mxu1 %v7052_v55 }
  0x60   :  { %758 = vmatmul.bf16.gmra.mxu2 %v7050_v54 }
  0x61   :  { %847 = vmatmul.bf16.gmra.mxu3 %v7052_v55 }
  0x6e   :  { %585 = vmatmul.bf16.gmra.mxu0 %v7058_v60 }
  0x6f   :  { %674 = vmatmul.bf16.gmra.mxu1 %v7060_v61 }
  0x70   :  { %763 = vmatmul.bf16.gmra.mxu2 %v7058_v60 }
  0x71   :  { %852 = vmatmul.bf16.gmra.mxu3 %v7060_v61 }
  0x7e   :  { %590 = vmatmul.bf16.gmra.mxu0 %v7066_v2 }
  0x7f   :  { %679 = vmatmul.bf16.gmra.mxu1 %v7068_v3 }
  0x80   :  { %768 = vmatmul.bf16.gmra.mxu2 %v7066_v2 }
  0x81   :  { %857 = vmatmul.bf16.gmra.mxu3 %v7068_v3 }
  0x8e   :  { %595 = vmatmul.bf16.gmra.mxu0 %v7074_v8 }
  0x8f   :  { %684 = vmatmul.bf16.gmra.mxu1 %v7076_v9 }
  0x90   :  { %773 = vmatmul.bf16.gmra.mxu2 %v7074_v8 }
  0x91   :  { %862 = vmatmul.bf16.gmra.mxu3 %v7076_v9 }
  0x9e   :  { %600 = vmatmul.bf16.gmra.mxu0 %v7082_v14 }
  0x9f   :  { %689 = vmatmul.bf16.gmra.mxu1 %v7084_v15 }
  0xa0   :  { %778 = vmatmul.bf16.gmra.mxu2 %v7082_v14 }
  0xa1   :  { %867 = vmatmul.bf16.gmra.mxu3 %v7084_v15 }
  0xab   :  { %v566_v21 = vpop.f32.mrf.mxu0 }
  0xac   :  { %v655_v23 = vpop.f32.mrf.mxu1 }
  0xad   :  { %v656_v24 = vadd.f32 %v655_v23, %v566_v21 }
  0xae   :  { %605 = vmatmul.bf16.gmra.mxu0 %v7090_v20 }
  0xaf   :  { %694 = vmatmul.bf16.gmra.mxu1 %v7092_v22 }
  0xb0   :  { %783 = vmatmul.bf16.gmra.mxu2 %v7090_v20 }
  0xb1   :  { %872 = vmatmul.bf16.gmra.mxu3 %v7092_v22 }
  0xb3   :  { %v744_v25 = vpop.f32.mrf.mxu2  ;;  %v568_v27 = vpop.f32.mrf.mxu0 }
  0xb4   :  { %v833_v26 = vpop.f32.mrf.mxu3  ;;  %v657_v29 = vpop.f32.mrf.mxu1 }
  0xb5   :  { %v834_v28 = vadd.f32 %v833_v26, %v744_v25  ;;  %v658_v30 = vadd.f32 %v657_v29, %v568_v27  ;;  %v5933_v26 = vld [vmem:[#allocation2 + $0xb0] sm:$0xf]  ;;  %v6634_v27 = vld [vmem:[#allocation2 + $0xb4] sm:$0xf0]  ;;  %v5935_v29 = vld [vmem:[#allocation2 + $0xb8] sm:$0xf0] }
  0xb6   :  { %v7124_v32 = vor.u32 %v6634_v27, %v5933_v26  ;;  %v6706_v26 = vld [vmem:[#allocation2 + $0x1f4] sm:$0xf0]  ;;  %v6689_v27 = vld [vmem:[#allocation2 + $0x174] sm:$0xf] }
  0xb7   :  { %v7098_v31 = vpack.c.bf16 %v658_v30, %v656_v24 }
  0xb8   :  { %11335 = vst [vmem:[#allocation30_spill] sm:$0xff] %v7124_v32 }
  0xbb   :  { %v746_v38 = vpop.f32.mrf.mxu2  ;;  %v571_v41 = vpop.f32.mrf.mxu0 }
  0xbc   :  { %v835_v40 = vpop.f32.mrf.mxu3  ;;  %v660_v46 = vpop.f32.mrf.mxu1 }
  0xbd   :  { %v836_v45 = vadd.f32 %v835_v40, %v746_v38  ;;  %v661_v47 = vadd.f32 %v660_v46, %v571_v41 }
  0xbe   :  { %610 = vmatmul.bf16.gmra.mxu0 %v7100_v39 }
  0xbf   :  { %v7104_v50 = vpack.c.bf16 %v836_v45, %v834_v28  ;;  %699 = vmatmul.bf16.gmra.mxu1 %v7102_v44  ;;  %v6633_v28 = vld [vmem:[#allocation2 + $0xb4] sm:$0xf] }
  0xc0   :  { %788 = vmatmul.bf16.gmra.mxu2 %v7100_v39  ;;  %v7126_v35 = vor.u32 %v6633_v28, %v5935_v29  ;;  %v6159_v29 = vld [vmem:[#allocation2 + $0x178] sm:$0xf0] }
  0xc1   :  { %877 = vmatmul.bf16.gmra.mxu3 %v7102_v44 }
  0xc2   :  { %11336 = vst [vmem:[#allocation31_spill] sm:$0xff] %v7126_v35 }
  0xc3   :  { %v749_v51 = vpop.f32.mrf.mxu2  ;;  %v573_v53 = vpop.f32.mrf.mxu0 }
  0xc4   :  { %v838_v52 = vpop.f32.mrf.mxu3  ;;  %v662_v57 = vpop.f32.mrf.mxu1 }
  0xc5   :  { %v839_v56 = vadd.f32 %v838_v52, %v749_v51  ;;  %v663_v58 = vadd.f32 %v662_v57, %v573_v53 }
  0xc7   :  { %v7110_v59 = vpack.c.bf16 %v663_v58, %v661_v47  ;;  %v5941_v58 = vld [vmem:[#allocation2 + $0xc0] sm:$0xf] }
  0xcb   :  { %v751_v4 = vpop.f32.mrf.mxu2  ;;  %v576_v7 = vpop.f32.mrf.mxu0 }
  0xcc   :  { %v840_v6 = vpop.f32.mrf.mxu3  ;;  %v665_v12 = vpop.f32.mrf.mxu1 }
  0xcd   :  { %v841_v11 = vadd.f32 %v840_v6, %v751_v4  ;;  %v666_v13 = vadd.f32 %v665_v12, %v576_v7  ;;  %v7136_v4 = vor.u32 %v6636_v62, %v5941_v58  ;;  %v6687_v58 = vld [vmem:[#allocation2 + $0x164] sm:$0xf]  ;;  %v6151_v62 = vld [vmem:[#allocation2 + $0x168] sm:$0xf0] }
  0xce   :  { %615 = vmatmul.bf16.gmra.mxu0 %v7112_v5 }
  0xcf   :  { %v7116_v16 = vpack.c.bf16 %v841_v11, %v839_v56  ;;  %704 = vmatmul.bf16.gmra.mxu1 %v7114_v10  ;;  %11337 = vst [vmem:[#allocation32_spill] sm:$0xff] %v7136_v4  ;;  %v7138_v11 = vor.u32 %v6635_v63, %v5943_v0 }
  0xd0   :  { %793 = vmatmul.bf16.gmra.mxu2 %v7112_v5 }
  0xd1   :  { %882 = vmatmul.bf16.gmra.mxu3 %v7114_v10  ;;  %11338 = vst [vmem:[#allocation33_spill] sm:$0xff] %v7138_v11 }
  0xd3   :  { %v754_v17 = vpop.f32.mrf.mxu2  ;;  %v578_v19 = vpop.f32.mrf.mxu0 }
  0xd4   :  { %v843_v18 = vpop.f32.mrf.mxu3  ;;  %v667_v23 = vpop.f32.mrf.mxu1 }
  0xd5   :  { %v844_v21 = vadd.f32 %v843_v18, %v754_v17  ;;  %v668_v24 = vadd.f32 %v667_v23, %v578_v19  ;;  %v6157_v19 = vld [vmem:[#allocation2 + $0x170] sm:$0xf] }
  0xd7   :  { %v7122_v25 = vpack.c.bf16 %v668_v24, %v666_v13  ;;  %v6221_v24 = vld [vmem:[#allocation2 + $0x1f0] sm:$0xf] }
  0xd8   :  { %v6222_v28 = vor.u32 %v6706_v26, %v6221_v24  ;;  %v6637_v24 = vld [vmem:[#allocation2 + $0xd4] sm:$0xf]  ;;  %v6141_v26 = vld [vmem:[#allocation2 + $0x150] sm:$0xf] }
  0xda   :  { %1233 = vmatpush.bf16.msrb.mxu1 %v6222_v28  ;;  %v6205_v28 = vld [vmem:[#allocation2 + $0x1d0] sm:$0xf] }
  0xdb   :  { %v756_v30 = vpop.f32.mrf.mxu2  ;;  %v581_v34 = vpop.f32.mrf.mxu0 }
  0xdc   :  { %v845_v33 = vpop.f32.mrf.mxu3  ;;  %v670_v40 = vpop.f32.mrf.mxu1 }
  0xdd   :  { %v846_v38 = vadd.f32 %v845_v33, %v756_v30  ;;  %v671_v41 = vadd.f32 %v670_v40, %v581_v34  ;;  %v6705_v30 = vld [vmem:[#allocation2 + $0x1f4] sm:$0xf]  ;;  %v6223_v33 = vld [vmem:[#allocation2 + $0x1f8] sm:$0xf0]  ;;  %v6162_v34 = vor.u32 %v6689_v27, %v6159_v29  ;;  %v6686_v27 = vld [vmem:[#allocation2 + $0x154] sm:$0xf0] }
  0xde   :  { %620 = vmatmul.bf16.gmra.mxu0 %v7124_v32 }
  0xdf   :  { %v7128_v45 = vpack.c.bf16 %v846_v38, %v844_v21  ;;  %709 = vmatmul.bf16.gmra.mxu1 %v7126_v35  ;;  %v6690_v21 = vld [vmem:[#allocation2 + $0x174] sm:$0xf0]  ;;  %v6226_v38 = vor.u32 %v6705_v30, %v6223_v33  ;;  %1322 = vmatpush.bf16.msrb.mxu2 %v6162_v34  ;;  %v6142_v30 = vor.u32 %v6686_v27, %v6141_v26  ;;  %v6685_v34 = vld [vmem:[#allocation2 + $0x154] sm:$0xf] }
  0xe0   :  { %798 = vmatmul.bf16.gmra.mxu2 %v7124_v32  ;;  %v6158_v23 = vor.u32 %v6690_v21, %v6157_v19  ;;  %v5949_v19 = vld [vmem:[#allocation2 + $0xd0] sm:$0xf]  ;;  %v6638_v21 = vld [vmem:[#allocation2 + $0xd4] sm:$0xf0] }
  0xe1   :  { %887 = vmatmul.bf16.gmra.mxu3 %v7126_v35  ;;  %v6702_v33 = vld [vmem:[#allocation2 + $0x1d4] sm:$0xf0] }
  0xe2   :  { %1144 = vmatpush.bf16.msrb.mxu0 %v6158_v23  ;;  %1411 = vmatpush.bf16.msrb.mxu3 %v6226_v38  ;;  %v6143_v38 = vld [vmem:[#allocation2 + $0x158] sm:$0xf0] }
  0xe3   :  { %v759_v46 = vpop.f32.mrf.mxu2  ;;  %v583_v51 = vpop.f32.mrf.mxu0 }
  0xe4   :  { %v848_v47 = vpop.f32.mrf.mxu3  ;;  %v672_v53 = vpop.f32.mrf.mxu1 }
  0xe5   :  { %v849_v52 = vadd.f32 %v848_v47, %v759_v46  ;;  %v673_v56 = vadd.f32 %v672_v53, %v583_v51  ;;  %v6688_v46 = vld [vmem:[#allocation2 + $0x164] sm:$0xf0]  ;;  %v6213_v47 = vld [vmem:[#allocation2 + $0x1e0] sm:$0xf] }
  0xe7   :  { %v7134_v57 = vpack.c.bf16 %v673_v56, %v671_v41  ;;  %v6149_v41 = vld [vmem:[#allocation2 + $0x160] sm:$0xf]  ;;  %v6704_v56 = vld [vmem:[#allocation2 + $0x1e4] sm:$0xf0] }
  0xe8   :  { %v6150_v53 = vor.u32 %v6688_v46, %v6149_v41  ;;  %v6206_v41 = vor.u32 %v6702_v33, %v6205_v28  ;;  %v6146_v46 = vor.u32 %v6685_v34, %v6143_v38 }
  0xea   :  { %1145 = vmatpush.bf16.msrb.mxu0 %v6150_v53 }
  0xeb   :  { %v761_v1 = vpop.f32.mrf.mxu2  ;;  %v586_v7 = vpop.f32.mrf.mxu0 }
  0xec   :  { %v850_v6 = vpop.f32.mrf.mxu3  ;;  %v675_v13 = vpop.f32.mrf.mxu1 }
  0xed   :  { %v851_v12 = vadd.f32 %v850_v6, %v761_v1  ;;  %v676_v17 = vadd.f32 %v675_v13, %v586_v7  ;;  %v6214_v1 = vor.u32 %v6704_v56, %v6213_v47  ;;  %v6154_v6 = vor.u32 %v6687_v58, %v6151_v62  ;;  %v6703_v7 = vld [vmem:[#allocation2 + $0x1e4] sm:$0xf]  ;;  %v6701_v47 = vld [vmem:[#allocation2 + $0x1d4] sm:$0xf]  ;;  %v6133_v58 = vld [vmem:[#allocation2 + $0x140] sm:$0xf] }
  0xee   :  { %625 = vmatmul.bf16.gmra.mxu0 %v7136_v4  ;;  %v7148_v56 = vor.u32 %v6638_v21, %v5949_v19  ;;  %v6197_v62 = vld [vmem:[#allocation2 + $0x1c0] sm:$0xf]  ;;  %v6699_v19 = vld [vmem:[#allocation2 + $0x1c4] sm:$0xf]  ;;  %v6199_v21 = vld [vmem:[#allocation2 + $0x1c8] sm:$0xf0] }
  0xef   :  { %v7140_v18 = vpack.c.bf16 %v851_v12, %v849_v52  ;;  %714 = vmatmul.bf16.gmra.mxu1 %v7138_v11  ;;  %v6215_v12 = vld [vmem:[#allocation2 + $0x1e8] sm:$0xf0]  ;;  %1323 = vmatpush.bf16.msrb.mxu2 %v6154_v6  ;;  %v6202_v34 = vor.u32 %v6699_v19, %v6199_v21 }
  0xf0   :  { %803 = vmatmul.bf16.gmra.mxu2 %v7136_v4  ;;  %v6218_v23 = vor.u32 %v6703_v7, %v6215_v12  ;;  %1234 = vmatpush.bf16.msrb.mxu1 %v6214_v1  ;;  %11339 = vst [vmem:[#allocation34_spill] sm:$0xff] %v7148_v56  ;;  %v6700_v12 = vld [vmem:[#allocation2 + $0x1c4] sm:$0xf0]  ;;  %v6119_v19 = vld [vmem:[#allocation2 + $0x128] sm:$0xf0] }
  0xf1   :  { %892 = vmatmul.bf16.gmra.mxu3 %v7138_v11  ;;  %1146 = vmatpush.bf16.msrb.mxu0 %v6142_v30  ;;  %v6198_v28 = vor.u32 %v6700_v12, %v6197_v62  ;;  %v6181_v12 = vld [vmem:[#allocation2 + $0x1a0] sm:$0xf] }
  0xf2   :  { %1412 = vmatpush.bf16.msrb.mxu3 %v6218_v23  ;;  %v6135_v23 = vld [vmem:[#allocation2 + $0x148] sm:$0xf0] }
  0xf3   :  { %v764_v40 = vpop.f32.mrf.mxu2  ;;  %v588_v52 = vpop.f32.mrf.mxu0  ;;  %1324 = vmatpush.bf16.msrb.mxu2 %v6146_v46  ;;  %v6189_v46 = vld [vmem:[#allocation2 + $0x1b0] sm:$0xf] }
  0xf4   :  { %v853_v51 = vpop.f32.mrf.mxu3  ;;  %v677_v0 = vpop.f32.mrf.mxu1  ;;  %1235 = vmatpush.bf16.msrb.mxu1 %v6206_v41 }
  0xf5   :  { %v854_v63 = vadd.f32 %v853_v51, %v764_v40  ;;  %v678_v13 = vadd.f32 %v677_v0, %v588_v52  ;;  %v5951_v40 = vld [vmem:[#allocation2 + $0xd8] sm:$0xf0] }
  0xf6   :  { %v6207_v51 = vld [vmem:[#allocation2 + $0x1d8] sm:$0xf0]  ;;  %v7150_v6 = vor.u32 %v6637_v24, %v5951_v40  ;;  %v6125_v24 = vld [vmem:[#allocation2 + $0x130] sm:$0xf]  ;;  %v6682_v40 = vld [vmem:[#allocation2 + $0x134] sm:$0xf0] }
  0xf7   :  { %v7146_v29 = vpack.c.bf16 %v678_v13, %v676_v17  ;;  %v6210_v52 = vor.u32 %v6701_v47, %v6207_v51  ;;  %v6684_v17 = vld [vmem:[#allocation2 + $0x144] sm:$0xf0]  ;;  %v6683_v13 = vld [vmem:[#allocation2 + $0x144] sm:$0xf]  ;;  %v6126_v41 = vor.u32 %v6682_v40, %v6125_v24  ;;  %v6698_v47 = vld [vmem:[#allocation2 + $0x1b4] sm:$0xf0] }
  0xf8   :  { %11340 = vst [vmem:[#allocation35_spill] sm:$0xff] %v7150_v6  ;;  %v6134_v7 = vor.u32 %v6684_v17, %v6133_v58  ;;  %v6138_v30 = vor.u32 %v6683_v13, %v6135_v23  ;;  %1236 = vmatpush.bf16.msrb.mxu1 %v6198_v28  ;;  %v6681_v51 = vld [vmem:[#allocation2 + $0x134] sm:$0xf]  ;;  %v6191_v58 = vld [vmem:[#allocation2 + $0x1b8] sm:$0xf0] }
  0xf9   :  { %1413 = vmatpush.bf16.msrb.mxu3 %v6210_v52  ;;  %v6190_v52 = vor.u32 %v6698_v47, %v6189_v46  ;;  %v6679_v28 = vld [vmem:[#allocation2 + $0x124] sm:$0xf]  ;;  %v5957_v47 = vld [vmem:[#allocation2 + $0xe0] sm:$0xf] }
  0xfa   :  { %1147 = vmatpush.bf16.msrb.mxu0 %v6134_v7  ;;  %1325 = vmatpush.bf16.msrb.mxu2 %v6138_v30  ;;  %v6680_v7 = vld [vmem:[#allocation2 + $0x124] sm:$0xf0]  ;;  %v6122_v40 = vor.u32 %v6679_v28, %v6119_v19  ;;  %v6693_v19 = vld [vmem:[#allocation2 + $0x194] sm:$0xf] }
  0xfb   :  { %v766_v53 = vpop.f32.mrf.mxu2  ;;  %v591_v1 = vpop.f32.mrf.mxu0 }
  0xfc   :  { %v855_v0 = vpop.f32.mrf.mxu3  ;;  %v680_v27 = vpop.f32.mrf.mxu1  ;;  %1237 = vmatpush.bf16.msrb.mxu1 %v6190_v52 }
  0xfd   :  { %v856_v26 = vadd.f32 %v855_v0, %v766_v53  ;;  %v681_v33 = vadd.f32 %v680_v27, %v591_v1  ;;  %v6127_v53 = vld [vmem:[#allocation2 + $0x138] sm:$0xf0]  ;;  %1414 = vmatpush.bf16.msrb.mxu3 %v6202_v34  ;;  %v6117_v1 = vld [vmem:[#allocation2 + $0x120] sm:$0xf]  ;;  %v6696_v27 = vld [vmem:[#allocation2 + $0x1a4] sm:$0xf0] }
  0xfe   :  { %630 = vmatmul.bf16.gmra.mxu0 %v7148_v56  ;;  %v6130_v17 = vor.u32 %v6681_v51, %v6127_v53  ;;  %v6182_v24 = vor.u32 %v6696_v27, %v6181_v12  ;;  %v6695_v34 = vld [vmem:[#allocation2 + $0x1a4] sm:$0xf]  ;;  %v6640_v51 = vld [vmem:[#allocation2 + $0xe4] sm:$0xf0]  ;;  %v6111_v12 = vld [vmem:[#allocation2 + $0x118] sm:$0xf0] }
  0xff   :  { %v7152_v38 = vpack.c.bf16 %v856_v26, %v854_v63  ;;  %719 = vmatmul.bf16.gmra.mxu1 %v7150_v6  ;;  %v6697_v63 = vld [vmem:[#allocation2 + $0x1b4] sm:$0xf]  ;;  %1148 = vmatpush.bf16.msrb.mxu0 %v6126_v41  ;;  %v6118_v26 = vor.u32 %v6680_v7, %v6117_v1  ;;  %v6183_v41 = vld [vmem:[#allocation2 + $0x1a8] sm:$0xf0]  ;;  %v6639_v53 = vld [vmem:[#allocation2 + $0xe4] sm:$0xf] }
 0x100   :  { %808 = vmatmul.bf16.gmra.mxu2 %v7148_v56  ;;  %v6194_v62 = vor.u32 %v6697_v63, %v6191_v58  ;;  %v6186_v52 = vor.u32 %v6695_v34, %v6183_v41  ;;  %1238 = vmatpush.bf16.msrb.mxu1 %v6182_v24  ;;  %v6109_v63 = vld [vmem:[#allocation2 + $0x110] sm:$0xf]  ;;  %v6678_v58 = vld [vmem:[#allocation2 + $0x114] sm:$0xf0]  ;;  %v5959_v27 = vld [vmem:[#allocation2 + $0xe8] sm:$0xf0]  ;;  %v7160_v24 = vor.u32 %v6640_v51, %v5957_v47 }
 0x101   :  { %897 = vmatmul.bf16.gmra.mxu3 %v7150_v6  ;;  %1326 = vmatpush.bf16.msrb.mxu2 %v6130_v17  ;;  %v6173_v1 = vld [vmem:[#allocation2 + $0x190] sm:$0xf]  ;;  %v6677_v17 = vld [vmem:[#allocation2 + $0x114] sm:$0xf]  ;;  %v6101_v34 = vld [vmem:[#allocation2 + $0x100] sm:$0xf] }
 0x102   :  { %1415 = vmatpush.bf16.msrb.mxu3 %v6194_v62  ;;  %11341 = vst [vmem:[#allocation36_spill] sm:$0xff] %v7160_v24  ;;  %v6165_v41 = vld [vmem:[#allocation2 + $0x180] sm:$0xf]  ;;  %v6167_v47 = vld [vmem:[#allocation2 + $0x188] sm:$0xf0] }
 0x103   :  { %v769_v0 = vpop.f32.mrf.mxu2  ;;  %v593_v23 = vpop.f32.mrf.mxu0  ;;  %1149 = vmatpush.bf16.msrb.mxu0 %v6118_v26 }
 0x104   :  { %v858_v13 = vpop.f32.mrf.mxu3  ;;  %v682_v21 = vpop.f32.mrf.mxu1 }
 0x105   :  { %v859_v30 = vadd.f32 %v858_v13, %v769_v0  ;;  %v683_v46 = vadd.f32 %v682_v21, %v593_v23  ;;  %v6110_v0 = vor.u32 %v6678_v58, %v6109_v63  ;;  %v6694_v13 = vld [vmem:[#allocation2 + $0x194] sm:$0xf0]  ;;  %1327 = vmatpush.bf16.msrb.mxu2 %v6122_v40  ;;  %v6114_v23 = vor.u32 %v6677_v17, %v6111_v12  ;;  %v6175_v21 = vld [vmem:[#allocation2 + $0x198] sm:$0xf0]  ;;  %v6692_v40 = vld [vmem:[#allocation2 + $0x184] sm:$0xf0] }
 0x106   :  { %v6174_v28 = vor.u32 %v6694_v13, %v6173_v1  ;;  %1416 = vmatpush.bf16.msrb.mxu3 %v6186_v52  ;;  %v6178_v62 = vor.u32 %v6693_v19, %v6175_v21  ;;  %v7162_v58 = vor.u32 %v6639_v53, %v5959_v27  ;;  %v6675_v1 = vld [vmem:[#allocation2 + $0x104] sm:$0xf]  ;;  %v6103_v13 = vld [vmem:[#allocation2 + $0x108] sm:$0xf0]  ;;  %v6166_v52 = vor.u32 %v6692_v40, %v6165_v41  ;;  %v6641_v41 = vld [vmem:[#allocation2 + $0xf4] sm:$0xf] }
 0x107   :  { %v7158_v7 = vpack.c.bf16 %v683_v46, %v681_v33  ;;  %1150 = vmatpush.bf16.msrb.mxu0 %v6110_v0  ;;  %v6676_v33 = vld [vmem:[#allocation2 + $0x104] sm:$0xf0]  ;;  %v6106_v0 = vor.u32 %v6675_v1, %v6103_v13  ;;  %v6691_v19 = vld [vmem:[#allocation2 + $0x184] sm:$0xf] }
 0x108   :  { %1239 = vmatpush.bf16.msrb.mxu1 %v6174_v28  ;;  %11342 = vst [vmem:[#allocation37_spill] sm:$0xff] %v7162_v58  ;;  %v6102_v6 = vor.u32 %v6676_v33, %v6101_v34  ;;  %v6170_v28 = vor.u32 %v6691_v19, %v6167_v47  ;;  %v6642_v33 = vld [vmem:[#allocation2 + $0xf4] sm:$0xf0] }
 0x109   :  { %1328 = vmatpush.bf16.msrb.mxu2 %v6114_v23 }
 0x10a   :  { %1417 = vmatpush.bf16.msrb.mxu3 %v6178_v62 }
 0x10b   :  { %v771_v26 = vpop.f32.mrf.mxu2  ;;  %v596_v63 = vpop.f32.mrf.mxu0  ;;  %1151 = vmatpush.bf16.msrb.mxu0 %v6102_v6 }
 0x10c   :  { %v860_v46 = vpop.f32.mrf.mxu3  ;;  %v685_v12 = vpop.f32.mrf.mxu1  ;;  %1240 = vmatpush.bf16.msrb.mxu1 %v6166_v52 }
 0x10d   :  { %v861_v17 = vadd.f32 %v860_v46, %v771_v26  ;;  %v686_v51 = vadd.f32 %v685_v12, %v596_v63  ;;  %1329 = vmatpush.bf16.msrb.mxu2 %v6106_v0  ;;  %v5967_v46 = vld [vmem:[#allocation2 + $0xf8] sm:$0xf0] }
 0x10e   :  { %635 = vmatmul.bf16.gmra.mxu0 %v7160_v24  ;;  %1418 = vmatpush.bf16.msrb.mxu3 %v6170_v28 }
 0x10f   :  { %v7164_v21 = vpack.c.bf16 %v861_v17, %v859_v30  ;;  %724 = vmatmul.bf16.gmra.mxu1 %v7162_v58  ;;  %v5965_v30 = vld [vmem:[#allocation2 + $0xf0] sm:$0xf]  ;;  %v7174_v17 = vor.u32 %v6641_v41, %v5967_v46 }
 0x110   :  { %813 = vmatmul.bf16.gmra.mxu2 %v7160_v24  ;;  %v7172_v40 = vor.u32 %v6642_v33, %v5965_v30 }
 0x111   :  { %902 = vmatmul.bf16.gmra.mxu3 %v7162_v58  ;;  %11344 = vst [vmem:[#allocation39_spill] sm:$0xff] %v7174_v17 }
 0x112   :  { %11343 = vst [vmem:[#allocation38_spill] sm:$0xff] %v7172_v40 }
 0x113   :  { %v774_v53 = vpop.f32.mrf.mxu2  ;;  %v598_v23 = vpop.f32.mrf.mxu0 }
 0x114   :  { %v863_v27 = vpop.f32.mrf.mxu3  ;;  %v687_v62 = vpop.f32.mrf.mxu1 }
 0x115   :  { %v864_v26 = vadd.f32 %v863_v27, %v774_v53  ;;  %v688_v6 = vadd.f32 %v687_v62, %v598_v23 }
 0x117   :  { %v7170_v34 = vpack.c.bf16 %v688_v6, %v686_v51 }
 0x11b   :  { %v776_v63 = vpop.f32.mrf.mxu2  ;;  %v601_v13 = vpop.f32.mrf.mxu0 }
 0x11c   :  { %v865_v1 = vpop.f32.mrf.mxu3  ;;  %v690_v52 = vpop.f32.mrf.mxu1 }
 0x11d   :  { %v866_v12 = vadd.f32 %v865_v1, %v776_v63  ;;  %v691_v0 = vadd.f32 %v690_v52, %v601_v13 }
 0x11e   :  { %640 = vmatmul.bf16.gmra.mxu0 %v7172_v40 }
 0x11f   :  { %v7176_v19 = vpack.c.bf16 %v866_v12, %v864_v26  ;;  %729 = vmatmul.bf16.gmra.mxu1 %v7174_v17 }
 0x120   :  { %818 = vmatmul.bf16.gmra.mxu2 %v7172_v40 }
 0x121   :  { %907 = vmatmul.bf16.gmra.mxu3 %v7174_v17 }
 0x123   :  { %v779_v47 = vpop.f32.mrf.mxu2  ;;  %v603_v28 = vpop.f32.mrf.mxu0 }
 0x124   :  { %v868_v51 = vpop.f32.mrf.mxu3  ;;  %v692_v27 = vpop.f32.mrf.mxu1 }
 0x125   :  { %v869_v53 = vadd.f32 %v868_v51, %v779_v47  ;;  %v693_v23 = vadd.f32 %v692_v27, %v603_v28 }
 0x127   :  { %v7182_v62 = vpack.c.bf16 %v693_v23, %v691_v0 }
 0x12b   :  { %v781_v6 = vpop.f32.mrf.mxu2  ;;  %v606_v26 = vpop.f32.mrf.mxu0 }
 0x12c   :  { %v870_v30 = vpop.f32.mrf.mxu3  ;;  %v695_v41 = vpop.f32.mrf.mxu1 }
 0x12d   :  { %v871_v33 = vadd.f32 %v870_v30, %v781_v6  ;;  %v696_v46 = vadd.f32 %v695_v41, %v606_v26 }
 0x12e   :  { %1152 = vmatmul.bf16.vlgmr.msrb.gmra.mxu0 %v7098_v31 }
 0x12f   :  { %v7184_v63 = vpack.c.bf16 %v871_v33, %v869_v53  ;;  %1241 = vmatmul.bf16.vlgmr.msrb.gmra.mxu1 %v7104_v50 }
 0x130   :  { %1330 = vmatmul.bf16.vlgmr.msrb.gmra.mxu2 %v7098_v31 }
 0x131   :  { %1419 = vmatmul.bf16.vlgmr.msrb.gmra.mxu3 %v7104_v50 }
 0x133   :  { %v784_v1 = vpop.f32.mrf.mxu2  ;;  %v608_v12 = vpop.f32.mrf.mxu0 }
 0x134   :  { %v873_v13 = vpop.f32.mrf.mxu3  ;;  %v697_v0 = vpop.f32.mrf.mxu1 }
 0x135   :  { %v874_v52 = vadd.f32 %v873_v13, %v784_v1  ;;  %v698_v47 = vadd.f32 %v697_v0, %v608_v12 }
 0x137   :  { %v7190_v51 = vpack.c.bf16 %v698_v47, %v696_v46 }
 0x13b   :  { %v786_v28 = vpop.f32.mrf.mxu2  ;;  %v611_v53 = vpop.f32.mrf.mxu0 }
 0x13c   :  { %v875_v27 = vpop.f32.mrf.mxu3  ;;  %v700_v6 = vpop.f32.mrf.mxu1 }
 0x13d   :  { %v876_v23 = vadd.f32 %v875_v27, %v786_v28  ;;  %v701_v30 = vadd.f32 %v700_v6, %v611_v53 }
 0x13e   :  { %1157 = vmatmul.bf16.gmra.mxu0 %v7110_v59 }
 0x13f   :  { %v7192_v26 = vpack.c.bf16 %v876_v23, %v874_v52  ;;  %1246 = vmatmul.bf16.gmra.mxu1 %v7116_v16 }
 0x140   :  { %1335 = vmatmul.bf16.gmra.mxu2 %v7110_v59 }
 0x141   :  { %1424 = vmatmul.bf16.gmra.mxu3 %v7116_v16 }
 0x143   :  { %v789_v31 = vpop.f32.mrf.mxu2  ;;  %v613_v33 = vpop.f32.mrf.mxu0 }
 0x144   :  { %v878_v50 = vpop.f32.mrf.mxu3  ;;  %v702_v46 = vpop.f32.mrf.mxu1 }
 0x145   :  { %v879_v41 = vadd.f32 %v878_v50, %v789_v31  ;;  %v703_v1 = vadd.f32 %v702_v46, %v613_v33 }
 0x147   :  { %v7198_v13 = vpack.c.bf16 %v703_v1, %v701_v30 }
 0x14b   :  { %v791_v12 = vpop.f32.mrf.mxu2  ;;  %v616_v52 = vpop.f32.mrf.mxu0 }
 0x14c   :  { %v880_v0 = vpop.f32.mrf.mxu3  ;;  %v705_v28 = vpop.f32.mrf.mxu1 }
 0x14d   :  { %v881_v47 = vadd.f32 %v880_v0, %v791_v12  ;;  %v706_v27 = vadd.f32 %v705_v28, %v616_v52 }
 0x14e   :  { %1162 = vmatmul.bf16.gmra.mxu0 %v7122_v25 }
 0x14f   :  { %v7200_v53 = vpack.c.bf16 %v881_v47, %v879_v41  ;;  %1251 = vmatmul.bf16.gmra.mxu1 %v7128_v45 }
 0x150   :  { %1340 = vmatmul.bf16.gmra.mxu2 %v7122_v25 }
 0x151   :  { %1429 = vmatmul.bf16.gmra.mxu3 %v7128_v45 }
 0x153   :  { %v794_v59 = vpop.f32.mrf.mxu2  ;;  %v618_v23 = vpop.f32.mrf.mxu0 }
 0x154   :  { %v883_v16 = vpop.f32.mrf.mxu3  ;;  %v707_v30 = vpop.f32.mrf.mxu1 }
 0x155   :  { %v884_v6 = vadd.f32 %v883_v16, %v794_v59  ;;  %v708_v31 = vadd.f32 %v707_v30, %v618_v23 }
 0x157   :  { %v7206_v50 = vpack.c.bf16 %v708_v31, %v706_v27 }
 0x15b   :  { %v796_v33 = vpop.f32.mrf.mxu2  ;;  %v621_v41 = vpop.f32.mrf.mxu0 }
 0x15c   :  { %v885_v46 = vpop.f32.mrf.mxu3  ;;  %v710_v12 = vpop.f32.mrf.mxu1 }
 0x15d   :  { %v886_v1 = vadd.f32 %v885_v46, %v796_v33  ;;  %v711_v0 = vadd.f32 %v710_v12, %v621_v41 }
 0x15e   :  { %1167 = vmatmul.bf16.gmra.mxu0 %v7134_v57 }
 0x15f   :  { %v7208_v52 = vpack.c.bf16 %v886_v1, %v884_v6  ;;  %1256 = vmatmul.bf16.gmra.mxu1 %v7140_v18 }
 0x160   :  { %1345 = vmatmul.bf16.gmra.mxu2 %v7134_v57 }
 0x161   :  { %1434 = vmatmul.bf16.gmra.mxu3 %v7140_v18 }
 0x163   :  { %v799_v25 = vpop.f32.mrf.mxu2  ;;  %v623_v47 = vpop.f32.mrf.mxu0 }
 0x164   :  { %v888_v45 = vpop.f32.mrf.mxu3  ;;  %v712_v27 = vpop.f32.mrf.mxu1 }
 0x165   :  { %v889_v28 = vadd.f32 %v888_v45, %v799_v25  ;;  %v713_v59 = vadd.f32 %v712_v27, %v623_v47 }
 0x167   :  { %v7214_v16 = vpack.c.bf16 %v713_v59, %v711_v0 }
 0x16b   :  { %v801_v23 = vpop.f32.mrf.mxu2  ;;  %v626_v6 = vpop.f32.mrf.mxu0 }
 0x16c   :  { %v890_v30 = vpop.f32.mrf.mxu3  ;;  %v715_v33 = vpop.f32.mrf.mxu1 }
 0x16d   :  { %v891_v31 = vadd.f32 %v890_v30, %v801_v23  ;;  %v716_v46 = vadd.f32 %v715_v33, %v626_v6 }
 0x16e   :  { %1172 = vmatmul.bf16.gmra.mxu0 %v7146_v29 }
 0x16f   :  { %v7216_v41 = vpack.c.bf16 %v891_v31, %v889_v28  ;;  %1261 = vmatmul.bf16.gmra.mxu1 %v7152_v38 }
 0x170   :  { %1350 = vmatmul.bf16.gmra.mxu2 %v7146_v29 }
 0x171   :  { %1439 = vmatmul.bf16.gmra.mxu3 %v7152_v38 }
 0x173   :  { %v804_v57 = vpop.f32.mrf.mxu2  ;;  %v628_v1 = vpop.f32.mrf.mxu0 }
 0x174   :  { %v893_v18 = vpop.f32.mrf.mxu3  ;;  %v717_v0 = vpop.f32.mrf.mxu1 }
 0x175   :  { %v894_v12 = vadd.f32 %v893_v18, %v804_v57  ;;  %v718_v25 = vadd.f32 %v717_v0, %v628_v1 }
 0x177   :  { %v7222_v45 = vpack.c.bf16 %v718_v25, %v716_v46 }
 0x17b   :  { %v806_v47 = vpop.f32.mrf.mxu2  ;;  %v631_v28 = vpop.f32.mrf.mxu0 }
 0x17c   :  { %v895_v27 = vpop.f32.mrf.mxu3  ;;  %v720_v23 = vpop.f32.mrf.mxu1 }
 0x17d   :  { %v896_v59 = vadd.f32 %v895_v27, %v806_v47  ;;  %v721_v30 = vadd.f32 %v720_v23, %v631_v28 }
 0x17e   :  { %1177 = vmatmul.bf16.gmra.mxu0 %v7158_v7 }
 0x17f   :  { %v7224_v6 = vpack.c.bf16 %v896_v59, %v894_v12  ;;  %1266 = vmatmul.bf16.gmra.mxu1 %v7164_v21 }
 0x180   :  { %1355 = vmatmul.bf16.gmra.mxu2 %v7158_v7 }
 0x181   :  { %1444 = vmatmul.bf16.gmra.mxu3 %v7164_v21 }
 0x183   :  { %v809_v29 = vpop.f32.mrf.mxu2  ;;  %v633_v31 = vpop.f32.mrf.mxu0 }
 0x184   :  { %v898_v38 = vpop.f32.mrf.mxu3  ;;  %v722_v46 = vpop.f32.mrf.mxu1 }
 0x185   :  { %v899_v33 = vadd.f32 %v898_v38, %v809_v29  ;;  %v723_v57 = vadd.f32 %v722_v46, %v633_v31 }
 0x187   :  { %v7230_v18 = vpack.c.bf16 %v723_v57, %v721_v30 }
 0x18b   :  { %v811_v1 = vpop.f32.mrf.mxu2  ;;  %v636_v12 = vpop.f32.mrf.mxu0 }
 0x18c   :  { %v900_v0 = vpop.f32.mrf.mxu3  ;;  %v725_v47 = vpop.f32.mrf.mxu1 }
 0x18d   :  { %v901_v25 = vadd.f32 %v900_v0, %v811_v1  ;;  %v726_v27 = vadd.f32 %v725_v47, %v636_v12 }
 0x18e   :  { %1182 = vmatmul.bf16.gmra.mxu0 %v7170_v34 }
 0x18f   :  { %v7232_v28 = vpack.c.bf16 %v901_v25, %v899_v33  ;;  %1271 = vmatmul.bf16.gmra.mxu1 %v7176_v19 }
 0x190   :  { %1360 = vmatmul.bf16.gmra.mxu2 %v7170_v34 }
 0x191   :  { %1449 = vmatmul.bf16.gmra.mxu3 %v7176_v19 }
 0x193   :  { %v814_v7 = vpop.f32.mrf.mxu2  ;;  %v638_v59 = vpop.f32.mrf.mxu0 }
 0x194   :  { %v903_v21 = vpop.f32.mrf.mxu3  ;;  %v727_v30 = vpop.f32.mrf.mxu1 }
 0x195   :  { %v904_v23 = vadd.f32 %v903_v21, %v814_v7  ;;  %v728_v29 = vadd.f32 %v727_v30, %v638_v59  ;;  %v978_v59 = vld [vmem:[#allocation4] ss:$8 sm:$0x3] }
 0x197   :  { %v7238_v38 = vpack.c.bf16 %v728_v29, %v726_v27  ;;  %v7248_v29 = vperm.slane %v978_v59, 0 }
 0x19b   :  { %v816_v31 = vpop.f32.mrf.mxu2  ;;  %v641_v33 = vpop.f32.mrf.mxu0 }
 0x19c   :  { %v905_v46 = vpop.f32.mrf.mxu3  ;;  %v730_v1 = vpop.f32.mrf.mxu1 }
 0x19d   :  { %v906_v57 = vadd.f32 %v905_v46, %v816_v31  ;;  %v731_v0 = vadd.f32 %v730_v1, %v641_v33 }
 0x19e   :  { %1187 = vmatmul.bf16.gmra.mxu0 %v7182_v62 }
 0x19f   :  { %v7240_v12 = vpack.c.bf16 %v906_v57, %v904_v23  ;;  %1276 = vmatmul.bf16.gmra.mxu1 %v7184_v63 }
 0x1a0   :  { %1365 = vmatmul.bf16.gmra.mxu2 %v7182_v62 }
 0x1a1   :  { %1454 = vmatmul.bf16.gmra.mxu3 %v7184_v63  ;;  %v7256_v63 = vperm.slane %v978_v59, 1 }
 0x1a3   :  { %v819_v34 = vpop.f32.mrf.mxu2  ;;  %v643_v25 = vpop.f32.mrf.mxu0 }
 0x1a4   :  { %v908_v19 = vpop.f32.mrf.mxu3  ;;  %v732_v27 = vpop.f32.mrf.mxu1 }
 0x1a5   :  { %v909_v47 = vadd.f32 %v908_v19, %v819_v34  ;;  %v733_v7 = vadd.f32 %v732_v27, %v643_v25 }
 0x1a7   :  { %v7246_v21 = vpack.c.bf16 %v733_v7, %v731_v0 }
 0x1ab   :  { %v821_v30 = vpop.f32.mrf.mxu2  ;;  %v1153_v31 = vpop.f32.mrf.mxu0 }
 0x1ac   :  { %v910_v23 = vpop.f32.mrf.mxu3  ;;  %v1242_v33 = vpop.f32.mrf.mxu1  ;;  %v1154_v62 = vadd.f32 %v1153_v31, %v7248_v29 }
 0x1ad   :  { %v911_v46 = vadd.f32 %v910_v23, %v821_v30 }
 0x1ae   :  { %1192 = vmatmul.bf16.gmra.mxu0 %v7190_v51  ;;  %v7259_v0 = vadd.f32 %v1242_v33, %v1154_v62 }
 0x1af   :  { %v7250_v57 = vpack.c.bf16 %v911_v46, %v909_v47  ;;  %1281 = vmatmul.bf16.gmra.mxu1 %v7192_v26 }
 0x1b0   :  { %1370 = vmatmul.bf16.gmra.mxu2 %v7190_v51  ;;  %v1564_v30 = vmul.f32 %v7259_v0, %v7259_v0 }
 0x1b1   :  { %1459 = vmatmul.bf16.gmra.mxu3 %v7192_v26 }
 0x1b3   :  { %v1331_v1 = vpop.f32.mrf.mxu2  ;;  %v1155_v25 = vpop.f32.mrf.mxu0 }
 0x1b4   :  { %v1332_v34 = vadd.f32 %v1331_v1, %v7256_v63  ;;  %v1420_v19 = vpop.f32.mrf.mxu3  ;;  %v1244_v47 = vpop.f32.mrf.mxu1  ;;  %v1156_v7 = vadd.f32 %v1155_v25, %v7248_v29 }
 0x1b6   :  { %v7262_v27 = vadd.f32 %v1420_v19, %v1332_v34  ;;  %v7269_v23 = vadd.f32 %v1244_v47, %v1156_v7 }
 0x1b8   :  { %v1565_v51 = vmul.f32 %v7262_v27, %v7262_v27  ;;  %v1566_v19 = vmul.f32 %v7269_v23, %v7269_v23 }
 0x1ba   :  { %v1628_v59 = vadd.f32 %v1565_v51, %v1564_v30 }
 0x1bb   :  { %v1333_v26 = vpop.f32.mrf.mxu2  ;;  %v1158_v33 = vpop.f32.mrf.mxu0 }
 0x1bc   :  { %v1334_v31 = vadd.f32 %v1333_v26, %v7256_v63  ;;  %v1422_v46 = vpop.f32.mrf.mxu3  ;;  %1629 = vadd.xlane.f32.xlu0 %v1628_v59  ;;  %v1247_v62 = vpop.f32.mrf.mxu1  ;;  %v1159_v34 = vadd.f32 %v1158_v33, %v7248_v29 }
 0x1be   :  { %v7272_v1 = vadd.f32 %v1422_v46, %v1334_v31  ;;  %1197 = vmatmul.bf16.gmra.mxu0 %v7198_v13  ;;  %v7283_v30 = vadd.f32 %v1247_v62, %v1159_v34 }
 0x1bf   :  { %1286 = vmatmul.bf16.gmra.mxu1 %v7200_v53 }
 0x1c0   :  { %1375 = vmatmul.bf16.gmra.mxu2 %v7198_v13  ;;  %v1567_v25 = vmul.f32 %v7272_v1, %v7272_v1  ;;  %v1568_v33 = vmul.f32 %v7283_v30, %v7283_v30 }
 0x1c1   :  { %1464 = vmatmul.bf16.gmra.mxu3 %v7200_v53 }
 0x1c2   :  { %v1631_v47 = vadd.f32 %v1567_v25, %v1566_v19 }
 0x1c3   :  { %v1336_v7 = vpop.f32.mrf.mxu2  ;;  %v1160_v26 = vpop.f32.mrf.mxu0 }
 0x1c4   :  { %v1337_v51 = vadd.f32 %v1336_v7, %v7256_v63  ;;  %v1425_v59 = vpop.f32.mrf.mxu3  ;;  %1632 = vadd.xlane.f32.xlu0 %v1631_v47  ;;  %v1249_v31 = vpop.f32.mrf.mxu1  ;;  %v1161_v13 = vadd.f32 %v1160_v26, %v7248_v29 }
 0x1c6   :  { %v7286_v46 = vadd.f32 %v1425_v59, %v1337_v51  ;;  %v7293_v62 = vadd.f32 %v1249_v31, %v1161_v13 }
 0x1c8   :  { %v1569_v53 = vmul.f32 %v7286_v46, %v7286_v46  ;;  %v1570_v26 = vmul.f32 %v7293_v62, %v7293_v62 }
 0x1ca   :  { %v1634_v19 = vadd.f32 %v1569_v53, %v1568_v33 }
 0x1cb   :  { %v1338_v25 = vpop.f32.mrf.mxu2  ;;  %v1163_v47 = vpop.f32.mrf.mxu0 }
 0x1cc   :  { %v1339_v34 = vadd.f32 %v1338_v25, %v7256_v63  ;;  %v1427_v7 = vpop.f32.mrf.mxu3  ;;  %1635 = vadd.xlane.f32.xlu1 %v1634_v19  ;;  %v1252_v17 = vpop.f32.mrf.mxu1  ;;  %v1164_v59 = vadd.f32 %v1163_v47, %v7248_v29 }
 0x1ce   :  { %v7296_v51 = vadd.f32 %v1427_v7, %v1339_v34  ;;  %1202 = vmatmul.bf16.gmra.mxu0 %v7206_v50  ;;  %v7307_v53 = vadd.f32 %v1252_v17, %v1164_v59 }
 0x1cf   :  { %1291 = vmatmul.bf16.gmra.mxu1 %v7208_v52 }
 0x1d0   :  { %1380 = vmatmul.bf16.gmra.mxu2 %v7206_v50  ;;  %v1571_v31 = vmul.f32 %v7296_v51, %v7296_v51  ;;  %v1572_v58 = vmul.f32 %v7307_v53, %v7307_v53 }
 0x1d1   :  { %1469 = vmatmul.bf16.gmra.mxu3 %v7208_v52 }
 0x1d2   :  { %v1637_v13 = vadd.f32 %v1571_v31, %v1570_v26 }
 0x1d3   :  { %v1341_v33 = vpop.f32.mrf.mxu2  ;;  %v1165_v34 = vpop.f32.mrf.mxu0 }
 0x1d4   :  { %v1342_v19 = vadd.f32 %v1341_v33, %v7256_v63  ;;  %v1430_v25 = vpop.f32.mrf.mxu3  ;;  %1638 = vadd.xlane.f32.xlu1 %v1637_v13  ;;  %v1254_v7 = vpop.f32.mrf.mxu1  ;;  %v1166_v50 = vadd.f32 %v1165_v34, %v7248_v29 }
 0x1d6   :  { %v7310_v47 = vadd.f32 %v1430_v25, %v1342_v19  ;;  %v7317_v17 = vadd.f32 %v1254_v7, %v1166_v50 }
 0x1d8   :  { %v1573_v52 = vmul.f32 %v7310_v47, %v7310_v47 }
 0x1da   :  { %v1640_v26 = vadd.f32 %v1573_v52, %v1572_v58  ;;  %v1574_v58 = vmul.f32 %v7317_v17, %v7317_v17 }
 0x1db   :  { %v1343_v31 = vpop.f32.mrf.mxu2  ;;  %v1168_v13 = vpop.f32.mrf.mxu0 }
 0x1dc   :  { %v1344_v59 = vadd.f32 %v1343_v31, %v7256_v63  ;;  %v1432_v33 = vpop.f32.mrf.mxu3  ;;  %1641 = vadd.xlane.f32.xlu2 %v1640_v26  ;;  %v1257_v11 = vpop.f32.mrf.mxu1  ;;  %v1169_v25 = vadd.f32 %v1168_v13, %v7248_v29 }
 0x1de   :  { %v7320_v19 = vadd.f32 %v1432_v33, %v1344_v59  ;;  %1207 = vmatmul.bf16.gmra.mxu0 %v7214_v16  ;;  %v7331_v52 = vadd.f32 %v1257_v11, %v1169_v25 }
 0x1df   :  { %1296 = vmatmul.bf16.gmra.mxu1 %v7216_v41 }
 0x1e0   :  { %1385 = vmatmul.bf16.gmra.mxu2 %v7214_v16  ;;  %v1575_v34 = vmul.f32 %v7320_v19, %v7320_v19  ;;  %v1576_v16 = vmul.f32 %v7331_v52, %v7331_v52 }
 0x1e1   :  { %1474 = vmatmul.bf16.gmra.mxu3 %v7216_v41 }
 0x1e2   :  { %v1643_v7 = vadd.f32 %v1575_v34, %v1574_v58 }
 0x1e3   :  { %v1346_v50 = vpop.f32.mrf.mxu2  ;;  %v1170_v59 = vpop.f32.mrf.mxu0 }
 0x1e4   :  { %v1347_v26 = vadd.f32 %v1346_v50, %v7256_v63  ;;  %v1435_v31 = vpop.f32.mrf.mxu3  ;;  %1644 = vadd.xlane.f32.xlu2 %v1643_v7  ;;  %v1259_v33 = vpop.f32.mrf.mxu1  ;;  %v1171_v41 = vadd.f32 %v1170_v59, %v7248_v29 }
 0x1e6   :  { %v7334_v13 = vadd.f32 %v1435_v31, %v1347_v26  ;;  %v7341_v11 = vadd.f32 %v1259_v33, %v1171_v41 }
 0x1e8   :  { %v1577_v35 = vmul.f32 %v7334_v13, %v7334_v13 }
 0x1ea   :  { %v1646_v58 = vadd.f32 %v1577_v35, %v1576_v16  ;;  %v1578_v35 = vmul.f32 %v7341_v11, %v7341_v11 }
 0x1eb   :  { %v1348_v34 = vpop.f32.mrf.mxu2  ;;  %v1173_v7 = vpop.f32.mrf.mxu0 }
 0x1ec   :  { %v1349_v25 = vadd.f32 %v1348_v34, %v7256_v63  ;;  %v1437_v50 = vpop.f32.mrf.mxu3  ;;  %1647 = vadd.xlane.f32.xlu0 %v1646_v58  ;;  %v1262_v10 = vpop.f32.mrf.mxu1  ;;  %v1174_v31 = vadd.f32 %v1173_v7, %v7248_v29 }
 0x1ee   :  { %v7344_v26 = vadd.f32 %v1437_v50, %v1349_v25  ;;  %1212 = vmatmul.bf16.gmra.mxu0 %v7222_v45  ;;  %v7355_v41 = vadd.f32 %v1262_v10, %v1174_v31 }
 0x1ef   :  { %1301 = vmatmul.bf16.gmra.mxu1 %v7224_v6 }
 0x1f0   :  { %1390 = vmatmul.bf16.gmra.mxu2 %v7222_v45  ;;  %v1579_v59 = vmul.f32 %v7344_v26, %v7344_v26  ;;  %v1580_v45 = vmul.f32 %v7355_v41, %v7355_v41 }
 0x1f1   :  { %1479 = vmatmul.bf16.gmra.mxu3 %v7224_v6 }
 0x1f2   :  { %v1649_v33 = vadd.f32 %v1579_v59, %v1578_v35 }
 0x1f3   :  { %v1351_v16 = vpop.f32.mrf.mxu2  ;;  %v1175_v25 = vpop.f32.mrf.mxu0 }
 0x1f4   :  { %v1352_v58 = vadd.f32 %v1351_v16, %v7256_v63  ;;  %v1440_v34 = vpop.f32.mrf.mxu3  ;;  %1650 = vadd.xlane.f32.xlu1 %v1649_v33  ;;  %v1264_v50 = vpop.f32.mrf.mxu1  ;;  %v1176_v6 = vadd.f32 %v1175_v25, %v7248_v29 }
 0x1f6   :  { %v7358_v7 = vadd.f32 %v1440_v34, %v1352_v58  ;;  %v7365_v10 = vadd.f32 %v1264_v50, %v1176_v6 }
 0x1f8   :  { %v1581_v44 = vmul.f32 %v7358_v7, %v7358_v7 }
 0x1fa   :  { %v1652_v35 = vadd.f32 %v1581_v44, %v1580_v45  ;;  %v1582_v44 = vmul.f32 %v7365_v10, %v7365_v10 }
 0x1fb   :  { %v1353_v59 = vpop.f32.mrf.mxu2  ;;  %v1178_v33 = vpop.f32.mrf.mxu0 }
 0x1fc   :  { %v1354_v31 = vadd.f32 %v1353_v59, %v7256_v63  ;;  %v1442_v16 = vpop.f32.mrf.mxu3  ;;  %1653 = vadd.xlane.f32.xlu2 %v1652_v35  ;;  %v1267_v22 = vpop.f32.mrf.mxu1  ;;  %v1179_v34 = vadd.f32 %v1178_v33, %v7248_v29 }
 0x1fe   :  { %v7368_v58 = vadd.f32 %v1442_v16, %v1354_v31  ;;  %1217 = vmatmul.bf16.gmra.mxu0 %v7230_v18  ;;  %v7379_v6 = vadd.f32 %v1267_v22, %v1179_v34 }
 0x1ff   :  { %1306 = vmatmul.bf16.gmra.mxu1 %v7232_v28 }
 0x200   :  { %1395 = vmatmul.bf16.gmra.mxu2 %v7230_v18  ;;  %v1583_v25 = vmul.f32 %v7368_v58, %v7368_v58  ;;  %v1584_v18 = vmul.f32 %v7379_v6, %v7379_v6 }
 0x201   :  { %1484 = vmatmul.bf16.gmra.mxu3 %v7232_v28 }
 0x202   :  { %v1655_v50 = vadd.f32 %v1583_v25, %v1582_v44 }
 0x203   :  { %v1356_v45 = vpop.f32.mrf.mxu2  ;;  %v1180_v31 = vpop.f32.mrf.mxu0 }
 0x204   :  { %v1357_v35 = vadd.f32 %v1356_v45, %v7256_v63  ;;  %v1445_v59 = vpop.f32.mrf.mxu3  ;;  %1656 = vadd.xlane.f32.xlu0 %v1655_v50  ;;  %v1269_v16 = vpop.f32.mrf.mxu1  ;;  %v1181_v28 = vadd.f32 %v1180_v31, %v7248_v29 }
 0x206   :  { %v7382_v33 = vadd.f32 %v1445_v59, %v1357_v35  ;;  %v7389_v22 = vadd.f32 %v1269_v16, %v1181_v28 }
 0x208   :  { %v1585_v40 = vmul.f32 %v7382_v33, %v7382_v33 }
 0x20a   :  { %v1658_v44 = vadd.f32 %v1585_v40, %v1584_v18  ;;  %v1586_v40 = vmul.f32 %v7389_v22, %v7389_v22 }
 0x20b   :  { %v1358_v25 = vpop.f32.mrf.mxu2  ;;  %v1183_v50 = vpop.f32.mrf.mxu0 }
 0x20c   :  { %v1359_v34 = vadd.f32 %v1358_v25, %v7256_v63  ;;  %v1447_v45 = vpop.f32.mrf.mxu3  ;;  %1659 = vadd.xlane.f32.xlu1 %v1658_v44  ;;  %v1272_v15 = vpop.f32.mrf.mxu1  ;;  %v1184_v59 = vadd.f32 %v1183_v50, %v7248_v29 }
 0x20e   :  { %v7392_v35 = vadd.f32 %v1447_v45, %v1359_v34  ;;  %1222 = vmatmul.bf16.gmra.mxu0 %v7238_v38  ;;  %v7403_v28 = vadd.f32 %v1272_v15, %v1184_v59 }
 0x20f   :  { %1311 = vmatmul.bf16.gmra.mxu1 %v7240_v12 }
 0x210   :  { %1400 = vmatmul.bf16.gmra.mxu2 %v7238_v38  ;;  %v1587_v31 = vmul.f32 %v7392_v35, %v7392_v35  ;;  %v1588_v38 = vmul.f32 %v7403_v28, %v7403_v28 }
 0x211   :  { %1489 = vmatmul.bf16.gmra.mxu3 %v7240_v12 }
 0x212   :  { %v1661_v16 = vadd.f32 %v1587_v31, %v1586_v40 }
 0x213   :  { %v1361_v18 = vpop.f32.mrf.mxu2  ;;  %v1185_v34 = vpop.f32.mrf.mxu0 }
 0x214   :  { %v1362_v44 = vadd.f32 %v1361_v18, %v7256_v63  ;;  %v1450_v25 = vpop.f32.mrf.mxu3  ;;  %1662 = vadd.xlane.f32.xlu2 %v1661_v16  ;;  %v1274_v45 = vpop.f32.mrf.mxu1  ;;  %v1186_v12 = vadd.f32 %v1185_v34, %v7248_v29 }
 0x216   :  { %v7406_v50 = vadd.f32 %v1450_v25, %v1362_v44  ;;  %v7413_v15 = vadd.f32 %v1274_v45, %v1186_v12 }
 0x218   :  { %v1589_v24 = vmul.f32 %v7406_v50, %v7406_v50 }
 0x21a   :  { %v1664_v40 = vadd.f32 %v1589_v24, %v1588_v38  ;;  %v1590_v24 = vmul.f32 %v7413_v15, %v7413_v15 }
 0x21b   :  { %v1363_v31 = vpop.f32.mrf.mxu2  ;;  %v1188_v16 = vpop.f32.mrf.mxu0 }
 0x21c   :  { %v1364_v59 = vadd.f32 %v1363_v31, %v7256_v63  ;;  %v1452_v18 = vpop.f32.mrf.mxu3  ;;  %1665 = vadd.xlane.f32.xlu0 %v1664_v40  ;;  %v1277_v9 = vpop.f32.mrf.mxu1  ;;  %v1189_v25 = vadd.f32 %v1188_v16, %v7248_v29 }
 0x21e   :  { %v7416_v44 = vadd.f32 %v1452_v18, %v1364_v59  ;;  %1227 = vmatmul.bf16.gmra.mxu0 %v7246_v21  ;;  %v7427_v12 = vadd.f32 %v1277_v9, %v1189_v25 }
 0x21f   :  { %1316 = vmatmul.bf16.gmra.mxu1 %v7250_v57 }
 0x220   :  { %1405 = vmatmul.bf16.gmra.mxu2 %v7246_v21  ;;  %v1591_v34 = vmul.f32 %v7416_v44, %v7416_v44  ;;  %v1592_v21 = vmul.f32 %v7427_v12, %v7427_v12 }
 0x221   :  { %1494 = vmatmul.bf16.gmra.mxu3 %v7250_v57 }
 0x222   :  { %v1667_v45 = vadd.f32 %v1591_v34, %v1590_v24 }
 0x223   :  { %v1366_v38 = vpop.f32.mrf.mxu2  ;;  %v1190_v59 = vpop.f32.mrf.mxu0 }
 0x224   :  { %v1367_v40 = vadd.f32 %v1366_v38, %v7256_v63  ;;  %v1455_v31 = vpop.f32.mrf.mxu3  ;;  %1668 = vadd.xlane.f32.xlu1 %v1667_v45  ;;  %v1279_v18 = vpop.f32.mrf.mxu1  ;;  %v1191_v57 = vadd.f32 %v1190_v59, %v7248_v29 }
 0x226   :  { %v7430_v16 = vadd.f32 %v1455_v31, %v1367_v40  ;;  %v7437_v9 = vadd.f32 %v1279_v18, %v1191_v57 }
 0x228   :  { %v1593_v56 = vmul.f32 %v7430_v16, %v7430_v16  ;;  %v1594_v4 = vmul.f32 %v7437_v9, %v7437_v9 }
 0x22a   :  { %v1670_v24 = vadd.f32 %v1593_v56, %v1592_v21 }
 0x22b   :  { %v1368_v34 = vpop.f32.mrf.mxu2  ;;  %v1193_v45 = vpop.f32.mrf.mxu0 }
 0x22c   :  { %v1369_v25 = vadd.f32 %v1368_v34, %v7256_v63  ;;  %v1457_v38 = vpop.f32.mrf.mxu3  ;;  %1671 = vadd.xlane.f32.xlu2 %v1670_v24  ;;  %v1282_v3 = vpop.f32.mrf.mxu1  ;;  %v1194_v31 = vadd.f32 %v1193_v45, %v7248_v29 }
 0x22e   :  { %v7440_v40 = vadd.f32 %v1457_v38, %v1369_v25  ;;  %v7447_v18 = vadd.f32 %v1282_v3, %v1194_v31 }
 0x230   :  { %v1595_v59 = vmul.f32 %v7440_v40, %v7440_v40  ;;  %v1596_v38 = vmul.f32 %v7447_v18, %v7447_v18 }
 0x232   :  { %v1673_v56 = vadd.f32 %v1595_v59, %v1594_v4 }
 0x233   :  { %v1371_v21 = vpop.f32.mrf.mxu2  ;;  %v1195_v24 = vpop.f32.mrf.mxu0 }
 0x234   :  { %v1372_v57 = vadd.f32 %v1371_v21, %v7256_v63  ;;  %v1460_v34 = vpop.f32.mrf.mxu3  ;;  %1674 = vadd.xlane.f32.xlu0 %v1673_v56  ;;  %v1284_v61 = vpop.f32.mrf.mxu1  ;;  %v1196_v32 = vadd.f32 %v1195_v24, %v7248_v29 }
 0x236   :  { %v7450_v25 = vadd.f32 %v1460_v34, %v1372_v57  ;;  %v7457_v3 = vadd.f32 %v1284_v61, %v1196_v32 }
 0x238   :  { %v1597_v45 = vmul.f32 %v7450_v25, %v7450_v25  ;;  %v1598_v5 = vmul.f32 %v7457_v3, %v7457_v3 }
 0x23a   :  { %v1676_v4 = vadd.f32 %v1597_v45, %v1596_v38 }
 0x23b   :  { %v1373_v59 = vpop.f32.mrf.mxu2  ;;  %v1198_v56 = vpop.f32.mrf.mxu0 }
 0x23c   :  { %v1374_v31 = vadd.f32 %v1373_v59, %v7256_v63  ;;  %v1462_v21 = vpop.f32.mrf.mxu3  ;;  %1677 = vadd.xlane.f32.xlu1 %v1676_v4  ;;  %v1287_v55 = vpop.f32.mrf.mxu1  ;;  %v1199_v34 = vadd.f32 %v1198_v56, %v7248_v29 }
 0x23e   :  { %v7460_v57 = vadd.f32 %v1462_v21, %v1374_v31  ;;  %v7467_v61 = vadd.f32 %v1287_v55, %v1199_v34 }
 0x240   :  { %11345 = vst [vmem:[#allocation40_spill] sm:$0xff] %v7460_v57  ;;  %v1599_v24 = vmul.f32 %v7460_v57, %v7460_v57  ;;  %v1600_v21 = vmul.f32 %v7467_v61, %v7467_v61 }
 0x241   :  { %11346 = vst [vmem:[#allocation41_spill] sm:$0xff] %v7467_v61 }
 0x242   :  { %v1679_v38 = vadd.f32 %v1599_v24, %v1598_v5 }
 0x243   :  { %v1376_v45 = vpop.f32.mrf.mxu2  ;;  %v1200_v4 = vpop.f32.mrf.mxu0 }
 0x244   :  { %v1377_v32 = vadd.f32 %v1376_v45, %v7256_v63  ;;  %v1465_v59 = vpop.f32.mrf.mxu3  ;;  %1680 = vadd.xlane.f32.xlu2 %v1679_v38  ;;  %v1289_v49 = vpop.f32.mrf.mxu1  ;;  %v1201_v39 = vadd.f32 %v1200_v4, %v7248_v29 }
 0x246   :  { %v7470_v31 = vadd.f32 %v1465_v59, %v1377_v32  ;;  %v7478_v43 = vadd.f32 %v1289_v49, %v1201_v39 }
 0x248   :  { %11347 = vst [vmem:[#allocation42_spill] sm:$0xff] %v7470_v31  ;;  %v1601_v56 = vmul.f32 %v7470_v31, %v7470_v31  ;;  %v1602_v20 = vmul.f32 %v7478_v43, %v7478_v43 }
 0x249   :  { %11348 = vst [vmem:[#allocation43_spill] sm:$0xff] %v7478_v43  ;;  %v7004_v43 = vmov 0.0  }
 0x24a   :  { %v1682_v5 = vadd.f32 %v1601_v56, %v1600_v21 }
 0x24b   :  { %v1378_v24 = vpop.f32.mrf.mxu2  ;;  %v1203_v45 = vpop.f32.mrf.mxu0 }
 0x24c   :  { %v1379_v55 = vadd.f32 %v1378_v24, %v7256_v63  ;;  %v1467_v34 = vpop.f32.mrf.mxu3  ;;  %1683 = vadd.xlane.f32.xlu0 %v1682_v5  ;;  %v1292_v38 = vpop.f32.mrf.mxu1  ;;  %v1204_v59 = vadd.f32 %v1203_v45, %v7248_v29 }
 0x24e   :  { %v7480_v32 = vadd.f32 %v1467_v34, %v1379_v55  ;;  %v7488_v14 = vadd.f32 %v1292_v38, %v1204_v59 }
 0x250   :  { %11349 = vst [vmem:[#allocation44_spill] sm:$0xff] %v7480_v32  ;;  %v1603_v4 = vmul.f32 %v7480_v32, %v7480_v32  ;;  %v1604_v55 = vmul.f32 %v7488_v14, %v7488_v14 }
 0x251   :  { %11350 = vst [vmem:[#allocation45_spill] sm:$0xff] %v7488_v14 }
 0x252   :  { %v1685_v37 = vadd.f32 %v1603_v4, %v1602_v20 }
 0x253   :  { %v1381_v21 = vpop.f32.mrf.mxu2  ;;  %v1205_v5 = vpop.f32.mrf.mxu0 }
 0x254   :  { %v1382_v56 = vadd.f32 %v1381_v21, %v7256_v63  ;;  %v1470_v24 = vpop.f32.mrf.mxu3  ;;  %v1294_v49 = vpop.f32.mrf.mxu1  ;;  %1686 = vadd.xlane.f32.xlu1 %v1685_v37  ;;  %v1206_v45 = vadd.f32 %v1205_v5, %v7248_v29 }
 0x256   :  { %v7490_v39 = vadd.f32 %v1470_v24, %v1382_v56  ;;  %v7498_v59 = vadd.f32 %v1294_v49, %v1206_v45 }
 0x258   :  { %11351 = vst [vmem:[#allocation46_spill] sm:$0xff] %v7490_v39  ;;  %v1605_v34 = vmul.f32 %v7490_v39, %v7490_v39  ;;  %v1606_v24 = vmul.f32 %v7498_v59, %v7498_v59 }
 0x259   :  { %11352 = vst [vmem:[#allocation47_spill] sm:$0xff] %v7498_v59 }
 0x25a   :  { %v1688_v2 = vadd.f32 %v1605_v34, %v1604_v55 }
 0x25b   :  { %v1383_v8 = vpop.f32.mrf.mxu2  ;;  %v1208_v4 = vpop.f32.mrf.mxu0 }
 0x25c   :  { %v1384_v21 = vadd.f32 %v1383_v8, %v7256_v63  ;;  %v1472_v20 = vpop.f32.mrf.mxu3  ;;  %1689 = vadd.xlane.f32.xlu2 %v1688_v2  ;;  %v1297_v38 = vpop.f32.mrf.mxu1  ;;  %v1209_v56 = vadd.f32 %v1208_v4, %v7248_v29 }
 0x25e   :  { %v7500_v37 = vadd.f32 %v1472_v20, %v1384_v21  ;;  %v7508_v2 = vadd.f32 %v1297_v38, %v1209_v56 }
 0x260   :  { %11353 = vst [vmem:[#allocation48_spill] sm:$0xff] %v7500_v37  ;;  %v1607_v5 = vmul.f32 %v7500_v37, %v7500_v37  ;;  %v1608_v21 = vmul.f32 %v7508_v2, %v7508_v2 }
 0x261   :  { %11354 = vst [vmem:[#allocation49_spill] sm:$0xff] %v7508_v2 }
 0x262   :  { %v1691_v34 = vadd.f32 %v1607_v5, %v1606_v24 }
 0x263   :  { %v1386_v60 = vpop.f32.mrf.mxu2  ;;  %v1210_v54 = vpop.f32.mrf.mxu0 }
 0x264   :  { %v1387_v55 = vadd.f32 %v1386_v60, %v7256_v63  ;;  %v1475_v8 = vpop.f32.mrf.mxu3  ;;  %v1299_v49 = vpop.f32.mrf.mxu1  ;;  %1692 = vadd.xlane.f32.xlu0 %v1691_v34  ;;  %v1211_v4 = vadd.f32 %v1210_v54, %v7248_v29 }
 0x266   :  { %v7510_v45 = vadd.f32 %v1475_v8, %v1387_v55  ;;  %v7518_v56 = vadd.f32 %v1299_v49, %v1211_v4 }
 0x268   :  { %11355 = vst [vmem:[#allocation50_spill] sm:$0xff] %v7510_v45  ;;  %v1609_v20 = vmul.f32 %v7510_v45, %v7510_v45  ;;  %v1610_v34 = vmul.f32 %v7518_v56, %v7518_v56 }
 0x269   :  { %11356 = vst [vmem:[#allocation51_spill] sm:$0xff] %v7518_v56 }
 0x26a   :  { %v1694_v42 = vadd.f32 %v1609_v20, %v1608_v21 }
 0x26b   :  { %v1388_v48 = vpop.f32.mrf.mxu2  ;;  %v1213_v5 = vpop.f32.mrf.mxu0 }
 0x26c   :  { %v1389_v60 = vadd.f32 %v1388_v48, %v7256_v63  ;;  %v1477_v24 = vpop.f32.mrf.mxu3  ;;  %1695 = vadd.xlane.f32.xlu1 %v1694_v42  ;;  %v1302_v38 = vpop.f32.mrf.mxu1  ;;  %v1214_v8 = vadd.f32 %v1213_v5, %v7248_v29 }
 0x26e   :  { %v7520_v55 = vadd.f32 %v1477_v24, %v1389_v60  ;;  %v7528_v42 = vadd.f32 %v1302_v38, %v1214_v8 }
 0x270   :  { %11357 = vst [vmem:[#allocation52_spill] sm:$0xff] %v7520_v55  ;;  %v1611_v54 = vmul.f32 %v7520_v55, %v7520_v55  ;;  %v1612_v60 = vmul.f32 %v7528_v42, %v7528_v42 }
 0x271   :  { %11358 = vst [vmem:[#allocation53_spill] sm:$0xff] %v7528_v42 }
 0x272   :  { %v1697_v20 = vadd.f32 %v1611_v54, %v1610_v34 }
 0x273   :  { %v1391_v36 = vpop.f32.mrf.mxu2  ;;  %v1215_v45 = vpop.f32.mrf.mxu0 }
 0x274   :  { %v1392_v21 = vadd.f32 %v1391_v36, %v7256_v63  ;;  %v1480_v48 = vpop.f32.mrf.mxu3  ;;  %v1304_v49 = vpop.f32.mrf.mxu1  ;;  %1698 = vadd.xlane.f32.xlu2 %v1697_v20  ;;  %v1216_v5 = vadd.f32 %v1215_v45, %v7248_v29 }
 0x276   :  { %v7530_v4 = vadd.f32 %v1480_v48, %v1392_v21  ;;  %v7538_v8 = vadd.f32 %v1304_v49, %v1216_v5 }
 0x278   :  { %11359 = vst [vmem:[#allocation54_spill] sm:$0xff] %v7530_v4  ;;  %v1613_v24 = vmul.f32 %v7530_v4, %v7530_v4  ;;  %v1614_v20 = vmul.f32 %v7538_v8, %v7538_v8 }
 0x279   :  { %11360 = vst [vmem:[#allocation55_spill] sm:$0xff] %v7538_v8 }
 0x27a   :  { %v1700_v56 = vadd.f32 %v1613_v24, %v1612_v60 }
 0x27b   :  { %v1393_v55 = vpop.f32.mrf.mxu2  ;;  %v1218_v54 = vpop.f32.mrf.mxu0 }
 0x27c   :  { %v1394_v36 = vadd.f32 %v1393_v55, %v7256_v63  ;;  %v1482_v34 = vpop.f32.mrf.mxu3  ;;  %1701 = vadd.xlane.f32.xlu0 %v1700_v56  ;;  %v1307_v38 = vpop.f32.mrf.mxu1  ;;  %v1219_v48 = vadd.f32 %v1218_v54, %v7248_v29 }
 0x27e   :  { %v7540_v21 = vadd.f32 %v1482_v34, %v1394_v36  ;;  %v7548_v56 = vadd.f32 %v1307_v38, %v1219_v48  ;;  %v1630_v38 = vpop.xlane.xlu0 %1629 }
 0x280   :  { %11361 = vst [vmem:[#allocation56_spill] sm:$0xff] %v7540_v21  ;;  %v1615_v45 = vmul.f32 %v7540_v21, %v7540_v21  ;;  %v1616_v36 = vmul.f32 %v7548_v56, %v7548_v56 }
 0x281   :  { %11362 = vst [vmem:[#allocation57_spill] sm:$0xff] %v7548_v56 }
 0x282   :  { %v1703_v24 = vadd.f32 %v1615_v45, %v1614_v20 }
 0x283   :  { %v1396_v4 = vpop.f32.mrf.mxu2  ;;  %v1220_v42 = vpop.f32.mrf.mxu0 }
 0x284   :  { %v1397_v60 = vadd.f32 %v1396_v4, %v7256_v63  ;;  %v1485_v55 = vpop.f32.mrf.mxu3  ;;  %v1309_v49 = vpop.f32.mrf.mxu1  ;;  %1704 = vadd.xlane.f32.xlu1 %v1703_v24  ;;  %v1221_v54 = vadd.f32 %v1220_v42, %v7248_v29 }
 0x286   :  { %v7550_v5 = vadd.f32 %v1485_v55, %v1397_v60  ;;  %v7558_v24 = vadd.f32 %v1309_v49, %v1221_v54  ;;  %v1633_v54 = vpop.xlane.xlu0 %1632 }
 0x288   :  { %11363 = vst [vmem:[#allocation58_spill] sm:$0xff] %v7550_v5  ;;  %v1617_v34 = vmul.f32 %v7550_v5, %v7550_v5  ;;  %v1618_v5 = vmul.f32 %v7558_v24, %v7558_v24 }
 0x289   :  { %11364 = vst [vmem:[#allocation59_spill] sm:$0xff] %v7558_v24 }
 0x28a   :  { %v1706_v8 = vadd.f32 %v1617_v34, %v1616_v36 }
 0x28b   :  { %v1398_v21 = vpop.f32.mrf.mxu2  ;;  %v1223_v45 = vpop.f32.mrf.mxu0 }
 0x28c   :  { %v1399_v4 = vadd.f32 %v1398_v21, %v7256_v63  ;;  %v1487_v20 = vpop.f32.mrf.mxu3  ;;  %1707 = vadd.xlane.f32.xlu2 %v1706_v8  ;;  %v1312_v48 = vpop.f32.mrf.mxu1  ;;  %v1224_v55 = vadd.f32 %v1223_v45, %v7248_v29  ;;  %v7572_v45 = vmax.f32 %v1630_v38, 1e-24  ;;  %v11205_v38 = vlaneseq }
 0x28e   :  { %v7560_v60 = vadd.f32 %v1487_v20, %v1399_v4  ;;  %v7568_v8 = vadd.f32 %v1312_v48, %v1224_v55  ;;  %v1636_v4 = vpop.xlane.xlu1 %1635  ;;  %6810 = vrsqrt.f32 %v7572_v45  ;;  %vm1762_vm2 = vweird.f32 %v7572_v45 }
 0x290   :  { %11365 = vst [vmem:[#allocation60_spill] sm:$0xff] %v7560_v60  ;;  %v1619_v42 = vmul.f32 %v7560_v60, %v7560_v60  ;;  %v1620_v24 = vmul.f32 %v7568_v8, %v7568_v8 }
 0x291   :  { %11366 = vst [vmem:[#allocation61_spill] sm:$0xff] %v7568_v8 }
 0x292   :  { %v1709_v56 = vadd.f32 %v1619_v42, %v1618_v5 }
 0x293   :  { %v1401_v36 = vpop.f32.mrf.mxu2  ;;  %v1225_v2 = vpop.f32.mrf.mxu0 }
 0x294   :  { %v1402_v21 = vadd.f32 %v1401_v36, %v7256_v63  ;;  %v1490_v34 = vpop.f32.mrf.mxu3  ;;  %1710 = vadd.xlane.f32.xlu0 %v1709_v56  ;;  %v1314_v49 = vpop.f32.mrf.mxu1  ;;  %v7578_v36 = vmax.f32 %v1633_v54, 1e-24  ;;  %v1226_v5 = vadd.f32 %v1225_v2, %v7248_v29 }
 0x295   :  { %v7596_v59 = vpop.eup %6810 }
 0x296   :  { %v7570_v20 = vadd.f32 %v1490_v34, %v1402_v21  ;;  %6812 = vrsqrt.f32 %v7578_v36  ;;  %v7584_v21 = vadd.f32 %v1314_v49, %v1226_v5  ;;  %v7586_v34 = vmax.f32 %v1636_v4, 1e-24  ;;  %v1639_v8 = vpop.xlane.xlu1 %1638 }
 0x297   :  { %v7601_v5 = vmax.f32 %v1639_v8, 1e-24  ;;  %vm1763_vm1 = vweird.f32 %v7596_v59  ;;  %vm1772_vm5 = vweird.f32 %v7578_v36 }
 0x298   :  { %11367 = vst [vmem:[#allocation62_spill] sm:$0xff] %v7570_v20  ;;  %v1621_v60 = vmul.f32 %v7570_v20, %v7570_v20  ;;  %v1642_v20 = vpop.xlane.xlu2 %1641  ;;  %6814 = vrsqrt.f32 %v7586_v34  ;;  %vm1764_vm4 = vmor %vm1762_vm2, %vm1763_vm1  ;;  %vm1782_vm8 = vweird.f32 %v7586_v34 }
 0x299   :  { %11368 = vst [vmem:[#allocation63_spill] sm:$0xff] %v7584_v21  ;;  %6816 = vrsqrt.f32 %v7601_v5  ;;  %vm1792_vm11 = vweird.f32 %v7601_v5 }
 0x29a   :  { %v1712_v55 = vadd.f32 %v1621_v60, %v1620_v24  ;;  %v76_v60 = vshrl.u32 %v11205_v38, 7 }
 0x29b   :  { %v1403_v48 = vpop.f32.mrf.mxu2  ;;  %v1228_v37 = vpop.f32.mrf.mxu0 }
 0x29c   :  { %v1404_v56 = vadd.f32 %v1403_v48, %v7256_v63  ;;  %v1492_v42 = vpop.f32.mrf.mxu3  ;;  %1713 = vadd.xlane.f32.xlu1 %v1712_v55  ;;  %v1317_v2 = vpop.f32.mrf.mxu1  ;;  %v1229_v24 = vadd.f32 %v1228_v37, %v7248_v29  ;;  %v1622_v48 = vmul.f32 %v7584_v21, %v7584_v21  ;;  %v107_v21 = vadd.s32 248, %v76_v60 }
 0x29d   :  { %v7599_v4 = vpop.eup %6812 }
 0x29e   :  { %v7588_v54 = vadd.f32 %v1492_v42, %v1404_v56  ;;  %v7604_v39 = vadd.f32 %v1317_v2, %v1229_v24  ;;  %v1767_v14 = vmul.f32 %v7599_v4, %v7578_v36  ;;  %vm139_vm0 = vcmp.lt.s32.totalorder %v107_v21, 250 }
 0x29f   :  { %vm1773_vm3 = vweird.f32 %v7599_v4 }
 0x2a0   :  { %11369 = vst [vmem:[#allocation64_spill] sm:$0xff] %v7588_v54  ;;  %v1623_v55 = vmul.f32 %v7588_v54, %v7588_v54  ;;  %v1757_v54 = vmul.f32 %v7596_v59, %v7572_v45  ;;  %v1624_v2 = vmul.f32 %v7604_v39, %v7604_v39  ;;  %vm1774_vm6 = vmor %vm1772_vm5, %vm1773_vm3 }
 0x2a1   :  { %11370 = vst [vmem:[#allocation65_spill] sm:$0xff] %v7604_v39  ;;  %v7627_v39 = vsel %vm139_vm0, 1.0, %v7004_v43 }
 0x2a2   :  { %v1715_v42 = vadd.f32 %v1623_v55, %v1622_v48  ;;  %v7616_v48 = vpop.eup %6814  ;;  %v1758_v60 = vmul.f32 %v7596_v59, %v1757_v54  ;;  %v1645_v55 = vpop.xlane.xlu2 %1644  ;;  %11372 = vst [vmem:[#allocation67_spill] sm:$0xff] %v7627_v39 }
 0x2a3   :  { %v1406_v49 = vpop.f32.mrf.mxu2  ;;  %v1230_v38 = vpop.f32.mrf.mxu0  ;;  %v7630_v21 = vmax.f32 %v1645_v55, 1e-24  ;;  %vm1783_vm7 = vweird.f32 %v7616_v48 }
 0x2a4   :  { %v1407_v56 = vadd.f32 %v1406_v49, %v7256_v63  ;;  %v1495_v37 = vpop.f32.mrf.mxu3  ;;  %1716 = vadd.xlane.f32.xlu2 %v1715_v42  ;;  %v1231_v8 = vadd.f32 %v1230_v38, %v7248_v29  ;;  %v7614_v49 = vmax.f32 %v1642_v20, 1e-24  ;;  %v1777_v20 = vmul.f32 %v7616_v48, %v7586_v34  ;;  %v7632_v54 = vpop.eup %6816  ;;  %vm1784_vm9 = vmor %vm1782_vm8, %vm1783_vm7 }
 0x2a5   :  { %v1759_v31 = vmul.f32 0.5, %v1758_v60  ;;  %v1787_v43 = vmul.f32 %v7632_v54, %v7601_v5  ;;  %vm1793_vm10 = vweird.f32 %v7632_v54  ;;  %vm1812_vm1 = vweird.f32 %v7630_v21 }
 0x2a6   :  { %v7610_v32 = vadd.f32 %v1495_v37, %v1407_v56  ;;  %v1319_v56 = vpop.f32.mrf.mxu1  ;;  %v1768_v37 = vmul.f32 %v7599_v4, %v1767_v14  ;;  %6818 = vrsqrt.f32 %v7614_v49  ;;  %v1648_v14 = vpop.xlane.xlu0 %1647  ;;  %v1778_v61 = vmul.f32 %v7616_v48, %v1777_v20  ;;  %vm1794_vm12 = vmor %vm1792_vm11, %vm1793_vm10 }
 0x2a7   :  { %v1320_v29 = vadd.f32 %v1319_v56, %v1231_v8  ;;  %6820 = vrsqrt.f32 %v7630_v21  ;;  %v1788_v20 = vmul.f32 %v7632_v54, %v1787_v43  ;;  %vm1802_vm14 = vweird.f32 %v7614_v49 }
 0x2a8   :  { %11371 = vst [vmem:[#allocation66_spill] sm:$0xff] %v7610_v32  ;;  %v1625_v24 = vmul.f32 %v7610_v32, %v7610_v32  ;;  %v1769_v56 = vmul.f32 0.5, %v1768_v37 }
 0x2aa   :  { %v1718_v42 = vadd.f32 %v1625_v24, %v1624_v2  ;;  %v7635_v2 = vmul.f32 %v7627_v39, %v1320_v29  ;;  %v1770_v37 = vsub.f32 1.5, %v1769_v56 }
 0x2ab   :  { %v1408_v38 = vpop.f32.mrf.mxu2 }
 0x2ac   :  { %v1409_v32 = vadd.f32 %v1408_v38, %v7256_v63  ;;  %1719 = vadd.xlane.f32.xlu0 %v1718_v42  ;;  %v1497_v8 = vpop.f32.mrf.mxu3  ;;  %11373 = vst [vmem:[#allocation68_spill] sm:$0xff] %v7635_v2  ;;  %v7641_v63 = vmax.f32 %v1648_v14, 1e-24  ;;  %v7646_v60 = vpop.eup %6818  ;;  %v1760_v38 = vsub.f32 1.5, %v1759_v31  ;;  %v1626_v29 = vmul.f32 %v7635_v2, %v7635_v2 }
 0x2ad   :  { %v1779_v42 = vmul.f32 0.5, %v1778_v61  ;;  %v1797_v14 = vmul.f32 %v7646_v60, %v7614_v49  ;;  %v7658_v31 = vpop.eup %6820  ;;  %v1771_v61 = vmul.f32 %v7599_v4, %v1770_v37  ;;  %v1789_v2 = vmul.f32 0.5, %v1788_v20 }
 0x2ae   :  { %v1498_v24 = vadd.f32 %v1497_v8, %v1409_v32  ;;  %6822 = vrsqrt.f32 %v7641_v63  ;;  %v1651_v8 = vpop.xlane.xlu1 %1650  ;;  %v1807_v45 = vmul.f32 %v7658_v31, %v7630_v21  ;;  %v1657_v37 = vpop.xlane.xlu0 %1656  ;;  %vm1803_vm13 = vweird.f32 %v7646_v60 }
 0x2af   :  { %v1780_v56 = vsub.f32 1.5, %v1779_v42  ;;  %v7663_v43 = vmax.f32 %v1651_v8, 1e-24  ;;  %v1775_v42 = vsel %vm1774_vm6, %v7599_v4, %v1771_v61  ;;  %v7686_v4 = vmax.f32 %v1657_v37, 1e-24  ;;  %vm1804_vm15 = vmor %vm1802_vm14, %vm1803_vm13 }
 0x2b0   :  { %v7644_v55 = vmul.f32 %v7627_v39, %v1498_v24  ;;  %v1761_v39 = vmul.f32 %v7596_v59, %v1760_v38  ;;  %v7692_v61 = vmul.f32 %v1775_v42, %v7269_v23  ;;  %v7695_v34 = vmul.f32 %v1775_v42, %v7272_v1 }
 0x2b1   :  { %v1781_v8 = vmul.f32 %v7616_v48, %v1780_v56  ;;  %6824 = vrsqrt.f32 %v7663_v43  ;;  %vm1813_vm0 = vweird.f32 %v7658_v31  ;;  %vm1832_vm6 = vweird.f32 %v7663_v43 }
 0x2b2   :  { %11374 = vst [vmem:[#allocation69_spill] sm:$0xff] %v7644_v55  ;;  %v1627_v32 = vmul.f32 %v7644_v55, %v7644_v55  ;;  %v1654_v55 = vpop.xlane.xlu2 %1653  ;;  %v1765_v38 = vsel %vm1764_vm4, %v7596_v59, %v1761_v39  ;;  %v1790_v59 = vsub.f32 1.5, %v1789_v2  ;;  %vm1814_vm2 = vmor %vm1812_vm1, %vm1813_vm0  ;;  %vm1822_vm4 = vweird.f32 %v7641_v63 }
 0x2b3   :  { %v7679_v39 = vmul.f32 %v1765_v38, %v7259_v0  ;;  %11377 = vst [vmem:[#allocation72_spill] sm:$0xff] %v7692_v61  ;;  %v1785_v2 = vsel %vm1784_vm9, %v7616_v48, %v1781_v8  ;;  %v2218_v48 = vmul.f32 %v7692_v61, %v7692_v61  ;;  %vm1852_vm13 = vweird.f32 %v7686_v4 }
 0x2b4   :  { %v1721_v24 = vadd.f32 %v1627_v32, %v1626_v29  ;;  %v1798_v29 = vmul.f32 %v7646_v60, %v1797_v14  ;;  %v7670_v32 = vmax.f32 %v1654_v55, 1e-24  ;;  %v1808_v55 = vmul.f32 %v7658_v31, %v1807_v45  ;;  %11378 = vst [vmem:[#allocation73_spill] sm:$0xff] %v7695_v34 }
 0x2b5   :  { %11375 = vst [vmem:[#allocation70_spill] sm:$0xff] %v7679_v39  ;;  %v7689_v14 = vmul.f32 %v1765_v38, %v7262_v27  ;;  %v2216_v56 = vmul.f32 %v7679_v39, %v7679_v39  ;;  %v7713_v42 = vmul.f32 %v1785_v2, %v7283_v30 }
 0x2b6   :  { %1722 = vadd.xlane.f32.xlu1 %v1721_v24  ;;  %v7672_v24 = vpop.eup %6822  ;;  %v1799_v36 = vmul.f32 0.5, %v1798_v29  ;;  %6826 = vrsqrt.f32 %v7670_v32  ;;  %v1660_v0 = vpop.xlane.xlu1 %1659  ;;  %v1791_v29 = vmul.f32 %v7632_v54, %v1790_v59  ;;  %v1809_v38 = vmul.f32 0.5, %v1808_v55 }
 0x2b7   :  { %v1817_v20 = vmul.f32 %v7672_v24, %v7641_v63  ;;  %11376 = vst [vmem:[#allocation71_spill] sm:$0xff] %v7689_v14  ;;  %v7702_v27 = vpop.eup %6824  ;;  %6828 = vrsqrt.f32 %v7686_v4  ;;  %v7706_v37 = vmax.f32 %v1660_v0, 1e-24  ;;  %v2217_v1 = vmul.f32 %v7689_v14, %v7689_v14 }
 0x2b8   :  { %v1800_v45 = vsub.f32 1.5, %v1799_v36  ;;  %11379 = vst [vmem:[#allocation74_spill] sm:$0xff] %v7713_v42  ;;  %v2140_v36 = vadd.f32 %v7692_v61, %v7679_v39  ;;  %v2177_v55 = vadd.f32 %v7695_v34, %v7689_v14  ;;  %v7725_v0 = vmul.f32 %v1785_v2, %v7286_v46 }
 0x2b9   :  { %v1818_v23 = vmul.f32 %v7672_v24, %v1817_v20  ;;  %v2219_v20 = vmul.f32 %v7695_v34, %v7695_v34  ;;  %v1795_v30 = vsel %vm1794_vm12, %v7632_v54, %v1791_v29  ;;  %v1827_v61 = vmul.f32 %v7702_v27, %v7663_v43 }
 0x2ba   :  { %v1663_v8 = vpop.xlane.xlu2 %1662  ;;  %11380 = vst [vmem:[#allocation75_spill] sm:$0xff] %v7725_v0  ;;  %v1801_v5 = vmul.f32 %v7646_v60, %v1800_v45  ;;  %v1810_v39 = vsub.f32 1.5, %v1809_v38  ;;  %6830 = vrsqrt.f32 %v7706_v37  ;;  %v2280_v46 = vadd.f32 %v2218_v48, %v2216_v56  ;;  %v1666_v56 = vpop.xlane.xlu0 %1665 }
 0x2bb   :  { %v1819_v14 = vmul.f32 0.5, %v1818_v23  ;;  %v7735_v34 = vmax.f32 %v1663_v8, 1e-24  ;;  %v2220_v2 = vmul.f32 %v7713_v42, %v7713_v42  ;;  %v2317_v45 = vadd.f32 %v2219_v20, %v2217_v1 }
 0x2bc   :  { %v7716_v59 = vpop.eup %6826  ;;  %v2141_v57 = vadd.f32 %v2140_v36, %v7713_v42  ;;  %v2178_v38 = vadd.f32 %v2177_v55, %v7725_v0  ;;  %v7747_v23 = vmul.f32 %v1795_v30, %v7293_v62  ;;  %v2221_v49 = vmul.f32 %v7725_v0, %v7725_v0 }
 0x2bd   :  { %v1837_v54 = vmul.f32 %v7716_v59, %v7670_v32  ;;  %v7742_v29 = vpop.eup %6828  ;;  %v7754_v48 = vmul.f32 %v1795_v30, %v7296_v51  ;;  %v1805_v8 = vsel %vm1804_vm15, %v7646_v60, %v1801_v5  ;;  %v1828_v1 = vmul.f32 %v7702_v27, %v1827_v61 }
 0x2be   :  { %11381 = vst [vmem:[#allocation76_spill] sm:$0xff] %v7747_v23  ;;  %v1811_v36 = vmul.f32 %v7658_v31, %v1810_v39  ;;  %v1820_v62 = vsub.f32 1.5, %v1819_v14  ;;  %6832 = vrsqrt.f32 %v7735_v34  ;;  %v2281_v55 = vadd.f32 %v2280_v46, %v2220_v2 }
 0x2bf   :  { %11382 = vst [vmem:[#allocation77_spill] sm:$0xff] %v7754_v48  ;;  %v1838_v20 = vmul.f32 %v7716_v59, %v1837_v54  ;;  %v1847_v0 = vmul.f32 %v7742_v29, %v7686_v4  ;;  %v7764_v42 = vmax.f32 %v1666_v56, 1e-24  ;;  %v2222_v60 = vmul.f32 %v7747_v23, %v7747_v23 }
 0x2c0   :  { %v7766_v51 = vpop.eup %6830  ;;  %v7771_v39 = vmul.f32 %v1805_v8, %v7307_v53  ;;  %v7774_v14 = vmul.f32 %v1805_v8, %v7310_v47  ;;  %v2318_v61 = vadd.f32 %v2317_v45, %v2221_v49  ;;  %v2142_v30 = vadd.f32 %v2141_v57, %v7747_v23  ;;  %v1669_v45 = vpop.xlane.xlu1 %1668 }
 0x2c1   :  { %v2223_v5 = vmul.f32 %v7754_v48, %v7754_v48  ;;  %v1829_v46 = vmul.f32 0.5, %v1828_v1  ;;  %v2179_v2 = vadd.f32 %v2178_v38, %v7754_v48  ;;  %v1815_v53 = vsel %vm1814_vm2, %v7658_v31, %v1811_v36 }
 0x2c2   :  { %v1821_v54 = vmul.f32 %v7672_v24, %v1820_v62  ;;  %vm1823_vm3 = vweird.f32 %v7672_v24  ;;  %v1839_v47 = vmul.f32 0.5, %v1838_v20  ;;  %v1848_v21 = vmul.f32 %v7742_v29, %v1847_v0  ;;  %v1672_v62 = vpop.xlane.xlu2 %1671 }
 0x2c3   :  { %v1857_v57 = vmul.f32 %v7766_v51, %v7706_v37  ;;  %6834 = vrsqrt.f32 %v7764_v42  ;;  %v2282_v49 = vadd.f32 %v2281_v55, %v2222_v60  ;;  %v2224_v38 = vmul.f32 %v7771_v39, %v7771_v39  ;;  %vm1824_vm5 = vmor %vm1822_vm4, %vm1823_vm3 }
 0x2c4   :  { %v7790_v56 = vpop.eup %6832  ;;  %v2225_v31 = vmul.f32 %v7774_v14, %v7774_v14  ;;  %v2319_v8 = vadd.f32 %v2318_v61, %v2223_v5  ;;  %v2143_v0 = vadd.f32 %v2142_v30, %v7771_v39  ;;  %v7799_v1 = vmul.f32 %v1815_v53, %v7317_v17 }
 0x2c5   :  { %v1830_v36 = vsub.f32 1.5, %v1829_v46  ;;  %v2180_v20 = vadd.f32 %v2179_v2, %v7774_v14  ;;  %v7803_v55 = vmul.f32 %v1815_v53, %v7320_v19  ;;  %v1825_v60 = vsel %vm1824_vm5, %v7672_v24, %v1821_v54  ;;  %v1675_v54 = vpop.xlane.xlu0 %1674 }
 0x2c6   :  { %v7806_v48 = vmax.f32 %v1669_v45, 1e-24  ;;  %v1840_v23 = vsub.f32 1.5, %v1839_v47  ;;  %v1849_v63 = vmul.f32 0.5, %v1848_v21  ;;  %v1858_v61 = vmul.f32 %v7766_v51, %v1857_v57 }
 0x2c7   :  { %v1867_v17 = vmul.f32 %v7790_v56, %v7735_v34  ;;  %v2283_v30 = vadd.f32 %v2282_v49, %v2224_v38  ;;  %v2320_v5 = vadd.f32 %v2319_v8, %v2225_v31  ;;  %v7812_v46 = vmax.f32 %v1672_v62, 1e-24 }
 0x2c8   :  { %v2226_v19 = vmul.f32 %v7799_v1, %v7799_v1  ;;  %v7819_v24 = vmul.f32 %v1825_v60, %v7331_v52  ;;  %v1831_v53 = vmul.f32 %v7702_v27, %v1830_v36  ;;  %vm1833_vm7 = vweird.f32 %v7702_v27 }
 0x2c9   :  { %v7814_v2 = vpop.eup %6834  ;;  %v2227_v47 = vmul.f32 %v7803_v55, %v7803_v55  ;;  %v7826_v21 = vmul.f32 %v1825_v60, %v7334_v13  ;;  %vm1843_vm8 = vweird.f32 %v7716_v59  ;;  %6836 = vrsqrt.f32 %v7806_v48  ;;  %vm1834_vm9 = vmor %vm1832_vm6, %vm1833_vm7 }
 0x2ca   :  { %11383 = vst [vmem:[#allocation78_spill] sm:$0xff] %v7819_v24  ;;  %v1841_v57 = vmul.f32 %v7716_v59, %v1840_v23  ;;  %v1850_v45 = vsub.f32 1.5, %v1849_v63  ;;  %v1859_v52 = vmul.f32 0.5, %v1858_v61  ;;  %v1868_v49 = vmul.f32 %v7790_v56, %v1867_v17  ;;  %v1678_v17 = vpop.xlane.xlu1 %1677 }
 0x2cb   :  { %11384 = vst [vmem:[#allocation79_spill] sm:$0xff] %v7826_v21  ;;  %v2144_v38 = vadd.f32 %v2143_v0, %v7799_v1  ;;  %v1877_v31 = vmul.f32 %v7814_v2, %v7764_v42  ;;  %6838 = vrsqrt.f32 %v7812_v46  ;;  %v7838_v13 = vmax.f32 %v1675_v54, 1e-24 }
 0x2cc   :  { %v2181_v8 = vadd.f32 %v2180_v20, %v7803_v55  ;;  %v2228_v23 = vmul.f32 %v7819_v24, %v7819_v24  ;;  %v1835_v36 = vsel %vm1834_vm9, %v7702_v27, %v1831_v53  ;;  %vm1842_vm10 = vweird.f32 %v7670_v32 }
 0x2cd   :  { %v2284_v0 = vadd.f32 %v2283_v30, %v2226_v19  ;;  %v2321_v62 = vadd.f32 %v2320_v5, %v2227_v47  ;;  %v2229_v43 = vmul.f32 %v7826_v21, %v7826_v21  ;;  %vm1844_vm11 = vmor %vm1842_vm10, %vm1843_vm8  ;;  %vm1853_vm12 = vweird.f32 %v7742_v29 }
 0x2ce   :  { %v1845_v60 = vsel %vm1844_vm11, %v7716_v59, %v1841_v57  ;;  %v1851_v20 = vmul.f32 %v7742_v29, %v1850_v45  ;;  %v1860_v63 = vsub.f32 1.5, %v1859_v52  ;;  %v1869_v61 = vmul.f32 0.5, %v1868_v49  ;;  %vm1854_vm14 = vmor %vm1852_vm13, %vm1853_vm12 }
 0x2cf   :  { %v7852_v27 = vpop.eup %6836  ;;  %v7855_v32 = vmul.f32 %v1835_v36, %v7341_v11  ;;  %v7858_v30 = vmul.f32 %v1835_v36, %v7344_v26  ;;  %v1878_v5 = vmul.f32 %v7814_v2, %v1877_v31  ;;  %6840 = vrsqrt.f32 %v7838_v13 }
 0x2d0   :  { %v2145_v19 = vadd.f32 %v2144_v38, %v7819_v24  ;;  %v2182_v59 = vadd.f32 %v2181_v8, %v7826_v21  ;;  %v2285_v53 = vadd.f32 %v2284_v0, %v2228_v23  ;;  %v2322_v47 = vadd.f32 %v2321_v62, %v2229_v43  ;;  %v1681_v8 = vpop.xlane.xlu2 %1680 }
 0x2d1   :  { %11385 = vst [vmem:[#allocation80_spill] sm:$0xff] %v7855_v32  ;;  %v7865_v54 = vpop.eup %6838  ;;  %v7868_v11 = vmul.f32 %v1845_v60, %v7355_v41  ;;  %vm1863_vm15 = vweird.f32 %v7766_v51  ;;  %v7873_v26 = vmax.f32 %v1678_v17, 1e-24  ;;  %v1855_v57 = vsel %vm1854_vm14, %v7742_v29, %v1851_v20 }
 0x2d2   :  { %11386 = vst [vmem:[#allocation81_spill] sm:$0xff] %v7858_v30  ;;  %v1861_v45 = vmul.f32 %v7766_v51, %v1860_v63  ;;  %v1870_v52 = vsub.f32 1.5, %v1869_v61  ;;  %v1887_v4 = vmul.f32 %v7852_v27, %v7806_v48  ;;  %v2146_v49 = vadd.f32 %v2145_v19, %v7855_v32 }
 0x2d3   :  { %v2230_v41 = vmul.f32 %v7855_v32, %v7855_v32  ;;  %v2231_v38 = vmul.f32 %v7858_v30, %v7858_v30  ;;  %v1879_v31 = vmul.f32 0.5, %v1878_v5  ;;  %v2183_v23 = vadd.f32 %v2182_v59, %v7858_v30  ;;  %v1684_v59 = vpop.xlane.xlu0 %1683 }
 0x2d4   :  { %v7886_v29 = vmul.f32 %v1845_v60, %v7358_v7  ;;  %vm1862_vm0 = vweird.f32 %v7706_v37  ;;  %v1897_v36 = vmul.f32 %v7865_v54, %v7812_v46  ;;  %v2232_v62 = vmul.f32 %v7868_v11, %v7868_v11 }
 0x2d5   :  { %v7891_v0 = vpop.eup %6840  ;;  %v7896_v43 = vmul.f32 %v1855_v57, %v7365_v10  ;;  %vm1864_vm1 = vmor %vm1862_vm0, %vm1863_vm15  ;;  %vm1873_vm2 = vweird.f32 %v7790_v56  ;;  %6842 = vrsqrt.f32 %v7873_v26  ;;  %v1871_v37 = vmul.f32 %v7790_v56, %v1870_v52 }
 0x2d6   :  { %v1865_v7 = vsel %vm1864_vm1, %v7766_v51, %v1861_v45  ;;  %v1888_v60 = vmul.f32 %v7852_v27, %v1887_v4  ;;  %v7905_v20 = vmax.f32 %v1681_v8, 1e-24  ;;  %v2286_v63 = vadd.f32 %v2285_v53, %v2230_v41 }
 0x2d7   :  { %v2323_v61 = vadd.f32 %v2322_v47, %v2231_v38  ;;  %v7908_v10 = vmul.f32 %v1855_v57, %v7368_v58  ;;  %v1880_v17 = vsub.f32 1.5, %v1879_v31  ;;  %v2233_v5 = vmul.f32 %v7886_v29, %v7886_v29 }
 0x2d8   :  { %vm1872_vm3 = vweird.f32 %v7735_v34  ;;  %v1898_v19 = vmul.f32 %v7865_v54, %v1897_v36  ;;  %v1907_v51 = vmul.f32 %v7891_v0, %v7838_v13  ;;  %v2147_v45 = vadd.f32 %v2146_v49, %v7868_v11 }
 0x2d9   :  { %v2184_v53 = vadd.f32 %v2183_v23, %v7886_v29  ;;  %v2287_v47 = vadd.f32 %v2286_v63, %v2232_v62  ;;  %v7919_v58 = vmul.f32 %v1865_v7, %v7379_v6  ;;  %vm1874_vm4 = vmor %vm1872_vm3, %vm1873_vm2  ;;  %v2234_v34 = vmul.f32 %v7896_v43, %v7896_v43  ;;  %v1687_v23 = vpop.xlane.xlu1 %1686 }
 0x2da   :  { %v1875_v57 = vsel %vm1874_vm4, %v7790_v56, %v1871_v37  ;;  %v1889_v52 = vmul.f32 0.5, %v1888_v60  ;;  %6844 = vrsqrt.f32 %v7905_v20  ;;  %v2235_v49 = vmul.f32 %v7908_v10, %v7908_v10 }
 0x2db   :  { %v7927_v4 = vpop.eup %6842  ;;  %v1881_v41 = vmul.f32 %v7814_v2, %v1880_v17  ;;  %vm1883_vm5 = vweird.f32 %v7814_v2  ;;  %v7933_v6 = vmax.f32 %v1684_v59, 1e-24  ;;  %v2324_v38 = vadd.f32 %v2323_v61, %v2233_v5 }
 0x2dc   :  { %v7936_v31 = vmul.f32 %v1865_v7, %v7382_v33  ;;  %v1899_v8 = vmul.f32 0.5, %v1898_v19  ;;  %v1908_v56 = vmul.f32 %v7891_v0, %v1907_v51  ;;  %v2148_v36 = vadd.f32 %v2147_v45, %v7896_v43  ;;  %v1690_v45 = vpop.xlane.xlu2 %1689 }
 0x2dd   :  { %v2236_v62 = vmul.f32 %v7919_v58, %v7919_v58  ;;  %v7943_v37 = vmul.f32 %v1875_v57, %v7389_v22  ;;  %vm1882_vm6 = vweird.f32 %v7764_v42  ;;  %v2185_v60 = vadd.f32 %v2184_v53, %v7908_v10 }
 0x2de   :  { %v2288_v63 = vadd.f32 %v2287_v47, %v2234_v34  ;;  %vm1884_vm7 = vmor %vm1882_vm6, %vm1883_vm5  ;;  %v1890_v33 = vsub.f32 1.5, %v1889_v52  ;;  %v1917_v7 = vmul.f32 %v7927_v4, %v7873_v26  ;;  %v2325_v61 = vadd.f32 %v2324_v38, %v2235_v49 }
 0x2df   :  { %v1885_v17 = vsel %vm1884_vm7, %v7814_v2, %v1881_v41  ;;  %6846 = vrsqrt.f32 %v7933_v6  ;;  %v7951_v5 = vmax.f32 %v1687_v23, 1e-24  ;;  %v2149_v22 = vadd.f32 %v2148_v36, %v7919_v58 }
 0x2e0   :  { %v7953_v19 = vpop.eup %6844  ;;  %v2186_v42 = vadd.f32 %v2185_v60, %v7936_v31  ;;  %v1900_v51 = vsub.f32 1.5, %v1899_v8  ;;  %v1909_v59 = vmul.f32 0.5, %v1908_v56  ;;  %v2237_v53 = vmul.f32 %v7936_v31, %v7936_v31 }
 0x2e1   :  { %v2289_v47 = vadd.f32 %v2288_v63, %v2236_v62  ;;  %v7960_v34 = vmul.f32 %v1875_v57, %v7392_v35  ;;  %v2238_v2 = vmul.f32 %v7943_v37, %v7943_v37  ;;  %v7965_v52 = vmul.f32 %v1885_v17, %v7403_v28 }
 0x2e2   :  { %v1891_v49 = vmul.f32 %v7852_v27, %v1890_v33  ;;  %vm1893_vm8 = vweird.f32 %v7852_v27  ;;  %v1918_v41 = vmul.f32 %v7927_v4, %v1917_v7  ;;  %v7971_v38 = vmul.f32 %v1885_v17, %v7406_v50  ;;  %v1693_v33 = vpop.xlane.xlu0 %1692 }
 0x2e3   :  { %v1927_v8 = vmul.f32 %v7953_v19, %v7905_v20  ;;  %6848 = vrsqrt.f32 %v7951_v5  ;;  %v7976_v35 = vmax.f32 %v1690_v45, 1e-24  ;;  %vm1892_vm9 = vweird.f32 %v7806_v48 }
 0x2e4   :  { %v1901_v28 = vmul.f32 %v7865_v54, %v1900_v51  ;;  %vm1903_vm10 = vweird.f32 %v7865_v54  ;;  %v1910_v57 = vsub.f32 1.5, %v1909_v59  ;;  %v2326_v23 = vadd.f32 %v2325_v61, %v2237_v53  ;;  %vm1894_vm11 = vmor %vm1892_vm9, %vm1893_vm8 }
 0x2e5   :  { %v7981_v56 = vpop.eup %6846  ;;  %v2150_v50 = vadd.f32 %v2149_v22, %v7943_v37  ;;  %v2187_v36 = vadd.f32 %v2186_v42, %v7960_v34  ;;  %v2239_v62 = vmul.f32 %v7960_v34, %v7960_v34  ;;  %v2290_v60 = vadd.f32 %v2289_v47, %v2238_v2  ;;  %v1696_v47 = vpop.xlane.xlu1 %1695 }
 0x2e6   :  { %v1895_v48 = vsel %vm1894_vm11, %v7852_v27, %v1891_v49  ;;  %vm1902_vm12 = vweird.f32 %v7812_v46  ;;  %v1919_v63 = vmul.f32 0.5, %v1918_v41  ;;  %v2240_v7 = vmul.f32 %v7965_v52, %v7965_v52 }
 0x2e7   :  { %v2241_v61 = vmul.f32 %v7971_v38, %v7971_v38  ;;  %vm1904_vm13 = vmor %vm1902_vm12, %vm1903_vm10  ;;  %v1928_v17 = vmul.f32 %v7953_v19, %v1927_v8  ;;  %6850 = vrsqrt.f32 %v7976_v35  ;;  %v1911_v27 = vmul.f32 %v7891_v0, %v1910_v57 }
 0x2e8   :  { %v1905_v22 = vsel %vm1904_vm13, %v7865_v54, %v1901_v28  ;;  %vm1913_vm14 = vweird.f32 %v7891_v0  ;;  %v1937_v46 = vmul.f32 %v7981_v56, %v7933_v6  ;;  %v2327_v51 = vadd.f32 %v2326_v23, %v2239_v62 }
 0x2e9   :  { %v8004_v42 = vpop.eup %6848  ;;  %v8007_v59 = vmul.f32 %v1895_v48, %v7413_v15  ;;  %v8010_v45 = vmul.f32 %v1895_v48, %v7416_v44  ;;  %v8012_v53 = vmax.f32 %v1693_v33, 1e-24  ;;  %v2151_v54 = vadd.f32 %v2150_v50, %v7965_v52 }
 0x2ea   :  { %v2188_v2 = vadd.f32 %v2187_v36, %v7971_v38  ;;  %vm1912_vm15 = vweird.f32 %v7838_v13  ;;  %v1920_v49 = vsub.f32 1.5, %v1919_v63  ;;  %v2291_v41 = vadd.f32 %v2290_v60, %v2240_v7  ;;  %v1699_v63 = vpop.xlane.xlu2 %1698 }
 0x2eb   :  { %v2328_v8 = vadd.f32 %v2327_v51, %v2241_v61  ;;  %v8018_v28 = vmul.f32 %v1905_v22, %v7427_v12  ;;  %vm1914_vm0 = vmor %vm1912_vm15, %vm1913_vm14  ;;  %v1929_v15 = vmul.f32 0.5, %v1928_v17  ;;  %v1938_v57 = vmul.f32 %v7981_v56, %v1937_v46 }
 0x2ec   :  { %v1915_v44 = vsel %vm1914_vm0, %v7891_v0, %v1911_v27  ;;  %v1947_v23 = vmul.f32 %v8004_v42, %v7951_v5  ;;  %v8026_v50 = vmax.f32 %v1696_v47, 1e-24  ;;  %v2152_v36 = vadd.f32 %v2151_v54, %v8007_v59 }
 0x2ed   :  { %v8028_v13 = vpop.eup %6850  ;;  %v2242_v12 = vmul.f32 %v8007_v59, %v8007_v59  ;;  %v2243_v62 = vmul.f32 %v8010_v45, %v8010_v45  ;;  %6852 = vrsqrt.f32 %v8012_v53  ;;  %v2189_v0 = vadd.f32 %v2188_v2, %v8010_v45 }
 0x2ee   :  { %v8038_v60 = vmul.f32 %v1905_v22, %v7430_v16  ;;  %v1921_v48 = vmul.f32 %v7927_v4, %v1920_v49  ;;  %vm1923_vm1 = vweird.f32 %v7927_v4  ;;  %v2244_v33 = vmul.f32 %v8018_v28, %v8018_v28 }
 0x2ef   :  { %v8045_v7 = vmul.f32 %v1915_v44, %v7437_v9  ;;  %vm1922_vm2 = vweird.f32 %v7873_v26  ;;  %v1930_v61 = vsub.f32 1.5, %v1929_v15  ;;  %v1939_v17 = vmul.f32 0.5, %v1938_v57  ;;  %v1702_v49 = vpop.xlane.xlu0 %1701 }
 0x2f0   :  { %v1948_v27 = vmul.f32 %v8004_v42, %v1947_v23  ;;  %v1957_v16 = vmul.f32 %v8028_v13, %v7976_v35  ;;  %6854 = vrsqrt.f32 %v8026_v50  ;;  %v2292_v22 = vadd.f32 %v2291_v41, %v2242_v12  ;;  %vm1924_vm3 = vmor %vm1922_vm2, %vm1923_vm1 }
 0x2f1   :  { %v2329_v46 = vadd.f32 %v2328_v8, %v2243_v62  ;;  %v2153_v51 = vadd.f32 %v2152_v36, %v8018_v28  ;;  %v8053_v47 = vmax.f32 %v1699_v63, 1e-24  ;;  %v2190_v9 = vadd.f32 %v2189_v0, %v8038_v60 }
 0x2f2   :  { %v2245_v26 = vmul.f32 %v8038_v60, %v8038_v60  ;;  %v8059_v54 = vmul.f32 %v1915_v44, %v7440_v40  ;;  %v1925_v2 = vsel %vm1924_vm3, %v7927_v4, %v1921_v48  ;;  %v2293_v41 = vadd.f32 %v2292_v22, %v2244_v33 }
 0x2f3   :  { %v8062_v15 = vpop.eup %6852  ;;  %v2246_v8 = vmul.f32 %v8045_v7, %v8045_v7  ;;  %v1931_v57 = vmul.f32 %v7953_v19, %v1930_v61  ;;  %vm1933_vm4 = vweird.f32 %v7953_v19  ;;  %vm1932_vm5 = vweird.f32 %v7905_v20 }
 0x2f4   :  { %v1940_v23 = vsub.f32 1.5, %v1939_v17  ;;  %v1949_v36 = vmul.f32 0.5, %v1948_v27  ;;  %v1958_v40 = vmul.f32 %v8028_v13, %v1957_v16  ;;  %v8071_v44 = vmul.f32 %v1925_v2, %v7447_v18  ;;  %vm1934_vm6 = vmor %vm1932_vm5, %vm1933_vm4 }
 0x2f5   :  { %v8074_v4 = vmul.f32 %v1925_v2, %v7450_v25  ;;  %6856 = vrsqrt.f32 %v8053_v47  ;;  %v8077_v12 = vmax.f32 %v1702_v49, 1e-24  ;;  %v2330_v0 = vadd.f32 %v2329_v46, %v2245_v26 }
 0x2f6   :  { %v8079_v62 = vpop.eup %6854  ;;  %v2247_v20 = vmul.f32 %v8059_v54, %v8059_v54  ;;  %v1967_v48 = vmul.f32 %v8062_v15, %v8012_v53  ;;  %v2154_v18 = vadd.f32 %v2153_v51, %v8045_v7  ;;  %v2191_v63 = vadd.f32 %v2190_v9, %v8059_v54 }
 0x2f7   :  { %v2294_v25 = vadd.f32 %v2293_v41, %v2246_v8  ;;  %v1935_v33 = vsel %vm1934_vm6, %v7953_v19, %v1931_v57  ;;  %v1941_v61 = vmul.f32 %v7981_v56, %v1940_v23  ;;  %vm1943_vm7 = vweird.f32 %v7981_v56  ;;  %v1705_v16 = vpop.xlane.xlu1 %1704  ;;  %v11387_v8 = vld [vmem:[#allocation40_spill] sm:$0xff] }
 0x2f8   :  { %v1950_v17 = vsub.f32 1.5, %v1949_v36  ;;  %v1959_v27 = vmul.f32 0.5, %v1958_v40  ;;  %v2248_v22 = vmul.f32 %v8071_v44, %v8071_v44  ;;  %v2249_v46 = vmul.f32 %v8074_v4, %v8074_v4 }
 0x2f9   :  { %v1977_v51 = vmul.f32 %v8079_v62, %v8026_v50  ;;  %6858 = vrsqrt.f32 %v8077_v12  ;;  %v2331_v9 = vadd.f32 %v2330_v0, %v2247_v20  ;;  %v8098_v19 = vmul.f32 %v1935_v33, %v7457_v3 }
 0x2fa   :  { %vm1942_vm8 = vweird.f32 %v7933_v6  ;;  %v1968_v26 = vmul.f32 %v8062_v15, %v1967_v48  ;;  %v2155_v49 = vadd.f32 %v2154_v18, %v8071_v44  ;;  %v2192_v41 = vadd.f32 %v2191_v63, %v8074_v4 }
 0x2fb   :  { %v8102_v2 = vpop.eup %6856  ;;  %v8107_v57 = vmul.f32 %v1935_v33, %v11387_v8  ;;  %vm1944_vm9 = vmor %vm1942_vm8, %vm1943_vm7  ;;  %v8111_v23 = vmax.f32 %v1705_v16, 1e-24  ;;  %v1951_v6 = vmul.f32 %v8004_v42, %v1950_v17  ;;  %vm1953_vm10 = vweird.f32 %v8004_v42 }
 0x2fc   :  { %v1945_v36 = vsel %vm1944_vm9, %v7981_v56, %v1941_v61  ;;  %v1960_v40 = vsub.f32 1.5, %v1959_v27  ;;  %v2295_v0 = vadd.f32 %v2294_v25, %v2248_v22  ;;  %v2332_v20 = vadd.f32 %v2331_v9, %v2249_v46  ;;  %v11389_v9 = vld [vmem:[#allocation42_spill] sm:$0xff] }
 0x2fd   :  { %vm1952_vm11 = vweird.f32 %v7951_v5  ;;  %v1978_v48 = vmul.f32 %v8079_v62, %v1977_v51  ;;  %v2156_v18 = vadd.f32 %v2155_v49, %v8098_v19  ;;  %v1969_v63 = vmul.f32 0.5, %v1968_v26  ;;  %v11388_v5 = vld [vmem:[#allocation41_spill] sm:$0xff] }
 0x2fe   :  { %v1987_v33 = vmul.f32 %v8102_v2, %v8053_v47  ;;  %v2250_v17 = vmul.f32 %v8098_v19, %v8098_v19  ;;  %v2251_v25 = vmul.f32 %v8107_v57, %v8107_v57  ;;  %v8130_v27 = vmul.f32 %v1945_v36, %v11388_v5  ;;  %vm1954_vm12 = vmor %vm1952_vm11, %vm1953_vm10 }
 0x2ff   :  { %v1708_v3 = vpop.xlane.xlu2 %1707  ;;  %v8123_v61 = vpop.eup %6858  ;;  %6860 = vrsqrt.f32 %v8111_v23  ;;  %v2193_v22 = vadd.f32 %v2192_v41, %v8107_v57  ;;  %v1955_v46 = vsel %vm1954_vm12, %v8004_v42, %v1951_v6  ;;  %v1961_v51 = vmul.f32 %v8028_v13, %v1960_v40 }
 0x300   :  { %v8121_v16 = vmax.f32 %v1708_v3, 1e-24  ;;  %vm1963_vm13 = vweird.f32 %v8028_v13  ;;  %v8140_v26 = vmul.f32 %v1945_v36, %v11389_v9  ;;  %vm1962_vm14 = vweird.f32 %v7976_v35  ;;  %v11391_v36 = vld [vmem:[#allocation43_spill] sm:$0xff] }
 0x301   :  { %v1979_v49 = vmul.f32 0.5, %v1978_v48  ;;  %v1970_v3 = vsub.f32 1.5, %v1969_v63  ;;  %v1988_v5 = vmul.f32 %v8102_v2, %v1987_v33  ;;  %v1997_v41 = vmul.f32 %v8123_v61, %v8077_v12  ;;  %vm1964_vm15 = vmor %vm1962_vm14, %vm1963_vm13  ;;  %v11393_v63 = vld [vmem:[#allocation44_spill] sm:$0xff] }
 0x302   :  { %11390 = vst [vmem:[#allocation40_spill] sm:$0xff] %v8140_v26  ;;  %6862 = vrsqrt.f32 %v8121_v16  ;;  %v2296_v42 = vadd.f32 %v2295_v0, %v2250_v17  ;;  %v2333_v6 = vadd.f32 %v2332_v20, %v2251_v25  ;;  %v2252_v40 = vmul.f32 %v8130_v27, %v8130_v27 }
 0x303   :  { %v8152_v9 = vmul.f32 %v1955_v46, %v11391_v36  ;;  %v2157_v48 = vadd.f32 %v2156_v18, %v8130_v27  ;;  %v1965_v33 = vsel %vm1964_vm15, %v8028_v13, %v1961_v51  ;;  %v2194_v0 = vadd.f32 %v2193_v22, %v8140_v26  ;;  %v11395_v36 = vld [vmem:[#allocation45_spill] sm:$0xff] }
 0x304   :  { %v2253_v20 = vmul.f32 %v8140_v26, %v8140_v26  ;;  %v1980_v17 = vsub.f32 1.5, %v1979_v49  ;;  %v1971_v25 = vmul.f32 %v8062_v15, %v1970_v3  ;;  %vm1973_vm0 = vweird.f32 %v8062_v15  ;;  %v11397_v3 = vld [vmem:[#allocation46_spill] sm:$0xff] }
 0x305   :  { %11392 = vst [vmem:[#allocation41_spill] sm:$0xff] %v8152_v9  ;;  %v8161_v21 = vpop.eup %6860  ;;  %v1989_v18 = vmul.f32 0.5, %v1988_v5  ;;  %v2297_v13 = vadd.f32 %v2296_v42, %v2252_v40  ;;  %v2254_v51 = vmul.f32 %v8152_v9, %v8152_v9  ;;  %vm1972_vm1 = vweird.f32 %v8012_v53 }
 0x306   :  { %v2007_v5 = vmul.f32 %v8161_v21, %v8111_v23  ;;  %v2158_v42 = vadd.f32 %v2157_v48, %v8152_v9  ;;  %vm1974_vm2 = vmor %vm1972_vm1, %vm1973_vm0  ;;  %v1981_v40 = vmul.f32 %v8079_v62, %v1980_v17  ;;  %vm1983_vm3 = vweird.f32 %v8079_v62  ;;  %v11404_v9 = vld [vmem:[#allocation51_spill] sm:$0xff] }
 0x307   :  { %v1711_v56 = vpop.xlane.xlu0 %1710  ;;  %v1975_v32 = vsel %vm1974_vm2, %v8062_v15, %v1971_v25  ;;  %v1990_v24 = vsub.f32 1.5, %v1989_v18  ;;  %v2298_v53 = vadd.f32 %v2297_v13, %v2254_v51  ;;  %vm1982_vm4 = vweird.f32 %v8026_v50  ;;  %v11399_v18 = vld [vmem:[#allocation47_spill] sm:$0xff]  ;;  %v11400_v13 = vld [vmem:[#allocation48_spill] sm:$0xff] }
 0x308   :  { %v8143_v8 = vmax.f32 %v1711_v56, 1e-24  ;;  %v8156_v56 = vmul.f32 %v1955_v46, %v11393_v63  ;;  %v1998_v46 = vmul.f32 %v8123_v61, %v1997_v41  ;;  %v8176_v22 = vpop.eup %6862  ;;  %v8181_v63 = vmul.f32 %v1965_v33, %v11397_v3  ;;  %vm1984_vm5 = vmor %vm1982_vm4, %vm1983_vm3 }
 0x309   :  { %v2334_v41 = vadd.f32 %v2333_v6, %v2253_v20  ;;  %v2017_v6 = vmul.f32 %v8176_v22, %v8121_v16  ;;  %v2008_v15 = vmul.f32 %v8161_v21, %v2007_v5  ;;  %v8208_v50 = vmul.f32 %v1975_v32, %v11400_v13 }
 0x30a   :  { %11394 = vst [vmem:[#allocation42_spill] sm:$0xff] %v8156_v56  ;;  %6864 = vrsqrt.f32 %v8143_v8  ;;  %v2255_v49 = vmul.f32 %v8156_v56, %v8156_v56  ;;  %v1985_v51 = vsel %vm1984_vm5, %v8079_v62, %v1981_v40  ;;  %vm1993_vm6 = vweird.f32 %v8102_v2 }
 0x30b   :  { %11398 = vst [vmem:[#allocation44_spill] sm:$0xff] %v8181_v63  ;;  %vm1992_vm7 = vweird.f32 %v8053_v47  ;;  %v2009_v62 = vmul.f32 0.5, %v2008_v15  ;;  %vm2003_vm9 = vweird.f32 %v8123_v61  ;;  %vm2002_vm10 = vweird.f32 %v8077_v12 }
 0x30c   :  { %v2335_v48 = vadd.f32 %v2334_v41, %v2255_v49  ;;  %v1991_v49 = vmul.f32 %v8102_v2, %v1990_v24  ;;  %vm1994_vm8 = vmor %vm1992_vm7, %vm1993_vm6  ;;  %vm2013_vm12 = vweird.f32 %v8161_v21  ;;  %vm2012_vm13 = vweird.f32 %v8111_v23 }
 0x30d   :  { %vm2004_vm11 = vmor %vm2002_vm10, %vm2003_vm9  ;;  %vm2023_vm15 = vweird.f32 %v8176_v22  ;;  %vm2022_vm0 = vweird.f32 %v8121_v16  ;;  %vm2032_vm2 = vweird.f32 %v8143_v8  ;;  %v11409_v16 = vld [vmem:[#allocation55_spill] sm:$0xff] }
 0x30e   :  { %vm2014_vm14 = vmor %vm2012_vm13, %vm2013_vm12 }
 0x30f   :  { %v1714_v35 = vpop.xlane.xlu1 %1713  ;;  %vm2024_vm1 = vmor %vm2022_vm0, %vm2023_vm15 }
 0x310   :  { %v8159_v30 = vmax.f32 %v1714_v35, 1e-24  ;;  %v8173_v35 = vmul.f32 %v1965_v33, %v11395_v36  ;;  %v2195_v36 = vadd.f32 %v2194_v0, %v8156_v56  ;;  %v1999_v33 = vmul.f32 0.5, %v1998_v46  ;;  %v8191_v3 = vpop.eup %6864 }
 0x311   :  { %v2257_v0 = vmul.f32 %v8181_v63, %v8181_v63  ;;  %v8205_v46 = vmul.f32 %v1975_v32, %v11399_v18  ;;  %v2018_v32 = vmul.f32 %v8176_v22, %v2017_v6  ;;  %v11401_v18 = vld [vmem:[#allocation49_spill] sm:$0xff]  ;;  %vm2033_vm3 = vweird.f32 %v8191_v3 }
 0x312   :  { %11396 = vst [vmem:[#allocation43_spill] sm:$0xff] %v8173_v35  ;;  %6866 = vrsqrt.f32 %v8159_v30  ;;  %v2256_v26 = vmul.f32 %v8173_v35, %v8173_v35  ;;  %v2159_v20 = vadd.f32 %v2158_v42, %v8173_v35  ;;  %v2000_v41 = vsub.f32 1.5, %v1999_v33  ;;  %vm2034_vm5 = vmor %vm2032_vm2, %vm2033_vm3 }
 0x313   :  { %v2027_v42 = vmul.f32 %v8191_v3, %v8143_v8  ;;  %v2196_v35 = vadd.f32 %v2195_v36, %v8181_v63  ;;  %v8221_v13 = vmul.f32 %v1985_v51, %v11401_v18  ;;  %v2336_v40 = vadd.f32 %v2335_v48, %v2257_v0  ;;  %v11402_v36 = vld [vmem:[#allocation50_spill] sm:$0xff] }
 0x314   :  { %v2299_v56 = vadd.f32 %v2298_v53, %v2256_v26  ;;  %v2258_v33 = vmul.f32 %v8205_v46, %v8205_v46  ;;  %v2259_v26 = vmul.f32 %v8208_v50, %v8208_v50  ;;  %v8231_v47 = vmul.f32 %v1985_v51, %v11402_v36 }
 0x315   :  { %v1995_v53 = vsel %vm1994_vm8, %v8102_v2, %v1991_v49  ;;  %v2001_v6 = vmul.f32 %v8123_v61, %v2000_v41  ;;  %v2028_v48 = vmul.f32 %v8191_v3, %v2027_v42  ;;  %v2160_v0 = vadd.f32 %v2159_v20, %v8205_v46 }
 0x316   :  { %11403 = vst [vmem:[#allocation45_spill] sm:$0xff] %v8231_v47  ;;  %v2197_v15 = vadd.f32 %v2196_v35, %v8208_v50  ;;  %v2260_v18 = vmul.f32 %v8221_v13, %v8221_v13  ;;  %v2010_v36 = vsub.f32 1.5, %v2009_v62  ;;  %v2300_v41 = vadd.f32 %v2299_v56, %v2258_v33 }
 0x317   :  { %v1717_v17 = vpop.xlane.xlu2 %1716  ;;  %v2337_v63 = vadd.f32 %v2336_v40, %v2259_v26  ;;  %v2161_v42 = vadd.f32 %v2160_v0, %v8221_v13  ;;  %v8249_v20 = vmul.f32 %v1995_v53, %v11404_v9  ;;  %v2261_v35 = vmul.f32 %v8231_v47, %v8231_v47 }
 0x318   :  { %v8202_v25 = vpop.eup %6866  ;;  %v8215_v5 = vmax.f32 %v1717_v17, 1e-24  ;;  %v2019_v17 = vmul.f32 0.5, %v2018_v32  ;;  %v2005_v32 = vsel %vm2004_vm11, %v8123_v61, %v2001_v6  ;;  %v2029_v62 = vmul.f32 0.5, %v2028_v48  ;;  %v11407_v6 = vld [vmem:[#allocation53_spill] sm:$0xff] }
 0x319   :  { %v2037_v24 = vmul.f32 %v8202_v25, %v8159_v30  ;;  %v2198_v56 = vadd.f32 %v2197_v15, %v8231_v47  ;;  %v2301_v26 = vadd.f32 %v2300_v41, %v2260_v18  ;;  %v2011_v0 = vmul.f32 %v8161_v21, %v2010_v36  ;;  %v11408_v15 = vld [vmem:[#allocation54_spill] sm:$0xff] }
 0x31a   :  { %6868 = vrsqrt.f32 %v8215_v5  ;;  %v2020_v9 = vsub.f32 1.5, %v2019_v17  ;;  %v2262_v61 = vmul.f32 %v8249_v20, %v8249_v20  ;;  %v8270_v48 = vmul.f32 %v2005_v32, %v11407_v6 }
 0x31b   :  { %v2038_v2 = vmul.f32 %v8202_v25, %v2037_v24  ;;  %v11405_v24 = vld [vmem:[#allocation52_spill] sm:$0xff]  ;;  %v8273_v47 = vmul.f32 %v2005_v32, %v11408_v15  ;;  %v2338_v17 = vadd.f32 %v2337_v63, %v2261_v35  ;;  %v2030_v18 = vsub.f32 1.5, %v2029_v62 }
 0x31c   :  { %v8261_v40 = vmul.f32 %v1995_v53, %v11405_v24  ;;  %v2162_v24 = vadd.f32 %v2161_v42, %v8249_v20  ;;  %v2021_v41 = vmul.f32 %v8176_v22, %v2020_v9  ;;  %v2302_v23 = vadd.f32 %v2301_v26, %v2262_v61  ;;  %v11410_v15 = vld [vmem:[#allocation56_spill] sm:$0xff] }
 0x31d   :  { %v2264_v35 = vmul.f32 %v8270_v48, %v8270_v48  ;;  %v2265_v62 = vmul.f32 %v8273_v47, %v8273_v47  ;;  %v2031_v6 = vmul.f32 %v8191_v3, %v2030_v18  ;;  %vm2043_vm4 = vweird.f32 %v8202_v25 }
 0x31e   :  { %11406 = vst [vmem:[#allocation46_spill] sm:$0xff] %v8261_v40  ;;  %v2199_v36 = vadd.f32 %v2198_v56, %v8261_v40  ;;  %v2163_v18 = vadd.f32 %v2162_v24, %v8270_v48  ;;  %vm2042_vm6 = vweird.f32 %v8159_v30  ;;  %v11416_v30 = vld [vmem:[#allocation60_spill] sm:$0xff]  ;;  %vm2052_vm9 = vweird.f32 %v8215_v5 }
 0x31f   :  { %v1720_v51 = vpop.xlane.xlu0 %1719  ;;  %vm2044_vm7 = vmor %vm2042_vm6, %vm2043_vm4 }
 0x320   :  { %v8245_v49 = vmax.f32 %v1720_v51, 1e-24  ;;  %v8253_v12 = vpop.eup %6868  ;;  %v2039_v51 = vmul.f32 0.5, %v2038_v2  ;;  %v2263_v2 = vmul.f32 %v8261_v40, %v8261_v40 }
 0x321   :  { %v2047_v33 = vmul.f32 %v8253_v12, %v8215_v5  ;;  %vm2053_vm8 = vweird.f32 %v8253_v12 }
 0x322   :  { %6870 = vrsqrt.f32 %v8245_v49  ;;  %v2040_v63 = vsub.f32 1.5, %v2039_v51  ;;  %v2339_v8 = vadd.f32 %v2338_v17, %v2263_v2  ;;  %vm2054_vm11 = vmor %vm2052_vm9, %vm2053_vm8  ;;  %vm2062_vm12 = vweird.f32 %v8245_v49 }
 0x323   :  { %v2048_v53 = vmul.f32 %v8253_v12, %v2047_v33  ;;  %v2015_v33 = vsel %vm2014_vm14, %v8161_v21, %v2011_v0  ;;  %v2025_v0 = vsel %vm2024_vm1, %v8176_v22, %v2021_v41  ;;  %v11412_v22 = vld [vmem:[#allocation57_spill] sm:$0xff] }
 0x324   :  { %v8299_v26 = vmul.f32 %v2015_v33, %v11409_v16  ;;  %v2041_v40 = vmul.f32 %v8202_v25, %v2040_v63  ;;  %v8312_v41 = vmul.f32 %v2025_v0, %v11412_v22  ;;  %v2303_v63 = vadd.f32 %v2302_v23, %v2264_v35 }
 0x325   :  { %v2049_v42 = vmul.f32 0.5, %v2048_v53  ;;  %v8304_v53 = vmul.f32 %v2015_v33, %v11410_v15  ;;  %v2035_v33 = vsel %vm2034_vm5, %v8191_v3, %v2031_v6  ;;  %v11415_v15 = vld [vmem:[#allocation59_spill] sm:$0xff]  ;;  %vm2389_vm5 = vcmask 1040384  }
 0x326   :  { %v2266_v2 = vmul.f32 %v8299_v26, %v8299_v26  ;;  %v8327_v3 = vmul.f32 %v2035_v33, %v11415_v15  ;;  %v8330_v23 = vmul.f32 %v2035_v33, %v11416_v30 }
 0x327   :  { %v2050_v51 = vsub.f32 1.5, %v2049_v42  ;;  %11411 = vst [vmem:[#allocation47_spill] sm:$0xff] %v8304_v53  ;;  %v11413_v42 = vld [vmem:[#allocation58_spill] sm:$0xff] }
 0x328   :  { %v8283_v32 = vpop.eup %6870  ;;  %11417 = vst [vmem:[#allocation49_spill] sm:$0xff] %v8330_v23  ;;  %v2304_v15 = vadd.f32 %v2303_v63, %v2266_v2  ;;  %v11424_v63 = vld [vmem:[#allocation64_spill] sm:$0xff] }
 0x329   :  { %v2057_v56 = vmul.f32 %v8283_v32, %v8245_v49  ;;  %v1723_v9 = vpop.xlane.xlu1 %1722  ;;  %v2051_v17 = vmul.f32 %v8253_v12, %v2050_v51  ;;  %vm2063_vm10 = vweird.f32 %v8283_v32  ;;  %v2270_v49 = vmul.f32 %v8327_v3, %v8327_v3 }
 0x32a   :  { %v8296_v21 = vmax.f32 %v1723_v9, 1e-24  ;;  %v2200_v9 = vadd.f32 %v2199_v36, %v8273_v47  ;;  %v2340_v36 = vadd.f32 %v2339_v8, %v2265_v62  ;;  %v2268_v62 = vmul.f32 %v8312_v41, %v8312_v41  ;;  %v11420_v8 = vld [vmem:[#allocation62_spill] sm:$0xff]  ;;  %vm2064_vm13 = vmor %vm2062_vm12, %vm2063_vm10 }
 0x32b   :  { %v2058_v61 = vmul.f32 %v8283_v32, %v2057_v56  ;;  %v8315_v56 = vmul.f32 %v2025_v0, %v11413_v42  ;;  %v2045_v0 = vsel %vm2044_vm7, %v8202_v25, %v2041_v40  ;;  %v11418_v40 = vld [vmem:[#allocation61_spill] sm:$0xff]  ;;  %v2055_v5 = vsel %vm2054_vm11, %v8253_v12, %v2051_v17 }
 0x32c   :  { %6872 = vrsqrt.f32 %v8296_v21  ;;  %v8341_v51 = vmul.f32 %v2045_v0, %v11418_v40  ;;  %v2164_v42 = vadd.f32 %v2163_v18, %v8299_v26  ;;  %v2201_v33 = vadd.f32 %v2200_v9, %v8304_v53  ;;  %v11422_v40 = vld [vmem:[#allocation63_spill] sm:$0xff] }
 0x32d   :  { %v2059_v16 = vmul.f32 0.5, %v2058_v61  ;;  %11414 = vst [vmem:[#allocation48_spill] sm:$0xff] %v8315_v56  ;;  %v2267_v61 = vmul.f32 %v8304_v53, %v8304_v53  ;;  %v2269_v6 = vmul.f32 %v8315_v56, %v8315_v56  ;;  %v8360_v9 = vmul.f32 %v2055_v5, %v11422_v40 }
 0x32e   :  { %11419 = vst [vmem:[#allocation50_spill] sm:$0xff] %v8341_v51  ;;  %v2165_v17 = vadd.f32 %v2164_v42, %v8312_v41  ;;  %v2202_v18 = vadd.f32 %v2201_v33, %v8315_v56  ;;  %v2305_v2 = vadd.f32 %v2304_v15, %v2268_v62  ;;  %vm2072_vm15 = vweird.f32 %v8296_v21 }
 0x32f   :  { %v2060_v24 = vsub.f32 1.5, %v2059_v16  ;;  %v8344_v16 = vmul.f32 %v2045_v0, %v11420_v8  ;;  %v2341_v30 = vadd.f32 %v2340_v36, %v2267_v61  ;;  %11423 = vst [vmem:[#allocation52_spill] sm:$0xff] %v8360_v9  ;;  %v8363_v36 = vmul.f32 %v2055_v5, %v11424_v63 }
 0x330   :  { %v2272_v8 = vmul.f32 %v8341_v51, %v8341_v51  ;;  %v2166_v40 = vadd.f32 %v2165_v17, %v8327_v3  ;;  %v2203_v5 = vadd.f32 %v2202_v18, %v8330_v23  ;;  %v2306_v63 = vadd.f32 %v2305_v2, %v2270_v49 }
 0x331   :  { %v2061_v25 = vmul.f32 %v8283_v32, %v2060_v24  ;;  %11421 = vst [vmem:[#allocation51_spill] sm:$0xff] %v8344_v16  ;;  %v2271_v24 = vmul.f32 %v8330_v23, %v8330_v23  ;;  %v2342_v61 = vadd.f32 %v2341_v30, %v2269_v6  ;;  %v2273_v53 = vmul.f32 %v8344_v16, %v8344_v16 }
 0x332   :  { %v6873_v35 = vpop.eup %6872  ;;  %11425 = vst [vmem:[#allocation53_spill] sm:$0xff] %v8363_v36  ;;  %v2274_v6 = vmul.f32 %v8360_v9, %v8360_v9  ;;  %v2275_v15 = vmul.f32 %v8363_v36, %v8363_v36 }
 0x333   :  { %v2067_v22 = vmul.f32 %v6873_v35, %v8296_v21  ;;  %v2065_v0 = vsel %vm2064_vm13, %v8283_v32, %v2061_v25  ;;  %v11426_v32 = vld [vmem:[#allocation65_spill] sm:$0xff]  ;;  %v2343_v62 = vadd.f32 %v2342_v61, %v2271_v24  ;;  %vm2073_vm14 = vweird.f32 %v6873_v35  ;;  %v6722_v21 = vld [vmem:[#allocation2 + $0x274] sm:$0xf0] }
 0x334   :  { %v8370_v25 = vmul.f32 %v2065_v0, %v11426_v32  ;;  %v2167_v32 = vadd.f32 %v2166_v40, %v8341_v51  ;;  %vm2074_vm0 = vmor %vm2072_vm15, %vm2073_vm14  ;;  %v6349_v51 = vld [vmem:[#allocation2 + $0x2f0] sm:$0xf] }
 0x335   :  { %v2068_v12 = vmul.f32 %v6873_v35, %v2067_v22  ;;  %v11428_v22 = vld [vmem:[#allocation66_spill] sm:$0xff] }
 0x336   :  { %11427 = vst [vmem:[#allocation54_spill] sm:$0xff] %v8370_v25  ;;  %v8373_v42 = vmul.f32 %v2065_v0, %v11428_v22  ;;  %v2204_v0 = vadd.f32 %v2203_v5, %v8344_v16  ;;  %v2307_v22 = vadd.f32 %v2306_v63, %v2272_v8  ;;  %v2276_v17 = vmul.f32 %v8370_v25, %v8370_v25  ;;  %v11430_v5 = vld [vmem:[#allocation68_spill] sm:$0xff] }
 0x337   :  { %v2069_v33 = vmul.f32 0.5, %v2068_v12  ;;  %v2344_v12 = vadd.f32 %v2343_v62, %v2273_v53  ;;  %v2168_v18 = vadd.f32 %v2167_v32, %v8360_v9  ;;  %v11432_v62 = vld [vmem:[#allocation69_spill] sm:$0xff] }
 0x338   :  { %11429 = vst [vmem:[#allocation55_spill] sm:$0xff] %v8373_v42  ;;  %v2277_v49 = vmul.f32 %v8373_v42, %v8373_v42  ;;  %v2205_v2 = vadd.f32 %v2204_v0, %v8363_v36  ;;  %v2308_v61 = vadd.f32 %v2307_v22, %v2274_v6  ;;  %v6738_v36 = vld [vmem:[#allocation2 + $0x2f4] sm:$0xf0]  ;;  %v6721_v6 = vld [vmem:[#allocation2 + $0x274] sm:$0xf] }
 0x339   :  { %v2070_v30 = vsub.f32 1.5, %v2069_v33  ;;  %v2345_v33 = vadd.f32 %v2344_v12, %v2275_v15  ;;  %v2169_v8 = vadd.f32 %v2168_v18, %v8370_v25  ;;  %v6287_v15 = vld [vmem:[#allocation2 + $0x278] sm:$0xf0]  ;;  %v6737_v18 = vld [vmem:[#allocation2 + $0x2f4] sm:$0xf] }
 0x33a   :  { %v2206_v53 = vadd.f32 %v2205_v2, %v8373_v42  ;;  %v2309_v32 = vadd.f32 %v2308_v61, %v2276_v17  ;;  %v6351_v2 = vld [vmem:[#allocation2 + $0x2f8] sm:$0xf0]  ;;  %v6290_v17 = vor.u32 %v6721_v6, %v6287_v15  ;;  %v6736_v42 = vld [vmem:[#allocation2 + $0x2e4] sm:$0xf0] }
 0x33b   :  { %v2071_v24 = vmul.f32 %v6873_v35, %v2070_v30  ;;  %v6285_v30 = vld [vmem:[#allocation2 + $0x270] sm:$0xf]  ;;  %v2346_v9 = vadd.f32 %v2345_v33, %v2277_v49  ;;  %v6354_v49 = vor.u32 %v6737_v18, %v6351_v2  ;;  %v6718_v2 = vld [vmem:[#allocation2 + $0x254] sm:$0xf0] }
 0x33c   :  { %v6286_v0 = vor.u32 %v6722_v21, %v6285_v30  ;;  %v6277_v30 = vld [vmem:[#allocation2 + $0x260] sm:$0xf]  ;;  %2951 = vmatpush.bf16.msra.mxu2 %v6290_v17  ;;  %v6269_v18 = vld [vmem:[#allocation2 + $0x250] sm:$0xf]  ;;  %v6734_v17 = vld [vmem:[#allocation2 + $0x2d4] sm:$0xf0] }
 0x33d   :  { %v2075_v40 = vsel %vm2074_vm0, %v6873_v35, %v2071_v24  ;;  %v6341_v21 = vld [vmem:[#allocation2 + $0x2e0] sm:$0xf]  ;;  %3040 = vmatpush.bf16.msra.mxu3 %v6354_v49 }
 0x33e   :  { %v8393_v63 = vmul.f32 %v2075_v40, %v11430_v5  ;;  %v8396_v16 = vmul.f32 %v2075_v40, %v11432_v62  ;;  %2773 = vmatpush.bf16.msra.mxu0 %v6286_v0  ;;  %v6350_v40 = vor.u32 %v6738_v36, %v6349_v51  ;;  %v6279_v51 = vld [vmem:[#allocation2 + $0x268] sm:$0xf0]  ;;  %v6735_v36 = vld [vmem:[#allocation2 + $0x2e4] sm:$0xf]  ;;  %v6342_v0 = vor.u32 %v6736_v42, %v6341_v21  ;;  %v6271_v42 = vld [vmem:[#allocation2 + $0x258] sm:$0xf0] }
 0x340   :  { %11431 = vst [vmem:[#allocation56_spill] sm:$0xff] %v8393_v63  ;;  %v2170_v35 = vadd.f32 %v2169_v8, %v8393_v63  ;;  %v2207_v22 = vadd.f32 %v2206_v53, %v8396_v16  ;;  %v2278_v12 = vmul.f32 %v8393_v63, %v8393_v63  ;;  %v2279_v24 = vmul.f32 %v8396_v16, %v8396_v16  ;;  %v6720_v8 = vld [vmem:[#allocation2 + $0x264] sm:$0xf0]  ;;  %v6719_v63 = vld [vmem:[#allocation2 + $0x264] sm:$0xf] }
 0x341   :  { %11433 = vst [vmem:[#allocation57_spill] sm:$0xff] %v8396_v16  ;;  %2862 = vmatpush.bf16.msra.mxu1 %v6350_v40  ;;  %v6278_v53 = vor.u32 %v6720_v8, %v6277_v30  ;;  %v6282_v6 = vor.u32 %v6719_v63, %v6279_v51  ;;  %v6733_v63 = vld [vmem:[#allocation2 + $0x2d4] sm:$0xf] }
 0x342   :  { %v2171_v61 = vrot.slane %v2170_v35, 4  ;;  %v2208_v33 = vrot.slane %v2207_v22, 4  ;;  %v2310_v5 = vadd.f32 %v2309_v32, %v2278_v12  ;;  %v2347_v62 = vadd.f32 %v2346_v9, %v2279_v24  ;;  %v6343_v32 = vld [vmem:[#allocation2 + $0x2e8] sm:$0xf0] }
 0x343   :  { %2774 = vmatpush.bf16.msra.mxu0 %v6278_v53  ;;  %2952 = vmatpush.bf16.msra.mxu2 %v6282_v6  ;;  %v6346_v40 = vor.u32 %v6735_v36, %v6343_v32  ;;  %v6261_v36 = vld [vmem:[#allocation2 + $0x240] sm:$0xf]  ;;  %v6732_v32 = vld [vmem:[#allocation2 + $0x2c4] sm:$0xf0] }
 0x344   :  { %v2172_v25 = vadd.f32 %v2171_v61, %v2170_v35  ;;  %v2209_v16 = vadd.f32 %v2208_v33, %v2207_v22  ;;  %v2311_v23 = vrot.slane %v2310_v5, 4  ;;  %v2348_v56 = vrot.slane %v2347_v62, 4  ;;  %v6333_v22 = vld [vmem:[#allocation2 + $0x2d0] sm:$0xf]  ;;  %v6717_v61 = vld [vmem:[#allocation2 + $0x254] sm:$0xf] }
 0x345   :  { %2863 = vmatpush.bf16.msra.mxu1 %v6342_v0  ;;  %v6270_v35 = vor.u32 %v6718_v2, %v6269_v18  ;;  %3041 = vmatpush.bf16.msra.mxu3 %v6346_v40  ;;  %v6334_v53 = vor.u32 %v6734_v17, %v6333_v22  ;;  %v6716_v0 = vld [vmem:[#allocation2 + $0x244] sm:$0xf0]  ;;  %v6731_v22 = vld [vmem:[#allocation2 + $0x2c4] sm:$0xf] }
 0x346   :  { %v2173_v9 = vrot.slane %v2172_v25, 2  ;;  %v2210_v15 = vrot.slane %v2209_v16, 2  ;;  %v2312_v12 = vadd.f32 %v2311_v23, %v2310_v5  ;;  %v2349_v24 = vadd.f32 %v2348_v56, %v2347_v62  ;;  %v6335_v56 = vld [vmem:[#allocation2 + $0x2d8] sm:$0xf0] }
 0x347   :  { %2775 = vmatpush.bf16.msra.mxu0 %v6270_v35  ;;  %v6274_v23 = vor.u32 %v6717_v61, %v6271_v42  ;;  %v6338_v6 = vor.u32 %v6733_v63, %v6335_v56  ;;  %v6263_v35 = vld [vmem:[#allocation2 + $0x248] sm:$0xf0]  ;;  %v6253_v63 = vld [vmem:[#allocation2 + $0x230] sm:$0xf] }
 0x348   :  { %v2174_v49 = vadd.f32 %v2173_v9, %v2172_v25  ;;  %v2211_v33 = vadd.f32 %v2210_v15, %v2209_v16  ;;  %v2313_v30 = vrot.slane %v2312_v12, 2  ;;  %v2350_v8 = vrot.slane %v2349_v24, 2  ;;  %v6325_v16 = vld [vmem:[#allocation2 + $0x2c0] sm:$0xf]  ;;  %v6715_v9 = vld [vmem:[#allocation2 + $0x244] sm:$0xf] }
 0x349   :  { %2864 = vmatpush.bf16.msra.mxu1 %v6334_v53  ;;  %2953 = vmatpush.bf16.msra.mxu2 %v6274_v23  ;;  %v6262_v25 = vor.u32 %v6716_v0, %v6261_v36  ;;  %v6326_v17 = vor.u32 %v6732_v32, %v6325_v16  ;;  %v6317_v53 = vld [vmem:[#allocation2 + $0x2b0] sm:$0xf]  ;;  %v6730_v23 = vld [vmem:[#allocation2 + $0x2b4] sm:$0xf0]  ;;  %v6713_v0 = vld [vmem:[#allocation2 + $0x234] sm:$0xf] }
 0x34a   :  { %v2175_v5 = vrot.slane %v2174_v49, 1  ;;  %v2212_v62 = vrot.slane %v2211_v33, 1  ;;  %v2314_v21 = vadd.f32 %v2313_v30, %v2312_v12  ;;  %v2351_v51 = vadd.f32 %v2350_v8, %v2349_v24  ;;  %3042 = vmatpush.bf16.msra.mxu3 %v6338_v6  ;;  %v6327_v24 = vld [vmem:[#allocation2 + $0x2c8] sm:$0xf0]  ;;  %v6319_v16 = vld [vmem:[#allocation2 + $0x2b8] sm:$0xf0] }
 0x34b   :  { %2776 = vmatpush.bf16.msra.mxu0 %v6262_v25  ;;  %v6266_v12 = vor.u32 %v6715_v9, %v6263_v35  ;;  %v6729_v25 = vld [vmem:[#allocation2 + $0x2b4] sm:$0xf]  ;;  %v6309_v35 = vld [vmem:[#allocation2 + $0x2a0] sm:$0xf] }
 0x34c   :  { %v2176_v15 = vadd.f32 %v2175_v5, %v2174_v49  ;;  %v2213_v18 = vadd.f32 %v2212_v62, %v2211_v33  ;;  %v2315_v2 = vrot.slane %v2314_v21, 1  ;;  %v2352_v40 = vrot.slane %v2351_v51, 1  ;;  %v6714_v33 = vld [vmem:[#allocation2 + $0x234] sm:$0xf0] }
 0x34d   :  { %2865 = vmatpush.bf16.msra.mxu1 %v6326_v17  ;;  %2954 = vmatpush.bf16.msra.mxu2 %v6266_v12  ;;  %v6330_v49 = vor.u32 %v6731_v22, %v6327_v24  ;;  %v6254_v6 = vor.u32 %v6714_v33, %v6253_v63  ;;  %v6728_v17 = vld [vmem:[#allocation2 + $0x2a4] sm:$0xf0]  ;;  %v6711_v12 = vld [vmem:[#allocation2 + $0x224] sm:$0xf]  ;;  %v6247_v24 = vld [vmem:[#allocation2 + $0x228] sm:$0xf0] }
 0x34e   :  { %v8404_v61 = vmul.f32 0.004, %v2176_v15  ;;  %v8406_v30 = vmul.f32 0.004, %v2213_v18  ;;  %v2316_v8 = vadd.f32 %v2315_v2, %v2314_v21  ;;  %v2353_v42 = vadd.f32 %v2352_v40, %v2351_v51  ;;  %v6255_v51 = vld [vmem:[#allocation2 + $0x238] sm:$0xf0] }
 0x34f   :  { %3043 = vmatpush.bf16.msra.mxu3 %v6330_v49  ;;  %v6318_v21 = vor.u32 %v6730_v23, %v6317_v53  ;;  %v6258_v15 = vor.u32 %v6713_v0, %v6255_v51  ;;  %v6322_v18 = vor.u32 %v6729_v25, %v6319_v16  ;;  %v6245_v2 = vld [vmem:[#allocation2 + $0x220] sm:$0xf]  ;;  %v6712_v40 = vld [vmem:[#allocation2 + $0x224] sm:$0xf0]  ;;  %2777 = vmatpush.bf16.msra.mxu0 %v6254_v6  ;;  %v6727_v33 = vld [vmem:[#allocation2 + $0x2a4] sm:$0xf] }
 0x350   :  { %v2354_v56 = vmul.f32 0.004, %v2316_v8  ;;  %v2355_v5 = vmul.f32 0.004, %v2353_v42  ;;  %v2356_v62 = vmul.f32 %v8404_v61, %v8404_v61  ;;  %v2357_v36 = vmul.f32 %v8406_v30, %v8406_v30  ;;  %v6311_v53 = vld [vmem:[#allocation2 + $0x2a8] sm:$0xf0] }
 0x351   :  { %2866 = vmatpush.bf16.msra.mxu1 %v6318_v21  ;;  %v6246_v22 = vor.u32 %v6712_v40, %v6245_v2  ;;  %2955 = vmatpush.bf16.msra.mxu2 %v6258_v15  ;;  %v6310_v63 = vor.u32 %v6728_v17, %v6309_v35  ;;  %v6250_v49 = vor.u32 %v6711_v12, %v6247_v24  ;;  %v6301_v0 = vld [vmem:[#allocation2 + $0x290] sm:$0xf]  ;;  %v6726_v6 = vld [vmem:[#allocation2 + $0x294] sm:$0xf0]  ;;  %v6709_v51 = vld [vmem:[#allocation2 + $0x214] sm:$0xf] }
 0x352   :  { %v2358_v32 = vsub.f32 %v2354_v56, %v2356_v62  ;;  %v2359_v9 = vsub.f32 %v2355_v5, %v2357_v36  ;;  %v6314_v23 = vor.u32 %v6727_v33, %v6311_v53  ;;  %v6237_v62 = vld [vmem:[#allocation2 + $0x210] sm:$0xf]  ;;  %v6710_v36 = vld [vmem:[#allocation2 + $0x214] sm:$0xf0]  ;;  %v6239_v25 = vld [vmem:[#allocation2 + $0x218] sm:$0xf0] }
 0x353   :  { %3044 = vmatpush.bf16.msra.mxu3 %v6322_v18  ;;  %2778 = vmatpush.bf16.msra.mxu0 %v6246_v22  ;;  %v6238_v21 = vor.u32 %v6710_v36, %v6237_v62  ;;  %v6725_v16 = vld [vmem:[#allocation2 + $0x294] sm:$0xf]  ;;  %v6303_v15 = vld [vmem:[#allocation2 + $0x298] sm:$0xf0]  ;;  %v6229_v18 = vld [vmem:[#allocation2 + $0x200] sm:$0xf] }
 0x354   :  { %v2360_v8 = vmax.f32 %v2358_v32, 0.0  ;;  %v2361_v42 = vmax.f32 %v2359_v9, 0.0  ;;  %v6302_v32 = vor.u32 %v6726_v6, %v6301_v0  ;;  %v6242_v9 = vor.u32 %v6709_v51, %v6239_v25  ;;  %v6708_v2 = vld [vmem:[#allocation2 + $0x204] sm:$0xf0]  ;;  %v6293_v35 = vld [vmem:[#allocation2 + $0x280] sm:$0xf] }
 0x355   :  { %2867 = vmatpush.bf16.msra.mxu1 %v6310_v63  ;;  %2956 = vmatpush.bf16.msra.mxu2 %v6250_v49  ;;  %v6306_v40 = vor.u32 %v6725_v16, %v6303_v15  ;;  %v6724_v22 = vld [vmem:[#allocation2 + $0x284] sm:$0xf0]  ;;  %v6707_v17 = vld [vmem:[#allocation2 + $0x204] sm:$0xf]  ;;  %v6230_v12 = vor.u32 %v6708_v2, %v6229_v18  ;;  %v6295_v63 = vld [vmem:[#allocation2 + $0x288] sm:$0xf0] }
 0x356   :  { %v2364_v56 = vadd.f32 1e-05, %v2360_v8  ;;  %v2365_v5 = vadd.f32 1e-05, %v2361_v42  ;;  %v6294_v24 = vor.u32 %v6724_v22, %v6293_v35  ;;  %v6231_v8 = vld [vmem:[#allocation2 + $0x208] sm:$0xf0] }
 0x357   :  { %3045 = vmatpush.bf16.msra.mxu3 %v6314_v23  ;;  %2779 = vmatpush.bf16.msra.mxu0 %v6238_v21  ;;  %v6723_v42 = vld [vmem:[#allocation2 + $0x284] sm:$0xf]  ;;  %v6234_v49 = vor.u32 %v6707_v17, %v6231_v8  ;;  %v2363_v18 = vld [vmem:[#allocation4 + $0x1] ss:$8 sm:$0x3] }
 0x358   :  { %6874 = vrsqrt.f32 %v2364_v56  ;;  %v6298_v33 = vor.u32 %v6723_v42, %v6295_v63  ;;  %vm2382_vm3 = vweird.f32 %v2365_v5  ;;  %vm2372_vm6 = vweird.f32 %v2364_v56  ;;  %v2394_v8 = vld [vmem:[#allocation4 + $0x2] ss:$8 sm:$0x3]  ;;  %v11434_v42 = vld [vmem:[#allocation70_spill] sm:$0xff] }
 0x359   :  { %6876 = vrsqrt.f32 %v2365_v5  ;;  %2868 = vmatpush.bf16.msra.mxu1 %v6302_v32  ;;  %2957 = vmatpush.bf16.msra.mxu2 %v6242_v9 }
 0x35b   :  { %3046 = vmatpush.bf16.msra.mxu3 %v6306_v40  ;;  %2780 = vmatpush.bf16.msra.mxu0 %v6230_v12 }
 0x35d   :  { %2869 = vmatpush.bf16.msra.mxu1 %v6294_v24  ;;  %2958 = vmatpush.bf16.msra.mxu2 %v6234_v49 }
 0x35e   :  { %v6875_v53 = vpop.eup %6874 }
 0x35f   :  { %v6877_v23 = vpop.eup %6876  ;;  %v2367_v62 = vmul.f32 %v6875_v53, %v2364_v56  ;;  %3047 = vmatpush.bf16.msra.mxu3 %v6298_v33  ;;  %vm2373_vm2 = vweird.f32 %v6875_v53  ;;  %v11435_v33 = vld [vmem:[#allocation71_spill] sm:$0xff] }
 0x360   :  { %v2377_v36 = vmul.f32 %v6877_v23, %v2365_v5  ;;  %vm2383_vm1 = vweird.f32 %v6877_v23  ;;  %vm2374_vm7 = vmor %vm2372_vm6, %vm2373_vm2 }
 0x361   :  { %v2368_v0 = vmul.f32 %v6875_v53, %v2367_v62  ;;  %vm2384_vm4 = vmor %vm2382_vm3, %vm2383_vm1 }
 0x362   :  { %v2378_v6 = vmul.f32 %v6877_v23, %v2377_v36  ;;  %v11437_v36 = vld [vmem:[#allocation73_spill] sm:$0xff] }
 0x363   :  { %v2369_v21 = vmul.f32 0.5, %v2368_v0 }
 0x364   :  { %v2379_v51 = vmul.f32 0.5, %v2378_v6  ;;  %v11438_v6 = vld [vmem:[#allocation74_spill] sm:$0xff] }
 0x365   :  { %v2370_v25 = vsub.f32 1.5, %v2369_v21 }
 0x366   :  { %v2380_v16 = vsub.f32 1.5, %v2379_v51 }
 0x367   :  { %v2371_v32 = vmul.f32 %v6875_v53, %v2370_v25  ;;  %v11440_v25 = vld [vmem:[#allocation75_spill] sm:$0xff] }
 0x368   :  { %v2381_v9 = vmul.f32 %v6877_v23, %v2380_v16 }
 0x369   :  { %v2375_v40 = vsel %vm2374_vm7, %v6875_v53, %v2371_v32  ;;  %v11441_v32 = vld [vmem:[#allocation77_spill] sm:$0xff] }
 0x36a   :  { %v2385_v15 = vsel %vm2384_vm4, %v6877_v23, %v2381_v9  ;;  %v11436_v23 = vld [vmem:[#allocation72_spill] sm:$0xff] }
 0x36b   :  { %v2388_v2 = vrot.slane %v2385_v15, 7 }
 0x36d   :  { %v2390_v35 = vsel %vm2389_vm5, %v2375_v40, %v2388_v2 }
 0x36e   :  { %v2392_v22 = vmul.f32 %v2390_v35, %v2363_v18 }
 0x370   :  { %v8413_v17 = vperm.slane %v2392_v22, 0  ;;  %v8415_v12 = vperm.slane %v2392_v22, 1 }
 0x372   :  { %v2401_v24 = vmul.f32 %v8415_v12, %v8406_v30  ;;  %v2400_v5 = vmul.f32 %v8413_v17, %v8404_v61  ;;  %v2408_v63 = vmul.f32 %v8413_v17, %v11434_v42  ;;  %v2409_v53 = vmul.f32 %v8415_v12, %v11435_v33  ;;  %v11439_v61 = vld [vmem:[#allocation76_spill] sm:$0xff] }
 0x373   :  { %v2410_v62 = vmul.f32 %v8413_v17, %v11436_v23  ;;  %v2411_v0 = vmul.f32 %v8415_v12, %v11437_v36  ;;  %v2412_v21 = vmul.f32 %v8413_v17, %v11438_v6  ;;  %v2414_v51 = vmul.f32 %v8413_v17, %v11439_v61 }
 0x374   :  { %v2404_v56 = vrot.slane %v2401_v24, 7  ;;  %v2413_v16 = vmul.f32 %v8415_v12, %v11440_v25  ;;  %v2415_v9 = vmul.f32 %v8415_v12, %v11441_v32  ;;  %v2416_v15 = vmul.f32 %v8413_v17, %v7771_v39 }
 0x375   :  { %v2418_v18 = vmul.f32 %v8413_v17, %v7799_v1  ;;  %v2417_v2 = vmul.f32 %v8415_v12, %v7774_v14  ;;  %v2419_v22 = vmul.f32 %v8415_v12, %v7803_v55  ;;  %v2424_v24 = vmul.f32 %v8413_v17, %v7868_v11 }
 0x376   :  { %v2405_v49 = vsel %vm2389_vm5, %v2400_v5, %v2404_v56  ;;  %v2425_v39 = vmul.f32 %v8415_v12, %v7886_v29  ;;  %v2427_v1 = vmul.f32 %v8415_v12, %v7908_v10  ;;  %v2428_v14 = vmul.f32 %v8413_v17, %v7919_v58 }
 0x377   :  { %v2407_v30 = vsub.f32 %v2394_v8, %v2405_v49  ;;  %v2426_v8 = vmul.f32 %v8413_v17, %v7896_v43  ;;  %v2430_v58 = vmul.f32 %v8413_v17, %v7943_v37  ;;  %v2432_v23 = vmul.f32 %v8413_v17, %v7965_v52 }
 0x378   :  { %v2433_v36 = vmul.f32 %v8415_v12, %v7971_v38  ;;  %v2436_v37 = vmul.f32 %v8413_v17, %v8018_v28 }
 0x379   :  { %v8444_v40 = vperm.slane %v2407_v30, 0  ;;  %v8446_v35 = vperm.slane %v2407_v30, 1 }
 0x37b   :  { %v2477_v5 = vadd.f32 %v8444_v40, %v2408_v63  ;;  %v2479_v56 = vadd.f32 %v8444_v40, %v2410_v62  ;;  %v2478_v55 = vadd.f32 %v8446_v35, %v2409_v53  ;;  %v2480_v11 = vadd.f32 %v8446_v35, %v2411_v0 }
 0x37c   :  { %v2481_v42 = vadd.f32 %v8444_v40, %v2412_v21  ;;  %v2483_v43 = vadd.f32 %v8444_v40, %v2414_v51  ;;  %v2482_v29 = vadd.f32 %v8446_v35, %v2413_v16  ;;  %v2484_v49 = vadd.f32 %v8446_v35, %v2415_v9 }
 0x37d   :  { %v2541_v10 = vpack.c.bf16 %v2479_v56, %v2477_v5  ;;  %v2542_v33 = vpack.c.bf16 %v2480_v11, %v2478_v55  ;;  %v2429_v63 = vmul.f32 %v8415_v12, %v7936_v31  ;;  %v2431_v53 = vmul.f32 %v8415_v12, %v7960_v34 }
 0x37e   :  { %v2434_v62 = vmul.f32 %v8413_v17, %v8007_v59  ;;  %v8481_v0 = vadd.f32 %v8444_v40, %v2416_v15  ;;  %v2435_v31 = vmul.f32 %v8415_v12, %v8010_v45  ;;  %v8487_v34 = vpack.c.bf16 %v2483_v43, %v2481_v42 }
 0x37f   :  { %2781 = vmatmul.bf16.vlgmr.msra.gmra.mxu0 %v2541_v10  ;;  %2870 = vmatmul.bf16.vlgmr.msra.gmra.mxu1 %v2542_v33  ;;  %v8489_v52 = vpack.c.bf16 %v2484_v49, %v2482_v29  ;;  %v8492_v59 = vadd.f32 %v8444_v40, %v2418_v18  ;;  %v8495_v38 = vadd.f32 %v8446_v35, %v2417_v2 }
 0x380   :  { %2959 = vmatmul.bf16.vlgmr.msra.gmra.mxu2 %v2541_v10  ;;  %3048 = vmatmul.bf16.vlgmr.msra.gmra.mxu3 %v2542_v33  ;;  %v2493_v30 = vadd.f32 %v8444_v40, %v2424_v24  ;;  %v2495_v6 = vadd.f32 %v8444_v40, %v2426_v8  ;;  %v2494_v45 = vadd.f32 %v8446_v35, %v2425_v39 }
 0x381   :  { %v8501_v28 = vadd.f32 %v8446_v35, %v2419_v22  ;;  %v2496_v21 = vadd.f32 %v8446_v35, %v2427_v1  ;;  %v2497_v61 = vadd.f32 %v8444_v40, %v2428_v14  ;;  %v2499_v51 = vadd.f32 %v8444_v40, %v2430_v58 }
 0x382   :  { %v8506_v25 = vpack.c.bf16 %v2495_v6, %v2493_v30  ;;  %v2498_v16 = vadd.f32 %v8446_v35, %v2429_v63  ;;  %v2500_v32 = vadd.f32 %v8446_v35, %v2431_v53  ;;  %v2501_v9 = vadd.f32 %v8444_v40, %v2432_v23  ;;  %v11442_v63 = vld [vmem:[#allocation41_spill] sm:$0xff]  ;;  %v11443_v23 = vld [vmem:[#allocation40_spill] sm:$0xff]  ;;  %v11445_v30 = vld [vmem:[#allocation43_spill] sm:$0xff] }
 0x383   :  { %v8511_v15 = vpack.c.bf16 %v2496_v21, %v2494_v45  ;;  %v8513_v18 = vpack.c.bf16 %v2499_v51, %v2497_v61  ;;  %v2503_v2 = vadd.f32 %v8444_v40, %v2434_v62  ;;  %v2502_v22 = vadd.f32 %v8446_v35, %v2433_v36 }
 0x384   :  { %v8517_v24 = vpack.c.bf16 %v2500_v32, %v2498_v16  ;;  %v2504_v8 = vadd.f32 %v8446_v35, %v2435_v31  ;;  %v2438_v39 = vmul.f32 %v8413_v17, %v8045_v7  ;;  %v2505_v1 = vadd.f32 %v8444_v40, %v2436_v37  ;;  %v11444_v31 = vld [vmem:[#allocation42_spill] sm:$0xff]  ;;  %v11446_v32 = vld [vmem:[#allocation44_spill] sm:$0xff] }
 0x385   :  { %v8523_v14 = vpack.c.bf16 %v2503_v2, %v2501_v9  ;;  %v2437_v5 = vmul.f32 %v8415_v12, %v8038_v60  ;;  %v2439_v56 = vmul.f32 %v8415_v12, %v8059_v54  ;;  %v2440_v55 = vmul.f32 %v8413_v17, %v8071_v44 }
 0x386   :  { %v8531_v11 = vpack.c.bf16 %v2504_v8, %v2502_v22  ;;  %v2507_v42 = vadd.f32 %v8444_v40, %v2438_v39  ;;  %v2442_v7 = vmul.f32 %v8413_v17, %v8098_v19  ;;  %v2441_v43 = vmul.f32 %v8415_v12, %v8074_v4 }
 0x387   :  { %v2506_v29 = vadd.f32 %v8446_v35, %v2437_v5  ;;  %v2508_v60 = vadd.f32 %v8446_v35, %v2439_v56  ;;  %v2509_v49 = vadd.f32 %v8444_v40, %v2440_v55  ;;  %v2443_v54 = vmul.f32 %v8415_v12, %v8107_v57 }
 0x388   :  { %v8543_v44 = vpack.c.bf16 %v2507_v42, %v2505_v1  ;;  %v2511_v10 = vadd.f32 %v8444_v40, %v2442_v7  ;;  %v2510_v33 = vadd.f32 %v8446_v35, %v2441_v43  ;;  %v2444_v19 = vmul.f32 %v8413_v17, %v8130_v27  ;;  %v11447_v42 = vld [vmem:[#allocation45_spill] sm:$0xff]  ;;  %v11448_v43 = vld [vmem:[#allocation46_spill] sm:$0xff] }
 0x389   :  { %v8549_v58 = vpack.c.bf16 %v2508_v60, %v2506_v29  ;;  %v2512_v4 = vadd.f32 %v8446_v35, %v2443_v54  ;;  %v2446_v53 = vmul.f32 %v8413_v17, %v11442_v63  ;;  %v2445_v62 = vmul.f32 %v8415_v12, %v11443_v23  ;;  %v11449_v54 = vld [vmem:[#allocation47_spill] sm:$0xff] }
 0x38a   :  { %v8556_v57 = vpack.c.bf16 %v2511_v10, %v2509_v49  ;;  %v2513_v36 = vadd.f32 %v8444_v40, %v2444_v19  ;;  %v2447_v37 = vmul.f32 %v8415_v12, %v11444_v31  ;;  %v2448_v27 = vmul.f32 %v8413_v17, %v11445_v30 }
 0x38b   :  { %v8563_v6 = vpack.c.bf16 %v2512_v4, %v2510_v33  ;;  %v2515_v45 = vadd.f32 %v8444_v40, %v2446_v53  ;;  %v2514_v21 = vadd.f32 %v8446_v35, %v2445_v62  ;;  %v2450_v61 = vmul.f32 %v8413_v17, %v8205_v46 }
 0x38c   :  { %v2516_v51 = vadd.f32 %v8446_v35, %v2447_v37  ;;  %v2517_v16 = vadd.f32 %v8444_v40, %v2448_v27  ;;  %v2449_v9 = vmul.f32 %v8415_v12, %v11446_v32  ;;  %v2451_v2 = vmul.f32 %v8415_v12, %v8208_v50  ;;  %v11451_v37 = vld [vmem:[#allocation49_spill] sm:$0xff] }
 0x38d   :  { %v8575_v22 = vpack.c.bf16 %v2515_v45, %v2513_v36  ;;  %v2519_v8 = vadd.f32 %v8444_v40, %v2450_v61  ;;  %v2452_v39 = vmul.f32 %v8413_v17, %v8221_v13  ;;  %v2454_v46 = vmul.f32 %v8413_v17, %v8249_v20  ;;  %v11450_v36 = vld [vmem:[#allocation48_spill] sm:$0xff] }
 0x38e   :  { %v8584_v1 = vpack.c.bf16 %v2516_v51, %v2514_v21  ;;  %v2518_v5 = vadd.f32 %v8446_v35, %v2449_v9  ;;  %v2520_v50 = vadd.f32 %v8446_v35, %v2451_v2  ;;  %v2453_v7 = vmul.f32 %v8415_v12, %v11447_v42  ;;  %v11452_v21 = vld [vmem:[#allocation50_spill] sm:$0xff]  ;;  %v11454_v9 = vld [vmem:[#allocation51_spill] sm:$0xff] }
 0x38f   :  { %2786 = vmatmul.bf16.gmra.mxu0 %v8487_v34  ;;  %2875 = vmatmul.bf16.gmra.mxu1 %v8489_v52  ;;  %v8590_v56 = vpack.c.bf16 %v2519_v8, %v2517_v16  ;;  %v2521_v13 = vadd.f32 %v8444_v40, %v2452_v39  ;;  %v2523_v20 = vadd.f32 %v8444_v40, %v2454_v46  ;;  %v11453_v16 = vld [vmem:[#allocation52_spill] sm:$0xff]  ;;  %v11455_v46 = vld [vmem:[#allocation53_spill] sm:$0xff] }
 0x390   :  { %2964 = vmatmul.bf16.gmra.mxu2 %v8487_v34  ;;  %3053 = vmatmul.bf16.gmra.mxu3 %v8489_v52  ;;  %v8594_v55 = vpack.c.bf16 %v2520_v50, %v2518_v5  ;;  %v2455_v29 = vmul.f32 %v8415_v12, %v11448_v43  ;;  %v2456_v60 = vmul.f32 %v8413_v17, %v8270_v48  ;;  %v11456_v50 = vld [vmem:[#allocation54_spill] sm:$0xff]  ;;  %v11457_v43 = vld [vmem:[#allocation56_spill] sm:$0xff] }
 0x391   :  { %v8602_v34 = vpack.c.bf16 %v2523_v20, %v2521_v13  ;;  %v2458_v52 = vmul.f32 %v8413_v17, %v8299_v26  ;;  %v2457_v49 = vmul.f32 %v8415_v12, %v8273_v47  ;;  %v2459_v10 = vmul.f32 %v8415_v12, %v11449_v54 }
 0x392   :  { %v2522_v33 = vadd.f32 %v8446_v35, %v2453_v7  ;;  %v2524_v19 = vadd.f32 %v8446_v35, %v2455_v29  ;;  %v2525_v4 = vadd.f32 %v8444_v40, %v2456_v60  ;;  %v2460_v48 = vmul.f32 %v8413_v17, %v8312_v41 }
 0x393   :  { %v2527_v63 = vadd.f32 %v8444_v40, %v2458_v52  ;;  %v2526_v53 = vadd.f32 %v8446_v35, %v2457_v49  ;;  %v2528_v26 = vadd.f32 %v8446_v35, %v2459_v10  ;;  %v2462_v47 = vmul.f32 %v8413_v17, %v8327_v3  ;;  %v11458_v49 = vld [vmem:[#allocation55_spill] sm:$0xff]  ;;  %v11459_v10 = vld [vmem:[#allocation57_spill] sm:$0xff] }
 0x394   :  { %v8620_v23 = vpack.c.bf16 %v2524_v19, %v2522_v33  ;;  %v2529_v62 = vadd.f32 %v8444_v40, %v2460_v48  ;;  %v2461_v31 = vmul.f32 %v8415_v12, %v11450_v36  ;;  %v2463_v30 = vmul.f32 %v8415_v12, %v11451_v37 }
 0x395   :  { %v8627_v41 = vpack.c.bf16 %v2527_v63, %v2525_v4  ;;  %v8629_v27 = vpack.c.bf16 %v2528_v26, %v2526_v53  ;;  %v2531_v45 = vadd.f32 %v8444_v40, %v2462_v47  ;;  %v2464_v61 = vmul.f32 %v8413_v17, %v11452_v21  ;;  %v11462_v21 = vld [vmem:[#allocation79_spill] sm:$0xff] }
 0x396   :  { %v2530_v3 = vadd.f32 %v8446_v35, %v2461_v31  ;;  %v2532_v51 = vadd.f32 %v8446_v35, %v2463_v30  ;;  %v2466_v32 = vmul.f32 %v8413_v17, %v11453_v16  ;;  %v2465_v2 = vmul.f32 %v8415_v12, %v11454_v9  ;;  %v11460_v31 = vld [vmem:[#allocation78_spill] sm:$0xff]  ;;  %v11461_v30 = vld [vmem:[#allocation80_spill] sm:$0xff] }
 0x397   :  { %v8640_v8 = vpack.c.bf16 %v2531_v45, %v2529_v62  ;;  %v2533_v39 = vadd.f32 %v8444_v40, %v2464_v61  ;;  %v2467_v5 = vmul.f32 %v8415_v12, %v11455_v46  ;;  %v2468_v13 = vmul.f32 %v8413_v17, %v11456_v50 }
 0x398   :  { %v8647_v20 = vpack.c.bf16 %v2532_v51, %v2530_v3  ;;  %v2535_v42 = vadd.f32 %v8444_v40, %v2466_v32  ;;  %v2534_v7 = vadd.f32 %v8446_v35, %v2465_v2  ;;  %v2470_v29 = vmul.f32 %v8413_v17, %v11457_v43 }
 0x399   :  { %v2536_v60 = vadd.f32 %v8446_v35, %v2467_v5  ;;  %v2537_v52 = vadd.f32 %v8444_v40, %v2468_v13  ;;  %v2469_v54 = vmul.f32 %v8415_v12, %v11458_v49  ;;  %v2471_v33 = vmul.f32 %v8415_v12, %v11459_v10 }
 0x39a   :  { %v8659_v19 = vpack.c.bf16 %v2535_v42, %v2533_v39  ;;  %v2539_v4 = vadd.f32 %v8444_v40, %v2470_v29  ;;  %v2545_v26 = vpack.c.bf16 %v8492_v59, %v8481_v0  ;;  %v2546_v47 = vpack.c.bf16 %v8501_v28, %v8495_v38  ;;  %v11463_v59 = vld [vmem:[#allocation81_spill] sm:$0xff] }
 0x39b   :  { %v8662_v48 = vpack.c.bf16 %v2536_v60, %v2534_v7  ;;  %v2538_v63 = vadd.f32 %v8446_v35, %v2469_v54  ;;  %v2540_v53 = vadd.f32 %v8446_v35, %v2471_v33  ;;  %v2420_v37 = vmul.f32 %v8413_v17, %v11460_v31 }
 0x39c   :  { %v8670_v62 = vpack.c.bf16 %v2539_v4, %v2537_v52  ;;  %v2422_v45 = vmul.f32 %v8413_v17, %v11461_v30  ;;  %v2421_v0 = vmul.f32 %v8415_v12, %v11462_v21  ;;  %v2423_v38 = vmul.f32 %v8415_v12, %v11463_v59  ;;  %v2607_v17 = vld [vmem:[#allocation4 + $0x3] ss:$8 sm:$0x3] }
 0x39d   :  { %v8672_v36 = vpack.c.bf16 %v2540_v53, %v2538_v63  ;;  %v2489_v28 = vadd.f32 %v8444_v40, %v2420_v37  ;;  %v8702_v12 = vperm.slane %v2607_v17, 0 }
 0x39e   :  { %v2491_v61 = vadd.f32 %v8444_v40, %v2422_v45  ;;  %v2490_v3 = vadd.f32 %v8446_v35, %v2421_v0  ;;  %v2492_v51 = vadd.f32 %v8446_v35, %v2423_v38 }
 0x39f   :  { %2791 = vmatmul.bf16.gmra.mxu0 %v2545_v26  ;;  %2880 = vmatmul.bf16.gmra.mxu1 %v2546_v47 }
 0x3a0   :  { %2969 = vmatmul.bf16.gmra.mxu2 %v2545_v26  ;;  %3058 = vmatmul.bf16.gmra.mxu3 %v2546_v47  ;;  %v2547_v16 = vpack.c.bf16 %v2491_v61, %v2489_v28  ;;  %v2548_v32 = vpack.c.bf16 %v2492_v51, %v2490_v3 }
 0x3af   :  { %2796 = vmatmul.bf16.gmra.mxu0 %v2547_v16  ;;  %2885 = vmatmul.bf16.gmra.mxu1 %v2548_v32 }
 0x3b0   :  { %2974 = vmatmul.bf16.gmra.mxu2 %v2547_v16  ;;  %3063 = vmatmul.bf16.gmra.mxu3 %v2548_v32 }
 0x3bf   :  { %2801 = vmatmul.bf16.gmra.mxu0 %v8506_v25  ;;  %2890 = vmatmul.bf16.gmra.mxu1 %v8511_v15 }
 0x3c0   :  { %2979 = vmatmul.bf16.gmra.mxu2 %v8506_v25  ;;  %3068 = vmatmul.bf16.gmra.mxu3 %v8511_v15 }
 0x3cf   :  { %2806 = vmatmul.bf16.gmra.mxu0 %v8513_v18  ;;  %2895 = vmatmul.bf16.gmra.mxu1 %v8517_v24 }
 0x3d0   :  { %2984 = vmatmul.bf16.gmra.mxu2 %v8513_v18  ;;  %3073 = vmatmul.bf16.gmra.mxu3 %v8517_v24  ;;  %v8711_v18 = vperm.slane %v2607_v17, 1 }
 0x3df   :  { %2811 = vmatmul.bf16.gmra.mxu0 %v8523_v14  ;;  %2900 = vmatmul.bf16.gmra.mxu1 %v8531_v11 }
 0x3e0   :  { %2989 = vmatmul.bf16.gmra.mxu2 %v8523_v14  ;;  %3078 = vmatmul.bf16.gmra.mxu3 %v8531_v11 }
 0x3ef   :  { %2816 = vmatmul.bf16.gmra.mxu0 %v8543_v44  ;;  %2905 = vmatmul.bf16.gmra.mxu1 %v8549_v58 }
 0x3f0   :  { %2994 = vmatmul.bf16.gmra.mxu2 %v8543_v44  ;;  %3083 = vmatmul.bf16.gmra.mxu3 %v8549_v58 }
 0x3fc   :  { %v2782_v40 = vpop.f32.mrf.mxu0  ;;  %v2871_v35 = vpop.f32.mrf.mxu1 }
 0x3fd   :  { %v2783_v25 = vadd.f32 %v2782_v40, %v8702_v12 }
 0x3ff   :  { %v8705_v15 = vadd.f32 %v2871_v35, %v2783_v25  ;;  %2821 = vmatmul.bf16.gmra.mxu0 %v8556_v57  ;;  %2910 = vmatmul.bf16.gmra.mxu1 %v8563_v6 }
 0x400   :  { %2999 = vmatmul.bf16.gmra.mxu2 %v8556_v57  ;;  %3088 = vmatmul.bf16.gmra.mxu3 %v8563_v6 }
 0x403   :  { %v2960_v24 = vpop.f32.mrf.mxu2  ;;  %v3049_v14 = vpop.f32.mrf.mxu3 }
 0x404   :  { %v2961_v11 = vadd.f32 %v2960_v24, %v8711_v18  ;;  %v2784_v44 = vpop.f32.mrf.mxu0  ;;  %v2873_v58 = vpop.f32.mrf.mxu1 }
 0x405   :  { %v2785_v9 = vadd.f32 %v2784_v44, %v8702_v12 }
 0x406   :  { %v8715_v2 = vadd.f32 %v3049_v14, %v2961_v11 }
 0x407   :  { %v8717_v39 = vadd.f32 %v2873_v58, %v2785_v9 }
 0x40b   :  { %v2962_v57 = vpop.f32.mrf.mxu2  ;;  %v3051_v5 = vpop.f32.mrf.mxu3 }
 0x40c   :  { %v2963_v6 = vadd.f32 %v2962_v57, %v8711_v18  ;;  %v2787_v50 = vpop.f32.mrf.mxu0  ;;  %v2876_v13 = vpop.f32.mrf.mxu1 }
 0x40d   :  { %v2788_v42 = vadd.f32 %v2787_v50, %v8702_v12 }
 0x40e   :  { %v8723_v7 = vadd.f32 %v3051_v5, %v2963_v6 }
 0x40f   :  { %v8725_v43 = vadd.f32 %v2876_v13, %v2788_v42  ;;  %2826 = vmatmul.bf16.gmra.mxu0 %v8575_v22  ;;  %2915 = vmatmul.bf16.gmra.mxu1 %v8584_v1 }
 0x410   :  { %3004 = vmatmul.bf16.gmra.mxu2 %v8575_v22  ;;  %3093 = vmatmul.bf16.gmra.mxu3 %v8584_v1 }
 0x413   :  { %v2965_v60 = vpop.f32.mrf.mxu2  ;;  %v3054_v52 = vpop.f32.mrf.mxu3 }
 0x414   :  { %v2966_v49 = vadd.f32 %v2965_v60, %v8711_v18  ;;  %v2789_v54 = vpop.f32.mrf.mxu0  ;;  %v2878_v10 = vpop.f32.mrf.mxu1 }
 0x415   :  { %v2790_v33 = vadd.f32 %v2789_v54, %v8702_v12 }
 0x416   :  { %v8735_v4 = vadd.f32 %v3054_v52, %v2966_v49 }
 0x417   :  { %v8737_v63 = vadd.f32 %v2878_v10, %v2790_v33 }
 0x419   :  { %v3131_v53 = vpack.c.bf16 %v8737_v63, %v8725_v43  ;;  %v11470_v63 = vld [vmem:[#allocation8_spill] sm:$0xff] }
 0x41b   :  { %v2967_v26 = vpop.f32.mrf.mxu2  ;;  %v3056_v47 = vpop.f32.mrf.mxu3 }
 0x41c   :  { %v2968_v22 = vadd.f32 %v2967_v26, %v8711_v18  ;;  %v2792_v1 = vpop.f32.mrf.mxu0  ;;  %v2881_v31 = vpop.f32.mrf.mxu1 }
 0x41d   :  { %v2793_v37 = vadd.f32 %v2792_v1, %v8702_v12 }
 0x41e   :  { %v8743_v30 = vadd.f32 %v3056_v47, %v2968_v22 }
 0x41f   :  { %v8745_v45 = vadd.f32 %v2881_v31, %v2793_v37  ;;  %2831 = vmatmul.bf16.gmra.mxu0 %v8590_v56  ;;  %2920 = vmatmul.bf16.gmra.mxu1 %v8594_v55 }
 0x420   :  { %3009 = vmatmul.bf16.gmra.mxu2 %v8590_v56  ;;  %3098 = vmatmul.bf16.gmra.mxu3 %v8594_v55  ;;  %v11469_v43 = vpack.c.bf16 %v8743_v30, %v8735_v4 }
 0x423   :  { %v2970_v0 = vpop.f32.mrf.mxu2  ;;  %v3059_v59 = vpop.f32.mrf.mxu3 }
 0x424   :  { %v2971_v38 = vadd.f32 %v2970_v0, %v8711_v18  ;;  %v2794_v28 = vpop.f32.mrf.mxu0  ;;  %v2883_v61 = vpop.f32.mrf.mxu1 }
 0x425   :  { %v2795_v3 = vadd.f32 %v2794_v28, %v8702_v12 }
 0x426   :  { %v8755_v51 = vadd.f32 %v3059_v59, %v2971_v38 }
 0x427   :  { %v8757_v16 = vadd.f32 %v2883_v61, %v2795_v3 }
 0x429   :  { %v3133_v32 = vpack.c.bf16 %v8757_v16, %v8745_v45  ;;  %v11468_v16 = vpack.c.bf16 %v8717_v39, %v8705_v15 }
 0x42b   :  { %v2972_v17 = vpop.f32.mrf.mxu2  ;;  %v3061_v40 = vpop.f32.mrf.mxu3 }
 0x42c   :  { %v2973_v56 = vadd.f32 %v2972_v17, %v8711_v18  ;;  %v2797_v55 = vpop.f32.mrf.mxu0  ;;  %v2886_v35 = vpop.f32.mrf.mxu1 }
 0x42d   :  { %v2798_v25 = vadd.f32 %v2797_v55, %v8702_v12 }
 0x42e   :  { %v8763_v24 = vadd.f32 %v3061_v40, %v2973_v56 }
 0x42f   :  { %v8765_v14 = vadd.f32 %v2886_v35, %v2798_v25  ;;  %2836 = vmatmul.bf16.gmra.mxu0 %v8602_v34  ;;  %2925 = vmatmul.bf16.gmra.mxu1 %v8620_v23 }
 0x430   :  { %3014 = vmatmul.bf16.gmra.mxu2 %v8602_v34  ;;  %3103 = vmatmul.bf16.gmra.mxu3 %v8620_v23  ;;  %v11467_v45 = vpack.c.bf16 %v8763_v24, %v8755_v51  ;;  %v11471_v51 = vpack.c.bf16 %v8723_v7, %v8715_v2 }
 0x433   :  { %v2975_v44 = vpop.f32.mrf.mxu2  ;;  %v3064_v58 = vpop.f32.mrf.mxu3 }
 0x434   :  { %v2976_v9 = vadd.f32 %v2975_v44, %v8711_v18  ;;  %v2799_v57 = vpop.f32.mrf.mxu0  ;;  %v2888_v5 = vpop.f32.mrf.mxu1 }
 0x435   :  { %v2800_v6 = vadd.f32 %v2799_v57, %v8702_v12 }
 0x436   :  { %v8775_v50 = vadd.f32 %v3064_v58, %v2976_v9 }
 0x437   :  { %v8777_v13 = vadd.f32 %v2888_v5, %v2800_v6 }
 0x439   :  { %v3135_v42 = vpack.c.bf16 %v8777_v13, %v8765_v14 }
 0x43b   :  { %v2977_v60 = vpop.f32.mrf.mxu2  ;;  %v3066_v52 = vpop.f32.mrf.mxu3 }
 0x43c   :  { %v2978_v34 = vadd.f32 %v2977_v60, %v8711_v18  ;;  %v2802_v23 = vpop.f32.mrf.mxu0  ;;  %v2891_v49 = vpop.f32.mrf.mxu1 }
 0x43d   :  { %v2803_v54 = vadd.f32 %v2802_v23, %v8702_v12 }
 0x43e   :  { %v8783_v10 = vadd.f32 %v3066_v52, %v2978_v34 }
 0x43f   :  { %v8785_v33 = vadd.f32 %v2891_v49, %v2803_v54  ;;  %2841 = vmatmul.bf16.gmra.mxu0 %v8627_v41  ;;  %2930 = vmatmul.bf16.gmra.mxu1 %v8629_v27 }
 0x440   :  { %v3136_v26 = vpack.c.bf16 %v8783_v10, %v8775_v50  ;;  %3019 = vmatmul.bf16.gmra.mxu2 %v8627_v41  ;;  %3108 = vmatmul.bf16.gmra.mxu3 %v8629_v27 }
 0x443   :  { %v2980_v47 = vpop.f32.mrf.mxu2  ;;  %v3069_v22 = vpop.f32.mrf.mxu3 }
 0x444   :  { %v2981_v1 = vadd.f32 %v2980_v47, %v8711_v18  ;;  %v2804_v31 = vpop.f32.mrf.mxu0  ;;  %v8794_v37 = vpop.f32.mrf.mxu1 }
 0x446   :  { %v8796_v0 = vadd.f32 %v3069_v22, %v2981_v1 }
 0x44b   :  { %v8798_v59 = vpop.f32.mrf.mxu2  ;;  %v8800_v38 = vpop.f32.mrf.mxu3 }
 0x44c   :  { %v2807_v28 = vpop.f32.mrf.mxu0  ;;  %v2896_v61 = vpop.f32.mrf.mxu1 }
 0x44f   :  { %2846 = vmatmul.bf16.gmra.mxu0 %v8640_v8  ;;  %2935 = vmatmul.bf16.gmra.mxu1 %v8647_v20 }
 0x450   :  { %3024 = vmatmul.bf16.gmra.mxu2 %v8640_v8  ;;  %3113 = vmatmul.bf16.gmra.mxu3 %v8647_v20 }
 0x453   :  { %v2985_v41 = vpop.f32.mrf.mxu2  ;;  %v8806_v27 = vpop.f32.mrf.mxu3 }
 0x454   :  { %v2809_v3 = vpop.f32.mrf.mxu0  ;;  %v2898_v17 = vpop.f32.mrf.mxu1 }
 0x455   :  { %v2810_v22 = vadd.f32 %v2809_v3, %v8702_v12 }
 0x45b   :  { %v2987_v40 = vpop.f32.mrf.mxu2  ;;  %v8808_v56 = vpop.f32.mrf.mxu3 }
 0x45c   :  { %v2812_v55 = vpop.f32.mrf.mxu0  ;;  %v2901_v35 = vpop.f32.mrf.mxu1 }
 0x45d   :  { %v2813_v49 = vadd.f32 %v2812_v55, %v8702_v12 }
 0x45f   :  { %2851 = vmatmul.bf16.gmra.mxu0 %v8659_v19  ;;  %2940 = vmatmul.bf16.gmra.mxu1 %v8662_v48  ;;  %v2902_v29 = vadd.f32 %v2901_v35, %v2813_v49 }
 0x460   :  { %3029 = vmatmul.bf16.gmra.mxu2 %v8659_v19  ;;  %3118 = vmatmul.bf16.gmra.mxu3 %v8662_v48 }
 0x463   :  { %v2990_v8 = vpop.f32.mrf.mxu2  ;;  %v3079_v20 = vpop.f32.mrf.mxu3 }
 0x464   :  { %v2814_v25 = vpop.f32.mrf.mxu0  ;;  %v2903_v44 = vpop.f32.mrf.mxu1 }
 0x465   :  { %v2815_v34 = vadd.f32 %v2814_v25, %v8702_v12 }
 0x467   :  { %v2904_v1 = vadd.f32 %v2903_v44, %v2815_v34 }
 0x469   :  { %v3141_v3 = vpack.c.bf16 %v2904_v1, %v2902_v29 }
 0x46b   :  { %v2992_v58 = vpop.f32.mrf.mxu2  ;;  %v3081_v9 = vpop.f32.mrf.mxu3 }
 0x46c   :  { %v2817_v57 = vpop.f32.mrf.mxu0  ;;  %v2906_v5 = vpop.f32.mrf.mxu1  ;;  %v2993_v25 = vadd.f32 %v2992_v58, %v8711_v18  ;;  %v2988_v58 = vadd.f32 %v2987_v40, %v8711_v18 }
 0x46d   :  { %v2818_v19 = vadd.f32 %v2817_v57, %v8702_v12  ;;  %v2808_v57 = vadd.f32 %v2807_v28, %v8702_v12 }
 0x46f   :  { %2856 = vmatmul.bf16.gmra.mxu0 %v8670_v62  ;;  %2945 = vmatmul.bf16.gmra.mxu1 %v8672_v36  ;;  %v2907_v54 = vadd.f32 %v2906_v5, %v2818_v19  ;;  %v2805_v5 = vadd.f32 %v2804_v31, %v8702_v12  ;;  %v2899_v19 = vadd.f32 %v2898_v17, %v2810_v22 }
 0x470   :  { %3034 = vmatmul.bf16.gmra.mxu2 %v8670_v62  ;;  %3123 = vmatmul.bf16.gmra.mxu3 %v8672_v36  ;;  %v2897_v35 = vadd.f32 %v2896_v61, %v2808_v57  ;;  %v2986_v31 = vadd.f32 %v2985_v41, %v8711_v18  ;;  %v3077_v61 = vadd.f32 %v8808_v56, %v2988_v58 }
 0x471   :  { %v2894_v49 = vadd.f32 %v8794_v37, %v2805_v5 }
 0x472   :  { %v3075_v41 = vadd.f32 %v8806_v27, %v2986_v31 }
 0x473   :  { %v2995_v6 = vpop.f32.mrf.mxu2  ;;  %v3084_v48 = vpop.f32.mrf.mxu3  ;;  %v3137_v37 = vpack.c.bf16 %v2894_v49, %v8785_v33 }
 0x474   :  { %v2819_v60 = vpop.f32.mrf.mxu0  ;;  %v2908_v52 = vpop.f32.mrf.mxu1  ;;  %v2996_v36 = vadd.f32 %v2995_v6, %v8711_v18  ;;  %v2991_v6 = vadd.f32 %v2990_v8, %v8711_v18 }
 0x475   :  { %v2820_v23 = vadd.f32 %v2819_v60, %v8702_v12 }
 0x476   :  { %v3080_v29 = vadd.f32 %v3079_v20, %v2991_v6 }
 0x477   :  { %v2909_v47 = vadd.f32 %v2908_v52, %v2820_v23  ;;  %v3085_v52 = vadd.f32 %v3084_v48, %v2996_v36  ;;  %v3082_v23 = vadd.f32 %v3081_v9, %v2993_v25 }
 0x479   :  { %v3143_v62 = vpack.c.bf16 %v2909_v47, %v2907_v54  ;;  %v3139_v54 = vpack.c.bf16 %v2899_v19, %v2897_v35  ;;  %v3142_v8 = vpack.c.bf16 %v3082_v23, %v3080_v29 }
 0x47b   :  { %v2997_v21 = vpop.f32.mrf.mxu2  ;;  %v3086_v46 = vpop.f32.mrf.mxu3  ;;  %3161 = vmatpush.bf16.msrb.mxu0 %v3143_v62 }
 0x47c   :  { %v2998_v60 = vadd.f32 %v2997_v21, %v8711_v18  ;;  %v2822_v11 = vpop.f32.mrf.mxu0  ;;  %v2911_v55 = vpop.f32.mrf.mxu1 }
 0x47d   :  { %v2823_v44 = vadd.f32 %v2822_v11, %v8702_v12 }
 0x47e   :  { %v3087_v28 = vadd.f32 %v3086_v46, %v2998_v60  ;;  %v2983_v46 = vadd.f32 %v8798_v59, %v8711_v18  ;;  %v3140_v59 = vpack.c.bf16 %v3077_v61, %v3075_v41 }
 0x47f   :  { %v8830_v34 = vadd.f32 %v2911_v55, %v2823_v44  ;;  %3162 = vmatpush.bf16.msrb.mxu0 %v3141_v3  ;;  %v11472_v55 = vld [vmem:[#allocation10_spill] sm:$0xff] }
 0x480   :  { %v3144_v21 = vpack.c.bf16 %v3087_v28, %v3085_v52  ;;  %v3072_v47 = vadd.f32 %v8800_v38, %v2983_v46 }
 0x482   :  { %3339 = vmatpush.bf16.msrb.mxu2 %v3144_v21  ;;  %v3138_v33 = vpack.c.bf16 %v3072_v47, %v8796_v0  ;;  %v11473_v21 = vld [vmem:[#allocation12_spill] sm:$0xff]  ;;  %v11474_v47 = vld [vmem:[#allocation14_spill] sm:$0xff] }
 0x483   :  { %v3000_v11 = vpop.f32.mrf.mxu2  ;;  %v3089_v17 = vpop.f32.mrf.mxu3  ;;  %3163 = vmatpush.bf16.msrb.mxu0 %v3139_v54 }
 0x484   :  { %v3001_v40 = vadd.f32 %v3000_v11, %v8711_v18  ;;  %v8839_v9 = vpop.f32.mrf.mxu0  ;;  %v8841_v48 = vpop.f32.mrf.mxu1 }
 0x486   :  { %v8845_v20 = vadd.f32 %v3089_v17, %v3001_v40  ;;  %3340 = vmatpush.bf16.msrb.mxu2 %v3142_v8 }
 0x487   :  { %3164 = vmatpush.bf16.msrb.mxu0 %v3137_v37 }
 0x488   :  { %11464 = vst [vmem:[#allocation58_spill] sm:$0xff] %v8845_v20  ;;  %v11477_v20 = vld [vmem:[#allocation20_spill] sm:$0xff] }
 0x48a   :  { %3341 = vmatpush.bf16.msrb.mxu2 %v3140_v59 }
 0x48b   :  { %v8848_v56 = vpop.f32.mrf.mxu2  ;;  %v8850_v22 = vpop.f32.mrf.mxu3  ;;  %3165 = vmatpush.bf16.msrb.mxu0 %v3135_v42 }
 0x48c   :  { %11465 = vst [vmem:[#allocation59_spill] sm:$0xff] %v8850_v22  ;;  %v2827_v1 = vpop.f32.mrf.mxu0  ;;  %v2916_v27 = vpop.f32.mrf.mxu1 }
 0x48d   :  { %v2828_v62 = vadd.f32 %v2827_v1, %v8702_v12 }
 0x48e   :  { %3342 = vmatpush.bf16.msrb.mxu2 %v3138_v33 }
 0x48f   :  { %v8857_v36 = vadd.f32 %v2916_v27, %v2828_v62  ;;  %3166 = vmatpush.bf16.msrb.mxu0 %v3133_v32 }
 0x492   :  { %3343 = vmatpush.bf16.msrb.mxu2 %v3136_v26 }
 0x493   :  { %v3005_v38 = vpop.f32.mrf.mxu2  ;;  %v3094_v14 = vpop.f32.mrf.mxu3  ;;  %3167 = vmatpush.bf16.msrb.mxu0 %v3131_v53 }
 0x494   :  { %v3006_v13 = vadd.f32 %v3005_v38, %v8711_v18  ;;  %v8869_v42 = vpop.f32.mrf.mxu0  ;;  %v8871_v0 = vpop.f32.mrf.mxu1 }
 0x496   :  { %v8873_v57 = vadd.f32 %v3094_v14, %v3006_v13  ;;  %3344 = vmatpush.bf16.msrb.mxu2 %v11467_v45  ;;  %v11475_v45 = vld [vmem:[#allocation16_spill] sm:$0xff] }
 0x497   :  { %3168 = vmatpush.bf16.msrb.mxu0 %v11468_v16 }
 0x498   :  { %11466 = vst [vmem:[#allocation60_spill] sm:$0xff] %v8873_v57 }
 0x49a   :  { %3345 = vmatpush.bf16.msrb.mxu2 %v11469_v43  ;;  %3169 = vmatmul.bf16.vlgmr.msrb.gmra.mxu0 %v11470_v63 }
 0x49b   :  { %v8885_v53 = vpop.f32.mrf.mxu2  ;;  %v8887_v32 = vpop.f32.mrf.mxu3 }
 0x49c   :  { %v2832_v50 = vpop.f32.mrf.mxu0  ;;  %v2921_v10 = vpop.f32.mrf.mxu1 }
 0x49d   :  { %v2833_v26 = vadd.f32 %v2832_v50, %v8702_v12 }
 0x49e   :  { %3346 = vmatpush.bf16.msrb.mxu2 %v11471_v51 }
 0x49f   :  { %v8893_v15 = vadd.f32 %v2921_v10, %v2833_v26 }
 0x4a1   :  { %3347 = vmatmul.bf16.vlgmr.msrb.gmra.mxu2 %v11470_v63 }
 0x4a3   :  { %v3010_v39 = vpop.f32.mrf.mxu2  ;;  %v3099_v4 = vpop.f32.mrf.mxu3 }
 0x4a4   :  { %v3011_v30 = vadd.f32 %v3010_v39, %v8711_v18  ;;  %v8897_v24 = vpop.f32.mrf.mxu0  ;;  %v8899_v25 = vpop.f32.mrf.mxu1 }
 0x4a6   :  { %v8901_v60 = vadd.f32 %v3099_v4, %v3011_v30  ;;  %v11476_v4 = vld [vmem:[#allocation18_spill] sm:$0xff] }
 0x4aa   :  { %3174 = vmatmul.bf16.gmra.mxu0 %v11472_v55 }
 0x4ab   :  { %v8904_v5 = vpop.f32.mrf.mxu2  ;;  %v8906_v2 = vpop.f32.mrf.mxu3 }
 0x4ac   :  { %v2837_v7 = vpop.f32.mrf.mxu0  ;;  %v2926_v19 = vpop.f32.mrf.mxu1 }
 0x4ad   :  { %v2838_v3 = vadd.f32 %v2837_v7, %v8702_v12 }
 0x4af   :  { %v8909_v44 = vadd.f32 %v2926_v19, %v2838_v3 }
 0x4b1   :  { %3352 = vmatmul.bf16.gmra.mxu2 %v11472_v55 }
 0x4b3   :  { %v3015_v6 = vpop.f32.mrf.mxu2  ;;  %v3104_v52 = vpop.f32.mrf.mxu3 }
 0x4b4   :  { %v3016_v28 = vadd.f32 %v3015_v6, %v8711_v18  ;;  %v8913_v35 = vpop.f32.mrf.mxu0  ;;  %v8915_v58 = vpop.f32.mrf.mxu1 }
 0x4b6   :  { %v8917_v23 = vadd.f32 %v3104_v52, %v3016_v28 }
 0x4ba   :  { %3179 = vmatmul.bf16.gmra.mxu0 %v11473_v21 }
 0x4bb   :  { %v8920_v49 = vpop.f32.mrf.mxu2  ;;  %v8922_v54 = vpop.f32.mrf.mxu3 }
 0x4bc   :  { %v2842_v31 = vpop.f32.mrf.mxu0  ;;  %v2931_v29 = vpop.f32.mrf.mxu1 }
 0x4bd   :  { %v2843_v11 = vadd.f32 %v2842_v31, %v8702_v12 }
 0x4bf   :  { %v8925_v17 = vadd.f32 %v2931_v29, %v2843_v11 }
 0x4c1   :  { %3357 = vmatmul.bf16.gmra.mxu2 %v11473_v21 }
 0x4c3   :  { %v3020_v46 = vpop.f32.mrf.mxu2  ;;  %v3109_v61 = vpop.f32.mrf.mxu3 }
 0x4c4   :  { %v3021_v8 = vadd.f32 %v3020_v46, %v8711_v18  ;;  %v2844_v40 = vpop.f32.mrf.mxu0  ;;  %v2933_v37 = vpop.f32.mrf.mxu1 }
 0x4c6   :  { %v8929_v41 = vadd.f32 %v3109_v61, %v3021_v8 }
 0x4ca   :  { %3184 = vmatmul.bf16.gmra.mxu0 %v11474_v47 }
 0x4cb   :  { %v8932_v59 = vpop.f32.mrf.mxu2  ;;  %v8934_v33 = vpop.f32.mrf.mxu3 }
 0x4cc   :  { %v2847_v1 = vpop.f32.mrf.mxu0  ;;  %v2936_v27 = vpop.f32.mrf.mxu1 }
 0x4d1   :  { %3362 = vmatmul.bf16.gmra.mxu2 %v11474_v47 }
 0x4d3   :  { %v3025_v62 = vpop.f32.mrf.mxu2  ;;  %v8937_v38 = vpop.f32.mrf.mxu3 }
 0x4d4   :  { %v2849_v14 = vpop.f32.mrf.mxu0  ;;  %v2938_v13 = vpop.f32.mrf.mxu1 }
 0x4d5   :  { %v2850_v8 = vadd.f32 %v2849_v14, %v8702_v12 }
 0x4da   :  { %3189 = vmatmul.bf16.gmra.mxu0 %v11475_v45 }
 0x4db   :  { %v3027_v16 = vpop.f32.mrf.mxu2  ;;  %v3116_v43 = vpop.f32.mrf.mxu3 }
 0x4dc   :  { %v2852_v63 = vpop.f32.mrf.mxu0  ;;  %v2941_v50 = vpop.f32.mrf.mxu1 }
 0x4dd   :  { %v2853_v11 = vadd.f32 %v2852_v63, %v8702_v12  ;;  %v2845_v63 = vadd.f32 %v2844_v40, %v8702_v12 }
 0x4df   :  { %v2942_v57 = vadd.f32 %v2941_v50, %v2853_v11  ;;  %v2934_v11 = vadd.f32 %v2933_v37, %v2845_v63  ;;  %v11487_v63 = vld [vmem:[#allocation28_spill] sm:$0xff] }
 0x4e1   :  { %3367 = vmatmul.bf16.gmra.mxu2 %v11475_v45 }
 0x4e3   :  { %v3030_v10 = vpop.f32.mrf.mxu2  ;;  %v3119_v26 = vpop.f32.mrf.mxu3 }
 0x4e4   :  { %v2854_v51 = vpop.f32.mrf.mxu0  ;;  %v2943_v39 = vpop.f32.mrf.mxu1 }
 0x4e5   :  { %v2855_v21 = vadd.f32 %v2854_v51, %v8702_v12 }
 0x4e7   :  { %v2944_v47 = vadd.f32 %v2943_v39, %v2855_v21  ;;  %v3031_v39 = vadd.f32 %v3030_v10, %v8711_v18 }
 0x4e9   :  { %v3120_v40 = vadd.f32 %v3119_v26, %v3031_v39  ;;  %v11488_v39 = vld [vmem:[#allocation15_spill] sm:$0xff] }
 0x4ea   :  { %3194 = vmatmul.bf16.gmra.mxu0 %v11476_v4 }
 0x4eb   :  { %v3032_v30 = vpop.f32.mrf.mxu2  ;;  %v3121_v55 = vpop.f32.mrf.mxu3 }
 0x4ec   :  { %v2857_v7 = vpop.f32.mrf.mxu0  ;;  %v2946_v19 = vpop.f32.mrf.mxu1  ;;  %v3033_v51 = vadd.f32 %v3032_v30, %v8711_v18  ;;  %v2840_v30 = vadd.f32 %v8913_v35, %v8702_v12  ;;  %v3153_v35 = vpack.c.bf16 %v2934_v11, %v8925_v17  ;;  %v3013_v17 = vadd.f32 %v8904_v5, %v8711_v18 }
 0x4ed   :  { %v2858_v3 = vadd.f32 %v2857_v7, %v8702_v12  ;;  %v2848_v7 = vadd.f32 %v2847_v1, %v8702_v12  ;;  %v3028_v1 = vadd.f32 %v3027_v16, %v8711_v18  ;;  %v2835_v16 = vadd.f32 %v8897_v24, %v8702_v12 }
 0x4ee   :  { %v3122_v50 = vadd.f32 %v3121_v55, %v3033_v51  ;;  %v2929_v55 = vadd.f32 %v8915_v58, %v2840_v30  ;;  %v11478_v58 = vld [vmem:[#allocation22_spill] sm:$0xff]  ;;  %v11486_v51 = vld [vmem:[#allocation13_spill] sm:$0xff]  ;;  %v11491_v30 = vld [vmem:[#allocation32_spill] sm:$0xff] }
 0x4ef   :  { %v2947_v46 = vadd.f32 %v2946_v19, %v2858_v3  ;;  %v2939_v19 = vadd.f32 %v2938_v13, %v2850_v8  ;;  %v3157_v3 = vpack.c.bf16 %v2944_v47, %v2942_v57  ;;  %v3026_v57 = vadd.f32 %v3025_v62, %v8711_v18  ;;  %v11485_v47 = vld [vmem:[#allocation26_spill] sm:$0xff] }
 0x4f0   :  { %v3117_v13 = vadd.f32 %v3116_v43, %v3028_v1  ;;  %v3158_v10 = vpack.c.bf16 %v3122_v50, %v3120_v40  ;;  %v2924_v43 = vadd.f32 %v8899_v25, %v2835_v16  ;;  %v3151_v24 = vpack.c.bf16 %v2929_v55, %v8909_v44 }
 0x4f1   :  { %3372 = vmatmul.bf16.gmra.mxu2 %v11476_v4  ;;  %v3115_v37 = vadd.f32 %v8937_v38, %v3026_v57  ;;  %v3008_v44 = vadd.f32 %v8885_v53, %v8711_v18 }
 0x4f2   :  { %v3149_v25 = vpack.c.bf16 %v2924_v43, %v8893_v15  ;;  %v11479_v15 = vld [vmem:[#allocation59_spill] sm:$0xff]  ;;  %v6753_v43 = vld [vmem:[#allocation2 + $0x374] sm:$0xf] }
 0x4f3   :  { %v3035_v6 = vpop.f32.mrf.mxu2  ;;  %v3124_v52 = vpop.f32.mrf.mxu3  ;;  %v3156_v26 = vpack.c.bf16 %v3117_v13, %v3115_v37  ;;  %v11493_v13 = vld [vmem:[#allocation34_spill] sm:$0xff]  ;;  %v11495_v37 = vld [vmem:[#allocation36_spill] sm:$0xff] }
 0x4f4   :  { %v2859_v28 = vpop.f32.mrf.mxu0  ;;  %v2948_v29 = vpop.f32.mrf.mxu1  ;;  %v3036_v4 = vadd.f32 %v3035_v6, %v8711_v18 }
 0x4f5   :  { %v2860_v31 = vadd.f32 %v2859_v28, %v8702_v12 }
 0x4f6   :  { %v3125_v21 = vadd.f32 %v3124_v52, %v3036_v4  ;;  %v3102_v52 = vadd.f32 %v8906_v2, %v3013_v17 }
 0x4f7   :  { %v2949_v61 = vadd.f32 %v2948_v29, %v2860_v31  ;;  %v2937_v31 = vadd.f32 %v2936_v27, %v2848_v7  ;;  %v3023_v27 = vadd.f32 %v8932_v59, %v8711_v18  ;;  %v2830_v59 = vadd.f32 %v8869_v42, %v8702_v12 }
 0x4f9   :  { %v3159_v45 = vpack.c.bf16 %v2949_v61, %v2947_v46  ;;  %v3112_v62 = vadd.f32 %v8934_v33, %v3023_v27  ;;  %v2825_v33 = vadd.f32 %v8839_v9, %v8702_v12  ;;  %v2919_v42 = vadd.f32 %v8871_v0, %v2830_v59  ;;  %v11482_v61 = vld [vmem:[#allocation24_spill] sm:$0xff]  ;;  %v11492_v27 = vld [vmem:[#allocation19_spill] sm:$0xff] }
 0x4fa   :  { %3199 = vmatmul.bf16.gmra.mxu0 %v11477_v20  ;;  %v3003_v12 = vadd.f32 %v8848_v56, %v8711_v18  ;;  %v3097_v9 = vadd.f32 %v8887_v32, %v3008_v44  ;;  %v3150_v0 = vpack.c.bf16 %v3102_v52, %v8901_v60  ;;  %v11484_v60 = vld [vmem:[#allocation11_spill] sm:$0xff] }
 0x4fb   :  { %v3037_v22 = vpop.f32.mrf.mxu2  ;;  %3250 = vmatpush.bf16.msrb.mxu1 %v3159_v45  ;;  %v3126_v14 = vpop.f32.mrf.mxu3  ;;  %v6754_v59 = vld [vmem:[#allocation2 + $0x374] sm:$0xf0] }
 0x4fc   :  { %v3038_v28 = vadd.f32 %v3037_v22, %v8711_v18  ;;  %v3155_v22 = vpack.c.bf16 %v2939_v19, %v2937_v31  ;;  %v3092_v2 = vadd.f32 %v11479_v15, %v3003_v12  ;;  %v6749_v12 = vld [vmem:[#allocation2 + $0x354] sm:$0xf] }
 0x4fe   :  { %v3127_v6 = vadd.f32 %v3126_v14, %v3038_v28 }
 0x4ff   :  { %3251 = vmatpush.bf16.msrb.mxu1 %v3157_v3 }
 0x500   :  { %v3160_v29 = vpack.c.bf16 %v3127_v6, %v3125_v21  ;;  %v11489_v6 = vld [vmem:[#allocation30_spill] sm:$0xff] }
 0x501   :  { %3377 = vmatmul.bf16.gmra.mxu2 %v11477_v20  ;;  %v3018_v20 = vadd.f32 %v8920_v49, %v8711_v18  ;;  %v3154_v49 = vpack.c.bf16 %v3112_v62, %v8929_v41  ;;  %v3147_v41 = vpack.c.bf16 %v2919_v42, %v8857_v36  ;;  %v11481_v36 = vld [vmem:[#allocation9_spill] sm:$0xff]  ;;  %v11483_v18 = vld [vmem:[#allocation58_spill] sm:$0xff] }
 0x502   :  { %3428 = vmatpush.bf16.msrb.mxu3 %v3160_v29  ;;  %v3146_v56 = vpack.c.bf16 %v3092_v2, %v11483_v18  ;;  %v11490_v29 = vld [vmem:[#allocation17_spill] sm:$0xff]  ;;  %v11497_v2 = vld [vmem:[#allocation38_spill] sm:$0xff] }
 0x503   :  { %3252 = vmatpush.bf16.msrb.mxu1 %v3155_v22  ;;  %v3107_v38 = vadd.f32 %v8922_v54, %v3018_v20  ;;  %v2914_v54 = vadd.f32 %v8841_v48, %v2825_v33  ;;  %v11480_v48 = vld [vmem:[#allocation60_spill] sm:$0xff]  ;;  %v6391_v18 = vld [vmem:[#allocation2 + $0x348] sm:$0xf0] }
 0x504   :  { %v6751_v33 = vld [vmem:[#allocation2 + $0x364] sm:$0xf] }
 0x505   :  { %v3152_v5 = vpack.c.bf16 %v3107_v38, %v8917_v23  ;;  %v3145_v53 = vpack.c.bf16 %v2914_v54, %v8830_v34  ;;  %v3148_v23 = vpack.c.bf16 %v3097_v9, %v11480_v48  ;;  %v6405_v38 = vld [vmem:[#allocation2 + $0x360] sm:$0xf]  ;;  %v6397_v54 = vld [vmem:[#allocation2 + $0x350] sm:$0xf] }
 0x506   :  { %3429 = vmatpush.bf16.msrb.mxu3 %v3158_v10  ;;  %v6389_v48 = vld [vmem:[#allocation2 + $0x340] sm:$0xf] }
 0x507   :  { %3253 = vmatpush.bf16.msrb.mxu1 %v3153_v35  ;;  %v11494_v35 = vld [vmem:[#allocation21_spill] sm:$0xff] }
 0x50a   :  { %3430 = vmatpush.bf16.msrb.mxu3 %v3156_v26  ;;  %3204 = vmatmul.bf16.gmra.mxu0 %v11478_v58  ;;  %v6413_v26 = vld [vmem:[#allocation2 + $0x370] sm:$0xf] }
 0x50b   :  { %3254 = vmatpush.bf16.msrb.mxu1 %v3151_v24  ;;  %v6414_v24 = vor.u32 %v6754_v59, %v6413_v26  ;;  %v6375_v26 = vld [vmem:[#allocation2 + $0x328] sm:$0xf0] }
 0x50d   :  { %3749 = vmatpush.bf16.msra.mxu0 %v6414_v24  ;;  %v6365_v24 = vld [vmem:[#allocation2 + $0x310] sm:$0xf] }
 0x50e   :  { %3431 = vmatpush.bf16.msrb.mxu3 %v3154_v49  ;;  %v6752_v49 = vld [vmem:[#allocation2 + $0x364] sm:$0xf0] }
 0x50f   :  { %3255 = vmatpush.bf16.msrb.mxu1 %v3149_v25  ;;  %v6406_v42 = vor.u32 %v6752_v49, %v6405_v38  ;;  %v6407_v25 = vld [vmem:[#allocation2 + $0x368] sm:$0xf0]  ;;  %v6367_v38 = vld [vmem:[#allocation2 + $0x318] sm:$0xf0] }
 0x510   :  { %v6410_v52 = vor.u32 %v6751_v33, %v6407_v25  ;;  %v11498_v49 = vld [vmem:[#allocation25_spill] sm:$0xff] }
 0x511   :  { %3382 = vmatmul.bf16.gmra.mxu2 %v11478_v58  ;;  %v6415_v58 = vld [vmem:[#allocation2 + $0x378] sm:$0xf0]  ;;  %3750 = vmatpush.bf16.msra.mxu0 %v6406_v42 }
 0x512   :  { %3432 = vmatpush.bf16.msrb.mxu3 %v3152_v5  ;;  %v6418_v17 = vor.u32 %v6753_v43, %v6415_v58  ;;  %v6742_v58 = vld [vmem:[#allocation2 + $0x314] sm:$0xf0] }
 0x513   :  { %3256 = vmatpush.bf16.msrb.mxu1 %v3147_v41  ;;  %v6750_v41 = vld [vmem:[#allocation2 + $0x354] sm:$0xf0]  ;;  %v6366_v33 = vor.u32 %v6742_v58, %v6365_v24 }
 0x514   :  { %3927 = vmatpush.bf16.msra.mxu2 %v6418_v17  ;;  %v6398_v9 = vor.u32 %v6750_v41, %v6397_v54  ;;  %v6741_v17 = vld [vmem:[#allocation2 + $0x314] sm:$0xf] }
 0x515   :  { %v6370_v25 = vor.u32 %v6741_v17, %v6367_v38 }
 0x516   :  { %3433 = vmatpush.bf16.msrb.mxu3 %v3150_v0  ;;  %v6399_v0 = vld [vmem:[#allocation2 + $0x358] sm:$0xf0]  ;;  %3751 = vmatpush.bf16.msra.mxu0 %v6398_v9  ;;  %v6740_v9 = vld [vmem:[#allocation2 + $0x304] sm:$0xf0] }
 0x517   :  { %3257 = vmatpush.bf16.msrb.mxu1 %v3145_v53  ;;  %v8998_v46 = vpop.f32.mrf.mxu0  ;;  %v11496_v53 = vld [vmem:[#allocation23_spill] sm:$0xff]  ;;  %v6402_v15 = vor.u32 %v6749_v12, %v6399_v0  ;;  %v6357_v12 = vld [vmem:[#allocation2 + $0x300] sm:$0xf]  ;;  %v6739_v0 = vld [vmem:[#allocation2 + $0x304] sm:$0xf] }
 0x518   :  { %3928 = vmatpush.bf16.msra.mxu2 %v6410_v52 }
 0x51a   :  { %3434 = vmatpush.bf16.msrb.mxu3 %v3148_v23  ;;  %3258 = vmatmul.bf16.vlgmr.msrb.gmra.mxu1 %v11481_v36  ;;  %v6748_v23 = vld [vmem:[#allocation2 + $0x344] sm:$0xf0] }
 0x51b   :  { %3209 = vmatmul.bf16.gmra.mxu0 %v11482_v61 }
 0x51c   :  { %3929 = vmatpush.bf16.msra.mxu2 %v6402_v15  ;;  %v6358_v15 = vor.u32 %v6740_v9, %v6357_v12 }
 0x51e   :  { %3435 = vmatpush.bf16.msrb.mxu3 %v3146_v56 }
 0x51f   :  { %v9004_v34 = vpop.f32.mrf.mxu0 }
 0x521   :  { %3436 = vmatmul.bf16.vlgmr.msrb.gmra.mxu3 %v11481_v36  ;;  %3387 = vmatmul.bf16.gmra.mxu2 %v11482_v61  ;;  %v6747_v36 = vld [vmem:[#allocation2 + $0x344] sm:$0xf]  ;;  %v6390_v61 = vor.u32 %v6748_v23, %v6389_v48 }
 0x523   :  { %3752 = vmatpush.bf16.msra.mxu0 %v6390_v61 }
 0x524   :  { %v9006_v32 = vpop.f32.mrf.mxu2 }
 0x527   :  { %v9009_v8 = vpop.f32.mrf.mxu0 }
 0x52a   :  { %3263 = vmatmul.bf16.gmra.mxu1 %v11484_v60 }
 0x52b   :  { %3214 = vmatmul.bf16.gmra.mxu0 %v11485_v47 }
 0x52c   :  { %v9012_v45 = vpop.f32.mrf.mxu2 }
 0x52f   :  { %v9016_v4 = vpop.f32.mrf.mxu0 }
 0x531   :  { %3441 = vmatmul.bf16.gmra.mxu3 %v11484_v60  ;;  %3392 = vmatmul.bf16.gmra.mxu2 %v11485_v47  ;;  %v6394_v60 = vor.u32 %v6747_v36, %v6391_v18 }
 0x533   :  { %3930 = vmatpush.bf16.msra.mxu2 %v6394_v60  ;;  %v11499_v60 = vld [vmem:[#allocation27_spill] sm:$0xff] }
 0x534   :  { %v9018_v7 = vpop.f32.mrf.mxu2 }
 0x537   :  { %v9021_v28 = vpop.f32.mrf.mxu0 }
 0x53a   :  { %3268 = vmatmul.bf16.gmra.mxu1 %v11486_v51 }
 0x53b   :  { %3219 = vmatmul.bf16.gmra.mxu0 %v11487_v63 }
 0x53c   :  { %v9024_v19 = vpop.f32.mrf.mxu2 }
 0x53f   :  { %v9028_v3 = vpop.f32.mrf.mxu0 }
 0x541   :  { %3446 = vmatmul.bf16.gmra.mxu3 %v11486_v51  ;;  %3397 = vmatmul.bf16.gmra.mxu2 %v11487_v63  ;;  %v6381_v51 = vld [vmem:[#allocation2 + $0x330] sm:$0xf]  ;;  %v6746_v63 = vld [vmem:[#allocation2 + $0x334] sm:$0xf0] }
 0x544   :  { %v9030_v14 = vpop.f32.mrf.mxu2 }
 0x547   :  { %v9033_v21 = vpop.f32.mrf.mxu0 }
 0x54a   :  { %3273 = vmatmul.bf16.gmra.mxu1 %v11488_v39 }
 0x54b   :  { %3224 = vmatmul.bf16.gmra.mxu0 %v11489_v6 }
 0x54c   :  { %v9036_v31 = vpop.f32.mrf.mxu2 }
 0x54f   :  { %v9042_v50 = vpop.f32.mrf.mxu0 }
 0x551   :  { %3451 = vmatmul.bf16.gmra.mxu3 %v11488_v39  ;;  %3402 = vmatmul.bf16.gmra.mxu2 %v11489_v6  ;;  %v6745_v39 = vld [vmem:[#allocation2 + $0x334] sm:$0xf]  ;;  %v6382_v6 = vor.u32 %v6746_v63, %v6381_v51 }
 0x553   :  { %3753 = vmatpush.bf16.msra.mxu0 %v6382_v6 }
 0x554   :  { %v9040_v1 = vpop.f32.mrf.mxu2 }
 0x557   :  { %v9048_v22 = vpop.f32.mrf.mxu0 }
 0x55a   :  { %3278 = vmatmul.bf16.gmra.mxu1 %v11490_v29 }
 0x55b   :  { %3229 = vmatmul.bf16.gmra.mxu0 %v11491_v30 }
 0x55c   :  { %v9046_v11 = vpop.f32.mrf.mxu2 }
 0x55f   :  { %v9054_v40 = vpop.f32.mrf.mxu0 }
 0x561   :  { %3456 = vmatmul.bf16.gmra.mxu3 %v11490_v29  ;;  %3407 = vmatmul.bf16.gmra.mxu2 %v11491_v30  ;;  %v6383_v29 = vld [vmem:[#allocation2 + $0x338] sm:$0xf0] }
 0x562   :  { %v6386_v30 = vor.u32 %v6745_v39, %v6383_v29 }
 0x564   :  { %v9052_v57 = vpop.f32.mrf.mxu2  ;;  %3931 = vmatpush.bf16.msra.mxu2 %v6386_v30 }
 0x567   :  { %v9062_v16 = vpop.f32.mrf.mxu0 }
 0x56a   :  { %3283 = vmatmul.bf16.gmra.mxu1 %v11492_v27 }
 0x56b   :  { %3234 = vmatmul.bf16.gmra.mxu0 %v11493_v13 }
 0x56c   :  { %v9058_v10 = vpop.f32.mrf.mxu2 }
 0x56f   :  { %v9068_v20 = vpop.f32.mrf.mxu0 }
 0x571   :  { %3461 = vmatmul.bf16.gmra.mxu3 %v11492_v27  ;;  %3412 = vmatmul.bf16.gmra.mxu2 %v11493_v13  ;;  %v6373_v27 = vld [vmem:[#allocation2 + $0x320] sm:$0xf]  ;;  %v6744_v13 = vld [vmem:[#allocation2 + $0x324] sm:$0xf0] }
 0x574   :  { %v9064_v55 = vpop.f32.mrf.mxu2 }
 0x577   :  { %v9074_v44 = vpop.f32.mrf.mxu0 }
 0x57a   :  { %3288 = vmatmul.bf16.gmra.mxu1 %v11494_v35 }
 0x57b   :  { %3239 = vmatmul.bf16.gmra.mxu0 %v11495_v37 }
 0x57c   :  { %v9070_v62 = vpop.f32.mrf.mxu2 }
 0x57f   :  { %v9081_v56 = vpop.f32.mrf.mxu0 }
 0x581   :  { %3466 = vmatmul.bf16.gmra.mxu3 %v11494_v35  ;;  %3417 = vmatmul.bf16.gmra.mxu2 %v11495_v37  ;;  %v6743_v35 = vld [vmem:[#allocation2 + $0x324] sm:$0xf]  ;;  %v6374_v37 = vor.u32 %v6744_v13, %v6373_v27 }
 0x582   :  { %v6378_v43 = vor.u32 %v6743_v35, %v6375_v26 }
 0x583   :  { %3754 = vmatpush.bf16.msra.mxu0 %v6374_v37 }
 0x584   :  { %v9076_v5 = vpop.f32.mrf.mxu2  ;;  %3932 = vmatpush.bf16.msra.mxu2 %v6378_v43 }
 0x587   :  { %v9087_v42 = vpop.f32.mrf.mxu0  ;;  %3755 = vmatpush.bf16.msra.mxu0 %v6366_v33 }
 0x588   :  { %3933 = vmatpush.bf16.msra.mxu2 %v6370_v25 }
 0x58a   :  { %3293 = vmatmul.bf16.gmra.mxu1 %v11496_v53 }
 0x58b   :  { %3244 = vmatmul.bf16.gmra.mxu0 %v11497_v2 }
 0x58c   :  { %v9084_v47 = vpop.f32.mrf.mxu2  ;;  %3756 = vmatpush.bf16.msra.mxu0 %v6358_v15 }
 0x58f   :  { %v9094_v61 = vpop.f32.mrf.mxu0 }
 0x591   :  { %3471 = vmatmul.bf16.gmra.mxu3 %v11496_v53  ;;  %3422 = vmatmul.bf16.gmra.mxu2 %v11497_v2  ;;  %v6359_v2 = vld [vmem:[#allocation2 + $0x308] sm:$0xf0] }
 0x592   :  { %v6362_v48 = vor.u32 %v6739_v0, %v6359_v2 }
 0x594   :  { %v9089_v52 = vpop.f32.mrf.mxu2  ;;  %3934 = vmatpush.bf16.msra.mxu2 %v6362_v48 }
 0x597   :  { %v3259_v59 = vpop.f32.mrf.mxu1 }
 0x598   :  { %v3260_v54 = vadd.f32 %v3259_v59, %v8998_v46  ;;  %v9104_v30 = vpop.f32.mrf.mxu0 }
 0x59a   :  { %3298 = vmatmul.bf16.gmra.mxu1 %v11498_v49 }
 0x59c   :  { %v9096_v46 = vpop.f32.mrf.mxu2 }
 0x59f   :  { %v3261_v41 = vpop.f32.mrf.mxu1 }
 0x5a0   :  { %v3262_v53 = vadd.f32 %v3261_v41, %v9004_v34  ;;  %v9110_v26 = vpop.f32.mrf.mxu0  ;;  %v11501_v41 = vld [vmem:[#allocation31_spill] sm:$0xff] }
 0x5a1   :  { %3476 = vmatmul.bf16.gmra.mxu3 %v11498_v49 }
 0x5a2   :  { %v3517_v23 = vpack.c.bf16 %v3262_v53, %v3260_v54 }
 0x5a4   :  { %v3437_v36 = vpop.f32.mrf.mxu3  ;;  %3757 = vmatmul.bf16.vlgmr.msra.gmra.mxu0 %v3517_v23  ;;  %3935 = vmatmul.bf16.vlgmr.msra.gmra.mxu2 %v3517_v23  ;;  %v9107_v13 = vpop.f32.mrf.mxu2 }
 0x5a5   :  { %v3438_v34 = vadd.f32 %v3437_v36, %v9006_v32 }
 0x5a7   :  { %v3264_v18 = vpop.f32.mrf.mxu1 }
 0x5a8   :  { %v3265_v39 = vadd.f32 %v3264_v18, %v9009_v8  ;;  %v9122_v33 = vpop.f32.mrf.mxu0  ;;  %v11502_v18 = vld [vmem:[#allocation33_spill] sm:$0xff] }
 0x5aa   :  { %3303 = vmatmul.bf16.gmra.mxu1 %v11499_v60 }
 0x5ac   :  { %v3439_v51 = vpop.f32.mrf.mxu3  ;;  %v9113_v8 = vpop.f32.mrf.mxu2 }
 0x5ad   :  { %v3440_v63 = vadd.f32 %v3439_v51, %v9012_v45  ;;  %v11500_v45 = vld [vmem:[#allocation29_spill] sm:$0xff] }
 0x5af   :  { %v9102_v6 = vpack.c.bf16 %v3440_v63, %v3438_v34  ;;  %v3266_v29 = vpop.f32.mrf.mxu1 }
 0x5b0   :  { %v3267_v27 = vadd.f32 %v3266_v29, %v9016_v4  ;;  %v9129_v9 = vpop.f32.mrf.mxu0  ;;  %v6770_v29 = vld [vmem:[#allocation2 + $0x3f4] sm:$0xf0] }
 0x5b1   :  { %3481 = vmatmul.bf16.gmra.mxu3 %v11499_v60 }
 0x5b2   :  { %v3519_v35 = vpack.c.bf16 %v3267_v27, %v3265_v39  ;;  %v6477_v39 = vld [vmem:[#allocation2 + $0x3f0] sm:$0xf] }
 0x5b4   :  { %v3442_v37 = vpop.f32.mrf.mxu3  ;;  %3762 = vmatmul.bf16.gmra.mxu0 %v3519_v35  ;;  %3940 = vmatmul.bf16.gmra.mxu2 %v3519_v35  ;;  %v9124_v54 = vpop.f32.mrf.mxu2  ;;  %v6478_v35 = vor.u32 %v6770_v29, %v6477_v39  ;;  %v6445_v39 = vld [vmem:[#allocation2 + $0x3b0] sm:$0xf]  ;;  %v6762_v29 = vld [vmem:[#allocation2 + $0x3b4] sm:$0xf0] }
 0x5b5   :  { %v3443_v43 = vadd.f32 %v3442_v37, %v9018_v7 }
 0x5b6   :  { %3838 = vmatpush.bf16.msra.mxu1 %v6478_v35 }
 0x5b7   :  { %v3269_v32 = vpop.f32.mrf.mxu1 }
 0x5b8   :  { %v3270_v24 = vadd.f32 %v3269_v32, %v9021_v28  ;;  %v9138_v36 = vpop.f32.mrf.mxu0 }
 0x5ba   :  { %3308 = vmatmul.bf16.gmra.mxu1 %v11500_v45 }
 0x5bc   :  { %v3444_v59 = vpop.f32.mrf.mxu3  ;;  %v9132_v0 = vpop.f32.mrf.mxu2 }
 0x5bd   :  { %v3445_v4 = vadd.f32 %v3444_v59, %v9024_v19  ;;  %v6769_v59 = vld [vmem:[#allocation2 + $0x3f4] sm:$0xf] }
 0x5bf   :  { %v9118_v58 = vpack.c.bf16 %v3445_v4, %v3443_v43  ;;  %v3271_v17 = vpop.f32.mrf.mxu1  ;;  %v6479_v43 = vld [vmem:[#allocation2 + $0x3f8] sm:$0xf0] }
 0x5c0   :  { %v3272_v38 = vadd.f32 %v3271_v17, %v9028_v3  ;;  %v9150_v37 = vpop.f32.mrf.mxu0  ;;  %v6461_v17 = vld [vmem:[#allocation2 + $0x3d0] sm:$0xf] }
 0x5c1   :  { %3486 = vmatmul.bf16.gmra.mxu3 %v11500_v45 }
 0x5c2   :  { %v3521_v49 = vpack.c.bf16 %v3272_v38, %v3270_v24  ;;  %v6482_v24 = vor.u32 %v6769_v59, %v6479_v43  ;;  %v6766_v38 = vld [vmem:[#allocation2 + $0x3d4] sm:$0xf0]  ;;  %v6437_v59 = vld [vmem:[#allocation2 + $0x3a0] sm:$0xf]  ;;  %v6447_v43 = vld [vmem:[#allocation2 + $0x3b8] sm:$0xf0] }
 0x5c4   :  { %v3447_v25 = vpop.f32.mrf.mxu3  ;;  %3767 = vmatmul.bf16.gmra.mxu0 %v3521_v49  ;;  %3945 = vmatmul.bf16.gmra.mxu2 %v3521_v49  ;;  %v6471_v49 = vld [vmem:[#allocation2 + $0x3e8] sm:$0xf0] }
 0x5c5   :  { %v3448_v28 = vadd.f32 %v3447_v25, %v9030_v14  ;;  %4016 = vmatpush.bf16.msra.mxu3 %v6482_v24 }
 0x5c7   :  { %v3274_v7 = vpop.f32.mrf.mxu1 }
 0x5c8   :  { %v3275_v3 = vadd.f32 %v3274_v7, %v9033_v21  ;;  %v6462_v7 = vor.u32 %v6766_v38, %v6461_v17  ;;  %v6429_v38 = vld [vmem:[#allocation2 + $0x390] sm:$0xf] }
 0x5ca   :  { %3313 = vmatmul.bf16.gmra.mxu1 %v11501_v41 }
 0x5cc   :  { %v3449_v19 = vpop.f32.mrf.mxu3 }
 0x5cd   :  { %v3450_v12 = vadd.f32 %v3449_v19, %v9036_v31  ;;  %v9140_v31 = vpop.f32.mrf.mxu2  ;;  %v6453_v19 = vld [vmem:[#allocation2 + $0x3c0] sm:$0xf] }
 0x5cf   :  { %v9134_v53 = vpack.c.bf16 %v3450_v12, %v3448_v28  ;;  %v3276_v15 = vpop.f32.mrf.mxu1  ;;  %v6764_v28 = vld [vmem:[#allocation2 + $0x3c4] sm:$0xf0]  ;;  %v6765_v12 = vld [vmem:[#allocation2 + $0x3d4] sm:$0xf] }
 0x5d0   :  { %v3277_v2 = vadd.f32 %v3276_v15, %v9042_v50  ;;  %v11503_v15 = vld [vmem:[#allocation35_spill] sm:$0xff] }
 0x5d1   :  { %3491 = vmatmul.bf16.gmra.mxu3 %v11501_v41 }
 0x5d2   :  { %v3523_v48 = vpack.c.bf16 %v3277_v2, %v3275_v3  ;;  %v6463_v3 = vld [vmem:[#allocation2 + $0x3d8] sm:$0xf0]  ;;  %v9155_v2 = vpop.f32.mrf.mxu0 }
 0x5d4   :  { %v3452_v23 = vpop.f32.mrf.mxu3  ;;  %3772 = vmatmul.bf16.gmra.mxu0 %v3523_v48  ;;  %3950 = vmatmul.bf16.gmra.mxu2 %v3523_v48  ;;  %v6454_v48 = vor.u32 %v6764_v28, %v6453_v19  ;;  %v6421_v28 = vld [vmem:[#allocation2 + $0x380] sm:$0xf] }
 0x5d5   :  { %v3453_v60 = vadd.f32 %v3452_v23, %v9040_v1  ;;  %v9152_v45 = vpop.f32.mrf.mxu2  ;;  %v6469_v1 = vld [vmem:[#allocation2 + $0x3e0] sm:$0xf]  ;;  %v6466_v23 = vor.u32 %v6765_v12, %v6463_v3  ;;  %v6756_v12 = vld [vmem:[#allocation2 + $0x384] sm:$0xf0]  ;;  %v6757_v3 = vld [vmem:[#allocation2 + $0x394] sm:$0xf] }
 0x5d7   :  { %v3279_v14 = vpop.f32.mrf.mxu1 }
 0x5d8   :  { %v3280_v50 = vadd.f32 %v3279_v14, %v9048_v22 }
 0x5da   :  { %3318 = vmatmul.bf16.gmra.mxu1 %v11502_v18  ;;  %v9166_v17 = vpop.f32.mrf.mxu0 }
 0x5dc   :  { %v3454_v21 = vpop.f32.mrf.mxu3 }
 0x5dd   :  { %v3455_v51 = vadd.f32 %v3454_v21, %v9046_v11  ;;  %v6768_v11 = vld [vmem:[#allocation2 + $0x3e4] sm:$0xf0] }
 0x5de   :  { %v6470_v22 = vor.u32 %v6768_v11, %v6469_v1  ;;  %v6455_v1 = vld [vmem:[#allocation2 + $0x3c8] sm:$0xf0] }
 0x5df   :  { %v9146_v34 = vpack.c.bf16 %v3455_v51, %v3453_v60  ;;  %v3281_v63 = vpop.f32.mrf.mxu1 }
 0x5e0   :  { %v3282_v27 = vadd.f32 %v3281_v63, %v9054_v40  ;;  %v6767_v40 = vld [vmem:[#allocation2 + $0x3e4] sm:$0xf]  ;;  %3839 = vmatpush.bf16.msra.mxu1 %v6470_v22  ;;  %v6761_v22 = vld [vmem:[#allocation2 + $0x3b4] sm:$0xf] }
 0x5e1   :  { %3496 = vmatmul.bf16.gmra.mxu3 %v11502_v18  ;;  %v6474_v41 = vor.u32 %v6767_v40, %v6471_v49  ;;  %v9157_v18 = vpop.f32.mrf.mxu2  ;;  %v6450_v24 = vor.u32 %v6761_v22, %v6447_v43  ;;  %v6759_v40 = vld [vmem:[#allocation2 + $0x3a4] sm:$0xf]  ;;  %v11505_v22 = vld [vmem:[#allocation39_spill] sm:$0xff] }
 0x5e2   :  { %v3525_v32 = vpack.c.bf16 %v3282_v27, %v3280_v50  ;;  %v6763_v27 = vld [vmem:[#allocation2 + $0x3c4] sm:$0xf] }
 0x5e3   :  { %4017 = vmatpush.bf16.msra.mxu3 %v6474_v41  ;;  %v6458_v11 = vor.u32 %v6763_v27, %v6455_v1 }
 0x5e4   :  { %v3457_v4 = vpop.f32.mrf.mxu3  ;;  %3777 = vmatmul.bf16.gmra.mxu0 %v3525_v32  ;;  %3955 = vmatmul.bf16.gmra.mxu2 %v3525_v32  ;;  %v6446_v32 = vor.u32 %v6762_v29, %v6445_v39  ;;  %v9174_v39 = vpop.f32.mrf.mxu0 }
 0x5e5   :  { %3840 = vmatpush.bf16.msra.mxu1 %v6462_v7  ;;  %v3458_v21 = vadd.f32 %v3457_v4, %v9052_v57 }
 0x5e7   :  { %v3284_v25 = vpop.f32.mrf.mxu1  ;;  %4018 = vmatpush.bf16.msra.mxu3 %v6466_v23  ;;  %v6422_v23 = vor.u32 %v6756_v12, %v6421_v28 }
 0x5e8   :  { %v3285_v51 = vadd.f32 %v3284_v25, %v9062_v16  ;;  %v6439_v25 = vld [vmem:[#allocation2 + $0x3a8] sm:$0xf0] }
 0x5e9   :  { %3841 = vmatpush.bf16.msra.mxu1 %v6454_v48  ;;  %v9168_v49 = vpop.f32.mrf.mxu2  ;;  %v6442_v19 = vor.u32 %v6759_v40, %v6439_v25  ;;  %v11504_v48 = vld [vmem:[#allocation37_spill] sm:$0xff] }
 0x5ea   :  { %3323 = vmatmul.bf16.gmra.mxu1 %v11503_v15 }
 0x5eb   :  { %4019 = vmatpush.bf16.msra.mxu3 %v6458_v11 }
 0x5ec   :  { %v3459_v14 = vpop.f32.mrf.mxu3 }
 0x5ed   :  { %v3460_v60 = vadd.f32 %v3459_v14, %v9058_v10  ;;  %v6760_v10 = vld [vmem:[#allocation2 + $0x3a4] sm:$0xf0]  ;;  %3842 = vmatpush.bf16.msra.mxu1 %v6446_v32  ;;  %v6423_v32 = vld [vmem:[#allocation2 + $0x388] sm:$0xf0] }
 0x5ee   :  { %v6438_v16 = vor.u32 %v6760_v10, %v6437_v59  ;;  %v9182_v59 = vpop.f32.mrf.mxu0 }
 0x5ef   :  { %v9162_v50 = vpack.c.bf16 %v3460_v60, %v3458_v21  ;;  %v3286_v63 = vpop.f32.mrf.mxu1  ;;  %4020 = vmatpush.bf16.msra.mxu3 %v6450_v24 }
 0x5f0   :  { %v3287_v35 = vadd.f32 %v3286_v63, %v9068_v20  ;;  %v6758_v20 = vld [vmem:[#allocation2 + $0x394] sm:$0xf0] }
 0x5f1   :  { %3501 = vmatmul.bf16.gmra.mxu3 %v11503_v15  ;;  %3843 = vmatpush.bf16.msra.mxu1 %v6438_v16  ;;  %v6430_v41 = vor.u32 %v6758_v20, %v6429_v38  ;;  %v6431_v15 = vld [vmem:[#allocation2 + $0x398] sm:$0xf0]  ;;  %v9179_v11 = vpop.f32.mrf.mxu2 }
 0x5f2   :  { %v3527_v57 = vpack.c.bf16 %v3287_v35, %v3285_v51  ;;  %v6434_v14 = vor.u32 %v6757_v3, %v6431_v15  ;;  %v6755_v35 = vld [vmem:[#allocation2 + $0x384] sm:$0xf] }
 0x5f3   :  { %4021 = vmatpush.bf16.msra.mxu3 %v6442_v19 }
 0x5f4   :  { %v3462_v4 = vpop.f32.mrf.mxu3  ;;  %3782 = vmatmul.bf16.gmra.mxu0 %v3527_v57  ;;  %3960 = vmatmul.bf16.gmra.mxu2 %v3527_v57  ;;  %v6426_v57 = vor.u32 %v6755_v35, %v6423_v32 }
 0x5f5   :  { %3844 = vmatpush.bf16.msra.mxu1 %v6430_v41  ;;  %v3463_v60 = vadd.f32 %v3462_v4, %v9064_v55 }
 0x5f6   :  { %v9194_v25 = vpop.f32.mrf.mxu0 }
 0x5f7   :  { %v3289_v7 = vpop.f32.mrf.mxu1  ;;  %4022 = vmatpush.bf16.msra.mxu3 %v6434_v14 }
 0x5f8   :  { %v3290_v63 = vadd.f32 %v3289_v7, %v9074_v44 }
 0x5f9   :  { %3845 = vmatpush.bf16.msra.mxu1 %v6422_v23  ;;  %v9184_v10 = vpop.f32.mrf.mxu2 }
 0x5fa   :  { %3328 = vmatmul.bf16.gmra.mxu1 %v11504_v48 }
 0x5fb   :  { %4023 = vmatpush.bf16.msra.mxu3 %v6426_v57 }
 0x5fc   :  { %v3464_v21 = vpop.f32.mrf.mxu3 }
 0x5fd   :  { %v3465_v51 = vadd.f32 %v3464_v21, %v9070_v62 }
 0x5ff   :  { %v9176_v29 = vpack.c.bf16 %v3465_v51, %v3463_v60  ;;  %v3291_v27 = vpop.f32.mrf.mxu1 }
 0x600   :  { %v3292_v1 = vadd.f32 %v3291_v27, %v9081_v56 }
 0x601   :  { %3506 = vmatmul.bf16.gmra.mxu3 %v11504_v48  ;;  %v9196_v7 = vpop.f32.mrf.mxu2 }
 0x602   :  { %v3529_v55 = vpack.c.bf16 %v3292_v1, %v3290_v63 }
 0x604   :  { %v3467_v62 = vpop.f32.mrf.mxu3  ;;  %3787 = vmatmul.bf16.gmra.mxu0 %v3529_v55  ;;  %3965 = vmatmul.bf16.gmra.mxu2 %v3529_v55 }
 0x605   :  { %v3468_v56 = vadd.f32 %v3467_v62, %v9076_v5 }
 0x607   :  { %v3294_v44 = vpop.f32.mrf.mxu1 }
 0x608   :  { %v3295_v4 = vadd.f32 %v3294_v44, %v9087_v42  ;;  %v9199_v42 = vpop.f32.mrf.mxu0 }
 0x609   :  { %v9204_v12 = vpop.f32.mrf.mxu2 }
 0x60a   :  { %3333 = vmatmul.bf16.gmra.mxu1 %v11505_v22 }
 0x60c   :  { %v3469_v16 = vpop.f32.mrf.mxu3 }
 0x60d   :  { %v3470_v43 = vadd.f32 %v3469_v16, %v9084_v47 }
 0x60f   :  { %v9190_v24 = vpack.c.bf16 %v3470_v43, %v3468_v56  ;;  %v3296_v38 = vpop.f32.mrf.mxu1 }
 0x610   :  { %v3297_v20 = vadd.f32 %v3296_v38, %v9094_v61  ;;  %v9210_v21 = vpop.f32.mrf.mxu0 }
 0x611   :  { %3511 = vmatmul.bf16.gmra.mxu3 %v11505_v22  ;;  %v9212_v60 = vpop.f32.mrf.mxu2 }
 0x612   :  { %v3531_v40 = vpack.c.bf16 %v3297_v20, %v3295_v4 }
 0x614   :  { %v3472_v41 = vpop.f32.mrf.mxu3  ;;  %3792 = vmatmul.bf16.gmra.mxu0 %v3531_v40  ;;  %3970 = vmatmul.bf16.gmra.mxu2 %v3531_v40 }
 0x615   :  { %v3473_v19 = vadd.f32 %v3472_v41, %v9089_v52 }
 0x617   :  { %v3299_v5 = vpop.f32.mrf.mxu1 }
 0x618   :  { %v3300_v28 = vadd.f32 %v3299_v5, %v9104_v30  ;;  %v9221_v35 = vpop.f32.mrf.mxu0 }
 0x619   :  { %v9224_v32 = vpop.f32.mrf.mxu2 }
 0x61a   :  { %3846 = vmatmul.bf16.vlgmr.msra.gmra.mxu1 %v9102_v6 }
 0x61c   :  { %v3474_v47 = vpop.f32.mrf.mxu3 }
 0x61d   :  { %v3475_v61 = vadd.f32 %v3474_v47, %v9096_v46 }
 0x61f   :  { %v9206_v3 = vpack.c.bf16 %v3475_v61, %v3473_v19  ;;  %v3301_v15 = vpop.f32.mrf.mxu1 }
 0x620   :  { %v3302_v48 = vadd.f32 %v3301_v15, %v9110_v26 }
 0x621   :  { %4024 = vmatmul.bf16.vlgmr.msra.gmra.mxu3 %v9102_v6 }
 0x622   :  { %v3533_v23 = vpack.c.bf16 %v3302_v48, %v3300_v28 }
 0x624   :  { %v3477_v14 = vpop.f32.mrf.mxu3  ;;  %3797 = vmatmul.bf16.gmra.mxu0 %v3533_v23  ;;  %3975 = vmatmul.bf16.gmra.mxu2 %v3533_v23 }
 0x625   :  { %v3478_v30 = vadd.f32 %v3477_v14, %v9107_v13 }
 0x627   :  { %v3304_v52 = vpop.f32.mrf.mxu1 }
 0x628   :  { %v3305_v26 = vadd.f32 %v3304_v52, %v9122_v33  ;;  %v9229_v33 = vpop.f32.mrf.mxu2 }
 0x62a   :  { %3851 = vmatmul.bf16.gmra.mxu1 %v9118_v58 }
 0x62c   :  { %v3479_v46 = vpop.f32.mrf.mxu3 }
 0x62d   :  { %v3480_v51 = vadd.f32 %v3479_v46, %v9113_v8  ;;  %v9227_v8 = vpop.f32.mrf.mxu0 }
 0x62f   :  { %v9218_v63 = vpack.c.bf16 %v3480_v51, %v3478_v30  ;;  %v3306_v6 = vpop.f32.mrf.mxu1 }
 0x630   :  { %v3307_v27 = vadd.f32 %v3306_v6, %v9129_v9  ;;  %v9240_v38 = vpop.f32.mrf.mxu2 }
 0x631   :  { %4029 = vmatmul.bf16.gmra.mxu3 %v9118_v58 }
 0x632   :  { %v3535_v1 = vpack.c.bf16 %v3307_v27, %v3305_v26 }
 0x634   :  { %v3482_v57 = vpop.f32.mrf.mxu3  ;;  %3802 = vmatmul.bf16.gmra.mxu0 %v3535_v1  ;;  %3980 = vmatmul.bf16.gmra.mxu2 %v3535_v1 }
 0x635   :  { %v3483_v9 = vadd.f32 %v3482_v57, %v9124_v54  ;;  %v9238_v4 = vpop.f32.mrf.mxu0 }
 0x637   :  { %v3309_v13 = vpop.f32.mrf.mxu1 }
 0x638   :  { %v3310_v58 = vadd.f32 %v3309_v13, %v9138_v36  ;;  %v9250_v5 = vpop.f32.mrf.mxu2 }
 0x63a   :  { %3856 = vmatmul.bf16.gmra.mxu1 %v9134_v53 }
 0x63c   :  { %v3484_v55 = vpop.f32.mrf.mxu3 }
 0x63d   :  { %v3485_v62 = vadd.f32 %v3484_v55, %v9132_v0  ;;  %v9246_v40 = vpop.f32.mrf.mxu0 }
 0x63f   :  { %v9234_v44 = vpack.c.bf16 %v3485_v62, %v3483_v9  ;;  %v3311_v22 = vpop.f32.mrf.mxu1 }
 0x640   :  { %v3312_v16 = vadd.f32 %v3311_v22, %v9150_v37 }
 0x641   :  { %4034 = vmatmul.bf16.gmra.mxu3 %v9134_v53 }
 0x642   :  { %v3537_v56 = vpack.c.bf16 %v3312_v16, %v3310_v58 }
 0x644   :  { %v3487_v43 = vpop.f32.mrf.mxu3  ;;  %3807 = vmatmul.bf16.gmra.mxu0 %v3537_v56  ;;  %3985 = vmatmul.bf16.gmra.mxu2 %v3537_v56 }
 0x645   :  { %v3488_v36 = vadd.f32 %v3487_v43, %v9140_v31  ;;  %v9254_v28 = vpop.f32.mrf.mxu0 }
 0x647   :  { %v3314_v54 = vpop.f32.mrf.mxu1 }
 0x648   :  { %v3315_v37 = vadd.f32 %v3314_v54, %v9155_v2 }
 0x64a   :  { %3861 = vmatmul.bf16.gmra.mxu1 %v9146_v34 }
 0x64c   :  { %v3489_v0 = vpop.f32.mrf.mxu3 }
 0x64d   :  { %v3490_v20 = vadd.f32 %v3489_v0, %v9152_v45  ;;  %v9256_v45 = vpop.f32.mrf.mxu2  ;;  %v9266_v46 = vpop.f32.mrf.mxu0 }
 0x64f   :  { %v9248_v53 = vpack.c.bf16 %v3490_v20, %v3488_v36  ;;  %v3316_v41 = vpop.f32.mrf.mxu1 }
 0x650   :  { %v3317_v47 = vadd.f32 %v3316_v41, %v9166_v17 }
 0x651   :  { %4039 = vmatmul.bf16.gmra.mxu3 %v9146_v34 }
 0x652   :  { %v3539_v19 = vpack.c.bf16 %v3317_v47, %v3315_v37 }
 0x654   :  { %v3492_v61 = vpop.f32.mrf.mxu3  ;;  %3812 = vmatmul.bf16.gmra.mxu0 %v3539_v19  ;;  %3990 = vmatmul.bf16.gmra.mxu2 %v3539_v19 }
 0x655   :  { %v3493_v15 = vadd.f32 %v3492_v61, %v9157_v18  ;;  %v9268_v30 = vpop.f32.mrf.mxu2 }
 0x657   :  { %v3319_v31 = vpop.f32.mrf.mxu1 }
 0x658   :  { %v3320_v17 = vadd.f32 %v3319_v31, %v9174_v39  ;;  %v9271_v39 = vpop.f32.mrf.mxu0 }
 0x65a   :  { %3866 = vmatmul.bf16.gmra.mxu1 %v9162_v50 }
 0x65c   :  { %v3494_v2 = vpop.f32.mrf.mxu3 }
 0x65d   :  { %v3495_v48 = vadd.f32 %v3494_v2, %v9168_v49  ;;  %v9275_v6 = vpop.f32.mrf.mxu2 }
 0x65f   :  { %v9262_v23 = vpack.c.bf16 %v3495_v48, %v3493_v15  ;;  %v3321_v34 = vpop.f32.mrf.mxu1  ;;  %v3583_v15 = vld [vmem:[#allocation4 + $0x4] ss:$8 sm:$0x3] }
 0x660   :  { %v3322_v14 = vadd.f32 %v3321_v34, %v9182_v59  ;;  %v9282_v9 = vpop.f32.mrf.mxu0 }
 0x661   :  { %4044 = vmatmul.bf16.gmra.mxu3 %v9162_v50 }
 0x662   :  { %v3541_v52 = vpack.c.bf16 %v3322_v14, %v3320_v17 }
 0x664   :  { %v3497_v51 = vpop.f32.mrf.mxu3  ;;  %3817 = vmatmul.bf16.gmra.mxu0 %v3541_v52  ;;  %3995 = vmatmul.bf16.gmra.mxu2 %v3541_v52 }
 0x665   :  { %v3498_v26 = vadd.f32 %v3497_v51, %v9179_v11  ;;  %v9284_v62 = vpop.f32.mrf.mxu2 }
 0x667   :  { %v3324_v18 = vpop.f32.mrf.mxu1 }
 0x668   :  { %v3325_v50 = vadd.f32 %v3324_v18, %v9194_v25  ;;  %v9293_v56 = vpop.f32.mrf.mxu0 }
 0x66a   :  { %3871 = vmatmul.bf16.gmra.mxu1 %v9176_v29 }
 0x66c   :  { %v3499_v49 = vpop.f32.mrf.mxu3 }
 0x66d   :  { %v3500_v59 = vadd.f32 %v3499_v49, %v9184_v10  ;;  %v9296_v43 = vpop.f32.mrf.mxu2 }
 0x66f   :  { %v9278_v27 = vpack.c.bf16 %v3500_v59, %v3498_v26  ;;  %v3326_v1 = vpop.f32.mrf.mxu1 }
 0x670   :  { %v3327_v57 = vadd.f32 %v3326_v1, %v9199_v42 }
 0x671   :  { %4049 = vmatmul.bf16.gmra.mxu3 %v9176_v29 }
 0x672   :  { %v3543_v13 = vpack.c.bf16 %v3327_v57, %v3325_v50 }
 0x674   :  { %v3502_v55 = vpop.f32.mrf.mxu3  ;;  %3822 = vmatmul.bf16.gmra.mxu0 %v3543_v13  ;;  %4000 = vmatmul.bf16.gmra.mxu2 %v3543_v13 }
 0x675   :  { %v3503_v25 = vadd.f32 %v3502_v55, %v9196_v7 }
 0x677   :  { %v3329_v11 = vpop.f32.mrf.mxu1 }
 0x678   :  { %v3330_v42 = vadd.f32 %v3329_v11, %v9210_v21  ;;  %v9301_v21 = vpop.f32.mrf.mxu2 }
 0x67a   :  { %3876 = vmatmul.bf16.gmra.mxu1 %v9190_v24 }
 0x67c   :  { %v3504_v10 = vpop.f32.mrf.mxu3 }
 0x67d   :  { %v3505_v58 = vadd.f32 %v3504_v10, %v9204_v12  ;;  %v9299_v12 = vpop.f32.mrf.mxu0 }
 0x67f   :  { %v9290_v22 = vpack.c.bf16 %v3505_v58, %v3503_v25  ;;  %v3331_v29 = vpop.f32.mrf.mxu1 }
 0x680   :  { %v3332_v16 = vadd.f32 %v3331_v29, %v9221_v35  ;;  %v9312_v2 = vpop.f32.mrf.mxu2 }
 0x681   :  { %4054 = vmatmul.bf16.gmra.mxu3 %v9190_v24 }
 0x682   :  { %v3545_v54 = vpack.c.bf16 %v3332_v16, %v3330_v42 }
 0x684   :  { %v3507_v0 = vpop.f32.mrf.mxu3  ;;  %3827 = vmatmul.bf16.gmra.mxu0 %v3545_v54  ;;  %4005 = vmatmul.bf16.gmra.mxu2 %v3545_v54 }
 0x685   :  { %v3508_v35 = vadd.f32 %v3507_v0, %v9212_v60  ;;  %v9310_v31 = vpop.f32.mrf.mxu0 }
 0x687   :  { %v3334_v7 = vpop.f32.mrf.mxu1 }
 0x688   :  { %v3335_v24 = vadd.f32 %v3334_v7, %v9227_v8  ;;  %v9315_v8 = vperm.slane %v3583_v15, 0  ;;  %v9356_v25 = vpop.f32.mrf.mxu2 }
 0x68a   :  { %3881 = vmatmul.bf16.gmra.mxu1 %v9206_v3  ;;  %v3759_v14 = vadd.f32 %v9246_v40, %v9315_v8  ;;  %v3761_v40 = vadd.f32 %v9254_v28, %v9315_v8  ;;  %v3764_v11 = vadd.f32 %v9266_v46, %v9315_v8 }
 0x68c   :  { %v3509_v36 = vpop.f32.mrf.mxu3 }
 0x68d   :  { %v3510_v20 = vadd.f32 %v3509_v36, %v9224_v32  ;;  %v9345_v57 = vpop.f32.mrf.mxu0 }
 0x68f   :  { %v9306_v37 = vpack.c.bf16 %v3510_v20, %v3508_v35  ;;  %v3336_v41 = vpop.f32.mrf.mxu1 }
 0x690   :  { %v3337_v47 = vadd.f32 %v3336_v41, %v9238_v4  ;;  %v9375_v20 = vpop.f32.mrf.mxu2 }
 0x691   :  { %4059 = vmatmul.bf16.gmra.mxu3 %v9206_v3  ;;  %v9319_v3 = vperm.slane %v3583_v15, 1 }
 0x692   :  { %v3547_v19 = vpack.c.bf16 %v3337_v47, %v3335_v24 }
 0x693   :  { %v3937_v52 = vadd.f32 %v9250_v5, %v9319_v3  ;;  %v3942_v10 = vadd.f32 %v9268_v30, %v9319_v3  ;;  %v3944_v7 = vadd.f32 %v9275_v6, %v9319_v3 }
 0x694   :  { %v3512_v61 = vpop.f32.mrf.mxu3  ;;  %3832 = vmatmul.bf16.gmra.mxu0 %v3547_v19  ;;  %4010 = vmatmul.bf16.gmra.mxu2 %v3547_v19  ;;  %v3769_v19 = vadd.f32 %v9282_v9, %v9315_v8 }
 0x695   :  { %v3513_v48 = vadd.f32 %v3512_v61, %v9229_v33  ;;  %v9368_v0 = vpop.f32.mrf.mxu0  ;;  %v3947_v61 = vadd.f32 %v9284_v62, %v9319_v3  ;;  %v3771_v62 = vadd.f32 %v9293_v56, %v9315_v8 }
 0x697   :  { %v3847_v60 = vpop.f32.mrf.mxu1 }
 0x698   :  { %v9328_v51 = vadd.f32 %v3847_v60, %v3759_v14 }
 0x69a   :  { %3886 = vmatmul.bf16.gmra.mxu1 %v9218_v63  ;;  %v4169_v33 = vmul.f32 %v9328_v51, %v9328_v51 }
 0x69c   :  { %v3514_v32 = vpop.f32.mrf.mxu3 }
 0x69d   :  { %v3515_v4 = vadd.f32 %v3514_v32, %v9240_v38  ;;  %v9388_v60 = vpop.f32.mrf.mxu0 }
 0x69f   :  { %v9321_v17 = vpack.c.bf16 %v3515_v4, %v3513_v48  ;;  %v3849_v34 = vpop.f32.mrf.mxu1  ;;  %v9394_v4 = vpop.f32.mrf.mxu2 }
 0x6a0   :  { %v9341_v5 = vadd.f32 %v3849_v34, %v3761_v40 }
 0x6a1   :  { %4064 = vmatmul.bf16.gmra.mxu3 %v9218_v63  ;;  %v3939_v63 = vadd.f32 %v9256_v45, %v9319_v3 }
 0x6a2   :  { %v4171_v55 = vmul.f32 %v9341_v5, %v9341_v5 }
 0x6a4   :  { %v4025_v18 = vpop.f32.mrf.mxu3 }
 0x6a5   :  { %v9330_v49 = vadd.f32 %v4025_v18, %v3937_v52  ;;  %v3949_v52 = vadd.f32 %v9296_v43, %v9319_v3 }
 0x6a7   :  { %v4170_v38 = vmul.f32 %v9330_v49, %v9330_v49  ;;  %v3852_v26 = vpop.f32.mrf.mxu1 }
 0x6a8   :  { %v9358_v58 = vadd.f32 %v3852_v26, %v3764_v11 }
 0x6a9   :  { %v4233_v59 = vadd.f32 %v4170_v38, %v4169_v33  ;;  %v9407_v38 = vpop.f32.mrf.mxu0 }
 0x6aa   :  { %3891 = vmatmul.bf16.gmra.mxu1 %v9234_v44  ;;  %v4173_v16 = vmul.f32 %v9358_v58, %v9358_v58 }
 0x6ab   :  { %4234 = vadd.xlane.f32.xlu2 %v4233_v59 }
 0x6ac   :  { %v4027_v50 = vpop.f32.mrf.mxu3 }
 0x6ad   :  { %v9343_v1 = vadd.f32 %v4027_v50, %v3939_v63  ;;  %v3774_v63 = vadd.f32 %v9299_v12, %v9315_v8  ;;  %v9417_v50 = vpop.f32.mrf.mxu2 }
 0x6af   :  { %v3854_v13 = vpop.f32.mrf.mxu1  ;;  %v4172_v28 = vmul.f32 %v9343_v1, %v9343_v1 }
 0x6b1   :  { %4069 = vmatmul.bf16.gmra.mxu3 %v9234_v44  ;;  %v4236_v45 = vadd.f32 %v4172_v28, %v4171_v55  ;;  %v3766_v44 = vadd.f32 %v9271_v39, %v9315_v8 }
 0x6b3   :  { %4237 = vadd.xlane.f32.xlu0 %v4236_v45  ;;  %v9373_v36 = vadd.f32 %v3854_v13, %v3766_v44  ;;  %v3952_v13 = vadd.f32 %v9301_v21, %v9319_v3  ;;  %v9426_v45 = vpop.f32.mrf.mxu0  ;;  %v3954_v21 = vadd.f32 %v9312_v2, %v9319_v3 }
 0x6b4   :  { %v4030_v42 = vpop.f32.mrf.mxu3 }
 0x6b5   :  { %v9360_v29 = vadd.f32 %v4030_v42, %v3942_v10  ;;  %v4175_v39 = vmul.f32 %v9373_v36, %v9373_v36 }
 0x6b7   :  { %v4174_v46 = vmul.f32 %v9360_v29, %v9360_v29  ;;  %v3857_v54 = vpop.f32.mrf.mxu1 }
 0x6b8   :  { %v9390_v15 = vadd.f32 %v3857_v54, %v3769_v19 }
 0x6b9   :  { %v4239_v30 = vadd.f32 %v4174_v46, %v4173_v16  ;;  %v3966_v46 = vpop.f32.mrf.mxu2 }
 0x6ba   :  { %3896 = vmatmul.bf16.gmra.mxu1 %v9248_v53  ;;  %v4177_v34 = vmul.f32 %v9390_v15, %v9390_v15 }
 0x6bb   :  { %4240 = vadd.xlane.f32.xlu1 %v4239_v30 }
 0x6bc   :  { %v4032_v35 = vpop.f32.mrf.mxu3 }
 0x6bd   :  { %v9377_v24 = vadd.f32 %v4032_v35, %v3944_v7 }
 0x6bf   :  { %v3859_v41 = vpop.f32.mrf.mxu1  ;;  %v4176_v47 = vmul.f32 %v9377_v24, %v9377_v24 }
 0x6c0   :  { %v9405_v18 = vadd.f32 %v3859_v41, %v3771_v62  ;;  %v3779_v41 = vadd.f32 %v9345_v57, %v9315_v8 }
 0x6c1   :  { %4074 = vmatmul.bf16.gmra.mxu3 %v9248_v53  ;;  %v4242_v6 = vadd.f32 %v4176_v47, %v4175_v39  ;;  %v3790_v39 = vpop.f32.mrf.mxu0  ;;  %v3957_v47 = vadd.f32 %v9356_v25, %v9319_v3  ;;  %v3959_v25 = vadd.f32 %v9375_v20, %v9319_v3 }
 0x6c2   :  { %v4179_v59 = vmul.f32 %v9405_v18, %v9405_v18 }
 0x6c3   :  { %4243 = vadd.xlane.f32.xlu2 %v4242_v6 }
 0x6c4   :  { %v4035_v32 = vpop.f32.mrf.mxu3 }
 0x6c5   :  { %v9392_v48 = vadd.f32 %v4035_v32, %v3947_v61  ;;  %v3968_v61 = vpop.f32.mrf.mxu2 }
 0x6c7   :  { %v4178_v53 = vmul.f32 %v9392_v48, %v9392_v48  ;;  %v3862_v9 = vpop.f32.mrf.mxu1 }
 0x6c8   :  { %v9422_v55 = vadd.f32 %v3862_v9, %v3774_v63  ;;  %v3784_v63 = vadd.f32 %v9388_v60, %v9315_v8 }
 0x6c9   :  { %v4245_v14 = vadd.f32 %v4178_v53, %v4177_v34  ;;  %v3793_v62 = vpop.f32.mrf.mxu0 }
 0x6ca   :  { %3901 = vmatmul.bf16.gmra.mxu1 %v9262_v23  ;;  %v4181_v10 = vmul.f32 %v9422_v55, %v9422_v55 }
 0x6cb   :  { %4246 = vadd.xlane.f32.xlu0 %v4245_v14 }
 0x6cc   :  { %v4037_v33 = vpop.f32.mrf.mxu3 }
 0x6cd   :  { %v9409_v26 = vadd.f32 %v4037_v33, %v3949_v52 }
 0x6cf   :  { %v3864_v40 = vpop.f32.mrf.mxu1  ;;  %v4180_v56 = vmul.f32 %v9409_v26, %v9409_v26 }
 0x6d1   :  { %4079 = vmatmul.bf16.gmra.mxu3 %v9262_v23  ;;  %v4248_v43 = vadd.f32 %v4180_v56, %v4179_v59  ;;  %v3776_v23 = vadd.f32 %v9310_v31, %v9315_v8 }
 0x6d3   :  { %4249 = vadd.xlane.f32.xlu1 %v4248_v43  ;;  %v9437_v54 = vadd.f32 %v3864_v40, %v3776_v23  ;;  %v3971_v40 = vpop.f32.mrf.mxu2  ;;  %v3962_v43 = vadd.f32 %v9394_v4, %v9319_v3  ;;  %v3964_v4 = vadd.f32 %v9417_v50, %v9319_v3 }
 0x6d4   :  { %v4040_v28 = vpop.f32.mrf.mxu3 }
 0x6d5   :  { %v9424_v11 = vadd.f32 %v4040_v28, %v3952_v13  ;;  %v4183_v35 = vmul.f32 %v9437_v54, %v9437_v54 }
 0x6d7   :  { %v4182_v12 = vmul.f32 %v9424_v11, %v9424_v11  ;;  %v3867_v42 = vpop.f32.mrf.mxu1 }
 0x6d8   :  { %v9450_v19 = vadd.f32 %v3867_v42, %v3779_v41 }
 0x6d9   :  { %v4251_v16 = vadd.f32 %v4182_v12, %v4181_v10  ;;  %v3795_v10 = vpop.f32.mrf.mxu0 }
 0x6da   :  { %3906 = vmatmul.bf16.gmra.mxu1 %v9278_v27  ;;  %v4185_v34 = vmul.f32 %v9450_v19, %v9450_v19 }
 0x6db   :  { %4252 = vadd.xlane.f32.xlu2 %v4251_v16  ;;  %v3973_v16 = vpop.f32.mrf.mxu2 }
 0x6dc   :  { %v4042_v44 = vpop.f32.mrf.mxu3 }
 0x6dd   :  { %v9439_v30 = vadd.f32 %v4042_v44, %v3954_v21 }
 0x6df   :  { %v3869_v7 = vpop.f32.mrf.mxu1  ;;  %v4184_v31 = vmul.f32 %v9439_v30, %v9439_v30 }
 0x6e1   :  { %4084 = vmatmul.bf16.gmra.mxu3 %v9278_v27  ;;  %v4254_v2 = vadd.f32 %v4184_v31, %v4183_v35  ;;  %v3781_v27 = vadd.f32 %v9368_v0, %v9315_v8  ;;  %v3798_v31 = vpop.f32.mrf.mxu0 }
 0x6e3   :  { %4255 = vadd.xlane.f32.xlu0 %v4254_v2  ;;  %v9463_v14 = vadd.f32 %v3869_v7, %v3781_v27 }
 0x6e4   :  { %v4045_v6 = vpop.f32.mrf.mxu3 }
 0x6e5   :  { %v9452_v32 = vadd.f32 %v4045_v6, %v3957_v47  ;;  %v4187_v56 = vmul.f32 %v9463_v14, %v9463_v14  ;;  %v3789_v47 = vadd.f32 %v9426_v45, %v9315_v8  ;;  %v3967_v6 = vadd.f32 %v3966_v46, %v9319_v3 }
 0x6e6   :  { %v3791_v45 = vadd.f32 %v3790_v39, %v9315_v8  ;;  %v3969_v46 = vadd.f32 %v3968_v61, %v9319_v3  ;;  %v3972_v61 = vadd.f32 %v3971_v40, %v9319_v3  ;;  %v3974_v40 = vadd.f32 %v3973_v16, %v9319_v3 }
 0x6e7   :  { %v4186_v57 = vmul.f32 %v9452_v32, %v9452_v32  ;;  %v3872_v53 = vpop.f32.mrf.mxu1 }
 0x6e8   :  { %v9476_v13 = vadd.f32 %v3872_v53, %v3784_v63 }
 0x6e9   :  { %v4257_v9 = vadd.f32 %v4186_v57, %v4185_v34  ;;  %v3976_v34 = vpop.f32.mrf.mxu2 }
 0x6ea   :  { %3911 = vmatmul.bf16.gmra.mxu1 %v9290_v22  ;;  %v4189_v42 = vmul.f32 %v9476_v13, %v9476_v13  ;;  %v3977_v16 = vadd.f32 %v3976_v34, %v9319_v3 }
 0x6eb   :  { %4258 = vadd.xlane.f32.xlu1 %v4257_v9 }
 0x6ec   :  { %v4047_v52 = vpop.f32.mrf.mxu3 }
 0x6ed   :  { %v9465_v33 = vadd.f32 %v4047_v52, %v3959_v25 }
 0x6ef   :  { %v3874_v59 = vpop.f32.mrf.mxu1  ;;  %v4188_v0 = vmul.f32 %v9465_v33, %v9465_v33 }
 0x6f1   :  { %4089 = vmatmul.bf16.gmra.mxu3 %v9290_v22  ;;  %v4260_v20 = vadd.f32 %v4188_v0, %v4187_v56  ;;  %v3786_v22 = vadd.f32 %v9407_v38, %v9315_v8  ;;  %v3978_v63 = vpop.f32.mrf.mxu2 }
 0x6f3   :  { %4261 = vadd.xlane.f32.xlu2 %v4260_v20  ;;  %v9489_v44 = vadd.f32 %v3874_v59, %v3786_v22 }
 0x6f4   :  { %v4050_v28 = vpop.f32.mrf.mxu3 }
 0x6f5   :  { %v9478_v12 = vadd.f32 %v4050_v28, %v3962_v43  ;;  %v4191_v2 = vmul.f32 %v9489_v44, %v9489_v44 }
 0x6f7   :  { %v4190_v23 = vmul.f32 %v9478_v12, %v9478_v12  ;;  %v3877_v60 = vpop.f32.mrf.mxu1 }
 0x6f8   :  { %v9501_v57 = vadd.f32 %v3877_v60, %v3789_v47 }
 0x6f9   :  { %v4263_v21 = vadd.f32 %v4190_v23, %v4189_v42  ;;  %v3794_v42 = vadd.f32 %v3793_v62, %v9315_v8 }
 0x6fa   :  { %3916 = vmatmul.bf16.gmra.mxu1 %v9306_v37  ;;  %v4193_v9 = vmul.f32 %v9501_v57, %v9501_v57 }
 0x6fb   :  { %4264 = vadd.xlane.f32.xlu0 %v4263_v21 }
 0x6fc   :  { %v4052_v7 = vpop.f32.mrf.mxu3 }
 0x6fd   :  { %v9491_v35 = vadd.f32 %v4052_v7, %v3964_v4  ;;  %v3981_v7 = vpop.f32.mrf.mxu2 }
 0x6ff   :  { %v3879_v41 = vpop.f32.mrf.mxu1  ;;  %v4192_v38 = vmul.f32 %v9491_v35, %v9491_v35 }
 0x700   :  { %v9512_v56 = vadd.f32 %v3879_v41, %v3791_v45  ;;  %v3799_v45 = vadd.f32 %v3798_v31, %v9315_v8 }
 0x701   :  { %4094 = vmatmul.bf16.gmra.mxu3 %v9306_v37  ;;  %v4266_v50 = vadd.f32 %v4192_v38, %v4191_v2  ;;  %v3800_v37 = vpop.f32.mrf.mxu0 }
 0x702   :  { %v4195_v28 = vmul.f32 %v9512_v56, %v9512_v56  ;;  %v3801_v31 = vadd.f32 %v3800_v37, %v9315_v8 }
 0x703   :  { %4267 = vadd.xlane.f32.xlu1 %v4266_v50 }
 0x704   :  { %v4055_v53 = vpop.f32.mrf.mxu3 }
 0x705   :  { %v9503_v27 = vadd.f32 %v4055_v53, %v3967_v6 }
 0x707   :  { %v4194_v25 = vmul.f32 %v9503_v27, %v9503_v27  ;;  %v3882_v52 = vpop.f32.mrf.mxu1 }
 0x708   :  { %v9523_v22 = vadd.f32 %v3882_v52, %v3794_v42 }
 0x709   :  { %v4269_v59 = vadd.f32 %v4194_v25, %v4193_v9  ;;  %v3803_v60 = vpop.f32.mrf.mxu0 }
 0x70a   :  { %3921 = vmatmul.bf16.gmra.mxu1 %v9321_v17  ;;  %v4197_v41 = vmul.f32 %v9523_v22, %v9523_v22 }
 0x70b   :  { %4270 = vadd.xlane.f32.xlu2 %v4269_v59 }
 0x70c   :  { %v4057_v0 = vpop.f32.mrf.mxu3 }
 0x70d   :  { %v9514_v20 = vadd.f32 %v4057_v0, %v3969_v46 }
 0x70f   :  { %v3884_v43 = vpop.f32.mrf.mxu1  ;;  %v4196_v39 = vmul.f32 %v9514_v20, %v9514_v20 }
 0x711   :  { %4099 = vmatmul.bf16.gmra.mxu3 %v9321_v17  ;;  %v4272_v23 = vadd.f32 %v4196_v39, %v4195_v28  ;;  %v3796_v17 = vadd.f32 %v3795_v10, %v9315_v8  ;;  %v3805_v6 = vpop.f32.mrf.mxu0  ;;  %v3983_v10 = vpop.f32.mrf.mxu2 }
 0x713   :  { %4273 = vadd.xlane.f32.xlu0 %v4272_v23  ;;  %v9533_v47 = vadd.f32 %v3884_v43, %v3796_v17 }
 0x714   :  { %v4060_v21 = vpop.f32.mrf.mxu3 }
 0x715   :  { %v9525_v4 = vadd.f32 %v4060_v21, %v3972_v61  ;;  %v4199_v25 = vmul.f32 %v9533_v47, %v9533_v47  ;;  %v3979_v21 = vadd.f32 %v3978_v63, %v9319_v3  ;;  %v3982_v63 = vadd.f32 %v3981_v7, %v9319_v3 }
 0x716   :  { %v3984_v7 = vadd.f32 %v3983_v10, %v9319_v3 }
 0x717   :  { %v4198_v2 = vmul.f32 %v9525_v4, %v9525_v4  ;;  %v3887_v62 = vpop.f32.mrf.mxu1 }
 0x718   :  { %v9543_v46 = vadd.f32 %v3887_v62, %v3799_v45 }
 0x719   :  { %v4275_v38 = vadd.f32 %v4198_v2, %v4197_v41  ;;  %v3808_v28 = vpop.f32.mrf.mxu0  ;;  %v3986_v34 = vpop.f32.mrf.mxu2 }
 0x71a   :  { %v4201_v39 = vmul.f32 %v9543_v46, %v9543_v46 }
 0x71b   :  { %4276 = vadd.xlane.f32.xlu1 %v4275_v38 }
 0x71c   :  { %v4062_v50 = vpop.f32.mrf.mxu3 }
 0x71d   :  { %v9535_v53 = vadd.f32 %v4062_v50, %v3974_v40  ;;  %v3804_v50 = vadd.f32 %v3803_v60, %v9315_v8  ;;  %v3806_v60 = vadd.f32 %v3805_v6, %v9315_v8 }
 0x71f   :  { %v3889_v9 = vpop.f32.mrf.mxu1  ;;  %v4200_v52 = vmul.f32 %v9535_v53, %v9535_v53 }
 0x720   :  { %v9553_v41 = vadd.f32 %v3889_v9, %v3801_v31 }
 0x721   :  { %v4278_v59 = vadd.f32 %v4200_v52, %v4199_v25  ;;  %v3810_v37 = vpop.f32.mrf.mxu0  ;;  %v3988_v45 = vpop.f32.mrf.mxu2 }
 0x722   :  { %v4203_v38 = vmul.f32 %v9553_v41, %v9553_v41 }
 0x723   :  { %4279 = vadd.xlane.f32.xlu2 %v4278_v59 }
 0x724   :  { %v4065_v0 = vpop.f32.mrf.mxu3 }
 0x725   :  { %v9545_v43 = vadd.f32 %v4065_v0, %v3977_v16 }
 0x727   :  { %v4202_v42 = vmul.f32 %v9545_v43, %v9545_v43  ;;  %v3892_v23 = vpop.f32.mrf.mxu1 }
 0x728   :  { %v9563_v52 = vadd.f32 %v3892_v23, %v3804_v50 }
 0x729   :  { %v4281_v61 = vadd.f32 %v4202_v42, %v4201_v39  ;;  %v3813_v31 = vpop.f32.mrf.mxu0 }
 0x72a   :  { %11507 = vst [vmem:[#allocation62_spill] sm:$0xff] %v9563_v52  ;;  %v4205_v16 = vmul.f32 %v9563_v52, %v9563_v52  ;;  %v11533_v52 = vld [vmem:[#allocation67_spill] sm:$0xff] }
 0x72b   :  { %4282 = vadd.xlane.f32.xlu0 %v4281_v61 }
 0x72c   :  { %v4067_v2 = vpop.f32.mrf.mxu3 }
 0x72d   :  { %v9555_v62 = vadd.f32 %v4067_v2, %v3979_v21  ;;  %v3991_v2 = vpop.f32.mrf.mxu2 }
 0x72f   :  { %11506 = vst [vmem:[#allocation61_spill] sm:$0xff] %v9555_v62  ;;  %v3894_v17 = vpop.f32.mrf.mxu1  ;;  %v4204_v40 = vmul.f32 %v9555_v62, %v9555_v62 }
 0x730   :  { %v9573_v61 = vadd.f32 %v3894_v17, %v3806_v60 }
 0x731   :  { %v4284_v25 = vadd.f32 %v4204_v40, %v4203_v38  ;;  %v3815_v17 = vpop.f32.mrf.mxu0 }
 0x732   :  { %11509 = vst [vmem:[#allocation64_spill] sm:$0xff] %v9573_v61  ;;  %v4207_v40 = vmul.f32 %v9573_v61, %v9573_v61 }
 0x733   :  { %4285 = vadd.xlane.f32.xlu1 %v4284_v25  ;;  %v3809_v25 = vadd.f32 %v3808_v28, %v9315_v8  ;;  %v3811_v28 = vadd.f32 %v3810_v37, %v9315_v8 }
 0x734   :  { %v4070_v9 = vpop.f32.mrf.mxu3 }
 0x735   :  { %v9565_v59 = vadd.f32 %v4070_v9, %v3982_v63  ;;  %v3987_v63 = vadd.f32 %v3986_v34, %v9319_v3  ;;  %v3989_v34 = vadd.f32 %v3988_v45, %v9319_v3  ;;  %v3992_v45 = vadd.f32 %v3991_v2, %v9319_v3 }
 0x737   :  { %11508 = vst [vmem:[#allocation63_spill] sm:$0xff] %v9565_v59  ;;  %v4206_v0 = vmul.f32 %v9565_v59, %v9565_v59  ;;  %v3897_v39 = vpop.f32.mrf.mxu1 }
 0x738   :  { %v9583_v9 = vadd.f32 %v3897_v39, %v3809_v25 }
 0x739   :  { %v4287_v42 = vadd.f32 %v4206_v0, %v4205_v16  ;;  %v3818_v25 = vpop.f32.mrf.mxu0 }
 0x73a   :  { %11511 = vst [vmem:[#allocation66_spill] sm:$0xff] %v9583_v9 }
 0x73b   :  { %4288 = vadd.xlane.f32.xlu2 %v4287_v42  ;;  %v4209_v42 = vmul.f32 %v9583_v9, %v9583_v9 }
 0x73c   :  { %v4072_v23 = vpop.f32.mrf.mxu3 }
 0x73d   :  { %v9575_v21 = vadd.f32 %v4072_v23, %v3984_v7  ;;  %v3993_v7 = vpop.f32.mrf.mxu2 }
 0x73f   :  { %11510 = vst [vmem:[#allocation65_spill] sm:$0xff] %v9575_v21  ;;  %v3899_v38 = vpop.f32.mrf.mxu1  ;;  %v4208_v50 = vmul.f32 %v9575_v21, %v9575_v21 }
 0x741   :  { %v4290_v6 = vadd.f32 %v4208_v50, %v4207_v40  ;;  %v9593_v40 = vadd.f32 %v3899_v38, %v3811_v28 }
 0x743   :  { %4291 = vadd.xlane.f32.xlu0 %v4290_v6  ;;  %11513 = vst [vmem:[#allocation69_spill] sm:$0xff] %v9593_v40 }
 0x744   :  { %v4075_v10 = vpop.f32.mrf.mxu3 }
 0x745   :  { %v9585_v16 = vadd.f32 %v4075_v10, %v3987_v63  ;;  %v4211_v63 = vmul.f32 %v9593_v40, %v9593_v40 }
 0x747   :  { %11512 = vst [vmem:[#allocation68_spill] sm:$0xff] %v9585_v16  ;;  %v3902_v0 = vpop.f32.mrf.mxu1  ;;  %v4210_v60 = vmul.f32 %v9585_v16, %v9585_v16 }
 0x749   :  { %v4293_v23 = vadd.f32 %v4210_v60, %v4209_v42  ;;  %v3814_v42 = vadd.f32 %v3813_v31, %v9315_v8  ;;  %v3996_v60 = vpop.f32.mrf.mxu2  ;;  %v3816_v31 = vadd.f32 %v3815_v17, %v9315_v8 }
 0x74b   :  { %4294 = vadd.xlane.f32.xlu1 %v4293_v23  ;;  %v9603_v23 = vadd.f32 %v3902_v0, %v3814_v42 }
 0x74c   :  { %v4077_v39 = vpop.f32.mrf.mxu3 }
 0x74d   :  { %v9595_v50 = vadd.f32 %v4077_v39, %v3989_v34  ;;  %11515 = vst [vmem:[#allocation71_spill] sm:$0xff] %v9603_v23  ;;  %v4213_v39 = vmul.f32 %v9603_v23, %v9603_v23 }
 0x74f   :  { %11514 = vst [vmem:[#allocation70_spill] sm:$0xff] %v9595_v50  ;;  %v3904_v6 = vpop.f32.mrf.mxu1  ;;  %v4212_v10 = vmul.f32 %v9595_v50, %v9595_v50  ;;  %v3820_v50 = vpop.f32.mrf.mxu0 }
 0x751   :  { %v4296_v37 = vadd.f32 %v4212_v10, %v4211_v63  ;;  %v3994_v63 = vadd.f32 %v3993_v7, %v9319_v3  ;;  %v3998_v0 = vpop.f32.mrf.mxu2  ;;  %v9613_v10 = vadd.f32 %v3904_v6, %v3816_v31  ;;  %v3997_v7 = vadd.f32 %v3996_v60, %v9319_v3 }
 0x753   :  { %4297 = vadd.xlane.f32.xlu2 %v4296_v37  ;;  %11517 = vst [vmem:[#allocation73_spill] sm:$0xff] %v9613_v10 }
 0x754   :  { %v4080_v38 = vpop.f32.mrf.mxu3 }
 0x755   :  { %v9605_v28 = vadd.f32 %v4080_v38, %v3992_v45  ;;  %v4215_v45 = vmul.f32 %v9613_v10, %v9613_v10 }
 0x757   :  { %11516 = vst [vmem:[#allocation72_spill] sm:$0xff] %v9605_v28  ;;  %v3907_v34 = vpop.f32.mrf.mxu1  ;;  %v4214_v40 = vmul.f32 %v9605_v28, %v9605_v28 }
 0x759   :  { %v4299_v16 = vadd.f32 %v4214_v40, %v4213_v39  ;;  %v3819_v40 = vadd.f32 %v3818_v25, %v9315_v8  ;;  %v3823_v39 = vpop.f32.mrf.mxu0  ;;  %v4001_v31 = vpop.f32.mrf.mxu2  ;;  %v3821_v25 = vadd.f32 %v3820_v50, %v9315_v8 }
 0x75b   :  { %4300 = vadd.xlane.f32.xlu0 %v4299_v16  ;;  %v9623_v16 = vadd.f32 %v3907_v34, %v3819_v40 }
 0x75c   :  { %v4082_v2 = vpop.f32.mrf.mxu3 }
 0x75d   :  { %v9615_v42 = vadd.f32 %v4082_v2, %v3994_v63  ;;  %11519 = vst [vmem:[#allocation76_spill] sm:$0xff] %v9623_v16  ;;  %v4217_v2 = vmul.f32 %v9623_v16, %v9623_v16 }
 0x75f   :  { %11518 = vst [vmem:[#allocation74_spill] sm:$0xff] %v9615_v42  ;;  %v3909_v37 = vpop.f32.mrf.mxu1  ;;  %v4216_v38 = vmul.f32 %v9615_v42, %v9615_v42 }
 0x761   :  { %v4302_v17 = vadd.f32 %v4216_v38, %v4215_v45  ;;  %v3999_v45 = vadd.f32 %v3998_v0, %v9319_v3  ;;  %v3825_v34 = vpop.f32.mrf.mxu0  ;;  %v9633_v38 = vadd.f32 %v3909_v37, %v3821_v25  ;;  %v4002_v0 = vadd.f32 %v4001_v31, %v9319_v3 }
 0x763   :  { %4303 = vadd.xlane.f32.xlu1 %v4302_v17  ;;  %11521 = vst [vmem:[#allocation77_spill] sm:$0xff] %v9633_v38  ;;  %v4003_v17 = vpop.f32.mrf.mxu2 }
 0x764   :  { %v4085_v28 = vpop.f32.mrf.mxu3  ;;  %v4004_v31 = vadd.f32 %v4003_v17, %v9319_v3 }
 0x765   :  { %v9625_v6 = vadd.f32 %v4085_v28, %v3997_v7  ;;  %v4219_v7 = vmul.f32 %v9633_v38, %v9633_v38 }
 0x767   :  { %11520 = vst [vmem:[#allocation75_spill] sm:$0xff] %v9625_v6  ;;  %v3912_v63 = vpop.f32.mrf.mxu1  ;;  %v4218_v42 = vmul.f32 %v9625_v6, %v9625_v6 }
 0x769   :  { %v4305_v10 = vadd.f32 %v4218_v42, %v4217_v2  ;;  %v3824_v42 = vadd.f32 %v3823_v39, %v9315_v8  ;;  %v3828_v25 = vpop.f32.mrf.mxu0  ;;  %v3826_v39 = vadd.f32 %v3825_v34, %v9315_v8 }
 0x76b   :  { %4306 = vadd.xlane.f32.xlu2 %v4305_v10  ;;  %v9643_v10 = vadd.f32 %v3912_v63, %v3824_v42 }
 0x76c   :  { %v4087_v60 = vpop.f32.mrf.mxu3 }
 0x76d   :  { %v9635_v28 = vadd.f32 %v4087_v60, %v3999_v45  ;;  %11523 = vst [vmem:[#allocation40_spill] sm:$0xff] %v9643_v10  ;;  %v4221_v45 = vmul.f32 %v9643_v10, %v9643_v10 }
 0x76f   :  { %11522 = vst [vmem:[#allocation41_spill] sm:$0xff] %v9635_v28  ;;  %v3914_v40 = vpop.f32.mrf.mxu1  ;;  %v4220_v6 = vmul.f32 %v9635_v28, %v9635_v28 }
 0x771   :  { %v4308_v50 = vadd.f32 %v4220_v6, %v4219_v7  ;;  %v4006_v6 = vpop.f32.mrf.mxu2  ;;  %v9653_v7 = vadd.f32 %v3914_v40, %v3826_v39  ;;  %v4235_v40 = vpop.xlane.xlu2 %4234 }
 0x772   :  { %v9667_v10 = vmax.f32 %v4235_v40, 1e-24 }
 0x773   :  { %4309 = vadd.xlane.f32.xlu0 %v4308_v50  ;;  %11525 = vst [vmem:[#allocation43_spill] sm:$0xff] %v9653_v7  ;;  %v3830_v50 = vpop.f32.mrf.mxu0 }
 0x774   :  { %v4090_v2 = vpop.f32.mrf.mxu3  ;;  %6878 = vrsqrt.f32 %v9667_v10  ;;  %vm4367_vm9 = vweird.f32 %v9667_v10 }
 0x775   :  { %v9645_v37 = vadd.f32 %v4090_v2, %v4002_v0  ;;  %v4223_v0 = vmul.f32 %v9653_v7, %v9653_v7 }
 0x777   :  { %11524 = vst [vmem:[#allocation42_spill] sm:$0xff] %v9645_v37  ;;  %v4222_v60 = vmul.f32 %v9645_v37, %v9645_v37  ;;  %v3917_v38 = vpop.f32.mrf.mxu1  ;;  %v4007_v37 = vadd.f32 %v4006_v6, %v9319_v3 }
 0x779   :  { %v4311_v28 = vadd.f32 %v4222_v60, %v4221_v45  ;;  %v3829_v45 = vadd.f32 %v3828_v25, %v9315_v8  ;;  %v4008_v39 = vpop.f32.mrf.mxu2 }
 0x77b   :  { %4312 = vadd.xlane.f32.xlu1 %v4311_v28  ;;  %v9663_v17 = vadd.f32 %v3917_v38, %v3829_v45  ;;  %v3831_v38 = vadd.f32 %v3830_v50, %v9315_v8  ;;  %v4241_v45 = vpop.xlane.xlu1 %4240 }
 0x77c   :  { %v4092_v63 = vpop.f32.mrf.mxu3 }
 0x77d   :  { %v9655_v42 = vadd.f32 %v4092_v63, %v4004_v31  ;;  %11527 = vst [vmem:[#allocation45_spill] sm:$0xff] %v9663_v17  ;;  %v4238_v63 = vpop.xlane.xlu0 %4237 }
 0x77f   :  { %11526 = vst [vmem:[#allocation44_spill] sm:$0xff] %v9655_v42  ;;  %v4224_v2 = vmul.f32 %v9655_v42, %v9655_v42  ;;  %v3919_v60 = vpop.f32.mrf.mxu1  ;;  %v4225_v42 = vmul.f32 %v9663_v17, %v9663_v17  ;;  %v9681_v17 = vmax.f32 %v4241_v45, 1e-24 }
 0x781   :  { %v4314_v34 = vadd.f32 %v4224_v2, %v4223_v0  ;;  %v9673_v0 = vmax.f32 %v4238_v63, 1e-24  ;;  %v3833_v2 = vpop.f32.mrf.mxu0  ;;  %vm4387_vm15 = vweird.f32 %v9681_v17 }
 0x783   :  { %4315 = vadd.xlane.f32.xlu2 %v4314_v34  ;;  %6880 = vrsqrt.f32 %v9673_v0  ;;  %vm4377_vm12 = vweird.f32 %v9673_v0 }
 0x784   :  { %v4095_v28 = vpop.f32.mrf.mxu3  ;;  %6882 = vrsqrt.f32 %v9681_v17 }
 0x785   :  { %v9665_v31 = vadd.f32 %v4095_v28, %v4007_v37  ;;  %v4009_v37 = vadd.f32 %v4008_v39, %v9319_v3  ;;  %v9678_v28 = vadd.f32 %v3919_v60, %v3831_v38  ;;  %v9689_v39 = vpop.eup %6878  ;;  %v3834_v60 = vadd.f32 %v3833_v2, %v9315_v8 }
 0x786   :  { %vm4368_vm8 = vweird.f32 %v9689_v39 }
 0x787   :  { %11528 = vst [vmem:[#allocation46_spill] sm:$0xff] %v9665_v31  ;;  %v4226_v25 = vmul.f32 %v9665_v31, %v9665_v31  ;;  %v3922_v40 = vpop.f32.mrf.mxu1  ;;  %v4227_v50 = vmul.f32 %v9678_v28, %v9678_v28  ;;  %vm4369_vm11 = vmor %vm4367_vm9, %vm4368_vm8 }
 0x788   :  { %11529 = vst [vmem:[#allocation47_spill] sm:$0xff] %v9678_v28  ;;  %v9698_v7 = vadd.f32 %v3922_v40, %v3834_v60 }
 0x789   :  { %v4317_v6 = vadd.f32 %v4226_v25, %v4225_v42  ;;  %v4011_v42 = vpop.f32.mrf.mxu2  ;;  %v4244_v25 = vpop.xlane.xlu2 %4243 }
 0x78a   :  { %v9695_v45 = vpop.eup %6880  ;;  %11531 = vst [vmem:[#allocation49_spill] sm:$0xff] %v9698_v7  ;;  %v3835_v16 = vpop.f32.mrf.mxu0 }
 0x78b   :  { %4318 = vadd.xlane.f32.xlu0 %v4317_v6  ;;  %v9693_v6 = vmax.f32 %v4244_v25, 1e-24  ;;  %v4372_v2 = vmul.f32 %v9695_v45, %v9673_v0  ;;  %v3836_v40 = vadd.f32 %v3835_v16, %v9315_v8  ;;  %vm4378_vm10 = vweird.f32 %v9695_v45 }
 0x78c   :  { %v4097_v34 = vpop.f32.mrf.mxu3  ;;  %vm4379_vm13 = vmor %vm4377_vm12, %vm4378_vm10 }
 0x78d   :  { %v9683_v63 = vadd.f32 %v4097_v34, %v4009_v37  ;;  %v4012_v37 = vadd.f32 %v4011_v42, %v9319_v3  ;;  %v4247_v34 = vpop.xlane.xlu0 %4246  ;;  %6884 = vrsqrt.f32 %v9693_v6  ;;  %v9709_v42 = vpop.eup %6882  ;;  %vm4397_vm2 = vweird.f32 %v9693_v6 }
 0x78e   :  { %v4382_v61 = vmul.f32 %v9709_v42, %v9681_v17  ;;  %vm4388_vm14 = vweird.f32 %v9709_v42 }
 0x78f   :  { %11530 = vst [vmem:[#allocation48_spill] sm:$0xff] %v9683_v63  ;;  %v4228_v31 = vmul.f32 %v9683_v63, %v9683_v63  ;;  %v4362_v63 = vmul.f32 %v9689_v39, %v9667_v10  ;;  %v3924_v25 = vpop.f32.mrf.mxu1  ;;  %vm4389_vm0 = vmor %vm4387_vm15, %vm4388_vm14 }
 0x790   :  { %v3925_v9 = vadd.f32 %v3924_v25, %v3836_v40 }
 0x791   :  { %v4320_v38 = vadd.f32 %v4228_v31, %v4227_v50  ;;  %v9707_v31 = vmax.f32 %v4247_v34, 1e-24  ;;  %v4229_v50 = vmul.f32 %v9698_v7, %v9698_v7  ;;  %v4373_v34 = vmul.f32 %v9695_v45, %v4372_v2  ;;  %v4253_v59 = vpop.xlane.xlu2 %4252 }
 0x792   :  { %v9727_v25 = vmul.f32 %v11533_v52, %v3925_v9 }
 0x793   :  { %4321 = vadd.xlane.f32.xlu1 %v4320_v38  ;;  %v4013_v38 = vpop.f32.mrf.mxu2  ;;  %6886 = vrsqrt.f32 %v9707_v31  ;;  %v4374_v2 = vmul.f32 0.5, %v4373_v34  ;;  %vm4407_vm6 = vweird.f32 %v9707_v31 }
 0x794   :  { %v4100_v28 = vpop.f32.mrf.mxu3  ;;  %v4014_v8 = vadd.f32 %v4013_v38, %v9319_v3  ;;  %11534 = vst [vmem:[#allocation52_spill] sm:$0xff] %v9727_v25  ;;  %v9733_v3 = vmax.f32 %v4253_v59, 1e-24  ;;  %v4231_v9 = vmul.f32 %v9727_v25, %v9727_v25 }
 0x795   :  { %v9702_v23 = vadd.f32 %v4100_v28, %v4012_v37  ;;  %v4363_v28 = vmul.f32 %v9689_v39, %v4362_v63  ;;  %v4250_v37 = vpop.xlane.xlu1 %4249 }
 0x796   :  { %v9722_v16 = vmax.f32 %v4250_v37, 1e-24  ;;  %vm4427_vm12 = vweird.f32 %v9733_v3 }
 0x797   :  { %11532 = vst [vmem:[#allocation50_spill] sm:$0xff] %v9702_v23  ;;  %v4230_v60 = vmul.f32 %v9702_v23, %v9702_v23  ;;  %v9724_v23 = vpop.eup %6884  ;;  %v4364_v63 = vmul.f32 0.5, %v4363_v28 }
 0x798   :  { %6888 = vrsqrt.f32 %v9722_v16  ;;  %vm4398_vm1 = vweird.f32 %v9724_v23  ;;  %vm4417_vm9 = vweird.f32 %v9722_v16 }
 0x799   :  { %v4323_v21 = vadd.f32 %v4230_v60, %v4229_v50  ;;  %v4383_v50 = vmul.f32 %v9709_v42, %v4382_v61  ;;  %v4392_v60 = vmul.f32 %v9724_v23, %v9693_v6  ;;  %v9738_v38 = vpop.eup %6886  ;;  %v4365_v28 = vsub.f32 1.5, %v4364_v63  ;;  %vm4399_vm3 = vmor %vm4397_vm2, %vm4398_vm1 }
 0x79a   :  { %v4375_v61 = vsub.f32 1.5, %v4374_v2  ;;  %v4402_v59 = vmul.f32 %v9738_v38, %v9707_v31  ;;  %6890 = vrsqrt.f32 %v9733_v3  ;;  %vm4408_vm4 = vweird.f32 %v9738_v38 }
 0x79b   :  { %4324 = vadd.xlane.f32.xlu2 %v4323_v21  ;;  %v4384_v37 = vmul.f32 0.5, %v4383_v50  ;;  %v4393_v34 = vmul.f32 %v9724_v23, %v4392_v60  ;;  %vm4409_vm7 = vmor %vm4407_vm6, %vm4408_vm4 }
 0x79c   :  { %v4102_v7 = vpop.f32.mrf.mxu3  ;;  %v4376_v2 = vmul.f32 %v9695_v45, %v4375_v61  ;;  %v4262_v61 = vpop.xlane.xlu2 %4261 }
 0x79d   :  { %v4103_v40 = vadd.f32 %v4102_v7, %v4014_v8  ;;  %v4385_v50 = vsub.f32 1.5, %v4384_v37  ;;  %v4394_v25 = vmul.f32 0.5, %v4393_v34 }
 0x79e   :  { %v9750_v63 = vpop.eup %6888  ;;  %v4380_v37 = vsel %vm4379_vm13, %v9695_v45, %v4376_v2  ;;  %v9778_v45 = vmax.f32 %v4262_v61, 1e-24 }
 0x79f   :  { %v9736_v21 = vmul.f32 %v11533_v52, %v4103_v40  ;;  %v4256_v52 = vpop.xlane.xlu0 %4255  ;;  %v4366_v40 = vmul.f32 %v9689_v39, %v4365_v28  ;;  %v4412_v10 = vmul.f32 %v9750_v63, %v9722_v16  ;;  %v4395_v0 = vsub.f32 1.5, %v4394_v25 }
 0x7a0   :  { %v9755_v60 = vmax.f32 %v4256_v52, 1e-24  ;;  %v4386_v52 = vmul.f32 %v9709_v42, %v4385_v50  ;;  %v9784_v2 = vmul.f32 %v4380_v37, %v9341_v5  ;;  %v9787_v17 = vmul.f32 %v4380_v37, %v9343_v1 }
 0x7a1   :  { %11535 = vst [vmem:[#allocation51_spill] sm:$0xff] %v9736_v21  ;;  %v4232_v7 = vmul.f32 %v9736_v21, %v9736_v21  ;;  %v4259_v21 = vpop.xlane.xlu1 %4258  ;;  %v4370_v28 = vsel %vm4369_vm11, %v9689_v39, %v4366_v40  ;;  %v4413_v34 = vmul.f32 %v9750_v63, %v4412_v10  ;;  %vm4418_vm8 = vweird.f32 %v9750_v63 }
 0x7a2   :  { %6892 = vrsqrt.f32 %v9755_v60  ;;  %v9771_v39 = vmul.f32 %v4370_v28, %v9328_v51  ;;  %v9781_v40 = vmul.f32 %v4370_v28, %v9330_v49  ;;  %11538 = vst [vmem:[#allocation56_spill] sm:$0xff] %v9784_v2  ;;  %v4390_v25 = vsel %vm4389_vm0, %v9709_v42, %v4386_v52  ;;  %vm4419_vm10 = vmor %vm4417_vm9, %vm4418_vm8 }
 0x7a3   :  { %v4326_v8 = vadd.f32 %v4232_v7, %v4231_v9  ;;  %v4403_v9 = vmul.f32 %v9738_v38, %v4402_v59  ;;  %v9762_v7 = vmax.f32 %v4259_v21, 1e-24  ;;  %11539 = vst [vmem:[#allocation55_spill] sm:$0xff] %v9787_v17  ;;  %v4414_v28 = vmul.f32 0.5, %v4413_v34 }
 0x7a4   :  { %11536 = vst [vmem:[#allocation53_spill] sm:$0xff] %v9771_v39  ;;  %v4821_v50 = vmul.f32 %v9771_v39, %v9771_v39  ;;  %v4822_v1 = vmul.f32 %v9781_v40, %v9781_v40  ;;  %v4823_v42 = vmul.f32 %v9784_v2, %v9784_v2  ;;  %v9805_v37 = vmul.f32 %v4390_v25, %v9358_v58 }
 0x7a5   :  { %4327 = vadd.xlane.f32.xlu0 %v4326_v8  ;;  %v9764_v8 = vpop.eup %6890  ;;  %v4404_v21 = vmul.f32 0.5, %v4403_v9  ;;  %6894 = vrsqrt.f32 %v9762_v7  ;;  %11537 = vst [vmem:[#allocation54_spill] sm:$0xff] %v9781_v40  ;;  %v4396_v9 = vmul.f32 %v9724_v23, %v4395_v0  ;;  %v4782_v34 = vadd.f32 %v9787_v17, %v9781_v40 }
 0x7a6   :  { %v4422_v59 = vmul.f32 %v9764_v8, %v9733_v3  ;;  %6896 = vrsqrt.f32 %v9778_v45  ;;  %11540 = vst [vmem:[#allocation57_spill] sm:$0xff] %v9805_v37  ;;  %vm4428_vm11 = vweird.f32 %v9764_v8  ;;  %vm4437_vm14 = vweird.f32 %v9755_v60 }
 0x7a7   :  { %v4265_v51 = vpop.xlane.xlu0 %4264  ;;  %v4405_v10 = vsub.f32 1.5, %v4404_v21  ;;  %v4745_v21 = vadd.f32 %v9784_v2, %v9771_v39  ;;  %v4400_v58 = vsel %vm4399_vm3, %v9724_v23, %v4396_v9  ;;  %v4415_v39 = vsub.f32 1.5, %v4414_v28  ;;  %vm4429_vm13 = vmor %vm4427_vm12, %vm4428_vm11 }
 0x7a8   :  { %v9794_v49 = vpop.eup %6892  ;;  %v4423_v5 = vmul.f32 %v9764_v8, %v4422_v59  ;;  %v9798_v61 = vmax.f32 %v4265_v51, 1e-24  ;;  %v4824_v59 = vmul.f32 %v9787_v17, %v9787_v17  ;;  %v9817_v51 = vmul.f32 %v4390_v25, %v9360_v29 }
 0x7a9   :  { %v4268_v52 = vpop.xlane.xlu1 %4267  ;;  %v4406_v6 = vmul.f32 %v9738_v38, %v4405_v10  ;;  %v4432_v2 = vmul.f32 %v9794_v49, %v9755_v60  ;;  %v4885_v29 = vadd.f32 %v4823_v42, %v4821_v50  ;;  %v4825_v25 = vmul.f32 %v9805_v37, %v9805_v37  ;;  %v4271_v50 = vpop.xlane.xlu2 %4270 }
 0x7aa   :  { %11541 = vst [vmem:[#allocation78_spill] sm:$0xff] %v9817_v51  ;;  %v4424_v40 = vmul.f32 0.5, %v4423_v5  ;;  %6898 = vrsqrt.f32 %v9798_v61  ;;  %v9827_v17 = vmax.f32 %v4268_v52, 1e-24  ;;  %v4922_v10 = vadd.f32 %v4824_v59, %v4822_v1 }
 0x7ab   :  { %v9808_v0 = vpop.eup %6894  ;;  %v4746_v62 = vadd.f32 %v4745_v21, %v9805_v37  ;;  %v4783_v28 = vadd.f32 %v4782_v34, %v9817_v51  ;;  %v9839_v5 = vmul.f32 %v4400_v58, %v9373_v36  ;;  %v4826_v31 = vmul.f32 %v9817_v51, %v9817_v51 }
 0x7ac   :  { %v4442_v23 = vmul.f32 %v9808_v0, %v9762_v7  ;;  %v9834_v9 = vpop.eup %6896  ;;  %v9846_v42 = vmul.f32 %v4400_v58, %v9377_v24  ;;  %v4410_v52 = vsel %vm4409_vm7, %v9738_v38, %v4406_v6  ;;  %v4433_v1 = vmul.f32 %v9794_v49, %v4432_v2 }
 0x7ad   :  { %11542 = vst [vmem:[#allocation80_spill] sm:$0xff] %v9839_v5  ;;  %v4416_v21 = vmul.f32 %v9750_v63, %v4415_v39  ;;  %v4425_v36 = vsub.f32 1.5, %v4424_v40  ;;  %6900 = vrsqrt.f32 %v9827_v17  ;;  %v4886_v34 = vadd.f32 %v4885_v29, %v4825_v25 }
 0x7ae   :  { %11543 = vst [vmem:[#allocation79_spill] sm:$0xff] %v9846_v42  ;;  %v4443_v59 = vmul.f32 %v9808_v0, %v4442_v23  ;;  %v4452_v51 = vmul.f32 %v9834_v9, %v9778_v45  ;;  %v9856_v37 = vmax.f32 %v4271_v50, 1e-24  ;;  %v4827_v38 = vmul.f32 %v9839_v5, %v9839_v5 }
 0x7af   :  { %v9863_v39 = vmul.f32 %v4410_v52, %v9390_v15  ;;  %v9866_v40 = vmul.f32 %v4410_v52, %v9392_v48  ;;  %v4923_v2 = vadd.f32 %v4922_v10, %v4826_v31  ;;  %v4747_v58 = vadd.f32 %v4746_v62, %v9839_v5  ;;  %v4274_v10 = vpop.xlane.xlu0 %4273 }
 0x7b0   :  { %v9858_v24 = vpop.eup %6898  ;;  %v4828_v6 = vmul.f32 %v9846_v42, %v9846_v42  ;;  %v4434_v29 = vmul.f32 0.5, %v4433_v1  ;;  %v4784_v25 = vadd.f32 %v4783_v28, %v9846_v42  ;;  %v4420_v15 = vsel %vm4419_vm10, %v9750_v63, %v4416_v21 }
 0x7b1   :  { %v4426_v23 = vmul.f32 %v9764_v8, %v4425_v36  ;;  %v4444_v48 = vmul.f32 0.5, %v4443_v59  ;;  %v4453_v16 = vmul.f32 %v9834_v9, %v4452_v51  ;;  %v4462_v62 = vmul.f32 %v9858_v24, %v9798_v61  ;;  %v4277_v36 = vpop.xlane.xlu1 %4276 }
 0x7b2   :  { %6902 = vrsqrt.f32 %v9856_v37  ;;  %v4887_v31 = vadd.f32 %v4886_v34, %v4827_v38  ;;  %v4829_v28 = vmul.f32 %v9863_v39, %v9863_v39  ;;  %v4830_v63 = vmul.f32 %v9866_v40, %v9866_v40 }
 0x7b3   :  { %v9882_v50 = vpop.eup %6900  ;;  %v4924_v52 = vadd.f32 %v4923_v2, %v4828_v6  ;;  %v4748_v51 = vadd.f32 %v4747_v58, %v9863_v39  ;;  %v9891_v1 = vmul.f32 %v4420_v15, %v9405_v18  ;;  %v4435_v21 = vsub.f32 1.5, %v4434_v29 }
 0x7b4   :  { %v4785_v59 = vadd.f32 %v4784_v25, %v9866_v40  ;;  %v9895_v34 = vmul.f32 %v4420_v15, %v9409_v26  ;;  %v4430_v38 = vsel %vm4429_vm13, %v9764_v8, %v4426_v23  ;;  %v9898_v42 = vmax.f32 %v4274_v10, 1e-24  ;;  %v4280_v23 = vpop.xlane.xlu2 %4279 }
 0x7b5   :  { %v4445_v5 = vsub.f32 1.5, %v4444_v48  ;;  %v4454_v3 = vmul.f32 0.5, %v4453_v16  ;;  %v4463_v2 = vmul.f32 %v9858_v24, %v4462_v62  ;;  %v4472_v18 = vmul.f32 %v9882_v50, %v9827_v17 }
 0x7b6   :  { %v4888_v58 = vadd.f32 %v4887_v31, %v4829_v28  ;;  %v4925_v6 = vadd.f32 %v4924_v52, %v4830_v63  ;;  %v9904_v29 = vmax.f32 %v4277_v36, 1e-24  ;;  %v4831_v26 = vmul.f32 %v9891_v1, %v9891_v1 }
 0x7b7   :  { %v9911_v8 = vmul.f32 %v4430_v38, %v9422_v55  ;;  %v4436_v15 = vmul.f32 %v9794_v49, %v4435_v21  ;;  %vm4438_vm15 = vweird.f32 %v9794_v49  ;;  %v4832_v48 = vmul.f32 %v9895_v34, %v9895_v34 }
 0x7b8   :  { %v9906_v25 = vpop.eup %6902  ;;  %v9918_v16 = vmul.f32 %v4430_v38, %v9424_v11  ;;  %vm4448_vm0 = vweird.f32 %v9808_v0  ;;  %6904 = vrsqrt.f32 %v9898_v42  ;;  %v4446_v62 = vmul.f32 %v9808_v0, %v4445_v5  ;;  %vm4439_vm1 = vmor %vm4437_vm14, %vm4438_vm15 }
 0x7b9   :  { %11544 = vst [vmem:[#allocation81_spill] sm:$0xff] %v9911_v8  ;;  %v4455_v10 = vsub.f32 1.5, %v4454_v3  ;;  %v4464_v55 = vmul.f32 0.5, %v4463_v2  ;;  %v4473_v31 = vmul.f32 %v9882_v50, %v4472_v18  ;;  %v4749_v28 = vadd.f32 %v4748_v51, %v9891_v1  ;;  %v4283_v18 = vpop.xlane.xlu0 %4282 }
 0x7ba   :  { %11545 = vst [vmem:[#allocation8_spill] sm:$0xff] %v9918_v16  ;;  %v4482_v63 = vmul.f32 %v9906_v25, %v9856_v37  ;;  %6906 = vrsqrt.f32 %v9904_v29  ;;  %v9930_v11 = vmax.f32 %v4280_v23, 1e-24  ;;  %v4786_v52 = vadd.f32 %v4785_v59, %v9895_v34 }
 0x7bb   :  { %v4833_v5 = vmul.f32 %v9911_v8, %v9911_v8  ;;  %v4440_v21 = vsel %vm4439_vm1, %v9794_v49, %v4436_v15  ;;  %vm4447_vm2 = vweird.f32 %v9762_v7  ;;  %v4889_v51 = vadd.f32 %v4888_v58, %v4831_v26 }
 0x7bc   :  { %v4926_v36 = vadd.f32 %v4925_v6, %v4832_v48  ;;  %v4834_v60 = vmul.f32 %v9918_v16, %v9918_v16  ;;  %vm4449_vm3 = vmor %vm4447_vm2, %vm4448_vm0  ;;  %vm4458_vm4 = vweird.f32 %v9834_v9  ;;  %v4456_v59 = vmul.f32 %v9834_v9, %v4455_v10 }
 0x7bd   :  { %v4450_v38 = vsel %vm4449_vm3, %v9808_v0, %v4446_v62  ;;  %v4465_v3 = vsub.f32 1.5, %v4464_v55  ;;  %v4474_v2 = vmul.f32 0.5, %v4473_v31  ;;  %v9947_v7 = vmul.f32 %v4440_v21, %v9437_v54 }
 0x7be   :  { %v9944_v49 = vpop.eup %6904  ;;  %v9950_v58 = vmul.f32 %v4440_v21, %v9439_v30  ;;  %v4483_v6 = vmul.f32 %v9906_v25, %v4482_v63  ;;  %6908 = vrsqrt.f32 %v9930_v11  ;;  %v4750_v26 = vadd.f32 %v4749_v28, %v9911_v8 }
 0x7bf   :  { %11546 = vst [vmem:[#allocation10_spill] sm:$0xff] %v9947_v7  ;;  %v4787_v0 = vadd.f32 %v4786_v52, %v9918_v16  ;;  %v4890_v15 = vadd.f32 %v4889_v51, %v4833_v5  ;;  %vm4457_vm6 = vweird.f32 %v9778_v45  ;;  %v4927_v48 = vadd.f32 %v4926_v36, %v4834_v60  ;;  %v4286_v52 = vpop.xlane.xlu1 %4285 }
 0x7c0   :  { %11547 = vst [vmem:[#allocation12_spill] sm:$0xff] %v9950_v58  ;;  %v9957_v23 = vpop.eup %6906  ;;  %v9960_v54 = vmul.f32 %v4450_v38, %v9450_v19  ;;  %vm4459_vm7 = vmor %vm4457_vm6, %vm4458_vm4  ;;  %vm4468_vm8 = vweird.f32 %v9858_v24  ;;  %v9965_v30 = vmax.f32 %v4283_v18, 1e-24  ;;  %v4466_v10 = vmul.f32 %v9858_v24, %v4465_v3 }
 0x7c1   :  { %v4460_v62 = vsel %vm4459_vm7, %v9834_v9, %v4456_v59  ;;  %v4475_v55 = vsub.f32 1.5, %v4474_v2  ;;  %v4492_v45 = vmul.f32 %v9944_v49, %v9898_v42  ;;  %v4751_v31 = vadd.f32 %v4750_v26, %v9947_v7 }
 0x7c2   :  { %v4835_v19 = vmul.f32 %v9947_v7, %v9947_v7  ;;  %v4836_v28 = vmul.f32 %v9950_v58, %v9950_v58  ;;  %v4484_v63 = vmul.f32 0.5, %v4483_v6  ;;  %v4788_v5 = vadd.f32 %v4787_v0, %v9950_v58  ;;  %v4289_v0 = vpop.xlane.xlu2 %4288 }
 0x7c3   :  { %v9978_v9 = vmul.f32 %v4450_v38, %v9452_v32  ;;  %vm4467_vm9 = vweird.f32 %v9798_v61  ;;  %v4502_v21 = vmul.f32 %v9957_v23, %v9904_v29  ;;  %v4837_v36 = vmul.f32 %v9960_v54, %v9960_v54 }
 0x7c4   :  { %v9983_v51 = vpop.eup %6908  ;;  %v9988_v60 = vmul.f32 %v4460_v62, %v9463_v14  ;;  %vm4469_vm10 = vmor %vm4467_vm9, %vm4468_vm8  ;;  %vm4478_vm11 = vweird.f32 %v9882_v50  ;;  %6910 = vrsqrt.f32 %v9965_v30  ;;  %v4476_v61 = vmul.f32 %v9882_v50, %v4475_v55 }
 0x7c5   :  { %v4470_v32 = vsel %vm4469_vm10, %v9858_v24, %v4466_v10  ;;  %v4493_v38 = vmul.f32 %v9944_v49, %v4492_v45  ;;  %v9997_v59 = vmax.f32 %v4286_v52, 1e-24  ;;  %v4891_v3 = vadd.f32 %v4890_v15, %v4835_v19 }
 0x7c6   :  { %v4928_v2 = vadd.f32 %v4927_v48, %v4836_v28  ;;  %v10000_v14 = vmul.f32 %v4460_v62, %v9465_v33  ;;  %v4485_v18 = vsub.f32 1.5, %v4484_v63  ;;  %v4838_v6 = vmul.f32 %v9978_v9, %v9978_v9 }
 0x7c7   :  { %vm4477_vm12 = vweird.f32 %v9827_v17  ;;  %v4503_v26 = vmul.f32 %v9957_v23, %v4502_v21  ;;  %v4512_v24 = vmul.f32 %v9983_v51, %v9930_v11  ;;  %v4752_v10 = vadd.f32 %v4751_v31, %v9960_v54 }
 0x7c8   :  { %v4789_v15 = vadd.f32 %v4788_v5, %v9978_v9  ;;  %v4892_v48 = vadd.f32 %v4891_v3, %v4837_v36  ;;  %v10011_v33 = vmul.f32 %v4470_v32, %v9476_v13  ;;  %vm4479_vm13 = vmor %vm4477_vm12, %vm4478_vm11  ;;  %v4839_v17 = vmul.f32 %v9988_v60, %v9988_v60  ;;  %v4292_v5 = vpop.xlane.xlu0 %4291 }
 0x7c9   :  { %v4480_v62 = vsel %vm4479_vm13, %v9882_v50, %v4476_v61  ;;  %v4494_v55 = vmul.f32 0.5, %v4493_v38  ;;  %6912 = vrsqrt.f32 %v9997_v59  ;;  %v4840_v31 = vmul.f32 %v10000_v14, %v10000_v14 }
 0x7ca   :  { %v10019_v45 = vpop.eup %6910  ;;  %v4486_v19 = vmul.f32 %v9906_v25, %v4485_v18  ;;  %vm4488_vm14 = vweird.f32 %v9906_v25  ;;  %v10025_v13 = vmax.f32 %v4289_v0, 1e-24  ;;  %v4929_v28 = vadd.f32 %v4928_v2, %v4838_v6 }
 0x7cb   :  { %v10028_v63 = vmul.f32 %v4470_v32, %v9478_v12  ;;  %v4504_v52 = vmul.f32 0.5, %v4503_v26  ;;  %v4513_v50 = vmul.f32 %v9983_v51, %v4512_v24  ;;  %v4753_v21 = vadd.f32 %v4752_v10, %v9988_v60  ;;  %v4295_v10 = vpop.xlane.xlu1 %4294 }
 0x7cc   :  { %v4841_v36 = vmul.f32 %v10011_v33, %v10011_v33  ;;  %v10035_v61 = vmul.f32 %v4480_v62, %v9489_v44  ;;  %vm4487_vm15 = vweird.f32 %v9856_v37  ;;  %v4790_v38 = vadd.f32 %v4789_v15, %v10000_v14 }
 0x7cd   :  { %v4893_v3 = vadd.f32 %v4892_v48, %v4839_v17  ;;  %vm4489_vm0 = vmor %vm4487_vm15, %vm4488_vm14  ;;  %v4495_v12 = vsub.f32 1.5, %v4494_v55  ;;  %v4522_v32 = vmul.f32 %v10019_v45, %v9965_v30  ;;  %v4930_v2 = vadd.f32 %v4929_v28, %v4840_v31 }
 0x7ce   :  { %v4490_v18 = vsel %vm4489_vm0, %v9906_v25, %v4486_v19  ;;  %6914 = vrsqrt.f32 %v10025_v13  ;;  %v10043_v6 = vmax.f32 %v4292_v5, 1e-24  ;;  %v4754_v44 = vadd.f32 %v4753_v21, %v10011_v33 }
 0x7cf   :  { %v10045_v26 = vpop.eup %6912  ;;  %v4791_v37 = vadd.f32 %v4790_v38, %v10028_v63  ;;  %v4505_v24 = vsub.f32 1.5, %v4504_v52  ;;  %v4514_v0 = vmul.f32 0.5, %v4513_v50  ;;  %v4842_v15 = vmul.f32 %v10028_v63, %v10028_v63 }
 0x7d0   :  { %v4894_v48 = vadd.f32 %v4893_v3, %v4841_v36  ;;  %v10052_v17 = vmul.f32 %v4480_v62, %v9491_v35  ;;  %v4843_v25 = vmul.f32 %v10035_v61, %v10035_v61  ;;  %v10057_v55 = vmul.f32 %v4490_v18, %v9501_v57 }
 0x7d1   :  { %v4496_v31 = vmul.f32 %v9944_v49, %v4495_v12  ;;  %vm4498_vm1 = vweird.f32 %v9944_v49  ;;  %v4523_v19 = vmul.f32 %v10019_v45, %v4522_v32  ;;  %v10063_v28 = vmul.f32 %v4490_v18, %v9503_v27  ;;  %v4298_v12 = vpop.xlane.xlu2 %4297 }
 0x7d2   :  { %v4532_v52 = vmul.f32 %v10045_v26, %v9997_v59  ;;  %6916 = vrsqrt.f32 %v10043_v6  ;;  %v10068_v35 = vmax.f32 %v4295_v10, 1e-24  ;;  %vm4497_vm2 = vweird.f32 %v9898_v42 }
 0x7d3   :  { %v4506_v57 = vmul.f32 %v9957_v23, %v4505_v24  ;;  %vm4508_vm3 = vweird.f32 %v9957_v23  ;;  %v4515_v62 = vsub.f32 1.5, %v4514_v0  ;;  %v4931_v5 = vadd.f32 %v4930_v2, %v4842_v15  ;;  %vm4499_vm4 = vmor %vm4497_vm2, %vm4498_vm1 }
 0x7d4   :  { %v10073_v50 = vpop.eup %6914  ;;  %v4755_v27 = vadd.f32 %v4754_v44, %v10035_v61  ;;  %v4792_v21 = vadd.f32 %v4791_v37, %v10052_v17  ;;  %v4844_v36 = vmul.f32 %v10052_v17, %v10052_v17  ;;  %v4895_v38 = vadd.f32 %v4894_v48, %v4843_v25  ;;  %v4301_v48 = vpop.xlane.xlu0 %4300 }
 0x7d5   :  { %v4500_v42 = vsel %vm4499_vm4, %v9944_v49, %v4496_v31  ;;  %vm4507_vm6 = vweird.f32 %v9904_v29  ;;  %v4524_v3 = vmul.f32 0.5, %v4523_v19  ;;  %v4845_v32 = vmul.f32 %v10057_v55, %v10057_v55 }
 0x7d6   :  { %v4846_v2 = vmul.f32 %v10063_v28, %v10063_v28  ;;  %vm4509_vm7 = vmor %vm4507_vm6, %vm4508_vm3  ;;  %v4533_v18 = vmul.f32 %v10045_v26, %v4532_v52  ;;  %6918 = vrsqrt.f32 %v10068_v35  ;;  %v4516_v49 = vmul.f32 %v9983_v51, %v4515_v62 }
 0x7d7   :  { %v4510_v44 = vsel %vm4509_vm7, %v9957_v23, %v4506_v57  ;;  %vm4518_vm8 = vweird.f32 %v9983_v51  ;;  %v4542_v29 = vmul.f32 %v10073_v50, %v10025_v13  ;;  %v4932_v24 = vadd.f32 %v4931_v5, %v4844_v36 }
 0x7d8   :  { %v10096_v37 = vpop.eup %6916  ;;  %v10099_v0 = vmul.f32 %v4500_v42, %v9512_v56  ;;  %v10102_v10 = vmul.f32 %v4500_v42, %v9514_v20  ;;  %v10104_v15 = vmax.f32 %v4298_v12, 1e-24  ;;  %v4756_v23 = vadd.f32 %v4755_v27, %v10057_v55 }
 0x7d9   :  { %v4793_v25 = vadd.f32 %v4792_v21, %v10063_v28  ;;  %vm4517_vm9 = vweird.f32 %v9930_v11  ;;  %v4525_v31 = vsub.f32 1.5, %v4524_v3  ;;  %v4896_v19 = vadd.f32 %v4895_v38, %v4845_v32  ;;  %v4304_v3 = vpop.xlane.xlu1 %4303 }
 0x7da   :  { %v4933_v52 = vadd.f32 %v4932_v24, %v4846_v2  ;;  %v10110_v57 = vmul.f32 %v4510_v44, %v9523_v22  ;;  %vm4519_vm10 = vmor %vm4517_vm9, %vm4518_vm8  ;;  %v4534_v56 = vmul.f32 0.5, %v4533_v18  ;;  %v4543_v62 = vmul.f32 %v10073_v50, %v4542_v29 }
 0x7db   :  { %v4520_v20 = vsel %vm4519_vm10, %v9983_v51, %v4516_v49  ;;  %v4552_v5 = vmul.f32 %v10096_v37, %v10043_v6  ;;  %v10118_v27 = vmax.f32 %v4301_v48, 1e-24  ;;  %v4757_v21 = vadd.f32 %v4756_v23, %v10099_v0 }
 0x7dc   :  { %v10120_v11 = vpop.eup %6918  ;;  %v4847_v22 = vmul.f32 %v10099_v0, %v10099_v0  ;;  %v4848_v36 = vmul.f32 %v10102_v10, %v10102_v10  ;;  %6920 = vrsqrt.f32 %v10104_v15  ;;  %v4794_v51 = vadd.f32 %v4793_v25, %v10102_v10 }
 0x7dd   :  { %v10130_v38 = vmul.f32 %v4510_v44, %v9525_v4  ;;  %v4526_v42 = vmul.f32 %v10019_v45, %v4525_v31  ;;  %vm4528_vm11 = vweird.f32 %v10019_v45  ;;  %v4849_v12 = vmul.f32 %v10110_v57, %v10110_v57 }
 0x7de   :  { %v10137_v32 = vmul.f32 %v4520_v20, %v9533_v47  ;;  %vm4527_vm12 = vweird.f32 %v9965_v30  ;;  %v4535_v2 = vsub.f32 1.5, %v4534_v56  ;;  %v4544_v18 = vmul.f32 0.5, %v4543_v62  ;;  %v4307_v31 = vpop.xlane.xlu2 %4306 }
 0x7df   :  { %v4553_v49 = vmul.f32 %v10096_v37, %v4552_v5  ;;  %v4562_v4 = vmul.f32 %v10120_v11, %v10068_v35  ;;  %6922 = vrsqrt.f32 %v10118_v27  ;;  %v4897_v44 = vadd.f32 %v4896_v19, %v4847_v22  ;;  %vm4529_vm13 = vmor %vm4527_vm12, %vm4528_vm11 }
 0x7e0   :  { %v4934_v29 = vadd.f32 %v4933_v52, %v4848_v36  ;;  %v4758_v24 = vadd.f32 %v4757_v21, %v10110_v57  ;;  %v10145_v48 = vmax.f32 %v4304_v3, 1e-24  ;;  %v4795_v47 = vadd.f32 %v4794_v51, %v10130_v38 }
 0x7e1   :  { %v4850_v30 = vmul.f32 %v10130_v38, %v10130_v38  ;;  %v10151_v23 = vmul.f32 %v4520_v20, %v9535_v53  ;;  %v4530_v25 = vsel %vm4529_vm13, %v10019_v45, %v4526_v42  ;;  %v4898_v19 = vadd.f32 %v4897_v44, %v4849_v12 }
 0x7e2   :  { %v10154_v56 = vpop.eup %6920  ;;  %v4851_v52 = vmul.f32 %v10137_v32, %v10137_v32  ;;  %v4536_v62 = vmul.f32 %v10045_v26, %v4535_v2  ;;  %vm4538_vm14 = vweird.f32 %v10045_v26  ;;  %vm4537_vm15 = vweird.f32 %v9997_v59 }
 0x7e3   :  { %v4545_v5 = vsub.f32 1.5, %v4544_v18  ;;  %v4554_v21 = vmul.f32 0.5, %v4553_v49  ;;  %v4563_v53 = vmul.f32 %v10120_v11, %v4562_v4  ;;  %v10163_v20 = vmul.f32 %v4530_v25, %v9543_v46  ;;  %vm4539_vm0 = vmor %vm4537_vm15, %vm4538_vm14 }
 0x7e4   :  { %v10166_v45 = vmul.f32 %v4530_v25, %v9545_v43  ;;  %6924 = vrsqrt.f32 %v10145_v48  ;;  %v10169_v22 = vmax.f32 %v4307_v31, 1e-24  ;;  %v4935_v51 = vadd.f32 %v4934_v29, %v4850_v30 }
 0x7e5   :  { %v10171_v36 = vpop.eup %6922  ;;  %v4852_v59 = vmul.f32 %v10151_v23, %v10151_v23  ;;  %v4572_v42 = vmul.f32 %v10154_v56, %v10104_v15  ;;  %v4759_v46 = vadd.f32 %v4758_v24, %v10137_v32  ;;  %v4796_v3 = vadd.f32 %v4795_v47, %v10151_v23 }
 0x7e6   :  { %v4899_v43 = vadd.f32 %v4898_v19, %v4851_v52  ;;  %v4540_v12 = vsel %vm4539_vm0, %v10045_v26, %v4536_v62  ;;  %v4546_v2 = vmul.f32 %v10073_v50, %v4545_v5  ;;  %vm4548_vm1 = vweird.f32 %v10073_v50  ;;  %v4310_v4 = vpop.xlane.xlu0 %4309  ;;  %v11548_v52 = vld [vmem:[#allocation61_spill] sm:$0xff] }
 0x7e7   :  { %v4555_v18 = vsub.f32 1.5, %v4554_v21  ;;  %v4564_v49 = vmul.f32 0.5, %v4563_v53  ;;  %v4853_v44 = vmul.f32 %v10163_v20, %v10163_v20  ;;  %v4854_v29 = vmul.f32 %v10166_v45, %v10166_v45 }
 0x7e8   :  { %v4582_v24 = vmul.f32 %v10171_v36, %v10118_v27  ;;  %6926 = vrsqrt.f32 %v10169_v22  ;;  %v4936_v47 = vadd.f32 %v4935_v51, %v4852_v59  ;;  %v10190_v26 = vmul.f32 %v4540_v12, %v9553_v41 }
 0x7e9   :  { %vm4547_vm2 = vweird.f32 %v10025_v13  ;;  %v4573_v30 = vmul.f32 %v10154_v56, %v4572_v42  ;;  %v4760_v31 = vadd.f32 %v4759_v46, %v10163_v20  ;;  %v4797_v19 = vadd.f32 %v4796_v3, %v10166_v45 }
 0x7ea   :  { %v10194_v25 = vpop.eup %6924  ;;  %v10199_v62 = vmul.f32 %v4540_v12, %v11548_v52  ;;  %vm4549_vm3 = vmor %vm4547_vm2, %vm4548_vm1  ;;  %v10203_v5 = vmax.f32 %v4310_v4, 1e-24  ;;  %v4556_v13 = vmul.f32 %v10096_v37, %v4555_v18  ;;  %vm4558_vm4 = vweird.f32 %v10096_v37 }
 0x7eb   :  { %v4550_v21 = vsel %vm4549_vm3, %v10073_v50, %v4546_v2  ;;  %v4565_v53 = vsub.f32 1.5, %v4564_v49  ;;  %v4900_v51 = vadd.f32 %v4899_v43, %v4853_v44  ;;  %v4937_v59 = vadd.f32 %v4936_v47, %v4854_v29  ;;  %v11550_v47 = vld [vmem:[#allocation63_spill] sm:$0xff] }
 0x7ec   :  { %vm4557_vm6 = vweird.f32 %v10043_v6  ;;  %v4583_v42 = vmul.f32 %v10171_v36, %v4582_v24  ;;  %v4761_v46 = vadd.f32 %v4760_v31, %v10190_v26  ;;  %v4574_v3 = vmul.f32 0.5, %v4573_v30  ;;  %v11549_v6 = vld [vmem:[#allocation62_spill] sm:$0xff] }
 0x7ed   :  { %v4592_v12 = vmul.f32 %v10194_v25, %v10145_v48  ;;  %v4855_v18 = vmul.f32 %v10190_v26, %v10190_v26  ;;  %v4856_v43 = vmul.f32 %v10199_v62, %v10199_v62  ;;  %v10222_v49 = vmul.f32 %v4550_v21, %v11549_v6  ;;  %vm4559_vm7 = vmor %vm4557_vm6, %vm4558_vm4 }
 0x7ee   :  { %v4313_v41 = vpop.xlane.xlu1 %4312  ;;  %v10215_v2 = vpop.eup %6926  ;;  %6928 = vrsqrt.f32 %v10203_v5  ;;  %v4798_v44 = vadd.f32 %v4797_v19, %v10199_v62  ;;  %v4560_v29 = vsel %vm4559_vm7, %v10096_v37, %v4556_v13  ;;  %v4566_v24 = vmul.f32 %v10120_v11, %v4565_v53 }
 0x7ef   :  { %v10213_v4 = vmax.f32 %v4313_v41, 1e-24  ;;  %vm4568_vm8 = vweird.f32 %v10120_v11  ;;  %v10232_v30 = vmul.f32 %v4550_v21, %v11550_v47  ;;  %vm4567_vm9 = vweird.f32 %v10068_v35  ;;  %v11552_v21 = vld [vmem:[#allocation64_spill] sm:$0xff] }
 0x7f0   :  { %v4584_v31 = vmul.f32 0.5, %v4583_v42  ;;  %v4575_v41 = vsub.f32 1.5, %v4574_v3  ;;  %v4593_v6 = vmul.f32 %v10194_v25, %v4592_v12  ;;  %v4602_v19 = vmul.f32 %v10215_v2, %v10169_v22  ;;  %vm4569_vm10 = vmor %vm4567_vm9, %vm4568_vm8  ;;  %v11554_v3 = vld [vmem:[#allocation65_spill] sm:$0xff] }
 0x7f1   :  { %11551 = vst [vmem:[#allocation14_spill] sm:$0xff] %v10232_v30  ;;  %6930 = vrsqrt.f32 %v10213_v4  ;;  %v4901_v37 = vadd.f32 %v4900_v51, %v4855_v18  ;;  %v4938_v13 = vadd.f32 %v4937_v59, %v4856_v43  ;;  %v4857_v53 = vmul.f32 %v10222_v49, %v10222_v49 }
 0x7f2   :  { %v10244_v47 = vmul.f32 %v4560_v29, %v11552_v21  ;;  %v4762_v42 = vadd.f32 %v4761_v46, %v10222_v49  ;;  %v4570_v12 = vsel %vm4569_vm10, %v10120_v11, %v4566_v24  ;;  %v4799_v51 = vadd.f32 %v4798_v44, %v10232_v30  ;;  %v11556_v21 = vld [vmem:[#allocation66_spill] sm:$0xff] }
 0x7f3   :  { %v4858_v59 = vmul.f32 %v10232_v30, %v10232_v30  ;;  %v4585_v18 = vsub.f32 1.5, %v4584_v31  ;;  %v4576_v43 = vmul.f32 %v10154_v56, %v4575_v41  ;;  %vm4578_vm11 = vweird.f32 %v10154_v56  ;;  %v11558_v41 = vld [vmem:[#allocation68_spill] sm:$0xff] }
 0x7f4   :  { %11553 = vst [vmem:[#allocation16_spill] sm:$0xff] %v10244_v47  ;;  %v10253_v16 = vpop.eup %6928  ;;  %v4594_v46 = vmul.f32 0.5, %v4593_v6  ;;  %v4902_v11 = vadd.f32 %v4901_v37, %v4857_v53  ;;  %v4859_v24 = vmul.f32 %v10244_v47, %v10244_v47  ;;  %vm4577_vm12 = vweird.f32 %v10104_v15 }
 0x7f5   :  { %v4612_v6 = vmul.f32 %v10253_v16, %v10203_v5  ;;  %v4763_v37 = vadd.f32 %v4762_v42, %v10244_v47  ;;  %vm4579_vm13 = vmor %vm4577_vm12, %vm4578_vm11  ;;  %v4586_v53 = vmul.f32 %v10171_v36, %v4585_v18  ;;  %vm4588_vm14 = vweird.f32 %v10171_v36  ;;  %v11565_v47 = vld [vmem:[#allocation73_spill] sm:$0xff] }
 0x7f6   :  { %v4316_v50 = vpop.xlane.xlu2 %4315  ;;  %v4580_v7 = vsel %vm4579_vm13, %v10154_v56, %v4576_v43  ;;  %v4595_v8 = vsub.f32 1.5, %v4594_v46  ;;  %v4903_v15 = vadd.f32 %v4902_v11, %v4859_v24  ;;  %vm4587_vm15 = vweird.f32 %v10118_v27  ;;  %v11560_v46 = vld [vmem:[#allocation69_spill] sm:$0xff]  ;;  %v11561_v11 = vld [vmem:[#allocation70_spill] sm:$0xff] }
 0x7f7   :  { %v10235_v52 = vmax.f32 %v4316_v50, 1e-24  ;;  %v10248_v50 = vmul.f32 %v4560_v29, %v11554_v3  ;;  %v4603_v29 = vmul.f32 %v10215_v2, %v4602_v19  ;;  %v10268_v44 = vpop.eup %6930  ;;  %v10273_v3 = vmul.f32 %v4570_v12, %v11558_v41  ;;  %vm4589_vm0 = vmor %vm4587_vm15, %vm4588_vm14 }
 0x7f8   :  { %v4939_v19 = vadd.f32 %v4938_v13, %v4858_v59  ;;  %v4622_v13 = vmul.f32 %v10268_v44, %v10213_v4  ;;  %v4613_v56 = vmul.f32 %v10253_v16, %v4612_v6  ;;  %v10300_v27 = vmul.f32 %v4580_v7, %v11561_v11 }
 0x7f9   :  { %11555 = vst [vmem:[#allocation18_spill] sm:$0xff] %v10248_v50  ;;  %6932 = vrsqrt.f32 %v10235_v52  ;;  %v4860_v31 = vmul.f32 %v10248_v50, %v10248_v50  ;;  %v4590_v24 = vsel %vm4589_vm0, %v10171_v36, %v4586_v53  ;;  %vm4598_vm1 = vweird.f32 %v10194_v25 }
 0x7fa   :  { %11559 = vst [vmem:[#allocation22_spill] sm:$0xff] %v10273_v3  ;;  %vm4597_vm2 = vweird.f32 %v10145_v48  ;;  %v4614_v36 = vmul.f32 0.5, %v4613_v56  ;;  %vm4608_vm4 = vweird.f32 %v10215_v2  ;;  %vm4607_vm6 = vweird.f32 %v10169_v22 }
 0x7fb   :  { %v4940_v42 = vadd.f32 %v4939_v19, %v4860_v31  ;;  %v4596_v31 = vmul.f32 %v10194_v25, %v4595_v8  ;;  %vm4599_vm3 = vmor %vm4597_vm2, %vm4598_vm1  ;;  %vm4618_vm8 = vweird.f32 %v10253_v16  ;;  %vm4617_vm9 = vweird.f32 %v10203_v5 }
 0x7fc   :  { %vm4609_vm7 = vmor %vm4607_vm6, %vm4608_vm4  ;;  %vm4628_vm11 = vweird.f32 %v10268_v44  ;;  %vm4627_vm12 = vweird.f32 %v10213_v4  ;;  %vm4637_vm14 = vweird.f32 %v10235_v52  ;;  %v11571_v4 = vld [vmem:[#allocation77_spill] sm:$0xff] }
 0x7fd   :  { %vm4619_vm10 = vmor %vm4617_vm9, %vm4618_vm8 }
 0x7fe   :  { %v4319_v35 = vpop.xlane.xlu0 %4318  ;;  %vm4629_vm13 = vmor %vm4627_vm12, %vm4628_vm11 }
 0x7ff   :  { %v10251_v58 = vmax.f32 %v4319_v35, 1e-24  ;;  %v10265_v35 = vmul.f32 %v4570_v12, %v11556_v21  ;;  %v4800_v21 = vadd.f32 %v4799_v51, %v10248_v50  ;;  %v4604_v12 = vmul.f32 0.5, %v4603_v29  ;;  %v10283_v41 = vpop.eup %6932 }
 0x800   :  { %v4862_v51 = vmul.f32 %v10273_v3, %v10273_v3  ;;  %v10297_v29 = vmul.f32 %v4580_v7, %v11560_v46  ;;  %v4623_v7 = vmul.f32 %v10268_v44, %v4622_v13  ;;  %v11562_v46 = vld [vmem:[#allocation71_spill] sm:$0xff]  ;;  %vm4638_vm15 = vweird.f32 %v10283_v41 }
 0x801   :  { %11557 = vst [vmem:[#allocation20_spill] sm:$0xff] %v10265_v35  ;;  %6934 = vrsqrt.f32 %v10251_v58  ;;  %v4861_v30 = vmul.f32 %v10265_v35, %v10265_v35  ;;  %v4764_v59 = vadd.f32 %v4763_v37, %v10265_v35  ;;  %v4605_v19 = vsub.f32 1.5, %v4604_v12  ;;  %vm4639_vm1 = vmor %vm4637_vm14, %vm4638_vm15 }
 0x802   :  { %v4632_v37 = vmul.f32 %v10283_v41, %v10235_v52  ;;  %v4801_v35 = vadd.f32 %v4800_v21, %v10273_v3  ;;  %v10313_v11 = vmul.f32 %v4590_v24, %v11562_v46  ;;  %v4941_v53 = vadd.f32 %v4940_v42, %v4862_v51  ;;  %v11563_v21 = vld [vmem:[#allocation72_spill] sm:$0xff] }
 0x803   :  { %v4904_v50 = vadd.f32 %v4903_v15, %v4861_v30  ;;  %v4863_v12 = vmul.f32 %v10297_v29, %v10297_v29  ;;  %v4864_v30 = vmul.f32 %v10300_v27, %v10300_v27  ;;  %v10323_v48 = vmul.f32 %v4590_v24, %v11563_v21 }
 0x804   :  { %v4600_v15 = vsel %vm4599_vm3, %v10194_v25, %v4596_v31  ;;  %v4606_v13 = vmul.f32 %v10215_v2, %v4605_v19  ;;  %v4633_v42 = vmul.f32 %v10283_v41, %v4632_v37  ;;  %v4765_v51 = vadd.f32 %v4764_v59, %v10297_v29 }
 0x805   :  { %11564 = vst [vmem:[#allocation59_spill] sm:$0xff] %v10323_v48  ;;  %v4802_v56 = vadd.f32 %v4801_v35, %v10300_v27  ;;  %v4865_v46 = vmul.f32 %v10313_v11, %v10313_v11  ;;  %v4615_v21 = vsub.f32 1.5, %v4614_v36  ;;  %v4905_v19 = vadd.f32 %v4904_v50, %v4863_v12 }
 0x806   :  { %v4322_v18 = vpop.xlane.xlu1 %4321  ;;  %v4942_v3 = vadd.f32 %v4941_v53, %v4864_v30  ;;  %v4766_v37 = vadd.f32 %v4765_v51, %v10313_v11  ;;  %v10341_v59 = vmul.f32 %v4600_v15, %v11565_v47  ;;  %v4866_v35 = vmul.f32 %v10323_v48, %v10323_v48 }
 0x807   :  { %v10294_v43 = vpop.eup %6934  ;;  %v10307_v6 = vmax.f32 %v4322_v18, 1e-24  ;;  %v4624_v18 = vmul.f32 0.5, %v4623_v7  ;;  %v4610_v7 = vsel %vm4609_vm7, %v10215_v2, %v4606_v13  ;;  %v4634_v36 = vmul.f32 0.5, %v4633_v42  ;;  %v11568_v13 = vld [vmem:[#allocation76_spill] sm:$0xff] }
 0x808   :  { %v4642_v8 = vmul.f32 %v10294_v43, %v10251_v58  ;;  %v4803_v50 = vadd.f32 %v4802_v56, %v10323_v48  ;;  %v4906_v30 = vadd.f32 %v4905_v19, %v4865_v46  ;;  %v4616_v51 = vmul.f32 %v10253_v16, %v4615_v21  ;;  %v11569_v56 = vld [vmem:[#allocation75_spill] sm:$0xff] }
 0x809   :  { %6936 = vrsqrt.f32 %v10307_v6  ;;  %v4625_v47 = vsub.f32 1.5, %v4624_v18  ;;  %v4867_v2 = vmul.f32 %v10341_v59, %v10341_v59  ;;  %v10362_v42 = vmul.f32 %v4610_v7, %v11568_v13 }
 0x80a   :  { %v4643_v25 = vmul.f32 %v10294_v43, %v4642_v8  ;;  %v11566_v8 = vld [vmem:[#allocation74_spill] sm:$0xff]  ;;  %v10365_v48 = vmul.f32 %v4610_v7, %v11569_v56  ;;  %v4943_v18 = vadd.f32 %v4942_v3, %v4866_v35  ;;  %v4635_v46 = vsub.f32 1.5, %v4634_v36  ;;  %v11572_v56 = vld [vmem:[#allocation41_spill] sm:$0xff] }
 0x80b   :  { %v10353_v53 = vmul.f32 %v4600_v15, %v11566_v8  ;;  %v4767_v8 = vadd.f32 %v4766_v37, %v10341_v59  ;;  %v4626_v19 = vmul.f32 %v10268_v44, %v4625_v47  ;;  %v4907_v5 = vadd.f32 %v4906_v30, %v4867_v2 }
 0x80c   :  { %11570 = vst [vmem:[#allocation9_spill] sm:$0xff] %v10365_v48  ;;  %v4869_v35 = vmul.f32 %v10362_v42, %v10362_v42  ;;  %v4870_v36 = vmul.f32 %v10365_v48, %v10365_v48  ;;  %v4636_v13 = vmul.f32 %v10283_v41, %v4635_v46  ;;  %vm4648_vm0 = vweird.f32 %v10294_v43 }
 0x80d   :  { %11567 = vst [vmem:[#allocation60_spill] sm:$0xff] %v10353_v53  ;;  %v4804_v21 = vadd.f32 %v4803_v50, %v10353_v53  ;;  %v4768_v46 = vadd.f32 %v4767_v8, %v10362_v42  ;;  %vm4647_vm2 = vweird.f32 %v10251_v58  ;;  %v11580_v58 = vld [vmem:[#allocation44_spill] sm:$0xff]  ;;  %vm4657_vm6 = vweird.f32 %v10307_v6 }
 0x80e   :  { %v4325_v24 = vpop.xlane.xlu2 %4324  ;;  %vm4649_vm3 = vmor %vm4647_vm2, %vm4648_vm0 }
 0x80f   :  { %v10337_v31 = vmax.f32 %v4325_v24, 1e-24  ;;  %v10345_v22 = vpop.eup %6936  ;;  %v4644_v24 = vmul.f32 0.5, %v4643_v25  ;;  %v4868_v25 = vmul.f32 %v10353_v53, %v10353_v53 }
 0x810   :  { %v4652_v12 = vmul.f32 %v10345_v22, %v10307_v6  ;;  %vm4658_vm4 = vweird.f32 %v10345_v22 }
 0x811   :  { %6938 = vrsqrt.f32 %v10337_v31  ;;  %v4645_v3 = vsub.f32 1.5, %v4644_v24  ;;  %v4944_v52 = vadd.f32 %v4943_v18, %v4868_v25  ;;  %vm4659_vm8 = vmor %vm4657_vm6, %vm4658_vm4  ;;  %vm4667_vm9 = vweird.f32 %v10337_v31 }
 0x812   :  { %v4653_v15 = vmul.f32 %v10345_v22, %v4652_v12  ;;  %v4620_v12 = vsel %vm4619_vm10, %v10253_v16, %v4616_v51  ;;  %v4630_v51 = vsel %vm4629_vm13, %v10268_v44, %v4626_v19  ;;  %v11574_v44 = vld [vmem:[#allocation40_spill] sm:$0xff] }
 0x813   :  { %v10391_v30 = vmul.f32 %v4620_v12, %v11571_v4  ;;  %v4646_v53 = vmul.f32 %v10294_v43, %v4645_v3  ;;  %v10404_v19 = vmul.f32 %v4630_v51, %v11574_v44  ;;  %v4908_v3 = vadd.f32 %v4907_v5, %v4869_v35 }
 0x814   :  { %v4654_v37 = vmul.f32 0.5, %v4653_v15  ;;  %v10396_v15 = vmul.f32 %v4620_v12, %v11572_v56  ;;  %v4640_v12 = vsel %vm4639_vm1, %v10283_v41, %v4636_v13  ;;  %v11578_v56 = vld [vmem:[#allocation43_spill] sm:$0xff] }
 0x815   :  { %11575 = vst [vmem:[#allocation58_spill] sm:$0xff] %v10404_v19  ;;  %v4871_v25 = vmul.f32 %v10391_v30, %v10391_v30  ;;  %v10419_v41 = vmul.f32 %v4640_v12, %v11578_v56  ;;  %v10422_v5 = vmul.f32 %v4640_v12, %v11580_v58 }
 0x816   :  { %v4655_v24 = vsub.f32 1.5, %v4654_v37  ;;  %11573 = vst [vmem:[#allocation24_spill] sm:$0xff] %v10396_v15  ;;  %v11576_v37 = vld [vmem:[#allocation42_spill] sm:$0xff] }
 0x817   :  { %v10375_v7 = vpop.eup %6938  ;;  %11579 = vst [vmem:[#allocation26_spill] sm:$0xff] %v10419_v41  ;;  %v4909_v56 = vadd.f32 %v4908_v3, %v4871_v25  ;;  %v11588_v3 = vld [vmem:[#allocation48_spill] sm:$0xff] }
 0x818   :  { %v4662_v50 = vmul.f32 %v10375_v7, %v10337_v31  ;;  %v4328_v47 = vpop.xlane.xlu0 %4327  ;;  %v4656_v18 = vmul.f32 %v10345_v22, %v4655_v24  ;;  %11581 = vst [vmem:[#allocation13_spill] sm:$0xff] %v10422_v5  ;;  %vm4668_vm7 = vweird.f32 %v10375_v7  ;;  %v4875_v31 = vmul.f32 %v10419_v41, %v10419_v41 }
 0x819   :  { %v10388_v16 = vmax.f32 %v4328_v47, 1e-24  ;;  %v4805_v47 = vadd.f32 %v4804_v21, %v10365_v48  ;;  %v4945_v21 = vadd.f32 %v4944_v52, %v4870_v36  ;;  %v4873_v36 = vmul.f32 %v10404_v19, %v10404_v19  ;;  %v11584_v52 = vld [vmem:[#allocation46_spill] sm:$0xff]  ;;  %vm4669_vm10 = vmor %vm4667_vm9, %vm4668_vm7  ;;  %v6559_v48 = vld [vmem:[#allocation2 + $0x498] sm:$0xf0] }
 0x81a   :  { %v4663_v2 = vmul.f32 %v10375_v7, %v4662_v50  ;;  %v10407_v50 = vmul.f32 %v4630_v51, %v11576_v37  ;;  %v4650_v51 = vsel %vm4649_vm3, %v10294_v43, %v4646_v53  ;;  %v11582_v53 = vld [vmem:[#allocation45_spill] sm:$0xff]  ;;  %v4660_v6 = vsel %vm4659_vm8, %v10345_v22, %v4656_v18 }
 0x81b   :  { %6940 = vrsqrt.f32 %v10388_v16  ;;  %v10433_v24 = vmul.f32 %v4650_v51, %v11582_v53  ;;  %v4769_v37 = vadd.f32 %v4768_v46, %v10391_v30  ;;  %v4806_v12 = vadd.f32 %v4805_v47, %v10396_v15  ;;  %v11586_v53 = vld [vmem:[#allocation47_spill] sm:$0xff] }
 0x81c   :  { %v4664_v4 = vmul.f32 0.5, %v4663_v2  ;;  %11577 = vst [vmem:[#allocation11_spill] sm:$0xff] %v10407_v50  ;;  %v4872_v2 = vmul.f32 %v10396_v15, %v10396_v15  ;;  %v4874_v13 = vmul.f32 %v10407_v50, %v10407_v50  ;;  %v10452_v47 = vmul.f32 %v4660_v6, %v11586_v53 }
 0x81d   :  { %11583 = vst [vmem:[#allocation28_spill] sm:$0xff] %v10433_v24  ;;  %v4770_v18 = vadd.f32 %v4769_v37, %v10404_v19  ;;  %v4807_v46 = vadd.f32 %v4806_v12, %v10407_v50  ;;  %v4910_v25 = vadd.f32 %v4909_v56, %v4873_v36  ;;  %vm4677_vm12 = vweird.f32 %v10388_v16  ;;  %v6796_v50 = vld [vmem:[#allocation2 + $0x4c4] sm:$0xf0] }
 0x81e   :  { %v4665_v8 = vsub.f32 1.5, %v4664_v4  ;;  %v10436_v4 = vmul.f32 %v4650_v51, %v11584_v52  ;;  %v4946_v58 = vadd.f32 %v4945_v21, %v4872_v2  ;;  %11587 = vst [vmem:[#allocation30_spill] sm:$0xff] %v10452_v47  ;;  %v10455_v21 = vmul.f32 %v4660_v6, %v11588_v3 }
 0x81f   :  { %v4877_v52 = vmul.f32 %v10433_v24, %v10433_v24  ;;  %v4771_v53 = vadd.f32 %v4770_v18, %v10419_v41  ;;  %v4808_v6 = vadd.f32 %v4807_v46, %v10422_v5  ;;  %v4911_v3 = vadd.f32 %v4910_v25, %v4875_v31 }
 0x820   :  { %v4666_v43 = vmul.f32 %v10375_v7, %v4665_v8  ;;  %11585 = vst [vmem:[#allocation15_spill] sm:$0xff] %v10436_v4  ;;  %v4876_v8 = vmul.f32 %v10422_v5, %v10422_v5  ;;  %v4947_v2 = vadd.f32 %v4946_v58, %v4874_v13  ;;  %v4878_v15 = vmul.f32 %v10436_v4, %v10436_v4  ;;  %v6581_v5 = vld [vmem:[#allocation2 + $0x4c0] sm:$0xf] }
 0x821   :  { %v6941_v35 = vpop.eup %6940  ;;  %11589 = vst [vmem:[#allocation17_spill] sm:$0xff] %v10455_v21  ;;  %v4879_v13 = vmul.f32 %v10452_v47, %v10452_v47  ;;  %v4880_v56 = vmul.f32 %v10455_v21, %v10455_v21 }
 0x822   :  { %v4672_v44 = vmul.f32 %v6941_v35, %v10388_v16  ;;  %v4670_v51 = vsel %vm4669_vm10, %v10375_v7, %v4666_v43  ;;  %v11590_v7 = vld [vmem:[#allocation49_spill] sm:$0xff]  ;;  %v4948_v36 = vadd.f32 %v4947_v2, %v4876_v8  ;;  %vm4678_vm11 = vweird.f32 %v6941_v35 }
 0x823   :  { %v10462_v43 = vmul.f32 %v4670_v51, %v11590_v7  ;;  %v4772_v7 = vadd.f32 %v4771_v53, %v10433_v24  ;;  %vm4679_vm13 = vmor %vm4677_vm12, %vm4678_vm11 }
 0x824   :  { %v4673_v22 = vmul.f32 %v6941_v35, %v4672_v44  ;;  %v11592_v44 = vld [vmem:[#allocation50_spill] sm:$0xff] }
 0x825   :  { %11591 = vst [vmem:[#allocation32_spill] sm:$0xff] %v10462_v43  ;;  %v10465_v37 = vmul.f32 %v4670_v51, %v11592_v44  ;;  %v4809_v51 = vadd.f32 %v4808_v6, %v10436_v4  ;;  %v4912_v44 = vadd.f32 %v4911_v3, %v4877_v52  ;;  %v4881_v18 = vmul.f32 %v10462_v43, %v10462_v43  ;;  %v11594_v6 = vld [vmem:[#allocation52_spill] sm:$0xff] }
 0x826   :  { %v4674_v12 = vmul.f32 0.5, %v4673_v22  ;;  %v4949_v22 = vadd.f32 %v4948_v36, %v4878_v15  ;;  %v4773_v46 = vadd.f32 %v4772_v7, %v10452_v47  ;;  %v11596_v36 = vld [vmem:[#allocation51_spill] sm:$0xff] }
 0x827   :  { %11593 = vst [vmem:[#allocation19_spill] sm:$0xff] %v10465_v37  ;;  %v4882_v31 = vmul.f32 %v10465_v37, %v10465_v37  ;;  %v4810_v25 = vadd.f32 %v4809_v51, %v10455_v21  ;;  %v4913_v2 = vadd.f32 %v4912_v44, %v4879_v13 }
 0x828   :  { %v4675_v58 = vsub.f32 1.5, %v4674_v12  ;;  %v4950_v12 = vadd.f32 %v4949_v22, %v4880_v56  ;;  %v4774_v52 = vadd.f32 %v4773_v46, %v10462_v43 }
 0x829   :  { %v4811_v15 = vadd.f32 %v4810_v25, %v10465_v37 }
 0x82a   :  { %v4676_v8 = vmul.f32 %v6941_v35, %v4675_v58  ;;  %v4914_v58 = vadd.f32 %v4913_v2, %v4881_v18  ;;  %v4951_v16 = vadd.f32 %v4950_v12, %v4882_v31 }
 0x82c   :  { %v4680_v53 = vsel %vm4679_vm13, %v6941_v35, %v4676_v8 }
 0x82d   :  { %v10485_v3 = vmul.f32 %v4680_v53, %v11594_v6  ;;  %v10488_v4 = vmul.f32 %v4680_v53, %v11596_v36 }
 0x82f   :  { %11595 = vst [vmem:[#allocation34_spill] sm:$0xff] %v10485_v3  ;;  %v4775_v7 = vadd.f32 %v4774_v52, %v10485_v3  ;;  %v4812_v51 = vadd.f32 %v4811_v15, %v10488_v4  ;;  %v4883_v13 = vmul.f32 %v10485_v3, %v10485_v3  ;;  %v4884_v35 = vmul.f32 %v10488_v4, %v10488_v4 }
 0x830   :  { %11597 = vst [vmem:[#allocation21_spill] sm:$0xff] %v10488_v4 }
 0x831   :  { %v4776_v56 = vrot.slane %v4775_v7, 4  ;;  %v4813_v44 = vrot.slane %v4812_v51, 4  ;;  %v4915_v22 = vadd.f32 %v4914_v58, %v4883_v13  ;;  %v4952_v8 = vadd.f32 %v4951_v16, %v4884_v35 }
 0x833   :  { %v4777_v46 = vadd.f32 %v4776_v56, %v4775_v7  ;;  %v4814_v25 = vadd.f32 %v4813_v44, %v4812_v51  ;;  %v4916_v53 = vrot.slane %v4915_v22, 4  ;;  %v4953_v6 = vrot.slane %v4952_v8, 4 }
 0x835   :  { %v4778_v18 = vrot.slane %v4777_v46, 2  ;;  %v4815_v31 = vrot.slane %v4814_v25, 2  ;;  %v4917_v2 = vadd.f32 %v4916_v53, %v4915_v22  ;;  %v4954_v12 = vadd.f32 %v4953_v6, %v4952_v8  ;;  %v6802_v6 = vld [vmem:[#allocation2 + $0x4f4] sm:$0xf0] }
 0x837   :  { %v4779_v52 = vadd.f32 %v4778_v18, %v4777_v46  ;;  %v4816_v15 = vadd.f32 %v4815_v31, %v4814_v25  ;;  %v4918_v36 = vrot.slane %v4917_v2, 2  ;;  %v4955_v37 = vrot.slane %v4954_v12, 2  ;;  %v6785_v18 = vld [vmem:[#allocation2 + $0x474] sm:$0xf]  ;;  %v6543_v31 = vld [vmem:[#allocation2 + $0x478] sm:$0xf0] }
 0x839   :  { %v4780_v3 = vrot.slane %v4779_v52, 1  ;;  %v4817_v43 = vrot.slane %v4816_v15, 1  ;;  %v4919_v21 = vadd.f32 %v4918_v36, %v4917_v2  ;;  %v4956_v4 = vadd.f32 %v4955_v37, %v4954_v12  ;;  %v6533_v36 = vld [vmem:[#allocation2 + $0x460] sm:$0xf] }
 0x83a   :  { %v6546_v12 = vor.u32 %v6785_v18, %v6543_v31  ;;  %v6589_v18 = vld [vmem:[#allocation2 + $0x4d0] sm:$0xf]  ;;  %v6798_v31 = vld [vmem:[#allocation2 + $0x4d4] sm:$0xf0] }
 0x83b   :  { %v4781_v47 = vadd.f32 %v4780_v3, %v4779_v52  ;;  %v4818_v24 = vadd.f32 %v4817_v43, %v4816_v15  ;;  %v4920_v58 = vrot.slane %v4919_v21, 1  ;;  %v4957_v16 = vrot.slane %v4956_v4, 1  ;;  %v6801_v52 = vld [vmem:[#allocation2 + $0x4f4] sm:$0xf]  ;;  %v6607_v15 = vld [vmem:[#allocation2 + $0x4f8] sm:$0xf0] }
 0x83c   :  { %5555 = vmatpush.bf16.msrb.mxu2 %v6546_v12 }
 0x83d   :  { %v10496_v7 = vmul.f32 0.004, %v4781_v47  ;;  %v10498_v51 = vmul.f32 0.004, %v4818_v24  ;;  %v4921_v13 = vadd.f32 %v4920_v58, %v4919_v21  ;;  %v4958_v35 = vadd.f32 %v4957_v16, %v4956_v4  ;;  %v6541_v24 = vld [vmem:[#allocation2 + $0x470] sm:$0xf] }
 0x83e   :  { %v6786_v4 = vld [vmem:[#allocation2 + $0x474] sm:$0xf0]  ;;  %v6605_v21 = vld [vmem:[#allocation2 + $0x4f0] sm:$0xf]  ;;  %v6610_v58 = vor.u32 %v6801_v52, %v6607_v15  ;;  %v6784_v16 = vld [vmem:[#allocation2 + $0x464] sm:$0xf0] }
 0x83f   :  { %v4959_v56 = vmul.f32 0.004, %v4921_v13  ;;  %v4960_v44 = vmul.f32 0.004, %v4958_v35  ;;  %v4961_v22 = vmul.f32 %v10496_v7, %v10496_v7  ;;  %v4962_v8 = vmul.f32 %v10498_v51, %v10498_v51  ;;  %v6597_v13 = vld [vmem:[#allocation2 + $0x4e0] sm:$0xf] }
 0x840   :  { %v6542_v53 = vor.u32 %v6786_v4, %v6541_v24  ;;  %v6606_v2 = vor.u32 %v6802_v6, %v6605_v21  ;;  %v6800_v35 = vld [vmem:[#allocation2 + $0x4e4] sm:$0xf0]  ;;  %5644 = vmatpush.bf16.msrb.mxu3 %v6610_v58  ;;  %v6525_v24 = vld [vmem:[#allocation2 + $0x450] sm:$0xf]  ;;  %v6782_v4 = vld [vmem:[#allocation2 + $0x454] sm:$0xf0] }
 0x841   :  { %v4963_v46 = vsub.f32 %v4959_v56, %v4961_v22  ;;  %v4964_v37 = vsub.f32 %v4960_v44, %v4962_v8  ;;  %v6534_v56 = vor.u32 %v6784_v16, %v6533_v36  ;;  %v6598_v44 = vor.u32 %v6800_v35, %v6597_v13  ;;  %v6783_v22 = vld [vmem:[#allocation2 + $0x464] sm:$0xf]  ;;  %v6535_v8 = vld [vmem:[#allocation2 + $0x468] sm:$0xf0]  ;;  %v6527_v15 = vld [vmem:[#allocation2 + $0x458] sm:$0xf0] }
 0x842   :  { %5377 = vmatpush.bf16.msrb.mxu0 %v6542_v53  ;;  %5466 = vmatpush.bf16.msrb.mxu1 %v6606_v2  ;;  %v6781_v2 = vld [vmem:[#allocation2 + $0x454] sm:$0xf]  ;;  %v6526_v52 = vor.u32 %v6782_v4, %v6525_v24  ;;  %v6590_v16 = vor.u32 %v6798_v31, %v6589_v18  ;;  %v6591_v35 = vld [vmem:[#allocation2 + $0x4d8] sm:$0xf0]  ;;  %v6519_v24 = vld [vmem:[#allocation2 + $0x448] sm:$0xf0]  ;;  %v6582_v18 = vor.u32 %v6796_v50, %v6581_v5 }
 0x843   :  { %v4965_v3 = vmax.f32 %v4963_v46, 0.0  ;;  %v4966_v43 = vmax.f32 %v4964_v37, 0.0  ;;  %v6799_v46 = vld [vmem:[#allocation2 + $0x4e4] sm:$0xf]  ;;  %v6797_v36 = vld [vmem:[#allocation2 + $0x4d4] sm:$0xf]  ;;  %v6530_v13 = vor.u32 %v6781_v2, %v6527_v15 }
 0x844   :  { %v6778_v2 = vld [vmem:[#allocation2 + $0x434] sm:$0xf0]  ;;  %v6773_v50 = vld [vmem:[#allocation2 + $0x414] sm:$0xf] }
 0x845   :  { %v10504_v25 = vadd.f32 1e-05, %v4965_v3  ;;  %v10506_v47 = vadd.f32 1e-05, %v4966_v43  ;;  %v6538_v3 = vor.u32 %v6783_v22, %v6535_v8  ;;  %v6599_v43 = vld [vmem:[#allocation2 + $0x4e8] sm:$0xf0] }
 0x846   :  { %v6602_v6 = vor.u32 %v6799_v46, %v6599_v43  ;;  %5378 = vmatpush.bf16.msrb.mxu0 %v6534_v56  ;;  %5467 = vmatpush.bf16.msrb.mxu1 %v6598_v44  ;;  %v6517_v22 = vld [vmem:[#allocation2 + $0x440] sm:$0xf]  ;;  %v6594_v46 = vor.u32 %v6797_v36, %v6591_v35  ;;  %v6780_v43 = vld [vmem:[#allocation2 + $0x444] sm:$0xf0]  ;;  %v6779_v56 = vld [vmem:[#allocation2 + $0x444] sm:$0xf] }
 0x847   :  { %6942 = vrsqrt.f32 %v10504_v25  ;;  %5556 = vmatpush.bf16.msrb.mxu2 %v6538_v3  ;;  %v6518_v19 = vor.u32 %v6780_v43, %v6517_v22  ;;  %v6583_v44 = vld [vmem:[#allocation2 + $0x4c8] sm:$0xf0]  ;;  %v6522_v31 = vor.u32 %v6779_v56, %v6519_v24  ;;  %v6573_v36 = vld [vmem:[#allocation2 + $0x4b0] sm:$0xf]  ;;  %vm4987_vm15 = vweird.f32 %v10506_v47  ;;  %v6511_v35 = vld [vmem:[#allocation2 + $0x438] sm:$0xf0] }
 0x848   :  { %6944 = vrsqrt.f32 %v10506_v47  ;;  %5645 = vmatpush.bf16.msrb.mxu3 %v6602_v6  ;;  %v6509_v6 = vld [vmem:[#allocation2 + $0x430] sm:$0xf]  ;;  %v6793_v22 = vld [vmem:[#allocation2 + $0x4b4] sm:$0xf]  ;;  %v6501_v43 = vld [vmem:[#allocation2 + $0x420] sm:$0xf]  ;;  %vm4977_vm2 = vweird.f32 %v10504_v25 }
 0x849   :  { %v6510_v5 = vor.u32 %v6778_v2, %v6509_v6  ;;  %v6776_v56 = vld [vmem:[#allocation2 + $0x424] sm:$0xf0]  ;;  %v6565_v24 = vld [vmem:[#allocation2 + $0x4a0] sm:$0xf]  ;;  %v6567_v6 = vld [vmem:[#allocation2 + $0x4a8] sm:$0xf0] }
 0x84a   :  { %5379 = vmatpush.bf16.msrb.mxu0 %v6526_v52  ;;  %5468 = vmatpush.bf16.msrb.mxu1 %v6590_v16  ;;  %v6777_v52 = vld [vmem:[#allocation2 + $0x434] sm:$0xf] }
 0x84b   :  { %5557 = vmatpush.bf16.msrb.mxu2 %v6530_v13  ;;  %v6575_v13 = vld [vmem:[#allocation2 + $0x4b8] sm:$0xf0] }
 0x84c   :  { %5646 = vmatpush.bf16.msrb.mxu3 %v6594_v46  ;;  %v6514_v46 = vor.u32 %v6777_v52, %v6511_v35  ;;  %v6557_v52 = vld [vmem:[#allocation2 + $0x490] sm:$0xf] }
 0x84d   :  { %v10510_v37 = vpop.eup %6942 }
 0x84e   :  { %v10512_v21 = vpop.eup %6944  ;;  %v4972_v53 = vmul.f32 %v10510_v37, %v10504_v25  ;;  %vm4978_vm0 = vweird.f32 %v10510_v37  ;;  %5380 = vmatpush.bf16.msrb.mxu0 %v6518_v19  ;;  %5469 = vmatpush.bf16.msrb.mxu1 %v6582_v18  ;;  %v6775_v19 = vld [vmem:[#allocation2 + $0x424] sm:$0xf] }
 0x84f   :  { %v4982_v12 = vmul.f32 %v10512_v21, %v10506_v47  ;;  %vm4988_vm14 = vweird.f32 %v10512_v21  ;;  %5558 = vmatpush.bf16.msrb.mxu2 %v6522_v31  ;;  %vm4979_vm3 = vmor %vm4977_vm2, %vm4978_vm0  ;;  %v6791_v31 = vld [vmem:[#allocation2 + $0x4a4] sm:$0xf] }
 0x850   :  { %v4973_v58 = vmul.f32 %v10510_v37, %v4972_v53  ;;  %v6795_v53 = vld [vmem:[#allocation2 + $0x4c4] sm:$0xf]  ;;  %vm10527_vm1 = vmor %vm4987_vm15, %vm4988_vm14 }
 0x851   :  { %v4983_v8 = vmul.f32 %v10512_v21, %v4982_v12  ;;  %v6586_v15 = vor.u32 %v6795_v53, %v6583_v44  ;;  %v6578_v53 = vor.u32 %v6793_v22, %v6575_v13  ;;  %v6792_v44 = vld [vmem:[#allocation2 + $0x4a4] sm:$0xf0]  ;;  %v6570_v22 = vor.u32 %v6791_v31, %v6567_v6  ;;  %v6495_v13 = vld [vmem:[#allocation2 + $0x418] sm:$0xf0]  ;;  %v6551_v31 = vld [vmem:[#allocation2 + $0x488] sm:$0xf0] }
 0x852   :  { %v4974_v41 = vmul.f32 0.5, %v4973_v58  ;;  %v6794_v58 = vld [vmem:[#allocation2 + $0x4b4] sm:$0xf0]  ;;  %5381 = vmatpush.bf16.msrb.mxu0 %v6510_v5  ;;  %v4998_v6 = vld [vmem:[#allocation4 + $0x6] ss:$8 sm:$0x3] }
 0x853   :  { %v4984_v4 = vmul.f32 0.5, %v4983_v8  ;;  %v4968_v8 = vld [vmem:[#allocation4 + $0x5] ss:$8 sm:$0x3]  ;;  %v6574_v47 = vor.u32 %v6794_v58, %v6573_v36  ;;  %5647 = vmatpush.bf16.msrb.mxu3 %v6586_v15  ;;  %5559 = vmatpush.bf16.msrb.mxu2 %v6514_v46  ;;  %v6493_v36 = vld [vmem:[#allocation2 + $0x410] sm:$0xf]  ;;  %v6498_v46 = vor.u32 %v6773_v50, %v6495_v13 }
 0x854   :  { %v4975_v3 = vsub.f32 1.5, %v4974_v41  ;;  %v6774_v58 = vld [vmem:[#allocation2 + $0x414] sm:$0xf0] }
 0x855   :  { %v4985_v12 = vsub.f32 1.5, %v4984_v4  ;;  %5470 = vmatpush.bf16.msrb.mxu1 %v6574_v47  ;;  %v6494_v5 = vor.u32 %v6774_v58, %v6493_v36  ;;  %v11600_v36 = vld [vmem:[#allocation53_spill] sm:$0xff]  ;;  %v11603_v50 = vld [vmem:[#allocation55_spill] sm:$0xff] }
 0x856   :  { %v4976_v41 = vmul.f32 %v10510_v37, %v4975_v3  ;;  %v6503_v3 = vld [vmem:[#allocation2 + $0x428] sm:$0xf0] }
 0x857   :  { %v4986_v16 = vmul.f32 %v10512_v21, %v4985_v12  ;;  %v6502_v12 = vor.u32 %v6776_v56, %v6501_v43  ;;  %v6506_v15 = vor.u32 %v6775_v19, %v6503_v3  ;;  %5648 = vmatpush.bf16.msrb.mxu3 %v6578_v53  ;;  %v6485_v43 = vld [vmem:[#allocation2 + $0x400] sm:$0xf]  ;;  %v6772_v56 = vld [vmem:[#allocation2 + $0x404] sm:$0xf0]  ;;  %v6771_v19 = vld [vmem:[#allocation2 + $0x404] sm:$0xf] }
 0x858   :  { %v4980_v2 = vsel %vm4979_vm3, %v10510_v37, %v4976_v41  ;;  %v6487_v3 = vld [vmem:[#allocation2 + $0x408] sm:$0xf0] }
 0x859   :  { %v4990_v4 = vsel %vm10527_vm1, %v10512_v21, %v4986_v16  ;;  %v6566_v21 = vor.u32 %v6792_v44, %v6565_v24  ;;  %v6790_v16 = vld [vmem:[#allocation2 + $0x494] sm:$0xf0]  ;;  %5382 = vmatpush.bf16.msrb.mxu0 %v6502_v12  ;;  %5560 = vmatpush.bf16.msrb.mxu2 %v6506_v15  ;;  %v6788_v44 = vld [vmem:[#allocation2 + $0x484] sm:$0xf0]  ;;  %v6490_v15 = vor.u32 %v6771_v19, %v6487_v3 }
 0x85a   :  { %v4993_v18 = vrot.slane %v4990_v4, 7  ;;  %v6789_v4 = vld [vmem:[#allocation2 + $0x494] sm:$0xf]  ;;  %v6558_v47 = vor.u32 %v6790_v16, %v6557_v52  ;;  %v11602_v16 = vld [vmem:[#allocation56_spill] sm:$0xff] }
 0x85b   :  { %5471 = vmatpush.bf16.msrb.mxu1 %v6566_v21  ;;  %5649 = vmatpush.bf16.msrb.mxu3 %v6570_v22  ;;  %v6562_v53 = vor.u32 %v6789_v4, %v6559_v48  ;;  %v11604_v4 = vld [vmem:[#allocation57_spill] sm:$0xff] }
 0x85c   :  { %v4994_v25 = vsel %vm2389_vm5, %v4980_v2, %v4993_v18  ;;  %v6787_v18 = vld [vmem:[#allocation2 + $0x484] sm:$0xf] }
 0x85d   :  { %v4996_v35 = vmul.f32 %v4994_v25, %v4968_v8  ;;  %v6549_v8 = vld [vmem:[#allocation2 + $0x480] sm:$0xf]  ;;  %5383 = vmatpush.bf16.msrb.mxu0 %v6494_v5  ;;  %v6486_v25 = vor.u32 %v6772_v56, %v6485_v43  ;;  %5561 = vmatpush.bf16.msrb.mxu2 %v6498_v46  ;;  %v6554_v58 = vor.u32 %v6787_v18, %v6551_v31  ;;  %v11606_v43 = vld [vmem:[#allocation78_spill] sm:$0xff] }
 0x85e   :  { %v6550_v21 = vor.u32 %v6788_v44, %v6549_v8  ;;  %v11607_v8 = vld [vmem:[#allocation79_spill] sm:$0xff] }
 0x85f   :  { %v10539_v37 = vperm.slane %v4996_v35, 0  ;;  %v10541_v41 = vperm.slane %v4996_v35, 1  ;;  %5472 = vmatpush.bf16.msrb.mxu1 %v6558_v47  ;;  %5650 = vmatpush.bf16.msrb.mxu3 %v6562_v53  ;;  %v11601_v35 = vld [vmem:[#allocation54_spill] sm:$0xff]  ;;  %v11605_v47 = vld [vmem:[#allocation80_spill] sm:$0xff] }
 0x861   :  { %v5005_v24 = vmul.f32 %v10541_v41, %v10498_v51  ;;  %v5004_v2 = vmul.f32 %v10539_v37, %v10496_v7  ;;  %v5012_v48 = vmul.f32 %v10539_v37, %v11600_v36  ;;  %v5013_v22 = vmul.f32 %v10541_v41, %v11601_v35  ;;  %5384 = vmatpush.bf16.msrb.mxu0 %v6486_v25 }
 0x862   :  { %v5014_v7 = vmul.f32 %v10539_v37, %v11602_v16  ;;  %v5015_v13 = vmul.f32 %v10541_v41, %v11603_v50  ;;  %v5016_v5 = vmul.f32 %v10539_v37, %v11604_v4  ;;  %v5018_v46 = vmul.f32 %v10539_v37, %v11605_v47  ;;  %5562 = vmatpush.bf16.msrb.mxu2 %v6490_v15 }
 0x863   :  { %v5008_v12 = vrot.slane %v5005_v24, 7  ;;  %v5017_v56 = vmul.f32 %v10541_v41, %v11606_v43  ;;  %v5019_v24 = vmul.f32 %v10541_v41, %v11607_v8  ;;  %5473 = vmatpush.bf16.msrb.mxu1 %v6550_v21  ;;  %v5020_v19 = vmul.f32 %v10539_v37, %v9863_v39  ;;  %5651 = vmatpush.bf16.msrb.mxu3 %v6554_v58 }
 0x864   :  { %v5022_v3 = vmul.f32 %v10539_v37, %v9891_v1  ;;  %v5021_v18 = vmul.f32 %v10541_v41, %v9866_v40  ;;  %v5023_v31 = vmul.f32 %v10541_v41, %v9895_v34  ;;  %v5031_v36 = vmul.f32 %v10541_v41, %v10000_v14 }
 0x865   :  { %v5009_v51 = vsel %vm2389_vm5, %v5004_v2, %v5008_v12  ;;  %v5030_v2 = vmul.f32 %v10539_v37, %v9988_v60  ;;  %v5029_v60 = vmul.f32 %v10541_v41, %v9978_v9  ;;  %v5034_v58 = vmul.f32 %v10539_v37, %v10035_v61 }
 0x866   :  { %v5011_v52 = vsub.f32 %v4998_v6, %v5009_v51  ;;  %v5028_v6 = vmul.f32 %v10539_v37, %v9960_v54  ;;  %v5035_v35 = vmul.f32 %v10541_v41, %v10052_v17  ;;  %v5036_v9 = vmul.f32 %v10539_v37, %v10057_v55 }
 0x867   :  { %v5038_v14 = vmul.f32 %v10539_v37, %v10099_v0  ;;  %v5039_v55 = vmul.f32 %v10541_v41, %v10102_v10 }
 0x868   :  { %v10564_v53 = vperm.slane %v5011_v52, 0  ;;  %v10566_v44 = vperm.slane %v5011_v52, 1  ;;  %v5033_v52 = vmul.f32 %v10541_v41, %v10028_v63 }
 0x86a   :  { %v5081_v12 = vadd.f32 %v10564_v53, %v5012_v48  ;;  %v5083_v39 = vadd.f32 %v10564_v53, %v5014_v7  ;;  %v5082_v25 = vadd.f32 %v10566_v44, %v5013_v22  ;;  %v5084_v1 = vadd.f32 %v10566_v44, %v5015_v13 }
 0x86b   :  { %v5085_v21 = vadd.f32 %v10564_v53, %v5016_v5  ;;  %v5087_v40 = vadd.f32 %v10564_v53, %v5018_v46  ;;  %v5086_v34 = vadd.f32 %v10566_v44, %v5017_v56  ;;  %v5088_v15 = vadd.f32 %v10566_v44, %v5019_v24 }
 0x86c   :  { %v5145_v54 = vpack.c.bf16 %v5083_v39, %v5081_v12  ;;  %v5146_v51 = vpack.c.bf16 %v5084_v1, %v5082_v25  ;;  %v5032_v48 = vmul.f32 %v10539_v37, %v10011_v33  ;;  %v10601_v22 = vadd.f32 %v10564_v53, %v5020_v19 }
 0x86d   :  { %v10607_v33 = vpack.c.bf16 %v5087_v40, %v5085_v21  ;;  %v10609_v61 = vpack.c.bf16 %v5088_v15, %v5086_v34  ;;  %v10612_v63 = vadd.f32 %v10564_v53, %v5022_v3  ;;  %v5097_v17 = vadd.f32 %v10564_v53, %v5028_v6 }
 0x86e   :  { %5385 = vmatmul.bf16.vlgmr.msrb.gmra.mxu0 %v5145_v54  ;;  %5474 = vmatmul.bf16.vlgmr.msrb.gmra.mxu1 %v5146_v51  ;;  %v5099_v16 = vadd.f32 %v10564_v53, %v5030_v2  ;;  %v5037_v7 = vmul.f32 %v10541_v41, %v10063_v28  ;;  %v10621_v0 = vadd.f32 %v10566_v44, %v5021_v18 }
 0x86f   :  { %5563 = vmatmul.bf16.vlgmr.msrb.gmra.mxu2 %v5145_v54  ;;  %5652 = vmatmul.bf16.vlgmr.msrb.gmra.mxu3 %v5146_v51  ;;  %v5098_v50 = vadd.f32 %v10566_v44, %v5029_v60  ;;  %v5100_v13 = vadd.f32 %v10566_v44, %v5031_v36  ;;  %v5101_v4 = vadd.f32 %v10564_v53, %v5032_v48 }
 0x870   :  { %v10627_v5 = vadd.f32 %v10566_v44, %v5023_v31  ;;  %v10629_v47 = vpack.c.bf16 %v5099_v16, %v5097_v17  ;;  %v5103_v46 = vadd.f32 %v10564_v53, %v5034_v58  ;;  %v5102_v28 = vadd.f32 %v10566_v44, %v5033_v52  ;;  %v11609_v52 = vld [vmem:[#allocation14_spill] sm:$0xff]  ;;  %v11611_v17 = vld [vmem:[#allocation20_spill] sm:$0xff] }
 0x871   :  { %v10633_v43 = vpack.c.bf16 %v5100_v13, %v5098_v50  ;;  %v5104_v10 = vadd.f32 %v10566_v44, %v5035_v35  ;;  %v5105_v56 = vadd.f32 %v10564_v53, %v5036_v9  ;;  %v5107_v8 = vadd.f32 %v10564_v53, %v5038_v14  ;;  %v11610_v9 = vld [vmem:[#allocation18_spill] sm:$0xff] }
 0x872   :  { %v10638_v24 = vpack.c.bf16 %v5103_v46, %v5101_v4  ;;  %v5106_v19 = vadd.f32 %v10566_v44, %v5037_v7  ;;  %v5108_v3 = vadd.f32 %v10566_v44, %v5039_v55  ;;  %v5040_v18 = vmul.f32 %v10539_v37, %v10110_v57  ;;  %v11612_v13 = vld [vmem:[#allocation22_spill] sm:$0xff] }
 0x873   :  { %v10644_v31 = vpack.c.bf16 %v5104_v10, %v5102_v28  ;;  %v10646_v6 = vpack.c.bf16 %v5107_v8, %v5105_v56  ;;  %v5042_v2 = vmul.f32 %v10539_v37, %v10137_v32  ;;  %v5041_v12 = vmul.f32 %v10541_v41, %v10130_v38 }
 0x874   :  { %v10652_v39 = vpack.c.bf16 %v5108_v3, %v5106_v19  ;;  %v5109_v25 = vadd.f32 %v10564_v53, %v5040_v18  ;;  %v5043_v1 = vmul.f32 %v10541_v41, %v10151_v23  ;;  %v5044_v57 = vmul.f32 %v10539_v37, %v10163_v20 }
 0x875   :  { %v5111_v21 = vadd.f32 %v10564_v53, %v5042_v2  ;;  %v5110_v40 = vadd.f32 %v10566_v44, %v5041_v12  ;;  %v5046_v32 = vmul.f32 %v10539_v37, %v10190_v26  ;;  %v5045_v38 = vmul.f32 %v10541_v41, %v10166_v45  ;;  %v11608_v26 = vld [vmem:[#allocation16_spill] sm:$0xff] }
 0x876   :  { %v5112_v34 = vadd.f32 %v10566_v44, %v5043_v1  ;;  %v5113_v15 = vadd.f32 %v10564_v53, %v5044_v57  ;;  %v5047_v23 = vmul.f32 %v10541_v41, %v10199_v62  ;;  %v5048_v20 = vmul.f32 %v10539_v37, %v10222_v49  ;;  %v11614_v57 = vld [vmem:[#allocation60_spill] sm:$0xff] }
 0x877   :  { %v10671_v54 = vpack.c.bf16 %v5111_v21, %v5109_v25  ;;  %v5115_v51 = vadd.f32 %v10564_v53, %v5046_v32  ;;  %v5114_v60 = vadd.f32 %v10566_v44, %v5045_v38  ;;  %v5050_v36 = vmul.f32 %v10539_v37, %v11608_v26  ;;  %v11613_v25 = vld [vmem:[#allocation59_spill] sm:$0xff]  ;;  %v11615_v38 = vld [vmem:[#allocation9_spill] sm:$0xff] }
 0x878   :  { %v10677_v45 = vpack.c.bf16 %v5112_v34, %v5110_v40  ;;  %v5116_v48 = vadd.f32 %v10566_v44, %v5047_v23  ;;  %v5117_v58 = vadd.f32 %v10564_v53, %v5048_v20  ;;  %v5049_v62 = vmul.f32 %v10541_v41, %v11609_v52 }
 0x879   :  { %v10683_v35 = vpack.c.bf16 %v5115_v51, %v5113_v15  ;;  %v5119_v49 = vadd.f32 %v10564_v53, %v5050_v36  ;;  %v5051_v14 = vmul.f32 %v10541_v41, %v11610_v9  ;;  %v5052_v16 = vmul.f32 %v10539_v37, %v11611_v17  ;;  %v11616_v15 = vld [vmem:[#allocation24_spill] sm:$0xff]  ;;  %v11619_v9 = vld [vmem:[#allocation11_spill] sm:$0xff]  ;;  %v11620_v17 = vld [vmem:[#allocation13_spill] sm:$0xff] }
 0x87a   :  { %v10690_v7 = vpack.c.bf16 %v5116_v48, %v5114_v60  ;;  %v5118_v55 = vadd.f32 %v10566_v44, %v5049_v62  ;;  %v5054_v50 = vmul.f32 %v10539_v37, %v10297_v29  ;;  %v5053_v4 = vmul.f32 %v10541_v41, %v11612_v13  ;;  %v11621_v13 = vld [vmem:[#allocation28_spill] sm:$0xff] }
 0x87b   :  { %v10697_v46 = vpack.c.bf16 %v5119_v49, %v5117_v58  ;;  %v5120_v28 = vadd.f32 %v10566_v44, %v5051_v14  ;;  %v5121_v10 = vadd.f32 %v10564_v53, %v5052_v16  ;;  %v5055_v56 = vmul.f32 %v10541_v41, %v10300_v27  ;;  %v11618_v58 = vld [vmem:[#allocation26_spill] sm:$0xff] }
 0x87c   :  { %v5123_v8 = vadd.f32 %v10564_v53, %v5054_v50  ;;  %v5122_v29 = vadd.f32 %v10566_v44, %v5053_v4  ;;  %v5056_v19 = vmul.f32 %v10539_v37, %v10313_v11  ;;  %v5058_v27 = vmul.f32 %v10539_v37, %v10341_v59 }
 0x87d   :  { %v10711_v3 = vpack.c.bf16 %v5120_v28, %v5118_v55  ;;  %v5124_v18 = vadd.f32 %v10566_v44, %v5055_v56  ;;  %v5057_v1 = vmul.f32 %v10541_v41, %v11613_v25  ;;  %v5059_v11 = vmul.f32 %v10541_v41, %v11614_v57  ;;  %v11622_v28 = vld [vmem:[#allocation30_spill] sm:$0xff]  ;;  %v11625_v57 = vld [vmem:[#allocation32_spill] sm:$0xff] }
 0x87e   :  { %5390 = vmatmul.bf16.gmra.mxu0 %v10607_v33  ;;  %5479 = vmatmul.bf16.gmra.mxu1 %v10609_v61  ;;  %v10716_v2 = vpack.c.bf16 %v5123_v8, %v5121_v10  ;;  %v5125_v12 = vadd.f32 %v10564_v53, %v5056_v19  ;;  %v5060_v21 = vmul.f32 %v10539_v37, %v10362_v42  ;;  %v11617_v42 = vld [vmem:[#allocation58_spill] sm:$0xff] }
 0x87f   :  { %5568 = vmatmul.bf16.gmra.mxu2 %v10607_v33  ;;  %5657 = vmatmul.bf16.gmra.mxu3 %v10609_v61  ;;  %v10723_v33 = vpack.c.bf16 %v5124_v18, %v5122_v29  ;;  %v5127_v61 = vadd.f32 %v10564_v53, %v5058_v27  ;;  %v5062_v59 = vmul.f32 %v10539_v37, %v10391_v30  ;;  %v11623_v29 = vld [vmem:[#allocation15_spill] sm:$0xff]  ;;  %v11624_v18 = vld [vmem:[#allocation17_spill] sm:$0xff] }
 0x880   :  { %v5126_v40 = vadd.f32 %v10566_v44, %v5057_v1  ;;  %v5128_v32 = vadd.f32 %v10566_v44, %v5059_v11  ;;  %v5061_v34 = vmul.f32 %v10541_v41, %v11615_v38  ;;  %v5063_v23 = vmul.f32 %v10541_v41, %v11616_v15  ;;  %v11627_v15 = vld [vmem:[#allocation19_spill] sm:$0xff] }
 0x881   :  { %v10736_v20 = vpack.c.bf16 %v5127_v61, %v5125_v12  ;;  %v5129_v51 = vadd.f32 %v10564_v53, %v5060_v21  ;;  %v5131_v60 = vadd.f32 %v10564_v53, %v5062_v59  ;;  %v5064_v26 = vmul.f32 %v10539_v37, %v11617_v42 }
 0x882   :  { %v10742_v30 = vpack.c.bf16 %v5128_v32, %v5126_v40  ;;  %v5130_v36 = vadd.f32 %v10566_v44, %v5061_v34  ;;  %v5132_v48 = vadd.f32 %v10566_v44, %v5063_v23  ;;  %v5066_v52 = vmul.f32 %v10539_v37, %v11618_v58  ;;  %v11626_v40 = vld [vmem:[#allocation34_spill] sm:$0xff] }
 0x883   :  { %v10748_v62 = vpack.c.bf16 %v5131_v60, %v5129_v51  ;;  %v5133_v49 = vadd.f32 %v10564_v53, %v5064_v26  ;;  %v5065_v14 = vmul.f32 %v10541_v41, %v11619_v9  ;;  %v5067_v16 = vmul.f32 %v10541_v41, %v11620_v17  ;;  %v11628_v51 = vld [vmem:[#allocation21_spill] sm:$0xff] }
 0x884   :  { %v10755_v55 = vpack.c.bf16 %v5132_v48, %v5130_v36  ;;  %v5135_v50 = vadd.f32 %v10564_v53, %v5066_v52  ;;  %v5068_v4 = vmul.f32 %v10539_v37, %v11621_v13  ;;  %v5070_v10 = vmul.f32 %v10539_v37, %v11622_v28 }
 0x885   :  { %v5134_v56 = vadd.f32 %v10566_v44, %v5065_v14  ;;  %v5136_v8 = vadd.f32 %v10566_v44, %v5067_v16  ;;  %v5069_v19 = vmul.f32 %v10541_v41, %v11623_v29  ;;  %v5071_v27 = vmul.f32 %v10541_v41, %v11624_v18  ;;  %v11629_v14 = vld [vmem:[#allocation81_spill] sm:$0xff]  ;;  %v11630_v16 = vld [vmem:[#allocation10_spill] sm:$0xff] }
 0x886   :  { %v10768_v12 = vpack.c.bf16 %v5135_v50, %v5133_v49  ;;  %v5137_v25 = vadd.f32 %v10564_v53, %v5068_v4  ;;  %v5139_v1 = vadd.f32 %v10564_v53, %v5070_v10  ;;  %v5072_v11 = vmul.f32 %v10539_v37, %v11625_v57 }
 0x887   :  { %v10774_v61 = vpack.c.bf16 %v5136_v8, %v5134_v56  ;;  %v5138_v21 = vadd.f32 %v10566_v44, %v5069_v19  ;;  %v5140_v59 = vadd.f32 %v10566_v44, %v5071_v27  ;;  %v5074_v32 = vmul.f32 %v10539_v37, %v11626_v40 }
 0x888   :  { %v10780_v38 = vpack.c.bf16 %v5139_v1, %v5137_v25  ;;  %v5141_v34 = vadd.f32 %v10564_v53, %v5072_v11  ;;  %v5073_v23 = vmul.f32 %v10541_v41, %v11627_v15  ;;  %v5075_v60 = vmul.f32 %v10541_v41, %v11628_v51 }
 0x889   :  { %v10787_v42 = vpack.c.bf16 %v5140_v59, %v5138_v21  ;;  %v5143_v26 = vadd.f32 %v10564_v53, %v5074_v32  ;;  %v5149_v36 = vpack.c.bf16 %v10612_v63, %v10601_v22  ;;  %v5150_v48 = vpack.c.bf16 %v10627_v5, %v10621_v0  ;;  %v11631_v63 = vld [vmem:[#allocation8_spill] sm:$0xff] }
 0x88a   :  { %v5142_v58 = vadd.f32 %v10566_v44, %v5073_v23  ;;  %v5144_v52 = vadd.f32 %v10566_v44, %v5075_v60  ;;  %v5024_v17 = vmul.f32 %v10539_v37, %v11629_v14  ;;  %v5026_v22 = vmul.f32 %v10539_v37, %v11630_v16  ;;  %v11632_v5 = vld [vmem:[#allocation12_spill] sm:$0xff] }
 0x88b   :  { %v10796_v49 = vpack.c.bf16 %v5143_v26, %v5141_v34  ;;  %v5025_v0 = vmul.f32 %v10541_v41, %v11631_v63  ;;  %v5027_v50 = vmul.f32 %v10541_v41, %v11632_v5  ;;  %v5211_v37 = vld [vmem:[#allocation4 + $0x7] ss:$8 sm:$0x3] }
 0x88c   :  { %v10798_v9 = vpack.c.bf16 %v5144_v52, %v5142_v58  ;;  %v5093_v13 = vadd.f32 %v10564_v53, %v5024_v17  ;;  %v5095_v4 = vadd.f32 %v10564_v53, %v5026_v22  ;;  %v10828_v41 = vperm.slane %v5211_v37, 0 }
 0x88d   :  { %v5094_v28 = vadd.f32 %v10566_v44, %v5025_v0  ;;  %v5096_v10 = vadd.f32 %v10566_v44, %v5027_v50 }
 0x88e   :  { %5395 = vmatmul.bf16.gmra.mxu0 %v5149_v36  ;;  %5484 = vmatmul.bf16.gmra.mxu1 %v5150_v48  ;;  %v5151_v56 = vpack.c.bf16 %v5095_v4, %v5093_v13 }
 0x88f   :  { %5573 = vmatmul.bf16.gmra.mxu2 %v5149_v36  ;;  %5662 = vmatmul.bf16.gmra.mxu3 %v5150_v48  ;;  %v5152_v8 = vpack.c.bf16 %v5096_v10, %v5094_v28 }
 0x89e   :  { %5400 = vmatmul.bf16.gmra.mxu0 %v5151_v56  ;;  %5489 = vmatmul.bf16.gmra.mxu1 %v5152_v8 }
 0x89f   :  { %5578 = vmatmul.bf16.gmra.mxu2 %v5151_v56  ;;  %5667 = vmatmul.bf16.gmra.mxu3 %v5152_v8 }
 0x8ae   :  { %5405 = vmatmul.bf16.gmra.mxu0 %v10629_v47  ;;  %5494 = vmatmul.bf16.gmra.mxu1 %v10633_v43 }
 0x8af   :  { %5583 = vmatmul.bf16.gmra.mxu2 %v10629_v47  ;;  %5672 = vmatmul.bf16.gmra.mxu3 %v10633_v43 }
 0x8be   :  { %5410 = vmatmul.bf16.gmra.mxu0 %v10638_v24  ;;  %5499 = vmatmul.bf16.gmra.mxu1 %v10644_v31 }
 0x8bf   :  { %5588 = vmatmul.bf16.gmra.mxu2 %v10638_v24  ;;  %5677 = vmatmul.bf16.gmra.mxu3 %v10644_v31  ;;  %v10837_v24 = vperm.slane %v5211_v37, 1 }
 0x8ce   :  { %5415 = vmatmul.bf16.gmra.mxu0 %v10646_v6  ;;  %5504 = vmatmul.bf16.gmra.mxu1 %v10652_v39 }
 0x8cf   :  { %5593 = vmatmul.bf16.gmra.mxu2 %v10646_v6  ;;  %5682 = vmatmul.bf16.gmra.mxu3 %v10652_v39 }
 0x8de   :  { %5420 = vmatmul.bf16.gmra.mxu0 %v10671_v54  ;;  %5509 = vmatmul.bf16.gmra.mxu1 %v10677_v45 }
 0x8df   :  { %5598 = vmatmul.bf16.gmra.mxu2 %v10671_v54  ;;  %5687 = vmatmul.bf16.gmra.mxu3 %v10677_v45 }
 0x8eb   :  { %v5386_v53 = vpop.f32.mrf.mxu0  ;;  %v5475_v44 = vpop.f32.mrf.mxu1 }
 0x8ec   :  { %v5387_v47 = vadd.f32 %v5386_v53, %v10828_v41 }
 0x8ee   :  { %v10831_v43 = vadd.f32 %v5475_v44, %v5387_v47  ;;  %5425 = vmatmul.bf16.gmra.mxu0 %v10683_v35  ;;  %5514 = vmatmul.bf16.gmra.mxu1 %v10690_v7 }
 0x8ef   :  { %5603 = vmatmul.bf16.gmra.mxu2 %v10683_v35  ;;  %5692 = vmatmul.bf16.gmra.mxu3 %v10690_v7 }
 0x8f2   :  { %v5564_v31 = vpop.f32.mrf.mxu2  ;;  %v5653_v6 = vpop.f32.mrf.mxu3 }
 0x8f3   :  { %v5565_v39 = vadd.f32 %v5564_v31, %v10837_v24  ;;  %v5388_v54 = vpop.f32.mrf.mxu0  ;;  %v5477_v45 = vpop.f32.mrf.mxu1 }
 0x8f4   :  { %v5389_v29 = vadd.f32 %v5388_v54, %v10828_v41 }
 0x8f5   :  { %v10841_v19 = vadd.f32 %v5653_v6, %v5565_v39 }
 0x8f6   :  { %v10843_v18 = vadd.f32 %v5477_v45, %v5389_v29 }
 0x8fa   :  { %v5566_v35 = vpop.f32.mrf.mxu2  ;;  %v5655_v25 = vpop.f32.mrf.mxu3 }
 0x8fb   :  { %v5567_v7 = vadd.f32 %v5566_v35, %v10837_v24  ;;  %v5391_v1 = vpop.f32.mrf.mxu0  ;;  %v5480_v57 = vpop.f32.mrf.mxu1 }
 0x8fc   :  { %v5392_v11 = vadd.f32 %v5391_v1, %v10828_v41 }
 0x8fd   :  { %v10849_v21 = vadd.f32 %v5655_v25, %v5567_v7 }
 0x8fe   :  { %v10851_v59 = vadd.f32 %v5480_v57, %v5392_v11  ;;  %5430 = vmatmul.bf16.gmra.mxu0 %v10697_v46  ;;  %5519 = vmatmul.bf16.gmra.mxu1 %v10711_v3 }
 0x8ff   :  { %5608 = vmatmul.bf16.gmra.mxu2 %v10697_v46  ;;  %5697 = vmatmul.bf16.gmra.mxu3 %v10711_v3 }
 0x902   :  { %v5569_v32 = vpop.f32.mrf.mxu2  ;;  %v5658_v34 = vpop.f32.mrf.mxu3 }
 0x903   :  { %v5570_v15 = vadd.f32 %v5569_v32, %v10837_v24  ;;  %v5393_v23 = vpop.f32.mrf.mxu0  ;;  %v5482_v51 = vpop.f32.mrf.mxu1 }
 0x904   :  { %v5394_v60 = vadd.f32 %v5393_v23, %v10828_v41 }
 0x905   :  { %v10861_v26 = vadd.f32 %v5658_v34, %v5570_v15 }
 0x906   :  { %v10863_v36 = vadd.f32 %v5482_v51, %v5394_v60 }
 0x90a   :  { %v5571_v58 = vpop.f32.mrf.mxu2  ;;  %v5660_v52 = vpop.f32.mrf.mxu3 }
 0x90b   :  { %v5572_v46 = vadd.f32 %v5571_v58, %v10837_v24  ;;  %v5396_v3 = vpop.f32.mrf.mxu0  ;;  %v5485_v14 = vpop.f32.mrf.mxu1 }
 0x90c   :  { %v5397_v17 = vadd.f32 %v5396_v3, %v10828_v41 }
 0x90d   :  { %v10869_v16 = vadd.f32 %v5660_v52, %v5572_v46 }
 0x90e   :  { %v10871_v22 = vadd.f32 %v5485_v14, %v5397_v17  ;;  %5435 = vmatmul.bf16.gmra.mxu0 %v10716_v2  ;;  %5524 = vmatmul.bf16.gmra.mxu1 %v10723_v33 }
 0x90f   :  { %5613 = vmatmul.bf16.gmra.mxu2 %v10716_v2  ;;  %5702 = vmatmul.bf16.gmra.mxu3 %v10723_v33 }
 0x912   :  { %v5574_v0 = vpop.f32.mrf.mxu2  ;;  %v5663_v5 = vpop.f32.mrf.mxu3 }
 0x913   :  { %v5575_v50 = vadd.f32 %v5574_v0, %v10837_v24  ;;  %v5398_v13 = vpop.f32.mrf.mxu0  ;;  %v5487_v4 = vpop.f32.mrf.mxu1 }
 0x914   :  { %v5399_v28 = vadd.f32 %v5398_v13, %v10828_v41 }
 0x915   :  { %v10881_v10 = vadd.f32 %v5663_v5, %v5575_v50 }
 0x916   :  { %v10883_v56 = vadd.f32 %v5487_v4, %v5399_v28 }
 0x918   :  { %v5746_v8 = vpack.c.bf16 %v10883_v56, %v10871_v22  ;;  %v11633_v56 = vpack.c.bf16 %v10863_v36, %v10851_v59  ;;  %v11635_v36 = vpack.c.bf16 %v10843_v18, %v10831_v43 }
 0x91a   :  { %v5576_v37 = vpop.f32.mrf.mxu2  ;;  %v5665_v53 = vpop.f32.mrf.mxu3 }
 0x91b   :  { %v5577_v2 = vadd.f32 %v5576_v37, %v10837_v24  ;;  %v5401_v33 = vpop.f32.mrf.mxu0  ;;  %v5490_v44 = vpop.f32.mrf.mxu1 }
 0x91c   :  { %v5402_v47 = vadd.f32 %v5401_v33, %v10828_v41 }
 0x91d   :  { %v10889_v31 = vadd.f32 %v5665_v53, %v5577_v2 }
 0x91e   :  { %v10891_v6 = vadd.f32 %v5490_v44, %v5402_v47  ;;  %5440 = vmatmul.bf16.gmra.mxu0 %v10736_v20  ;;  %5529 = vmatmul.bf16.gmra.mxu1 %v10742_v30 }
 0x91f   :  { %v5747_v39 = vpack.c.bf16 %v10889_v31, %v10881_v10  ;;  %5618 = vmatmul.bf16.gmra.mxu2 %v10736_v20  ;;  %5707 = vmatmul.bf16.gmra.mxu3 %v10742_v30  ;;  %v11634_v31 = vpack.c.bf16 %v10869_v16, %v10861_v26  ;;  %v11636_v16 = vpack.c.bf16 %v10849_v21, %v10841_v19 }
 0x922   :  { %v5579_v54 = vpop.f32.mrf.mxu2  ;;  %v5668_v45 = vpop.f32.mrf.mxu3 }
 0x923   :  { %v5580_v29 = vadd.f32 %v5579_v54, %v10837_v24  ;;  %v5403_v35 = vpop.f32.mrf.mxu0  ;;  %v5492_v25 = vpop.f32.mrf.mxu1 }
 0x924   :  { %v5404_v7 = vadd.f32 %v5403_v35, %v10828_v41 }
 0x925   :  { %v10901_v1 = vadd.f32 %v5668_v45, %v5580_v29 }
 0x926   :  { %v10903_v57 = vadd.f32 %v5492_v25, %v5404_v7 }
 0x928   :  { %v5748_v11 = vpack.c.bf16 %v10903_v57, %v10891_v6 }
 0x92a   :  { %v5581_v32 = vpop.f32.mrf.mxu2  ;;  %v5670_v34 = vpop.f32.mrf.mxu3 }
 0x92b   :  { %v5582_v20 = vadd.f32 %v5581_v32, %v10837_v24  ;;  %v5406_v30 = vpop.f32.mrf.mxu0  ;;  %v5495_v15 = vpop.f32.mrf.mxu1 }
 0x92c   :  { %v5407_v23 = vadd.f32 %v5406_v30, %v10828_v41 }
 0x92d   :  { %v10909_v51 = vadd.f32 %v5670_v34, %v5582_v20 }
 0x92e   :  { %v10911_v60 = vadd.f32 %v5495_v15, %v5407_v23  ;;  %5445 = vmatmul.bf16.gmra.mxu0 %v10748_v62  ;;  %5534 = vmatmul.bf16.gmra.mxu1 %v10755_v55 }
 0x92f   :  { %v5749_v58 = vpack.c.bf16 %v10909_v51, %v10901_v1  ;;  %5623 = vmatmul.bf16.gmra.mxu2 %v10748_v62  ;;  %5712 = vmatmul.bf16.gmra.mxu3 %v10755_v55 }
 0x932   :  { %v5584_v52 = vpop.f32.mrf.mxu2  ;;  %v5673_v46 = vpop.f32.mrf.mxu3 }
 0x933   :  { %v5585_v3 = vadd.f32 %v5584_v52, %v10837_v24  ;;  %v10920_v14 = vpop.f32.mrf.mxu0  ;;  %v10922_v17 = vpop.f32.mrf.mxu1 }
 0x935   :  { %v10924_v0 = vadd.f32 %v5673_v46, %v5585_v3 }
 0x93a   :  { %v10926_v5 = vpop.f32.mrf.mxu2  ;;  %v10928_v50 = vpop.f32.mrf.mxu3 }
 0x93b   :  { %v5411_v13 = vpop.f32.mrf.mxu0  ;;  %v10930_v4 = vpop.f32.mrf.mxu1 }
 0x93e   :  { %5450 = vmatmul.bf16.gmra.mxu0 %v10768_v12  ;;  %5539 = vmatmul.bf16.gmra.mxu1 %v10774_v61 }
 0x93f   :  { %5628 = vmatmul.bf16.gmra.mxu2 %v10768_v12  ;;  %5717 = vmatmul.bf16.gmra.mxu3 %v10774_v61 }
 0x942   :  { %v10936_v62 = vpop.f32.mrf.mxu2  ;;  %v10938_v55 = vpop.f32.mrf.mxu3 }
 0x943   :  { %v5413_v28 = vpop.f32.mrf.mxu0  ;;  %v5502_v37 = vpop.f32.mrf.mxu1 }
 0x94a   :  { %v10940_v53 = vpop.f32.mrf.mxu2  ;;  %v10942_v2 = vpop.f32.mrf.mxu3 }
 0x94b   :  { %v5416_v33 = vpop.f32.mrf.mxu0  ;;  %v5505_v44 = vpop.f32.mrf.mxu1 }
 0x94c   :  { %v5417_v3 = vadd.f32 %v5416_v33, %v10828_v41  ;;  %v5414_v33 = vadd.f32 %v5413_v28, %v10828_v41 }
 0x94e   :  { %5455 = vmatmul.bf16.gmra.mxu0 %v10780_v38  ;;  %5544 = vmatmul.bf16.gmra.mxu1 %v10787_v42 }
 0x94f   :  { %5633 = vmatmul.bf16.gmra.mxu2 %v10780_v38  ;;  %5722 = vmatmul.bf16.gmra.mxu3 %v10787_v42 }
 0x952   :  { %v5594_v12 = vpop.f32.mrf.mxu2  ;;  %v5683_v61 = vpop.f32.mrf.mxu3 }
 0x953   :  { %v5418_v47 = vpop.f32.mrf.mxu0  ;;  %v5507_v54 = vpop.f32.mrf.mxu1 }
 0x954   :  { %v5419_v23 = vadd.f32 %v5418_v47, %v10828_v41 }
 0x956   :  { %v5508_v63 = vadd.f32 %v5507_v54, %v5419_v23 }
 0x95a   :  { %v5596_v45 = vpop.f32.mrf.mxu2  ;;  %v5685_v29 = vpop.f32.mrf.mxu3 }
 0x95b   :  { %v5421_v35 = vpop.f32.mrf.mxu0  ;;  %v5510_v25 = vpop.f32.mrf.mxu1  ;;  %v5597_v47 = vadd.f32 %v5596_v45, %v10837_v24 }
 0x95c   :  { %v5422_v38 = vadd.f32 %v5421_v35, %v10828_v41 }
 0x95d   :  { %v5686_v23 = vadd.f32 %v5685_v29, %v5597_v47  ;;  %v5409_v29 = vadd.f32 %v10920_v14, %v10828_v41 }
 0x95e   :  { %5460 = vmatmul.bf16.gmra.mxu0 %v10796_v49  ;;  %5549 = vmatmul.bf16.gmra.mxu1 %v10798_v9  ;;  %v5511_v30 = vadd.f32 %v5510_v25, %v5422_v38  ;;  %v5506_v38 = vadd.f32 %v5505_v44, %v5417_v3 }
 0x95f   :  { %5638 = vmatmul.bf16.gmra.mxu2 %v10796_v49  ;;  %5727 = vmatmul.bf16.gmra.mxu3 %v10798_v9 }
 0x962   :  { %v5599_v7 = vpop.f32.mrf.mxu2  ;;  %v5688_v42 = vpop.f32.mrf.mxu3 }
 0x963   :  { %v5423_v32 = vpop.f32.mrf.mxu0  ;;  %v5512_v34 = vpop.f32.mrf.mxu1  ;;  %v5600_v46 = vadd.f32 %v5599_v7, %v10837_v24 }
 0x964   :  { %v5424_v20 = vadd.f32 %v5423_v32, %v10828_v41 }
 0x965   :  { %v5689_v32 = vadd.f32 %v5688_v42, %v5600_v46 }
 0x966   :  { %v5513_v15 = vadd.f32 %v5512_v34, %v5424_v20  ;;  %v5754_v20 = vpack.c.bf16 %v5508_v63, %v5506_v38 }
 0x968   :  { %v5756_v52 = vpack.c.bf16 %v5513_v15, %v5511_v30  ;;  %v5595_v30 = vadd.f32 %v5594_v12, %v10837_v24  ;;  %v5412_v15 = vadd.f32 %v5411_v13, %v10828_v41  ;;  %v5592_v13 = vadd.f32 %v10940_v53, %v10837_v24 }
 0x96a   :  { %v5601_v49 = vpop.f32.mrf.mxu2  ;;  %v5690_v40 = vpop.f32.mrf.mxu3  ;;  %5774 = vmatpush.bf16.xpose.msra.mxu0 %v5756_v52  ;;  %v5684_v42 = vadd.f32 %v5683_v61, %v5595_v30  ;;  %v5501_v63 = vadd.f32 %v10930_v4, %v5412_v15  ;;  %v5590_v61 = vadd.f32 %v10936_v62, %v10837_v24  ;;  %v5681_v4 = vadd.f32 %v10942_v2, %v5592_v13 }
 0x96b   :  { %v5602_v9 = vadd.f32 %v5601_v49, %v10837_v24  ;;  %v5426_v35 = vpop.f32.mrf.mxu0  ;;  %v5515_v27 = vpop.f32.mrf.mxu1  ;;  %v5587_v62 = vadd.f32 %v10926_v5, %v10837_v24 }
 0x96c   :  { %v5427_v48 = vadd.f32 %v5426_v35, %v10828_v41  ;;  %v5755_v12 = vpack.c.bf16 %v5686_v23, %v5684_v42  ;;  %v5679_v38 = vadd.f32 %v10938_v55, %v5590_v61 }
 0x96d   :  { %v5691_v25 = vadd.f32 %v5690_v40, %v5602_v9  ;;  %v5676_v15 = vadd.f32 %v10928_v50, %v5587_v62 }
 0x96e   :  { %v10959_v34 = vadd.f32 %v5515_v27, %v5427_v48  ;;  %v5503_v48 = vadd.f32 %v5502_v37, %v5414_v33  ;;  %v5753_v33 = vpack.c.bf16 %v5681_v4, %v5679_v38 }
 0x96f   :  { %v5757_v7 = vpack.c.bf16 %v5691_v25, %v5689_v32  ;;  %v5498_v25 = vadd.f32 %v10922_v17, %v5409_v29 }
 0x970   :  { %v5752_v3 = vpack.c.bf16 %v5503_v48, %v5501_v63 }
 0x971   :  { %5787 = vmatpush.bf16.xpose.msra.mxu1 %v5757_v7 }
 0x972   :  { %v5604_v52 = vpop.f32.mrf.mxu2  ;;  %v5693_v54 = vpop.f32.mrf.mxu3  ;;  %5775 = vmatpush.bf16.xpose.msra.mxu0 %v5754_v20  ;;  %v5750_v20 = vpack.c.bf16 %v5498_v25, %v10911_v60 }
 0x973   :  { %v5605_v40 = vadd.f32 %v5604_v52, %v10837_v24  ;;  %v5428_v44 = vpop.f32.mrf.mxu0  ;;  %v5517_v27 = vpop.f32.mrf.mxu1 }
 0x974   :  { %v5429_v45 = vadd.f32 %v5428_v44, %v10828_v41  ;;  %v5751_v44 = vpack.c.bf16 %v5676_v15, %v10924_v0 }
 0x975   :  { %v10967_v46 = vadd.f32 %v5693_v54, %v5605_v40 }
 0x976   :  { %v10970_v28 = vadd.f32 %v5517_v27, %v5429_v45 }
 0x979   :  { %5788 = vmatpush.bf16.xpose.msra.mxu1 %v5755_v12 }
 0x97a   :  { %v5606_v49 = vpop.f32.mrf.mxu2  ;;  %v5695_v9 = vpop.f32.mrf.mxu3  ;;  %5776 = vmatpush.bf16.xpose.msra.mxu0 %v5752_v3 }
 0x97b   :  { %v5607_v35 = vadd.f32 %v5606_v49, %v10837_v24  ;;  %v5431_v53 = vpop.f32.mrf.mxu0  ;;  %v5520_v32 = vpop.f32.mrf.mxu1 }
 0x97c   :  { %v5432_v14 = vadd.f32 %v5431_v53, %v10828_v41 }
 0x97d   :  { %v10985_v47 = vadd.f32 %v5695_v9, %v5607_v35 }
 0x97e   :  { %v10987_v7 = vadd.f32 %v5520_v32, %v5432_v14 }
 0x981   :  { %5789 = vmatpush.bf16.xpose.msra.mxu1 %v5753_v33 }
 0x982   :  { %v5609_v30 = vpop.f32.mrf.mxu2  ;;  %v5698_v17 = vpop.f32.mrf.mxu3  ;;  %5777 = vmatpush.bf16.xpose.msra.mxu0 %v5750_v20 }
 0x983   :  { %v5610_v55 = vadd.f32 %v5609_v30, %v10837_v24  ;;  %v5433_v52 = vpop.f32.mrf.mxu0  ;;  %v5522_v54 = vpop.f32.mrf.mxu1 }
 0x984   :  { %v5434_v23 = vadd.f32 %v5433_v52, %v10828_v41 }
 0x985   :  { %v10997_v40 = vadd.f32 %v5698_v17, %v5610_v55 }
 0x986   :  { %v10999_v5 = vadd.f32 %v5522_v54, %v5434_v23 }
 0x988   :  { %v5760_v60 = vpack.c.bf16 %v10999_v5, %v10987_v7 }
 0x989   :  { %5790 = vmatpush.bf16.xpose.msra.mxu1 %v5751_v44 }
 0x98a   :  { %v5611_v27 = vpop.f32.mrf.mxu2  ;;  %v5700_v48 = vpop.f32.mrf.mxu3  ;;  %5778 = vmatpush.bf16.xpose.msra.mxu0 %v5748_v11 }
 0x98b   :  { %v5612_v50 = vadd.f32 %v5611_v27, %v10837_v24  ;;  %v5436_v45 = vpop.f32.mrf.mxu0  ;;  %v5525_v42 = vpop.f32.mrf.mxu1 }
 0x98c   :  { %v5437_v63 = vadd.f32 %v5436_v45, %v10828_v41 }
 0x98d   :  { %v11009_v13 = vadd.f32 %v5700_v48, %v5612_v50 }
 0x98e   :  { %v11011_v12 = vadd.f32 %v5525_v42, %v5437_v63 }
 0x98f   :  { %v5761_v0 = vpack.c.bf16 %v11009_v13, %v10997_v40 }
 0x991   :  { %5791 = vmatpush.bf16.xpose.msra.mxu1 %v5749_v58 }
 0x992   :  { %v5614_v29 = vpop.f32.mrf.mxu2  ;;  %v5703_v6 = vpop.f32.mrf.mxu3  ;;  %5779 = vmatpush.bf16.xpose.msra.mxu0 %v5746_v8 }
 0x993   :  { %v5615_v57 = vadd.f32 %v5614_v29, %v10837_v24  ;;  %v5438_v11 = vpop.f32.mrf.mxu0  ;;  %v5527_v3 = vpop.f32.mrf.mxu1 }
 0x994   :  { %v5439_v61 = vadd.f32 %v5438_v11, %v10828_v41 }
 0x995   :  { %v11023_v49 = vadd.f32 %v5703_v6, %v5615_v57 }
 0x996   :  { %v11025_v9 = vadd.f32 %v5527_v3, %v5439_v61 }
 0x998   :  { %v5762_v1 = vpack.c.bf16 %v11025_v9, %v11011_v12  ;;  %v11638_v12 = vpack.c.bf16 %v10985_v47, %v10967_v46 }
 0x999   :  { %5792 = vmatpush.bf16.xpose.msra.mxu1 %v5747_v39 }
 0x99a   :  { %v5616_v51 = vpop.f32.mrf.mxu2  ;;  %v5705_v22 = vpop.f32.mrf.mxu3  ;;  %5780 = vmatpush.bf16.xpose.msra.mxu0 %v11633_v56 }
 0x99b   :  { %v5617_v8 = vadd.f32 %v5616_v51, %v10837_v24  ;;  %v5441_v58 = vpop.f32.mrf.mxu0  ;;  %v5530_v4 = vpop.f32.mrf.mxu1 }
 0x99c   :  { %v5442_v35 = vadd.f32 %v5441_v58, %v10828_v41 }
 0x99d   :  { %v11037_v53 = vadd.f32 %v5705_v22, %v5617_v8 }
 0x99e   :  { %v11039_v32 = vadd.f32 %v5530_v4, %v5442_v35 }
 0x99f   :  { %v5763_v10 = vpack.c.bf16 %v11037_v53, %v11023_v49 }
 0x9a1   :  { %5793 = vmatpush.bf16.xpose.msra.mxu1 %v11634_v31 }
 0x9a2   :  { %v5619_v39 = vpop.f32.mrf.mxu2  ;;  %v5708_v59 = vpop.f32.mrf.mxu3  ;;  %5781 = vmatpush.bf16.xpose.msra.mxu0 %v11635_v36 }
 0x9a3   :  { %v5620_v25 = vadd.f32 %v5619_v39, %v10837_v24  ;;  %v5443_v14 = vpop.f32.mrf.mxu0  ;;  %v5532_v38 = vpop.f32.mrf.mxu1 }
 0x9a4   :  { %v5444_v62 = vadd.f32 %v5443_v14, %v10828_v41 }
 0x9a5   :  { %v11051_v33 = vadd.f32 %v5708_v59, %v5620_v25 }
 0x9a6   :  { %v11053_v20 = vadd.f32 %v5532_v38, %v5444_v62 }
 0x9a8   :  { %v5764_v26 = vpack.c.bf16 %v11053_v20, %v11039_v32  ;;  %v11637_v32 = vpack.c.bf16 %v10970_v28, %v10959_v34 }
 0x9a9   :  { %5794 = vmatpush.bf16.xpose.msra.mxu1 %v11636_v16 }
 0x9aa   :  { %v5621_v30 = vpop.f32.mrf.mxu2  ;;  %v5710_v43 = vpop.f32.mrf.mxu3 }
 0x9ab   :  { %v5622_v18 = vadd.f32 %v5621_v30, %v10837_v24  ;;  %v5446_v17 = vpop.f32.mrf.mxu0  ;;  %v5535_v15 = vpop.f32.mrf.mxu1 }
 0x9ac   :  { %v5447_v55 = vadd.f32 %v5446_v17, %v10828_v41 }
 0x9ad   :  { %v11062_v52 = vadd.f32 %v5710_v43, %v5622_v18 }
 0x9ae   :  { %v11064_v54 = vadd.f32 %v5535_v15, %v5447_v55 }
 0x9af   :  { %v5765_v23 = vpack.c.bf16 %v11062_v52, %v11051_v33 }
 0x9b2   :  { %v5624_v44 = vpop.f32.mrf.mxu2  ;;  %v5713_v27 = vpop.f32.mrf.mxu3 }
 0x9b3   :  { %v5625_v19 = vadd.f32 %v5624_v44, %v10837_v24  ;;  %v5448_v21 = vpop.f32.mrf.mxu0  ;;  %v5537_v48 = vpop.f32.mrf.mxu1 }
 0x9b4   :  { %v5449_v50 = vadd.f32 %v5448_v21, %v10828_v41 }
 0x9b5   :  { %v11070_v45 = vadd.f32 %v5713_v27, %v5625_v19 }
 0x9b6   :  { %v11072_v42 = vadd.f32 %v5537_v48, %v5449_v50 }
 0x9b8   :  { %v5766_v63 = vpack.c.bf16 %v11072_v42, %v11064_v54 }
 0x9ba   :  { %v5626_v29 = vpop.f32.mrf.mxu2  ;;  %v5715_v6 = vpop.f32.mrf.mxu3 }
 0x9bb   :  { %v5627_v57 = vadd.f32 %v5626_v29, %v10837_v24  ;;  %v5451_v11 = vpop.f32.mrf.mxu0  ;;  %v5540_v3 = vpop.f32.mrf.mxu1 }
 0x9bd   :  { %v5716_v61 = vadd.f32 %v5715_v6, %v5627_v57 }
 0x9bf   :  { %v5767_v51 = vpack.c.bf16 %v5716_v61, %v11070_v45 }
 0x9c2   :  { %v5629_v22 = vpop.f32.mrf.mxu2  ;;  %v5718_v56 = vpop.f32.mrf.mxu3 }
 0x9c3   :  { %v5453_v8 = vpop.f32.mrf.mxu0  ;;  %v5542_v58 = vpop.f32.mrf.mxu1 }
 0x9ca   :  { %v5631_v4 = vpop.f32.mrf.mxu2  ;;  %v5720_v35 = vpop.f32.mrf.mxu3 }
 0x9cb   :  { %v5456_v31 = vpop.f32.mrf.mxu0  ;;  %v5545_v39 = vpop.f32.mrf.mxu1 }
 0x9cc   :  { %v5457_v45 = vadd.f32 %v5456_v31, %v10828_v41  ;;  %v5452_v31 = vadd.f32 %v5451_v11, %v10828_v41 }
 0x9ce   :  { %v5546_v37 = vadd.f32 %v5545_v39, %v5457_v45 }
 0x9d2   :  { %v5634_v59 = vpop.f32.mrf.mxu2  ;;  %v5723_v36 = vpop.f32.mrf.mxu3 }
 0x9d3   :  { %v5458_v25 = vpop.f32.mrf.mxu0  ;;  %v5547_v14 = vpop.f32.mrf.mxu1 }
 0x9d4   :  { %v5459_v21 = vadd.f32 %v5458_v25, %v10828_v41 }
 0x9d6   :  { %v5548_v57 = vadd.f32 %v5547_v14, %v5459_v21  ;;  %v5541_v14 = vadd.f32 %v5540_v3, %v5452_v31 }
 0x9d8   :  { %v5770_v25 = vpack.c.bf16 %v5548_v57, %v5546_v37 }
 0x9da   :  { %v5636_v38 = vpop.f32.mrf.mxu2  ;;  %v5725_v62 = vpop.f32.mrf.mxu3 }
 0x9db   :  { %v5461_v16 = vpop.f32.mrf.mxu0  ;;  %v5550_v30 = vpop.f32.mrf.mxu1 }
 0x9dc   :  { %v5462_v43 = vadd.f32 %v5461_v16, %v10828_v41 }
 0x9de   :  { %v5551_v27 = vadd.f32 %v5550_v30, %v5462_v43  ;;  %v5454_v43 = vadd.f32 %v5453_v8, %v10828_v41 }
 0x9e2   :  { %v5639_v18 = vpop.f32.mrf.mxu2  ;;  %v5728_v17 = vpop.f32.mrf.mxu3 }
 0x9e3   :  { %v5463_v15 = vpop.f32.mrf.mxu0  ;;  %v5552_v44 = vpop.f32.mrf.mxu1  ;;  %v5640_v50 = vadd.f32 %v5639_v18, %v10837_v24 }
 0x9e4   :  { %v5464_v55 = vadd.f32 %v5463_v15, %v10828_v41  ;;  %v5637_v15 = vadd.f32 %v5636_v38, %v10837_v24  ;;  %v5630_v38 = vadd.f32 %v5629_v22, %v10837_v24  ;;  %v5734_v41 = vld [vmem:[#allocation4 + $0x10] ss:$8 sm:$0x3] }
 0x9e5   :  { %v5729_v16 = vadd.f32 %v5728_v17, %v5640_v50  ;;  %v5632_v17 = vadd.f32 %v5631_v4, %v10837_v24  ;;  %v5736_v11 = vperm.slane %v5734_v41, 0  ;;  %v5737_v3 = vperm.slane %v5734_v41, 1 }
 0x9e6   :  { %v5553_v19 = vadd.f32 %v5552_v44, %v5464_v55  ;;  %v5635_v55 = vadd.f32 %v5634_v59, %v10837_v24  ;;  %v5726_v18 = vadd.f32 %v5725_v62, %v5637_v15  ;;  %v5543_v44 = vadd.f32 %v5542_v58, %v5454_v43 }
 0x9e7   :  { %v5719_v37 = vadd.f32 %v5718_v56, %v5630_v38  ;;  %v5740_v58 = vpack.c.bf16 %v5736_v11, %v5736_v11 }
 0x9e8   :  { %v5772_v48 = vpack.c.bf16 %v5553_v19, %v5551_v27  ;;  %v5724_v27 = vadd.f32 %v5723_v36, %v5635_v55  ;;  %v5768_v39 = vpack.c.bf16 %v5543_v44, %v5541_v14 }
 0x9e9   :  { %5782 = vmatmul.bf16.vlgmr.msra.gmra.mxu0 %v5740_v58 }
 0x9ea   :  { %v5641_v29 = vpop.f32.mrf.mxu2  ;;  %5800 = vmatpush.bf16.xpose.msra.mxu2 %v5772_v48  ;;  %v5730_v61 = vpop.f32.mrf.mxu3  ;;  %v5771_v19 = vpack.c.bf16 %v5726_v18, %v5724_v27 }
 0x9eb   :  { %v5642_v6 = vadd.f32 %v5641_v29, %v10837_v24  ;;  %v5741_v24 = vpack.c.bf16 %v5737_v3, %v5737_v3 }
 0x9ed   :  { %v5731_v2 = vadd.f32 %v5730_v61, %v5642_v6  ;;  %5795 = vmatmul.bf16.vlgmr.msra.gmra.mxu1 %v5741_v24 }
 0x9ef   :  { %v5773_v30 = vpack.c.bf16 %v5731_v2, %v5729_v16  ;;  %v5721_v2 = vadd.f32 %v5720_v35, %v5632_v17 }
 0x9f1   :  { %5813 = vmatpush.bf16.xpose.msra.mxu3 %v5773_v30  ;;  %v5769_v8 = vpack.c.bf16 %v5721_v2, %v5719_v37 }
 0x9f2   :  { %5801 = vmatpush.bf16.xpose.msra.mxu2 %v5770_v25 }
 0x9f9   :  { %5814 = vmatpush.bf16.xpose.msra.mxu3 %v5771_v19 }
 0x9fa   :  { %5802 = vmatpush.bf16.xpose.msra.mxu2 %v5768_v39 }
 0xa01   :  { %5815 = vmatpush.bf16.xpose.msra.mxu3 %v5769_v8 }
 0xa02   :  { %5803 = vmatpush.bf16.xpose.msra.mxu2 %v5766_v63 }
 0xa09   :  { %5816 = vmatpush.bf16.xpose.msra.mxu3 %v5767_v51 }
 0xa0a   :  { %5804 = vmatpush.bf16.xpose.msra.mxu2 %v5764_v26 }
 0xa11   :  { %5817 = vmatpush.bf16.xpose.msra.mxu3 %v5765_v23 }
 0xa12   :  { %5805 = vmatpush.bf16.xpose.msra.mxu2 %v5762_v1 }
 0xa19   :  { %5818 = vmatpush.bf16.xpose.msra.mxu3 %v5763_v10 }
 0xa1a   :  { %5806 = vmatpush.bf16.xpose.msra.mxu2 %v5760_v60 }
 0xa21   :  { %5819 = vmatpush.bf16.xpose.msra.mxu3 %v5761_v0  ;;  %v11639_v0 = vlaneseq }
 0xa22   :  { %5807 = vmatpush.bf16.xpose.msra.mxu2 %v11637_v32 }
 0xa23   :  { %vm5833_vm4 = vcmp.lt.s32.totalorder %v11639_v0, 256 }
 0xa29   :  { %5820 = vmatpush.bf16.xpose.msra.mxu3 %v11638_v12  ;;  %5808 = vmatmul.bf16.vlgmr.msra.gmra.mxu2 %v5740_v58 }
 0xa30   :  { %5821 = vmatmul.bf16.vlgmr.msra.gmra.mxu3 %v5741_v24 }
 0xa66   :  { %v5783_v49 = vpop.f32.mrf.mxu0 }
 0xa6a   :  { %v5796_v9 = vpop.f32.mrf.mxu1 }
 0xa6b   :  { %v5797_v40 = vadd.f32 %v5796_v9, %v5783_v49 }
 0xa6e   :  { %v5785_v1 = vpop.f32.mrf.mxu0 }
 0xa72   :  { %v5798_v53 = vpop.f32.mrf.mxu1 }
 0xaac   :  { %v5809_v7 = vpop.f32.mrf.mxu2 }
 0xab3   :  { %v5822_v5 = vpop.f32.mrf.mxu3 }
 0xab4   :  { %v5823_v60 = vadd.f32 %v5822_v5, %v5809_v7  ;;  %v5811_v10 = vpop.f32.mrf.mxu2 }
 0xab6   :  { %v5828_v13 = vrot.slane %v5823_v60, 7 }
 0xab8   :  { %v5829_v34 = vsel %vm2389_vm5, %v5797_v40, %v5828_v13 }
 0xab9   :  { %5835 = vst.msk [vmem:[%s11124_s2] sm:$0x3] %vm5833_vm4, %v5829_v34 }
 0xabb   :  { %v5824_v46 = vpop.f32.mrf.mxu3 }
 0xabc   :  { %5840 = vsyncpa [#allocation3], 1 }
 0xabd   :  { %5841 = vsyncpa [#allocation5], 1 }

</bundles_post_ra>
